<compile_context>
chip_gen: v7x
topology: tpu7x:2x2x1
jax: 0.10.0
libtpu: 0.0.40
codegen_flags: <defaults>
</compile_context>

<pallas_src>
import functools

import jax
import jax.numpy as jnp
import numpy as np
from jax.experimental import pallas as pl
from jax.experimental.pallas import tpu as pltpu


def _round_up(x, m):
    return ((x + m - 1) // m) * m


def _pad2(a, shape):
    pads = [(0, t - s) for s, t in zip(a.shape, shape)]
    if all(p == (0, 0) for p in pads):
        return a
    return jnp.pad(a, pads)


def _pick_tile(n, candidates):
    for c in candidates:
        if n % c == 0:
            return c
    return n


def _vmem_limit_bytes():
    # Generation-aware scoped-VMEM limit with ~25% headroom:
    #   v7x (64 MiB/TC)  -> 48 MiB ; v5e/v6e (128 MiB) -> 96 MiB.
    try:
        cap = int(pltpu.get_tpu_info().vmem_capacity_bytes)
    except Exception:
        cap = 128 * 1024 * 1024
    return (cap * 3) // 4


# ---------------------------------------------------------------------------
# Encoder kernels (row-tiled; adj streamed in (TME, Np) slabs)
# ---------------------------------------------------------------------------
def _xw_kernel(x_ref, w_ref, o_ref):
    # E1: XW0 row block = X_rowblock @ W0   (f32 accumulation)
    o_ref[...] = jnp.dot(
        x_ref[...], w_ref[...], preferred_element_type=jnp.float32
    ).astype(o_ref.dtype)


def _hidden_wcat_kernel(adj_ref, xw0_ref, wcat_ref, hw_ref):
    # E2: HW row block = relu(adj_rowblock @ XW0) @ Wcat
    #     ('hidden' is never materialized in HBM; Wcat = [Wmu | Wsig])
    hidden = jnp.maximum(
        jnp.dot(adj_ref[...], xw0_ref[...], preferred_element_type=jnp.float32),
        0.0,
    )
    hw_ref[...] = jnp.dot(
        hidden.astype(wcat_ref.dtype), wcat_ref[...],
        preferred_element_type=jnp.float32,
    ).astype(hw_ref.dtype)


def _z_kernel(adj_ref, hw_ref, noise_ref, z_ref, *, h2p):
    # E3: [mean | logstd] row block = adj_rowblock @ HW ; reparameterize in f32
    ms = jnp.dot(adj_ref[...], hw_ref[...], preferred_element_type=jnp.float32)
    mean = ms[:, :h2p]
    logstd = ms[:, h2p:]
    z_ref[...] = noise_ref[...] * jnp.exp(logstd) + mean


# ---------------------------------------------------------------------------
# Decoder kernel: A[i, j] = sigmoid(Z_i @ Z_j^T)  (transpose-free, f32 MXU)
# ---------------------------------------------------------------------------
def _decoder_kernel(zi_ref, zj_ref, a_ref):
    logits = jax.lax.dot_general(
        zi_ref[...], zj_ref[...],
        dimension_numbers=(((1,), (1,)), ((), ())),
        preferred_element_type=jnp.float32,
    )
    a_ref[...] = jax.nn.sigmoid(logits).astype(a_ref.dtype)


@functools.partial(jax.jit, static_argnames=("use_bf16",))
def vgae_forward(x, adj, w0, wmu, wsig, noise, *, use_bf16=True):
    N, D = x.shape
    h1 = w0.shape[1]
    h2 = wmu.shape[1]
    mm_dtype = jnp.bfloat16 if use_bf16 else jnp.float32
    vmem_limit = _vmem_limit_bytes()

    # Lane-dense zero padding (exact: padded rows/cols of Z are identically 0).
    Np = _round_up(N, 128)
    Dp = _round_up(D, 128)
    h1p = _round_up(h1, 128)
    h2p = _round_up(h2, 128)

    # Pre-cast matmul operands ONCE to bf16 (halves adj HBM/VMEM footprint).
    x_p = _pad2(x, (Np, Dp)).astype(mm_dtype)
    adj_p = _pad2(adj, (Np, Np)).astype(mm_dtype)
    w0_p = _pad2(w0, (Dp, h1p)).astype(mm_dtype)
    wcat = jnp.concatenate(
        [_pad2(wmu, (h1p, h2p)), _pad2(wsig, (h1p, h2p))], axis=1
    ).astype(mm_dtype)
    noise_p = _pad2(noise, (Np, h2p))  # stays f32 (elementwise path)

    TME = _pick_tile(Np, (256, 128))  # encoder row-block size
    enc_params = pltpu.CompilerParams(
        dimension_semantics=("parallel",), vmem_limit_bytes=vmem_limit)

    # ---- E1: XW0 = X @ W0 ---------------------------------------------------
    xw0 = pl.pallas_call(
        _xw_kernel,
        out_shape=jax.ShapeDtypeStruct((Np, h1p), mm_dtype),
        grid=(Np // TME,),
        in_specs=[pl.BlockSpec((TME, Dp), lambda i: (i, 0)),
                  pl.BlockSpec((Dp, h1p), lambda i: (0, 0))],
        out_specs=pl.BlockSpec((TME, h1p), lambda i: (i, 0)),
        compiler_params=enc_params,
    )(x_p, w0_p)

    # ---- E2: HW = relu(adj @ XW0) @ Wcat (adj streamed row-block-wise) -----
    hw = pl.pallas_call(
        _hidden_wcat_kernel,
        out_shape=jax.ShapeDtypeStruct((Np, 2 * h2p), mm_dtype),
        grid=(Np // TME,),
        in_specs=[pl.BlockSpec((TME, Np), lambda i: (i, 0)),
                  pl.BlockSpec((Np, h1p), lambda i: (0, 0)),
                  pl.BlockSpec((h1p, 2 * h2p), lambda i: (0, 0))],
        out_specs=pl.BlockSpec((TME, 2 * h2p), lambda i: (i, 0)),
        compiler_params=enc_params,
    )(adj_p, xw0, wcat)

    # ---- E3: Z = noise * exp(logstd) + mean, [mean|logstd] = adj @ HW ------
    z = pl.pallas_call(
        functools.partial(_z_kernel, h2p=h2p),
        out_shape=jax.ShapeDtypeStruct((Np, h2p), jnp.float32),  # Z kept in f32
        grid=(Np // TME,),
        in_specs=[pl.BlockSpec((TME, Np), lambda i: (i, 0)),
                  pl.BlockSpec((Np, 2 * h2p), lambda i: (0, 0)),
                  pl.BlockSpec((TME, h2p), lambda i: (i, 0))],
        out_specs=pl.BlockSpec((TME, h2p), lambda i: (i, 0)),
        compiler_params=enc_params,
    )(adj_p, hw, noise_p)

    # ---- Decoder: A_pred = sigmoid(Z @ Z.T), tiled 2D parallel grid --------
    # Large lane-dense tiles; output shape (N, N) with masked edge tiles so no
    # padded (Np, Np) array is written and re-sliced.  TM/TN divide Np, so all
    # Z-block reads stay in bounds.
    TM = _pick_tile(Np, (512, 256, 128))
    TN = _pick_tile(Np, (1024, 512, 256, 128))
    a_pred = pl.pallas_call(
        _decoder_kernel,
        out_shape=jax.ShapeDtypeStruct((N, N), jnp.float32),
        grid=(pl.cdiv(N, TM), pl.cdiv(N, TN)),
        in_specs=[pl.BlockSpec((TM, h2p), lambda i, j: (i, 0)),
                  pl.BlockSpec((TN, h2p), lambda i, j: (j, 0))],
        out_specs=pl.BlockSpec((TM, TN), lambda i, j: (i, j)),
        compiler_params=pltpu.CompilerParams(
            dimension_semantics=("parallel", "parallel"),
            vmem_limit_bytes=vmem_limit),
    )(z, z)

    return a_pred


def glorot_init(key, input_dim, output_dim):
    init_range = np.sqrt(6.0 / (input_dim + output_dim))
    return jax.random.uniform(
        key, (input_dim, output_dim), jnp.float32,
        minval=-init_range, maxval=init_range,
    )


if __name__ == "__main__":
    # Small shapes consistent with the module (args.input_dim / hidden1 / hidden2).
    N = 512          # number of graph nodes
    input_dim = 32
    hidden1 = 32
    hidden2 = 16

    key = jax.random.PRNGKey(0)
    k_x, k_adj, k_w0, k_wmu, k_wsig, k_noise = jax.random.split(key, 6)

    # node features
    x = jax.random.normal(k_x, (N, input_dim), jnp.float32)

    # symmetric normalized dense adjacency (synthetic)
    a_raw = (jax.random.uniform(k_adj, (N, N)) < 0.05).astype(jnp.float32)
    a_sym = jnp.maximum(a_raw, a_raw.T) + jnp.eye(N, dtype=jnp.float32)
    deg = jnp.sum(a_sym, axis=1)
    d_inv_sqrt = 1.0 / jnp.sqrt(deg)
    adj = a_sym * d_inv_sqrt[:, None] * d_inv_sqrt[None, :]

    # deterministic glorot-initialized weights
    w0 = glorot_init(k_w0, input_dim, hidden1)
    wmu = glorot_init(k_wmu, hidden1, hidden2)
    wsig = glorot_init(k_wsig, hidden1, hidden2)

    # deterministic reparameterization noise (torch.randn equivalent)
    noise = jax.random.normal(k_noise, (N, hidden2), jnp.float32)

    a_pred = vgae_forward(x, adj, w0, wmu, wsig, noise, use_bf16=True)
    jax.block_until_ready(a_pred)

    # sanity check against plain-JAX f32 reference (bf16 encoder matmul operands
    # -> loose tol; Z itself and the decoder dot stay in f32)
    hidden = jax.nn.relu(adj @ (x @ w0))
    mean = adj @ (hidden @ wmu)
    logstd = adj @ (hidden @ wsig)
    z = noise * jnp.exp(logstd) + mean
    a_ref = jax.nn.sigmoid(z @ z.T)
    np.testing.assert_allclose(np.asarray(a_pred), np.asarray(a_ref),
                               rtol=0.0, atol=5e-2)

    print("KERNEL_OK")
</pallas_src>

<mosaic_0001>
module attributes {stable_mosaic.version = 11 : i64} {
  func.func @_xw_kernel(%arg0: i32, %arg1: memref<256x128xbf16, #tpu.memory_space<vmem>>, %arg2: memref<128x128xbf16, #tpu.memory_space<vmem>>, %arg3: memref<256x128xbf16, #tpu.memory_space<vmem>>) attributes {dimension_semantics = [#tpu.dimension_semantics<parallel>], iteration_bounds = array<i64: 2>, scalar_prefetch = 0 : i64, scratch_operands = 0 : i64, tpu.core_type = #tpu.core_type<tc>, window_params = [{transform_indices = @transform_0, window_bounds = array<i64: 256, 128>}, {pipeline_mode = #tpu.pipeline_mode<synchronous>, transform_indices = @transform_1, window_bounds = array<i64: 128, 128>}, {transform_indices = @transform_2, window_bounds = array<i64: 256, 128>}]} {
    %c0 = arith.constant 0 : index
    %c0_0 = arith.constant 0 : index
    %0 = vector.load %arg1[%c0, %c0_0] : memref<256x128xbf16, #tpu.memory_space<vmem>>, vector<256x128xbf16>
    %c0_1 = arith.constant 0 : index
    %c0_2 = arith.constant 0 : index
    %1 = vector.load %arg2[%c0_1, %c0_2] : memref<128x128xbf16, #tpu.memory_space<vmem>>, vector<128x128xbf16>
    %cst = arith.constant dense<0.000000e+00> : vector<256x128xf32>
    %2 = tpu.matmul %0, %1, %cst {dimension_numbers = #tpu.dot_dimension_numbers<[1], [0], [0], [1], [0, 0, 1, 1], [], []>} : vector<256x128xbf16>, vector<128x128xbf16>, vector<256x128xf32> -> vector<256x128xf32>
    %3 = arith.truncf %2 : vector<256x128xf32> to vector<256x128xbf16>
    %c0_3 = arith.constant 0 : index
    %c0_4 = arith.constant 0 : index
    %4 = vector.load %arg3[%c0_3, %c0_4] : memref<256x128xbf16, #tpu.memory_space<vmem>>, vector<256x128xbf16>
    tpu.vector_store %arg3[%c0_3, %c0_4], %3 {strides = array<i32>} : memref<256x128xbf16, #tpu.memory_space<vmem>>, vector<256x128xbf16>,
    return
  }
  func.func @transform_0(%arg0: i32) -> (i32, i32) {
    %c0_i32 = arith.constant 0 : i32
    %c0_i32_0 = arith.constant 0 : i32
    return %arg0, %c0_i32 : i32, i32
  }
  func.func @transform_1(%arg0: i32) -> (i32, i32) {
    %c0_i32 = arith.constant 0 : i32
    %c0_i32_0 = arith.constant 0 : i32
    %c0_i32_1 = arith.constant 0 : i32
    return %c0_i32, %c0_i32_0 : i32, i32
  }
  func.func @transform_2(%arg0: i32) -> (i32, i32) {
    %c0_i32 = arith.constant 0 : i32
    %c0_i32_0 = arith.constant 0 : i32
    return %arg0, %c0_i32 : i32, i32
  }
}

module attributes {stable_mosaic.version = 11 : i64} {
  func.func @_z_kernel(%arg0: i32, %arg1: memref<256x512xbf16, #tpu.memory_space<vmem>>, %arg2: memref<512x256xbf16, #tpu.memory_space<vmem>>, %arg3: memref<256x128xf32, #tpu.memory_space<vmem>>, %arg4: memref<256x128xf32, #tpu.memory_space<vmem>>) attributes {dimension_semantics = [#tpu.dimension_semantics<parallel>], iteration_bounds = array<i64: 2>, scalar_prefetch = 0 : i64, scratch_operands = 0 : i64, tpu.core_type = #tpu.core_type<tc>, window_params = [{transform_indices = @transform_0, window_bounds = array<i64: 256, 512>}, {pipeline_mode = #tpu.pipeline_mode<synchronous>, transform_indices = @transform_1, window_bounds = array<i64: 512, 256>}, {transform_indices = @transform_2, window_bounds = array<i64: 256, 128>}, {transform_indices = @transform_3, window_bounds = array<i64: 256, 128>}]} {
    %c0 = arith.constant 0 : index
    %c0_0 = arith.constant 0 : index
    %0 = vector.load %arg1[%c0, %c0_0] : memref<256x512xbf16, #tpu.memory_space<vmem>>, vector<256x512xbf16>
    %c0_1 = arith.constant 0 : index
    %c0_2 = arith.constant 0 : index
    %1 = vector.load %arg2[%c0_1, %c0_2] : memref<512x256xbf16, #tpu.memory_space<vmem>>, vector<512x256xbf16>
    %cst = arith.constant dense<0.000000e+00> : vector<256x256xf32>
    %2 = tpu.matmul %0, %1, %cst {dimension_numbers = #tpu.dot_dimension_numbers<[1], [0], [0], [1], [0, 0, 1, 1], [], []>} : vector<256x512xbf16>, vector<512x256xbf16>, vector<256x256xf32> -> vector<256x256xf32>
    %3 = vector.extract_strided_slice %2 {offsets = [0, 0], sizes = [256, 128], strides = [1, 1]} : vector<256x256xf32> to vector<256x128xf32>
    %4 = vector.extract_strided_slice %2 {offsets = [0, 128], sizes = [256, 128], strides = [1, 1]} : vector<256x256xf32> to vector<256x128xf32>
    %c0_3 = arith.constant 0 : index
    %c0_4 = arith.constant 0 : index
    %5 = vector.load %arg3[%c0_3, %c0_4] : memref<256x128xf32, #tpu.memory_space<vmem>>, vector<256x128xf32>
    %6 = math.exp %4 : vector<256x128xf32>
    %7 = arith.mulf %5, %6 : vector<256x128xf32>
    %8 = arith.addf %7, %3 : vector<256x128xf32>
    %c0_5 = arith.constant 0 : index
    %c0_6 = arith.constant 0 : index
    %9 = vector.load %arg4[%c0_5, %c0_6] : memref<256x128xf32, #tpu.memory_space<vmem>>, vector<256x128xf32>
    tpu.vector_store %arg4[%c0_5, %c0_6], %8 {strides = array<i32>} : memref<256x128xf32, #tpu.memory_space<vmem>>, vector<256x128xf32>,
    return
  }
  func.func @transform_0(%arg0: i32) -> (i32, i32) {
    %c0_i32 = arith.constant 0 : i32
    %c0_i32_0 = arith.constant 0 : i32
    return %arg0, %c0_i32 : i32, i32
  }
  func.func @transform_1(%arg0: i32) -> (i32, i32) {
    %c0_i32 = arith.constant 0 : i32
    %c0_i32_0 = arith.constant 0 : i32
    %c0_i32_1 = arith.constant 0 : i32
    return %c0_i32, %c0_i32_0 : i32, i32
  }
  func.func @transform_2(%arg0: i32) -> (i32, i32) {
    %c0_i32 = arith.constant 0 : i32
    %c0_i32_0 = arith.constant 0 : i32
    return %arg0, %c0_i32 : i32, i32
  }
  func.func @transform_3(%arg0: i32) -> (i32, i32) {
    %c0_i32 = arith.constant 0 : i32
    %c0_i32_0 = arith.constant 0 : i32
    return %arg0, %c0_i32 : i32, i32
  }
}

module attributes {stable_mosaic.version = 11 : i64} {
  func.func @_hidden_wcat_kernel(%arg0: i32, %arg1: memref<256x512xbf16, #tpu.memory_space<vmem>>, %arg2: memref<512x128xbf16, #tpu.memory_space<vmem>>, %arg3: memref<128x256xbf16, #tpu.memory_space<vmem>>, %arg4: memref<256x256xbf16, #tpu.memory_space<vmem>>) attributes {dimension_semantics = [#tpu.dimension_semantics<parallel>], iteration_bounds = array<i64: 2>, scalar_prefetch = 0 : i64, scratch_operands = 0 : i64, tpu.core_type = #tpu.core_type<tc>, window_params = [{transform_indices = @transform_0, window_bounds = array<i64: 256, 512>}, {pipeline_mode = #tpu.pipeline_mode<synchronous>, transform_indices = @transform_1, window_bounds = array<i64: 512, 128>}, {pipeline_mode = #tpu.pipeline_mode<synchronous>, transform_indices = @transform_2, window_bounds = array<i64: 128, 256>}, {transform_indices = @transform_3, window_bounds = array<i64: 256, 256>}]} {
    %c0 = arith.constant 0 : index
    %c0_0 = arith.constant 0 : index
    %0 = vector.load %arg1[%c0, %c0_0] : memref<256x512xbf16, #tpu.memory_space<vmem>>, vector<256x512xbf16>
    %c0_1 = arith.constant 0 : index
    %c0_2 = arith.constant 0 : index
    %1 = vector.load %arg2[%c0_1, %c0_2] : memref<512x128xbf16, #tpu.memory_space<vmem>>, vector<512x128xbf16>
    %cst = arith.constant dense<0.000000e+00> : vector<256x128xf32>
    %2 = tpu.matmul %0, %1, %cst {dimension_numbers = #tpu.dot_dimension_numbers<[1], [0], [0], [1], [0, 0, 1, 1], [], []>} : vector<256x512xbf16>, vector<512x128xbf16>, vector<256x128xf32> -> vector<256x128xf32>
    %cst_3 = arith.constant 0.000000e+00 : f32
    %3 = vector.broadcast %cst_3 : f32 to vector<256x128xf32>
    %4 = arith.maximumf %2, %3 : vector<256x128xf32>
    %5 = arith.truncf %4 : vector<256x128xf32> to vector<256x128xbf16>
    %c0_4 = arith.constant 0 : index
    %c0_5 = arith.constant 0 : index
    %6 = vector.load %arg3[%c0_4, %c0_5] : memref<128x256xbf16, #tpu.memory_space<vmem>>, vector<128x256xbf16>
    %cst_6 = arith.constant dense<0.000000e+00> : vector<256x256xf32>
    %7 = tpu.matmul %5, %6, %cst_6 {dimension_numbers = #tpu.dot_dimension_numbers<[1], [0], [0], [1], [0, 0, 1, 1], [], []>} : vector<256x128xbf16>, vector<128x256xbf16>, vector<256x256xf32> -> vector<256x256xf32>
    %8 = arith.truncf %7 : vector<256x256xf32> to vector<256x256xbf16>
    %c0_7 = arith.constant 0 : index
    %c0_8 = arith.constant 0 : index
    %9 = vector.load %arg4[%c0_7, %c0_8] : memref<256x256xbf16, #tpu.memory_space<vmem>>, vector<256x256xbf16>
    tpu.vector_store %arg4[%c0_7, %c0_8], %8 {strides = array<i32>} : memref<256x256xbf16, #tpu.memory_space<vmem>>, vector<256x256xbf16>,
    return
  }
  func.func @transform_0(%arg0: i32) -> (i32, i32) {
    %c0_i32 = arith.constant 0 : i32
    %c0_i32_0 = arith.constant 0 : i32
    return %arg0, %c0_i32 : i32, i32
  }
  func.func @transform_1(%arg0: i32) -> (i32, i32) {
    %c0_i32 = arith.constant 0 : i32
    %c0_i32_0 = arith.constant 0 : i32
    %c0_i32_1 = arith.constant 0 : i32
    return %c0_i32, %c0_i32_0 : i32, i32
  }
  func.func @transform_2(%arg0: i32) -> (i32, i32) {
    %c0_i32 = arith.constant 0 : i32
    %c0_i32_0 = arith.constant 0 : i32
    %c0_i32_1 = arith.constant 0 : i32
    return %c0_i32, %c0_i32_0 : i32, i32
  }
  func.func @transform_3(%arg0: i32) -> (i32, i32) {
    %c0_i32 = arith.constant 0 : i32
    %c0_i32_0 = arith.constant 0 : i32
    return %arg0, %c0_i32 : i32, i32
  }
}

module attributes {stable_mosaic.version = 11 : i64} {
  func.func @_decoder_kernel(%arg0: i32, %arg1: i32, %arg2: memref<512x128xf32, #tpu.memory_space<vmem>>, %arg3: memref<512x128xf32, #tpu.memory_space<vmem>>, %arg4: memref<512x512xf32, #tpu.memory_space<vmem>>) attributes {dimension_semantics = [#tpu.dimension_semantics<parallel>, #tpu.dimension_semantics<parallel>], iteration_bounds = array<i64: 1, 1>, scalar_prefetch = 0 : i64, scratch_operands = 0 : i64, tpu.core_type = #tpu.core_type<tc>, window_params = [{transform_indices = @transform_0, window_bounds = array<i64: 512, 128>}, {transform_indices = @transform_1, window_bounds = array<i64: 512, 128>}, {transform_indices = @transform_2, window_bounds = array<i64: 512, 512>}]} {
    %c0 = arith.constant 0 : index
    %c0_0 = arith.constant 0 : index
    %0 = vector.load %arg2[%c0, %c0_0] : memref<512x128xf32, #tpu.memory_space<vmem>>, vector<512x128xf32>
    %c0_1 = arith.constant 0 : index
    %c0_2 = arith.constant 0 : index
    %1 = vector.load %arg3[%c0_1, %c0_2] : memref<512x128xf32, #tpu.memory_space<vmem>>, vector<512x128xf32>
    %cst = arith.constant dense<0.000000e+00> : vector<512x512xf32>
    %2 = tpu.matmul %0, %1, %cst {dimension_numbers = #tpu.dot_dimension_numbers<[1], [1], [0], [0], [0, 0, 1, 0], [], []>} : vector<512x128xf32>, vector<512x128xf32>, vector<512x512xf32> -> vector<512x512xf32>
    %3 = arith.negf %2 : vector<512x512xf32>
    %4 = math.exp %3 : vector<512x512xf32>
    %cst_3 = arith.constant 1.000000e+00 : f32
    %5 = vector.broadcast %cst_3 : f32 to vector<512x512xf32>
    %6 = arith.addf %5, %4 : vector<512x512xf32>
    %7 = arith.divf %5, %6 : vector<512x512xf32>
    %c0_4 = arith.constant 0 : index
    %c0_5 = arith.constant 0 : index
    %8 = vector.load %arg4[%c0_4, %c0_5] : memref<512x512xf32, #tpu.memory_space<vmem>>, vector<512x512xf32>
    tpu.vector_store %arg4[%c0_4, %c0_5], %7 {strides = array<i32>} : memref<512x512xf32, #tpu.memory_space<vmem>>, vector<512x512xf32>,
    return
  }
  func.func @transform_0(%arg0: i32, %arg1: i32) -> (i32, i32) {
    %c0_i32 = arith.constant 0 : i32
    %c0_i32_0 = arith.constant 0 : i32
    return %arg0, %c0_i32 : i32, i32
  }
  func.func @transform_1(%arg0: i32, %arg1: i32) -> (i32, i32) {
    %c0_i32 = arith.constant 0 : i32
    %c0_i32_0 = arith.constant 0 : i32
    return %arg1, %c0_i32 : i32, i32
  }
  func.func @transform_2(%arg0: i32, %arg1: i32) -> (i32, i32) {
    %c0_i32 = arith.constant 0 : i32
    return %arg0, %arg1 : i32, i32
  }
}

</mosaic_0001>

<bundles_post_ra>
// kernel: vgae_forward.4
= control target key start
LH: loop header
LB: loop body
LE: loop exit
PB: predicated region body
PF: predicated region fallthrough
CT: control target
= control target key end

     0   :  { %7 = vsyncpa [#allocation3], 0  ;;  %s1564_s0 = inlined_call_operand.hbm [shape: bf16[512,128], index: 0, kind: input, shape index: {}]   ;;  %s1565_s1 = inlined_call_operand.hbm [shape: bf16[128,128], index: 1, kind: input, shape index: {}]   ;;  %s1566_s2 = inlined_call_operand.hbm [shape: bf16[512,128], index: 2, kind: output, shape index: {}]  }
   0x1   :  { %9 = vsyncpa [#allocation3 + $0x1], 0 }
   0x2   :  { %10 = vsyncpa [#allocation6], 0 }
   0x3   :  { %11 = vsyncpa [#allocation4], 0 }
   0x4   :  { %13 = vsyncpa [#allocation4 + $0x1], 0  ;;  %s1316_s9 = smov 0   ;;  %s1318_s10 = smov 0  }
   0x5   :  { %s1320_s11 = smov 0   ;;  %s1322_s12 = smov 0  }
   0x6 LB: > { %s1337_s13 = sadd.s32 4294967295, %s1292_s12   ;;  %s790_s14 = sadd.s32 4294967294, %s1292_s12   ;;  %s1292_s12 = sphi %s1322_s12, %s1586_s12   ;;  %s1288_s11 = sphi %s1320_s11, %s1585_s11   ;;  %s1284_s10 = sphi %s1318_s10, %s1584_s10   ;;  %s1280_s9 = sphi %s1316_s9, %s1583_s9  }
   0x7   : > { %p39_p0 = scmp.ne.s32.totalorder %s1284_s10, %s1280_s9  ;;  %p1567_p1 = scmp.eq.s32.totalorder %s1337_s13, 0 }
   0x8   : > { %p90_p3 = scmp.eq.s32.totalorder %s790_s14, 1  ;;  %p791_p5 = scmp.ge.s32.totalorder %s1292_s12, 1 }
   0x9   : > { %p1346_p4 = por %p1567_p1, %p39_p0  ;;  %p97_p7 = scmp.lt.s32.totalorder %s1292_s12, 3 }
   0xa   : > { %p1351_p6 = por %p90_p3, %p39_p0  ;;  %s1294_s18 = smov [#allocation5]  }
   0xb   : > { %s1570_s15 = scalar_select %p1346_p4, 1, 0 }
   0xc   : > { %s1571_s16 = scalar_select %p1351_p6, 1, 0 }
   0xd   : > { %p1356_p8 = pnand %p791_p5, %p97_p7  ;;  %s109_s19 = sshll.u32 %s1294_s18, 4  ;;  %s1360_s19 = int_to_ptr.vmem [resolvable:$true] %s109_s19 }
   0xe   : > { %s1372_s21 = sadd.s32 1, %s1292_s12   ;;  %s26_s22 = sadd.s32 1, %s1288_s11 }
   0xf   : > { %s1572_s17 = scalar_select %p1356_p8, 1, 0 }
  0x10   : > { %p1087_p9 = pneg %p1356_p8  ;;  %s23_s23 = ssub.s32 %s1292_s12, %s1372_s21 }
  0x11   : > { %s1164_s26 = scalar_lea.hbm %s1565_s1, 1024 }
  0x12   : > { %p1367_p11 = pnand %p1087_p9, %p1567_p1  ;;  %p1165_p12 = scmp.ne.s32.totalorder %s1565_s1, %s1164_s26 }
  0x13   : > { %p1171_p5 = scmp.lt.u32.totalorder %s1164_s26, %s1565_s1 }
  0x14   : > { %p1166_p13 = pneg %p1367_p11 }
  0x16   : > { %p1167_p0 = pnand %p1166_p13, %p1165_p12 }
  0x18   : > { %p1168_p3 = pneg %p1167_p0 }
  0x1a   : > { %p1173_p7 = pnand %p1171_p5, %p1168_p3 }
  0x1c   : > { %1176 = shalt.err (!%p1173_p7)
}
  0x1d   : > { %s1177_s3 = scalar_lea.vmem %s1360_s19, 1024  ;;  %p1185_p2 = scmp.lt.s32.totalorder %s1360_s19, %s1360_s19 }
  0x1e   : > { %p1178_p9 = scmp.ne.s32.totalorder %s1360_s19, %s1177_s3  ;;  %p1186_p6 = scmp.lt.s32.totalorder %s1177_s3, %s1177_s3 }
  0x20   : > { %p1180_p10 = pnand %p1178_p9, %p1166_p13  ;;  %p1187_p4 = por %p1186_p6, %p1185_p2 }
  0x22   : > { %p1181_p1 = pneg %p1180_p10 }
  0x24   : > { %p1188_p8 = pnand %p1187_p4, %p1181_p1 }
  0x26   : > { %1191 = shalt.err (!%p1188_p8)
}
  0x27   : > { %s1295_s4 = smov 64   ;;  %s1296_s5 = smov 4  }
  0x28   : > { %1090 = dma.hbm_to_vmem [thread:$0]  (!%p1367_p11), %s1565_s1, 1024, %s1360_s19, [#allocation6], %s1295_s4, %s1295_s4, %s1296_s5  }
  0x29   : > { %p24_p1 = scmp.eq.s32.totalorder %s23_s23, 0  ;;  %p33_p2 = scmp.ne.s32.totalorder %s1288_s11, %s1284_s10 }
  0x2a   : > { %p34_p4 = scmp.eq.s32.totalorder %s1292_s12, 0  ;;  %p1100_p6 = scmp.lt.s32.totalorder %s1292_s12, 2 }
  0x2b   : > { %s1406_s8 = scalar_select %p24_p1, %s1288_s11, %s26_s22  }
  0x2c   : > { %p35_p8 = por %p34_p4, %p33_p2  ;;  %p1574_p10 = scmp.eq.s32.totalorder %s1337_s13, 1 }
  0x2d   : > { %s123_s18 = sand.u32 1, %s1288_s11   ;;  %s862_s20 = sshll.u32 %s1292_s12, 11 }
  0x2e   : > { %p1410_p12 = por %p1574_p10, %p33_p2  ;;  %s794_s24 = sshll.u32 %s123_s18, 7 }
  0x2f   : > { %s1419_s27 = scalar_lea.hbm %s1564_s0, %s862_s20  ;;  %s127_s19 = scalar_lea.vmem [#allocation2], %s794_s24 }
  0x30   : > { %s134_s22 = sshll.u32 %s127_s19, 4  ;;  %p1421_p11 = pnand %p1100_p6, %p35_p8  ;;  %s1425_s22 = int_to_ptr.vmem [resolvable:$true] %s134_s22 }
  0x31   : > { %s1427_s28 = scalar_lea.sflag [#allocation3], %s123_s18  ;;  %s1192_s29 = scalar_lea.hbm %s1419_s27, 2048 }
  0x32   : > { %p1193_p13 = scmp.ne.s32.totalorder %s1419_s27, %s1192_s29  ;;  %p1194_p0 = pneg %p1421_p11 }
  0x33   : > { %s1197_s6 = scalar_lea.hbm %s1564_s0, 4096  ;;  %p1198_p7 = scmp.lt.u32.totalorder %s1419_s27, %s1564_s0 }
  0x34   : > { %p1195_p3 = pnand %p1194_p0, %p1193_p13  ;;  %p1199_p9 = scmp.lt.u32.totalorder %s1197_s6, %s1192_s29 }
  0x35   : > { %p1201_p2 = scmp.lt.u32.totalorder %s1192_s29, %s1419_s27 }
  0x36   : > { %p1196_p5 = pneg %p1195_p3  ;;  %p1200_p1 = por %p1199_p9, %p1198_p7 }
  0x38   : > { %p1202_p4 = por %p1201_p2, %p1200_p1 }
  0x3a   : > { %p1203_p6 = pnand %p1202_p4, %p1196_p5 }
  0x3c   : > { %1206 = shalt.err (!%p1203_p6)
}
  0x3d   : > { %s1207_s18 = scalar_lea.vmem %s1425_s22, 2048  ;;  %s1297_s24 = smov [#allocation2]  }
  0x3e   : > { %p1208_p8 = scmp.ne.s32.totalorder %s1425_s22, %s1207_s18  ;;  %s1212_s25 = sshll.u32 %s1297_s24, 4  ;;  %s1213_s25 = int_to_ptr.vmem [resolvable:$false] %s1212_s25 }
  0x3f   : > { %s1214_s26 = scalar_lea.vmem %s1213_s25, 4096  ;;  %p1215_p3 = scmp.lt.s32.totalorder %s1425_s22, %s1213_s25 }
  0x40   : > { %p1210_p10 = pnand %p1208_p8, %p1194_p0  ;;  %p1216_p7 = scmp.lt.s32.totalorder %s1214_s26, %s1207_s18 }
  0x42   : > { %p1211_p13 = pneg %p1210_p10  ;;  %p1217_p9 = por %p1216_p7, %p1215_p3 }
  0x44   : > { %p1218_p1 = pnand %p1217_p9, %p1211_p13 }
  0x46   : > { %1221 = shalt.err (!%p1218_p1)
}
  0x47   : > { %1094 = dma.hbm_to_vmem [thread:$0]  (!%p1421_p11), %s1419_s27, 2048, %s1425_s22, %s1427_s28, %s1295_s4, %s1295_s4, %s1296_s5  }
  0x48   : > { %p1577_p0 = scmp.ne.s32.totalorder %s1572_s17, 0 }
  0x49   : > { %s1461_s19 = sand.u32 (!%p1577_p0), 1, %s1284_s10   ;;  %p1578_p5 = scmp.ne.s32.totalorder (!%p1577_p0), %s1570_s15, 0 }
  0x4a   : > { %146 = sbr.rel (%p1577_p0) target bundleno = 374 (0x176), region = 28  ;;  %s798_s29 = sshll.u32 (!%p1577_p0), %s1461_s19, 7 }
  0x4b   : > { %s149_s30 = scalar_lea.sflag (!%p1577_p0), [#allocation3], %s1461_s19  ;;  %s1467_s23 = scalar_lea.vmem (!%p1577_p0), [#allocation2], %s798_s29 }
  0x51   : > { %1267 = dma.done.wait (%p1578_p5), %s149_s30, 2048  }
  0x52   : > { %1269 = vsyncadd (%p1578_p5), %s149_s30, 4294965248  ;;  %p1579_p11 = scmp.eq.s32.totalorder %s1337_s13, 0 }
  0x54   : > { %1271 = dma.done.wait (%p1579_p11), [#allocation6], 1024   ;;  %p1580_p2 = pmov %p1579_p11 }
  0x55   : > { %v1140_v0 = vld [vmem:[#allocation5] sm:$0xff]   ;;  %v1141_v1 = vld [vmem:[#allocation5 + $0x8] sm:$0xff]   ;;  %v1142_v2 = vld [vmem:[#allocation5 + $0x10] sm:$0xff]   ;;  %s1495_s15 = scalar_lea.vmem [#allocation7], %s798_s29  ;;  %s895_s17 = sshll.u32 %s1337_s13, 11 }
  0x56   : > { %1273 = vsyncadd (%p1580_p2), [#allocation6], 4294966272  ;;  %1015 = vmatprep.subr.bf16.mxu0 %v1140_v0  ;;  %1063 = vmatprep.subr.bf16.mxu1 %v1140_v0  ;;  %v1143_v3 = vld [vmem:[#allocation5 + $0x18] sm:$0xff]   ;;  %v1148_v4 = vld [vmem:[%s1467_s23] sm:$0xff]   ;;  %s707_s4 = sshll.u32 %s1495_s15, 4  ;;  %s1514_s22 = scalar_lea.hbm %s1566_s2, %s895_s17  ;;  %s1516_s4 = int_to_ptr.vmem [resolvable:$true] %s707_s4 }
  0x57   : > { %1016 = vmatpush3.bf16.msra.mxu0 %v1140_v0  ;;  %1071 = vmatpush3.bf16.msra.mxu1 %v1140_v0  ;;  %v1149_v5 = vld [vmem:[%s1467_s23 + $0x40] sm:$0xff]   ;;  %v1145_v7 = vld [vmem:[#allocation5 + $0x28] sm:$0xff]   ;;  %v1146_v8 = vld [vmem:[#allocation5 + $0x30] sm:$0xff]   ;;  %s694_s13 = scalar_lea.sflag [#allocation4], %s1461_s19  ;;  %s1222_s28 = scalar_lea.vmem %s1516_s4, 2048 }
  0x58   : > { %1017 = vmatprep.subr.bf16.mxu0 %v1141_v1  ;;  %1064 = vmatprep.subr.bf16.mxu1 %v1141_v1  ;;  %v1144_v6 = vld [vmem:[#allocation5 + $0x20] sm:$0xff]   ;;  %v1147_v9 = vld [vmem:[#allocation5 + $0x38] sm:$0xff]   ;;  %v1150_v10 = vld [vmem:[%s1467_s23 + $0x8] sm:$0xff]   ;;  %p1223_p4 = scmp.ne.s32.totalorder %s1516_s4, %s1222_s28  ;;  %s1298_s3 = smov [#allocation7]  }
  0x59   : > { %1031 = vmatprep.mubr.bf16.mxu0 %v1148_v4  ;;  %1047 = vmatprep.mubr.bf16.mxu1 %v1149_v5  ;;  %v1151_v11 = vld [vmem:[%s1467_s23 + $0x48] sm:$0xff]   ;;  %v1152_v12 = vld [vmem:[%s1467_s23 + $0x10] sm:$0xff]   ;;  %v1154_v14 = vld [vmem:[%s1467_s23 + $0x18] sm:$0xff]   ;;  %s1226_s6 = sshll.u32 %s1298_s3, 4  ;;  %s1227_s6 = int_to_ptr.vmem [resolvable:$false] %s1226_s6 }
  0x5a   : > { %v1153_v13 = vld [vmem:[%s1467_s23 + $0x50] sm:$0xff]   ;;  %v1155_v15 = vld [vmem:[%s1467_s23 + $0x58] sm:$0xff]   ;;  %v1156_v16 = vld [vmem:[%s1467_s23 + $0x20] sm:$0xff]   ;;  %p1224_p6 = pnand %p1223_p4, %p1410_p12  ;;  %s1228_s7 = scalar_lea.vmem %s1227_s6, 4096 }
  0x5b   : > { %1018 = vmatpush3.bf16.msra.mxu0 %v1141_v1  ;;  %1072 = vmatpush3.bf16.msra.mxu1 %v1141_v1  ;;  %v1157_v17 = vld [vmem:[%s1467_s23 + $0x60] sm:$0xff]   ;;  %v1158_v18 = vld [vmem:[%s1467_s23 + $0x28] sm:$0xff]   ;;  %v1160_v20 = vld [vmem:[%s1467_s23 + $0x30] sm:$0xff]   ;;  %p1229_p10 = scmp.lt.s32.totalorder %s1516_s4, %s1227_s6  ;;  %p1230_p13 = scmp.lt.s32.totalorder %s1228_s7, %s1222_s28 }
  0x5c   : > { %1019 = vmatprep.subr.bf16.mxu0 %v1142_v2  ;;  %1065 = vmatprep.subr.bf16.mxu1 %v1142_v2  ;;  %v1159_v19 = vld [vmem:[%s1467_s23 + $0x68] sm:$0xff]   ;;  %v1161_v21 = vld [vmem:[%s1467_s23 + $0x70] sm:$0xff]   ;;  %v1162_v22 = vld [vmem:[%s1467_s23 + $0x38] sm:$0xff]   ;;  %p1225_p8 = pneg %p1224_p6 }
  0x5d   : > { %v1163_v23 = vld [vmem:[%s1467_s23 + $0x78] sm:$0xff]   ;;  %p1231_p3 = por %p1230_p13, %p1229_p10 }
  0x5f   : > { %1020 = vmatpush3.bf16.msra.mxu0 %v1142_v2  ;;  %1073 = vmatpush3.bf16.msra.mxu1 %v1142_v2  ;;  %p1232_p7 = pnand %p1231_p3, %p1225_p8 }
  0x60   : > { %1021 = vmatprep.subr.bf16.mxu0 %v1143_v3  ;;  %1066 = vmatprep.subr.bf16.mxu1 %v1143_v3 }
  0x63   : > { %1022 = vmatpush3.bf16.msra.mxu0 %v1143_v3  ;;  %1074 = vmatpush3.bf16.msra.mxu1 %v1143_v3 }
  0x64   : > { %1023 = vmatprep.subr.bf16.mxu0 %v1144_v6  ;;  %1067 = vmatprep.subr.bf16.mxu1 %v1144_v6 }
  0x67   : > { %1024 = vmatpush3.bf16.msra.mxu0 %v1144_v6  ;;  %1075 = vmatpush3.bf16.msra.mxu1 %v1144_v6 }
  0x68   : > { %1025 = vmatprep.subr.bf16.mxu0 %v1145_v7  ;;  %1068 = vmatprep.subr.bf16.mxu1 %v1145_v7 }
  0x6b   : > { %1026 = vmatpush3.bf16.msra.mxu0 %v1145_v7  ;;  %1076 = vmatpush3.bf16.msra.mxu1 %v1145_v7 }
  0x6c   : > { %1027 = vmatprep.subr.bf16.mxu0 %v1146_v8  ;;  %1069 = vmatprep.subr.bf16.mxu1 %v1146_v8 }
  0x6f   : > { %1028 = vmatpush3.bf16.msra.mxu0 %v1146_v8  ;;  %1077 = vmatpush3.bf16.msra.mxu1 %v1146_v8 }
  0x70   : > { %1029 = vmatprep.subr.bf16.mxu0 %v1147_v9  ;;  %1070 = vmatprep.subr.bf16.mxu1 %v1147_v9 }
  0x73   : > { %1030 = vmatpush3.bf16.msra.mxu0 %v1147_v9  ;;  %1078 = vmatpush3.bf16.msra.mxu1 %v1147_v9 }
  0x76   : > { %1032 = vmatmul.mubr.bf16.vlgmr.msra.gmra.mrb[0].mxu0 %v1150_v10  ;;  %1048 = vmatmul.mubr.bf16.vlgmr.msra.gmra.mrb[0].mxu1 %v1151_v11 }
  0x77   : > { %1035 = vmatprep.mubr.bf16.mxu0 %v1152_v12  ;;  %1051 = vmatprep.mubr.bf16.mxu1 %v1153_v13 }
  0x7e   : > { %1036 = vmatmul.mubr.bf16.gmra.mrb[4].mxu0 %v1154_v14  ;;  %1052 = vmatmul.mubr.bf16.gmra.mrb[4].mxu1 %v1155_v15 }
  0x7f   : > { %1039 = vmatprep.mubr.bf16.mxu0 %v1156_v16  ;;  %1055 = vmatprep.mubr.bf16.mxu1 %v1157_v17 }
  0x86   : > { %1040 = vmatmul.mubr.bf16.gmra.mrb[8].mxu0 %v1158_v18  ;;  %1056 = vmatmul.mubr.bf16.gmra.mrb[8].mxu1 %v1159_v19 }
  0x87   : > { %1043 = vmatprep.mubr.bf16.mxu0 %v1160_v20  ;;  %1059 = vmatprep.mubr.bf16.mxu1 %v1161_v21 }
  0x8e   : > { %1044 = vmatmul.mubr.bf16.gmra.mrb[12].mxu0 %v1162_v22  ;;  %1060 = vmatmul.mubr.bf16.gmra.mrb[12].mxu1 %v1163_v23 }
 0x149   : > { %v1033_v24 = vpop.f32.mrb[0].mxu0  ;;  %v1049_v25 = vpop.f32.mrb[0].mxu1 }
 0x14a   : > { %v406_v26 = vpop.f32.mrb[1].mxu0  ;;  %v470_v27 = vpop.f32.mrb[1].mxu1 }
 0x14b   : > { %v1034_v28 = vpop.f32.mrb[2].mxu0  ;;  %v1050_v29 = vpop.f32.mrb[2].mxu1 }
 0x14c   : > { %v904_v30 = vpack.c.bf16 %v1034_v28, %v1033_v24  ;;  %v944_v31 = vpack.c.bf16 %v1050_v29, %v1049_v25  ;;  %v409_v32 = vpop.f32.mrb[3].mxu0  ;;  %v473_v33 = vpop.f32.mrb[3].mxu1 }
 0x14d   : > { %v899_v34 = vpack.c.bf16 %v409_v32, %v406_v26  ;;  %v939_v35 = vpack.c.bf16 %v473_v33, %v470_v27 }
 0x14e   : > { %976 = vst [vmem:[%s1495_s15 + $0x8] sm:$0xff] %v904_v30   ;;  %984 = vst [vmem:[%s1495_s15 + $0x48] sm:$0xff] %v944_v31  }
 0x14f   : > { %900 = vst [vmem:[%s1495_s15] sm:$0xff] %v899_v34   ;;  %983 = vst [vmem:[%s1495_s15 + $0x40] sm:$0xff] %v939_v35  }
 0x151   : > { %v1037_v36 = vpop.f32.mrb[4].mxu0  ;;  %v1053_v37 = vpop.f32.mrb[4].mxu1 }
 0x152   : > { %v422_v38 = vpop.f32.mrb[5].mxu0  ;;  %v486_v39 = vpop.f32.mrb[5].mxu1 }
 0x153   : > { %v1038_v40 = vpop.f32.mrb[6].mxu0  ;;  %v1054_v41 = vpop.f32.mrb[6].mxu1 }
 0x154   : > { %v914_v42 = vpack.c.bf16 %v1038_v40, %v1037_v36  ;;  %v954_v43 = vpack.c.bf16 %v1054_v41, %v1053_v37  ;;  %v425_v44 = vpop.f32.mrb[7].mxu0  ;;  %v489_v45 = vpop.f32.mrb[7].mxu1 }
 0x155   : > { %v909_v46 = vpack.c.bf16 %v425_v44, %v422_v38  ;;  %v949_v47 = vpack.c.bf16 %v489_v45, %v486_v39 }
 0x156   : > { %978 = vst [vmem:[%s1495_s15 + $0x18] sm:$0xff] %v914_v42   ;;  %986 = vst [vmem:[%s1495_s15 + $0x58] sm:$0xff] %v954_v43  }
 0x157   : > { %977 = vst [vmem:[%s1495_s15 + $0x10] sm:$0xff] %v909_v46   ;;  %985 = vst [vmem:[%s1495_s15 + $0x50] sm:$0xff] %v949_v47  }
 0x159   : > { %v1041_v48 = vpop.f32.mrb[8].mxu0  ;;  %v1057_v49 = vpop.f32.mrb[8].mxu1 }
 0x15a   : > { %v438_v50 = vpop.f32.mrb[9].mxu0  ;;  %v502_v51 = vpop.f32.mrb[9].mxu1 }
 0x15b   : > { %v1042_v52 = vpop.f32.mrb[10].mxu0  ;;  %v1058_v53 = vpop.f32.mrb[10].mxu1 }
 0x15c   : > { %v924_v54 = vpack.c.bf16 %v1042_v52, %v1041_v48  ;;  %v964_v55 = vpack.c.bf16 %v1058_v53, %v1057_v49  ;;  %v441_v56 = vpop.f32.mrb[11].mxu0  ;;  %v505_v57 = vpop.f32.mrb[11].mxu1 }
 0x15d   : > { %v919_v58 = vpack.c.bf16 %v441_v56, %v438_v50  ;;  %v959_v59 = vpack.c.bf16 %v505_v57, %v502_v51 }
 0x15e   : > { %980 = vst [vmem:[%s1495_s15 + $0x28] sm:$0xff] %v924_v54   ;;  %988 = vst [vmem:[%s1495_s15 + $0x68] sm:$0xff] %v964_v55  }
 0x15f   : > { %979 = vst [vmem:[%s1495_s15 + $0x20] sm:$0xff] %v919_v58   ;;  %987 = vst [vmem:[%s1495_s15 + $0x60] sm:$0xff] %v959_v59  }
 0x161   : > { %v1045_v60 = vpop.f32.mrb[12].mxu0  ;;  %v1061_v61 = vpop.f32.mrb[12].mxu1 }
 0x162   : > { %v454_v62 = vpop.f32.mrb[13].mxu0  ;;  %v518_v63 = vpop.f32.mrb[13].mxu1 }
 0x163   : > { %v1046_v0 = vpop.f32.mrb[14].mxu0  ;;  %v1062_v1 = vpop.f32.mrb[14].mxu1 }
 0x164   : > { %v934_v2 = vpack.c.bf16 %v1046_v0, %v1045_v60  ;;  %v974_v3 = vpack.c.bf16 %v1062_v1, %v1061_v61  ;;  %v457_v4 = vpop.f32.mrb[15].mxu0  ;;  %v521_v5 = vpop.f32.mrb[15].mxu1 }
 0x165   : > { %v929_v6 = vpack.c.bf16 %v457_v4, %v454_v62  ;;  %v969_v7 = vpack.c.bf16 %v521_v5, %v518_v63 }
 0x166   : > { %982 = vst [vmem:[%s1495_s15 + $0x38] sm:$0xff] %v934_v2   ;;  %990 = vst [vmem:[%s1495_s15 + $0x78] sm:$0xff] %v974_v3  }
 0x167   : > { %981 = vst [vmem:[%s1495_s15 + $0x30] sm:$0xff] %v929_v6   ;;  %989 = vst [vmem:[%s1495_s15 + $0x70] sm:$0xff] %v969_v7  }
 0x168   : > { %1235 = shalt.err (!%p1232_p7)
}
 0x169   : > { %s1236_s20 = scalar_lea.hbm %s1514_s22, 2048  ;;  %s1240_s25 = scalar_lea.hbm %s1566_s2, 4096 }
 0x16a   : > { %p1237_p9 = scmp.ne.s32.totalorder %s1514_s22, %s1236_s20  ;;  %p1241_p5 = scmp.lt.u32.totalorder %s1514_s22, %s1566_s2 }
 0x16b   : > { %p1242_p11 = scmp.lt.u32.totalorder %s1240_s25, %s1236_s20  ;;  %p1244_p4 = scmp.lt.u32.totalorder %s1236_s20, %s1514_s22 }
 0x16c   : > { %p1238_p1 = pnand %p1237_p9, %p1410_p12 }
 0x16d   : > { %p1243_p2 = por %p1242_p11, %p1241_p5 }
 0x16e   : > { %p1239_p0 = pneg %p1238_p1 }
 0x16f   : > { %p1245_p6 = por %p1244_p4, %p1243_p2 }
 0x171   : > { %p1246_p8 = pnand %p1245_p6, %p1239_p0 }
 0x173   : > { %1249 = shalt.err (!%p1246_p8)
}
 0x174   : > { %s1299_s30 = smov 64   ;;  %s1300_s23 = smov 4  }
 0x175   : > { %1085 = dma.vmem_to_hbm [thread:$0]  (%p1410_p12), %s1516_s4, 2048, %s1514_s22, %s694_s13, %s1299_s30, %s1299_s30, %s1300_s23  }
 0x176 PF: > { %s722_s15 = sand.u32 1, %s1280_s9   ;;  %p1581_p10 = scmp.ne.s32.totalorder %s1571_s16, 0 }
 0x177   : > { %p1582_p13 = scmp.ge.s32.totalorder %s1292_s12, 2  ;;  %s723_s17 = scalar_lea.sflag [#allocation4], %s722_s15 }
 0x179   : > { %p1096_p3 = pnand %p1582_p13, %p1581_p10 }
 0x17b   : > { %1275 = dma.done.wait (!%p1096_p3), %s723_s17, 2048  }
 0x17c   : > { %1277 = vsyncadd (!%p1096_p3), %s723_s17, 4294965248  ;;  %p16_p7 = scmp.ge.s32.totalorder %s1372_s21, 4   ;;  %s1583_s9 = smov %s1284_s10 }
 0x17d   : > { %s1584_s10 = smov %s1288_s11  ;;  %s1585_s11 = smov %s1406_s8 }
 0x17e   : > { %s1586_s12 = smov %s1372_s21  ;;  %18 = sbr.rel (!%p16_p7) target bundleno = 6 (0x6), region = 77 }
 0x185   :  { %728 = vsyncpa [#allocation3], 1 }
 0x186   :  { %730 = vsyncpa [#allocation3 + $0x1], 1 }
 0x187   :  { %731 = vsyncpa [#allocation6], 1 }
 0x188   :  { %732 = vsyncpa [#allocation4], 1 }
 0x189   :  { %734 = vsyncpa [#allocation4 + $0x1], 1 }

// kernel: vgae_forward.6
= control target key start
LH: loop header
LB: loop body
LE: loop exit
PB: predicated region body
PF: predicated region fallthrough
CT: control target
= control target key end

     0   :  { %8 = vsyncpa [#allocation3], 0  ;;  %s2829_s0 = inlined_call_operand.hbm [shape: bf16[512,512], index: 0, kind: input, shape index: {}]   ;;  %s2830_s1 = inlined_call_operand.hbm [shape: bf16[512,256], index: 1, kind: input, shape index: {}]   ;;  %s2831_s2 = inlined_call_operand.hbm [shape: f32[512,128], index: 2, kind: input, shape index: {}]   ;;  %s2832_s3 = inlined_call_operand.hbm [shape: f32[512,128], index: 3, kind: output, shape index: {}]  }
   0x1   :  { %10 = vsyncpa [#allocation3 + $0x1], 0 }
   0x2   :  { %11 = vsyncpa [#allocation6], 0 }
   0x3   :  { %12 = vsyncpa [#allocation4], 0 }
   0x4   :  { %14 = vsyncpa [#allocation4 + $0x1], 0  ;;  %s2443_s12 = smov 0   ;;  %s2445_s13 = smov 0  }
   0x5   :  { %s2447_s14 = smov 0   ;;  %s2449_s15 = smov 0  }
   0x6 LB: > { %s2464_s16 = sadd.s32 1, %s2411_s15   ;;  %s27_s17 = sadd.s32 1, %s2407_s14  ;;  %s2411_s15 = sphi %s2449_s15, %s2853_s15   ;;  %s2407_s14 = sphi %s2447_s14, %s2852_s14   ;;  %s2403_s13 = sphi %s2445_s13, %s2851_s13   ;;  %s2399_s12 = sphi %s2443_s12, %s2850_s12  }
   0x7   : > { %s24_s18 = ssub.s32 %s2411_s15, %s2464_s16  ;;  %p34_p0 = scmp.ne.s32.totalorder %s2407_s14, %s2403_s13 }
   0x8   : > { %p25_p1 = scmp.eq.s32.totalorder %s24_s18, 0  ;;  %p35_p2 = scmp.eq.s32.totalorder %s2411_s15, 0 }
   0x9   : > { %p1951_p4 = scmp.lt.s32.totalorder %s2411_s15, 2  ;;  %s150_s20 = sand.u32 1, %s2411_s15  }
   0xa   : > { %s2475_s19 = scalar_select %p25_p1, %s2407_s14, %s27_s17  }
   0xb   : > { %p36_p5 = por %p35_p2, %p34_p0  ;;  %s152_s21 = sand.u32 1, %s2407_s14  }
   0xc   : > { %s1712_s22 = sshll.u32 %s152_s21, 9  ;;  %s1858_s23 = sshll.u32 %s2411_s15, 13 }
   0xd   : > { %s2488_s26 = scalar_lea.hbm %s2829_s0, %s1858_s23  ;;  %s154_s27 = scalar_lea.vmem [#allocation2], %s1712_s22 }
   0xe   : > { %s162_s28 = sshll.u32 %s154_s27, 4  ;;  %p2490_p6 = pnand %p1951_p4, %p36_p5  ;;  %s2494_s28 = int_to_ptr.vmem [resolvable:$true] %s162_s28 }
   0xf   : > { %s2496_s30 = scalar_lea.sflag [#allocation3], %s150_s20  ;;  %s2249_s4 = scalar_lea.hbm %s2488_s26, 8192 }
  0x10   : > { %p2250_p7 = scmp.ne.s32.totalorder %s2488_s26, %s2249_s4  ;;  %p2251_p8 = pneg %p2490_p6 }
  0x11   : > { %s2254_s7 = scalar_lea.hbm %s2829_s0, 16384  ;;  %p2255_p11 = scmp.lt.u32.totalorder %s2488_s26, %s2829_s0 }
  0x12   : > { %p2252_p9 = pnand %p2251_p8, %p2250_p7  ;;  %p2256_p12 = scmp.lt.u32.totalorder %s2254_s7, %s2249_s4 }
  0x13   : > { %p2258_p1 = scmp.lt.u32.totalorder %s2249_s4, %s2488_s26 }
  0x14   : > { %p2253_p10 = pneg %p2252_p9  ;;  %p2257_p13 = por %p2256_p12, %p2255_p11 }
  0x16   : > { %p2259_p2 = por %p2258_p1, %p2257_p13 }
  0x18   : > { %p2260_p4 = pnand %p2259_p2, %p2253_p10 }
  0x1a   : > { %2263 = shalt.err (!%p2260_p4)
}
  0x1b   : > { %s2264_s10 = scalar_lea.vmem %s2494_s28, 8192  ;;  %s2413_s11 = smov [#allocation2]  }
  0x1c   : > { %p2265_p5 = scmp.ne.s32.totalorder %s2494_s28, %s2264_s10  ;;  %s2269_s17 = sshll.u32 %s2413_s11, 4  ;;  %s2270_s17 = int_to_ptr.vmem [resolvable:$false] %s2269_s17 }
  0x1d   : > { %s2271_s18 = scalar_lea.vmem %s2270_s17, 16384  ;;  %p2272_p3 = scmp.lt.s32.totalorder %s2494_s28, %s2270_s17 }
  0x1e   : > { %p2267_p7 = pnand %p2265_p5, %p2251_p8  ;;  %p2273_p11 = scmp.lt.s32.totalorder %s2271_s18, %s2264_s10 }
  0x20   : > { %p2268_p9 = pneg %p2267_p7  ;;  %p2274_p12 = por %p2273_p11, %p2272_p3 }
  0x22   : > { %p2275_p13 = pnand %p2274_p12, %p2268_p9 }
  0x24   : > { %2278 = shalt.err (!%p2275_p13)
}
  0x25   : > { %s2414_s20 = smov 256   ;;  %s2415_s22 = smov 16  }
  0x26   : > { %1942 = dma.hbm_to_vmem [thread:$0]  (!%p2490_p6), %s2488_s26, 8192, %s2494_s28, %s2496_s30, %s2414_s20, %s2414_s20, %s2415_s22  }
  0x27   : > { %s1716_s23 = sshll.u32 %s152_s21, 8  ;;  %s2527_s27 = sadd.s32 4294967295, %s2411_s15  }
  0x28   : > { %s176_s24 = scalar_lea.vmem [#allocation7], %s1716_s23  ;;  %s1708_s4 = sadd.s32 4294967294, %s2411_s15  }
  0x29   : > { %s183_s25 = sshll.u32 %s176_s24, 4  ;;  %p40_p3 = scmp.ne.s32.totalorder %s2403_s13, %s2399_s12  ;;  %s2562_s25 = int_to_ptr.vmem [resolvable:$true] %s183_s25 }
  0x2a   : > { %p2833_p10 = scmp.eq.s32.totalorder %s2527_s27, 0  ;;  %p111_p1 = scmp.eq.s32.totalorder %s2527_s27, 1 }
  0x2b   : > { %p117_p2 = scmp.eq.s32.totalorder %s1708_s4, 1  ;;  %p1709_p4 = scmp.ge.s32.totalorder %s2411_s15, 1 }
  0x2c   : > { %p2537_p5 = por %p2833_p10, %p40_p3  ;;  %p2544_p7 = por %p111_p1, %p34_p0 }
  0x2d   : > { %p2548_p9 = por %p117_p2, %p40_p3  ;;  %p124_p11 = scmp.lt.s32.totalorder %s2411_s15, 3 }
  0x2e   : > { %s2838_s26 = scalar_select %p2537_p5, 1, 0 }
  0x2f   : > { %s2839_s21 = scalar_select %p2544_p7, 1, 0 }
  0x30   : > { %s2840_s28 = scalar_select %p2548_p9, 1, 0 }
  0x31   : > { %p2553_p12 = pnand %p1709_p4, %p124_p11  ;;  %s2416_s6 = smov [#allocation5]  }
  0x32   : > { %s136_s7 = sshll.u32 %s2416_s6, 4  ;;  %s1859_s8 = sshll.u32 %s2411_s15, 12  ;;  %s2557_s7 = int_to_ptr.vmem [resolvable:$true] %s136_s7 }
  0x33   : > { %s2841_s5 = scalar_select %p2553_p12, 1, 0 }
  0x34   : > { %p1935_p13 = pneg %p2553_p12  ;;  %s2573_s17 = scalar_lea.hbm %s2831_s2, %s1859_s8 }
  0x35   : > { %s2279_s18 = scalar_lea.hbm %s2573_s17, 4096  ;;  %s2284_s23 = scalar_lea.hbm %s2831_s2, 8192 }
  0x36   : > { %p2566_p0 = pnand %p1935_p13, %p2833_p10  ;;  %p2280_p3 = scmp.ne.s32.totalorder %s2573_s17, %s2279_s18 }
  0x37   : > { %p2285_p4 = scmp.lt.u32.totalorder %s2573_s17, %s2831_s2  ;;  %p2286_p11 = scmp.lt.u32.totalorder %s2284_s23, %s2279_s18 }
  0x38   : > { %p2282_p1 = pnand %p2280_p3, %p2251_p8  ;;  %p2288_p10 = scmp.lt.u32.totalorder %s2279_s18, %s2573_s17 }
  0x39   : > { %p2287_p13 = por %p2286_p11, %p2285_p4 }
  0x3a   : > { %p2283_p2 = pneg %p2282_p1 }
  0x3b   : > { %p2289_p9 = por %p2288_p10, %p2287_p13 }
  0x3d   : > { %p2290_p7 = pnand %p2289_p9, %p2283_p2 }
  0x3f   : > { %2293 = shalt.err (!%p2290_p7)
}
  0x40   : > { %s2294_s6 = scalar_lea.vmem %s2562_s25, 4096  ;;  %s2417_s8 = smov [#allocation7]  }
  0x41   : > { %p2295_p3 = scmp.ne.s32.totalorder %s2562_s25, %s2294_s6  ;;  %s2299_s10 = sshll.u32 %s2417_s8, 4  ;;  %s2300_s10 = int_to_ptr.vmem [resolvable:$false] %s2299_s10 }
  0x42   : > { %s2301_s11 = scalar_lea.vmem %s2300_s10, 8192  ;;  %p2302_p12 = scmp.lt.s32.totalorder %s2562_s25, %s2300_s10 }
  0x43   : > { %p2297_p1 = pnand %p2295_p3, %p2251_p8  ;;  %p2303_p4 = scmp.lt.s32.totalorder %s2301_s11, %s2294_s6 }
  0x45   : > { %p2298_p5 = pneg %p2297_p1  ;;  %p2304_p11 = por %p2303_p4, %p2302_p12 }
  0x47   : > { %p2305_p10 = pnand %p2304_p11, %p2298_p5 }
  0x49   : > { %2308 = shalt.err (!%p2305_p10)
}
  0x4a   : > { %s2418_s18 = smov 128   ;;  %s2419_s20 = smov 8  }
  0x4b   : > { %1945 = dma.hbm_to_vmem [thread:$0]  (!%p2490_p6), %s2573_s17, 4096, %s2562_s25, %s2496_s30, %s2418_s18, %s2418_s18, %s2419_s20  }
  0x4c   : > { %s2309_s24 = scalar_lea.hbm %s2830_s1, 8192  ;;  %p2311_p5 = pneg %p2566_p0 }
  0x4d   : > { %p2310_p8 = scmp.ne.s32.totalorder %s2830_s1, %s2309_s24  ;;  %p2316_p12 = scmp.lt.u32.totalorder %s2309_s24, %s2830_s1 }
  0x4f   : > { %p2312_p7 = pnand %p2311_p5, %p2310_p8 }
  0x51   : > { %p2313_p9 = pneg %p2312_p7 }
  0x53   : > { %p2318_p2 = pnand %p2316_p12, %p2313_p9 }
  0x55   : > { %2321 = shalt.err (!%p2318_p2)
}
  0x56   : > { %s2322_s29 = scalar_lea.vmem %s2557_s7, 8192  ;;  %p2330_p1 = scmp.lt.s32.totalorder %s2557_s7, %s2557_s7 }
  0x57   : > { %p2323_p6 = scmp.ne.s32.totalorder %s2557_s7, %s2322_s29  ;;  %p2331_p4 = scmp.lt.s32.totalorder %s2322_s29, %s2322_s29 }
  0x59   : > { %p2325_p13 = pnand %p2323_p6, %p2311_p5  ;;  %p2332_p11 = por %p2331_p4, %p2330_p1 }
  0x5b   : > { %p2326_p3 = pneg %p2325_p13 }
  0x5d   : > { %p2333_p10 = pnand %p2332_p11, %p2326_p3 }
  0x5f   : > { %2336 = shalt.err (!%p2333_p10)
}
  0x60   : > { %1938 = dma.hbm_to_vmem [thread:$0]  (!%p2566_p0), %s2830_s1, 8192, %s2557_s7, [#allocation6], %s2418_s18, %s2418_s18, %s2419_s20  }
  0x61   : > { %p2843_p8 = scmp.ne.s32.totalorder %s2841_s5, 0 }
  0x62   : > { %s197_s17 = sand.u32 (!%p2843_p8), 1, %s2527_s27   ;;  %s2624_s11 = sand.u32 (!%p2843_p8), 1, %s2403_s13  }
  0x63   : > { %195 = sbr.rel (%p2843_p8) target bundleno = 549 (0x225), region = 32  ;;  %s1720_s22 = sshll.u32 (!%p2843_p8), %s2624_s11, 9 }
  0x64   : > { %s198_s23 = scalar_lea.sflag (!%p2843_p8), [#allocation3], %s197_s17  ;;  %s2627_s24 = scalar_lea.vmem (!%p2843_p8), [#allocation2], %s1720_s22 }
  0x65   : > { %p2844_p5 = scmp.ne.s32.totalorder (!%p2843_p8), %s2838_s26, 0 }
  0x6a   : > { %2382 = dma.done.wait (%p2844_p5), %s198_s23, 8192  }
  0x6b   : > { %2384 = vsyncadd (%p2844_p5), %s198_s23, 4294959104  ;;  %p2845_p0 = scmp.eq.s32.totalorder %s2527_s27, 0 }
  0x6d   : > { %2386 = dma.done.wait (%p2845_p0), [#allocation6], 8192   ;;  %p2846_p7 = pmov %p2845_p0 }
  0x6e   : > { %s1722_s5 = sshll.u32 %s2624_s11, 8 }
  0x6f   : > { %2388 = vsyncadd (%p2846_p7), [#allocation6], 4294959104  ;;  %s2640_s7 = scalar_lea.vmem [#allocation7], %s1722_s5 }
  0x70   : > { %2390 = dma.done.wait (%p2844_p5), %s198_s23, 4096  }
  0x71   : > { %2392 = vsyncadd (%p2844_p5), %s198_s23, 4294963200  ;;  %v1993_v0 = vld [vmem:[#allocation5 + $0x4] ss:$8 sps:$4 sm:$0xff]   ;;  %v1997_v2 = vld [vmem:[#allocation5] ss:$8 sps:$4 sm:$0xff]   ;;  %s2714_s26 = scalar_lea.vmem [#allocation8], %s1722_s5 }
  0x72   : > { %v1995_v1 = vld [vmem:[#allocation5 + $0x104] ss:$8 sps:$4 sm:$0xff]   ;;  %1013 = vmatprep.subr.bf16.mxu1 %v1993_v0  ;;  %v1998_v3 = vld [vmem:[#allocation5 + $0x100] ss:$8 sps:$4 sm:$0xff]   ;;  %v1999_v4 = vld [vmem:[#allocation5 + $0x14] ss:$8 sps:$4 sm:$0xff]  }
  0x73   : > { %1206 = vmatprep.subr.bf16.mxu0 %v1995_v1  ;;  %1014 = vmatpush1.bf16.msra.mxu1 %v1997_v2  ;;  %v2001_v5 = vld [vmem:[#allocation5 + $0x114] ss:$8 sps:$4 sm:$0xff]   ;;  %v2003_v6 = vld [vmem:[#allocation5 + $0x10] ss:$8 sps:$4 sm:$0xff]   ;;  %v2005_v8 = vld [vmem:[#allocation5 + $0x24] ss:$8 sps:$4 sm:$0xff]  }
  0x74   : > { %1207 = vmatpush1.bf16.msra.mxu0 %v1998_v3  ;;  %1015 = vmatprep.subr.bf16.mxu1 %v1999_v4  ;;  %v2004_v7 = vld [vmem:[#allocation5 + $0x110] ss:$8 sps:$4 sm:$0xff]   ;;  %v2007_v9 = vld [vmem:[#allocation5 + $0x124] ss:$8 sps:$4 sm:$0xff]   ;;  %v2009_v10 = vld [vmem:[#allocation5 + $0x20] ss:$8 sps:$4 sm:$0xff]  }
  0x75   : > { %1208 = vmatprep.subr.bf16.mxu0 %v2001_v5  ;;  %v2010_v11 = vld [vmem:[#allocation5 + $0x120] ss:$8 sps:$4 sm:$0xff]   ;;  %v2011_v12 = vld [vmem:[#allocation5 + $0x34] ss:$8 sps:$4 sm:$0xff]   ;;  %v2015_v14 = vld [vmem:[#allocation5 + $0x30] ss:$8 sps:$4 sm:$0xff]  }
  0x76   : > { %v2013_v13 = vld [vmem:[#allocation5 + $0x134] ss:$8 sps:$4 sm:$0xff]   ;;  %v2016_v15 = vld [vmem:[#allocation5 + $0x130] ss:$8 sps:$4 sm:$0xff]   ;;  %v2017_v16 = vld [vmem:[#allocation5 + $0x44] ss:$8 sps:$4 sm:$0xff]  }
  0x77   : > { %1016 = vmatpush1.bf16.msra.mxu1 %v2003_v6  ;;  %v2019_v17 = vld [vmem:[#allocation5 + $0x144] ss:$8 sps:$4 sm:$0xff]   ;;  %v2021_v18 = vld [vmem:[#allocation5 + $0x40] ss:$8 sps:$4 sm:$0xff]   ;;  %v2023_v20 = vld [vmem:[#allocation5 + $0x54] ss:$8 sps:$4 sm:$0xff]  }
  0x78   : > { %1209 = vmatpush1.bf16.msra.mxu0 %v2004_v7  ;;  %1017 = vmatprep.subr.bf16.mxu1 %v2005_v8  ;;  %v2022_v19 = vld [vmem:[#allocation5 + $0x140] ss:$8 sps:$4 sm:$0xff]   ;;  %v2025_v21 = vld [vmem:[#allocation5 + $0x154] ss:$8 sps:$4 sm:$0xff]   ;;  %v2027_v22 = vld [vmem:[#allocation5 + $0x50] ss:$8 sps:$4 sm:$0xff]  }
  0x79   : > { %1210 = vmatprep.subr.bf16.mxu0 %v2007_v9  ;;  %v2028_v23 = vld [vmem:[#allocation5 + $0x150] ss:$8 sps:$4 sm:$0xff]   ;;  %v2029_v24 = vld [vmem:[#allocation5 + $0x64] ss:$8 sps:$4 sm:$0xff]   ;;  %v2033_v26 = vld [vmem:[#allocation5 + $0x60] ss:$8 sps:$4 sm:$0xff]  }
  0x7a   : > { %v2031_v25 = vld [vmem:[#allocation5 + $0x164] ss:$8 sps:$4 sm:$0xff]   ;;  %v2034_v27 = vld [vmem:[#allocation5 + $0x160] ss:$8 sps:$4 sm:$0xff]   ;;  %v2035_v28 = vld [vmem:[#allocation5 + $0x74] ss:$8 sps:$4 sm:$0xff]  }
  0x7b   : > { %1018 = vmatpush1.bf16.msra.mxu1 %v2009_v10  ;;  %v2037_v29 = vld [vmem:[#allocation5 + $0x174] ss:$8 sps:$4 sm:$0xff]   ;;  %v2039_v30 = vld [vmem:[#allocation5 + $0x70] ss:$8 sps:$4 sm:$0xff]   ;;  %v2041_v32 = vld [vmem:[#allocation5 + $0x84] ss:$8 sps:$4 sm:$0xff]  }
  0x7c   : > { %1211 = vmatpush1.bf16.msra.mxu0 %v2010_v11  ;;  %1019 = vmatprep.subr.bf16.mxu1 %v2011_v12  ;;  %v2040_v31 = vld [vmem:[#allocation5 + $0x170] ss:$8 sps:$4 sm:$0xff]   ;;  %v2043_v33 = vld [vmem:[#allocation5 + $0x184] ss:$8 sps:$4 sm:$0xff]   ;;  %v2045_v34 = vld [vmem:[#allocation5 + $0x80] ss:$8 sps:$4 sm:$0xff]  }
  0x7d   : > { %1212 = vmatprep.subr.bf16.mxu0 %v2013_v13  ;;  %v2046_v35 = vld [vmem:[#allocation5 + $0x180] ss:$8 sps:$4 sm:$0xff]   ;;  %v2047_v36 = vld [vmem:[#allocation5 + $0x94] ss:$8 sps:$4 sm:$0xff]   ;;  %v2051_v38 = vld [vmem:[#allocation5 + $0x90] ss:$8 sps:$4 sm:$0xff]  }
  0x7e   : > { %v2049_v37 = vld [vmem:[#allocation5 + $0x194] ss:$8 sps:$4 sm:$0xff]   ;;  %v2052_v39 = vld [vmem:[#allocation5 + $0x190] ss:$8 sps:$4 sm:$0xff]   ;;  %v2053_v40 = vld [vmem:[#allocation5 + $0xa4] ss:$8 sps:$4 sm:$0xff]  }
  0x7f   : > { %1020 = vmatpush1.bf16.msra.mxu1 %v2015_v14  ;;  %v2055_v41 = vld [vmem:[#allocation5 + $0x1a4] ss:$8 sps:$4 sm:$0xff]   ;;  %v2057_v42 = vld [vmem:[#allocation5 + $0xa0] ss:$8 sps:$4 sm:$0xff]   ;;  %v2059_v44 = vld [vmem:[#allocation5 + $0xb4] ss:$8 sps:$4 sm:$0xff]  }
  0x80   : > { %1213 = vmatpush1.bf16.msra.mxu0 %v2016_v15  ;;  %1021 = vmatprep.subr.bf16.mxu1 %v2017_v16  ;;  %v2058_v43 = vld [vmem:[#allocation5 + $0x1a0] ss:$8 sps:$4 sm:$0xff]   ;;  %v2061_v45 = vld [vmem:[#allocation5 + $0x1b4] ss:$8 sps:$4 sm:$0xff]   ;;  %v2063_v46 = vld [vmem:[#allocation5 + $0xb0] ss:$8 sps:$4 sm:$0xff]  }
  0x81   : > { %1214 = vmatprep.subr.bf16.mxu0 %v2019_v17  ;;  %v2064_v47 = vld [vmem:[#allocation5 + $0x1b0] ss:$8 sps:$4 sm:$0xff]   ;;  %v2065_v48 = vld [vmem:[#allocation5 + $0xc4] ss:$8 sps:$4 sm:$0xff]   ;;  %v2069_v52 = vld [vmem:[#allocation5 + $0xc0] ss:$8 sps:$4 sm:$0xff]  }
  0x82   : > { %v2091_v49 = vld [vmem:[%s2627_s24 + $0x4] ss:$16 sps:$4 sm:$0xff]   ;;  %v2094_v51 = vld [vmem:[%s2627_s24 + $0xc] ss:$16 sps:$4 sm:$0xff]   ;;  %v2070_v53 = vld [vmem:[#allocation5 + $0x1c0] ss:$8 sps:$4 sm:$0xff]  }
  0x83   : > { %1022 = vmatpush1.bf16.msra.mxu1 %v2021_v18  ;;  %v2067_v50 = vld [vmem:[#allocation5 + $0x1c4] ss:$8 sps:$4 sm:$0xff]   ;;  %1045 = vmatprep.mubr.bf16.mxu1 %v2091_v49  ;;  %v2071_v54 = vld [vmem:[#allocation5 + $0xd4] ss:$8 sps:$4 sm:$0xff]   ;;  %v2075_v56 = vld [vmem:[#allocation5 + $0xd0] ss:$8 sps:$4 sm:$0xff]  }
  0x84   : > { %1215 = vmatpush1.bf16.msra.mxu0 %v2022_v19  ;;  %1023 = vmatprep.subr.bf16.mxu1 %v2023_v20  ;;  %v2073_v55 = vld [vmem:[#allocation5 + $0x1d4] ss:$8 sps:$4 sm:$0xff]   ;;  %v2076_v57 = vld [vmem:[#allocation5 + $0x1d0] ss:$8 sps:$4 sm:$0xff]   ;;  %v2077_v58 = vld [vmem:[#allocation5 + $0xe4] ss:$8 sps:$4 sm:$0xff]  }
  0x85   : > { %1216 = vmatprep.subr.bf16.mxu0 %v2025_v21  ;;  %1238 = vmatprep.mubr.bf16.mxu0 %v2094_v51  ;;  %v2079_v59 = vld [vmem:[#allocation5 + $0x1e4] ss:$8 sps:$4 sm:$0xff]   ;;  %v2081_v60 = vld [vmem:[#allocation5 + $0xe0] ss:$8 sps:$4 sm:$0xff]   ;;  %v2083_v62 = vld [vmem:[#allocation5 + $0xf4] ss:$8 sps:$4 sm:$0xff]  }
  0x86   : > { %v2082_v61 = vld [vmem:[#allocation5 + $0x1e0] ss:$8 sps:$4 sm:$0xff]   ;;  %v2085_v63 = vld [vmem:[#allocation5 + $0x1f4] ss:$8 sps:$4 sm:$0xff]   ;;  %v2087_v0 = vld [vmem:[#allocation5 + $0xf0] ss:$8 sps:$4 sm:$0xff]  }
  0x87   : > { %1024 = vmatpush1.bf16.msra.mxu1 %v2027_v22  ;;  %v2088_v1 = vld [vmem:[#allocation5 + $0x1f0] ss:$8 sps:$4 sm:$0xff]   ;;  %v2095_v4 = vld [vmem:[%s2627_s24 + $0x24] ss:$16 sps:$4 sm:$0xff]   ;;  %v2097_v5 = vld [vmem:[%s2627_s24 + $0x2c] ss:$16 sps:$4 sm:$0xff]  }
  0x88   : > { %1217 = vmatpush1.bf16.msra.mxu0 %v2028_v23  ;;  %1025 = vmatprep.subr.bf16.mxu1 %v2029_v24  ;;  %v2089_v2 = vld [vmem:[%s2627_s24] ss:$16 sps:$4 sm:$0xff]   ;;  %v2092_v3 = vld [vmem:[%s2627_s24 + $0x8] ss:$16 sps:$4 sm:$0xff]   ;;  %v2101_v8 = vld [vmem:[%s2627_s24 + $0x44] ss:$16 sps:$4 sm:$0xff]  }
  0x89   : > { %1218 = vmatprep.subr.bf16.mxu0 %v2031_v25  ;;  %v2099_v6 = vld [vmem:[%s2627_s24 + $0x20] ss:$16 sps:$4 sm:$0xff]   ;;  %v2100_v7 = vld [vmem:[%s2627_s24 + $0x28] ss:$16 sps:$4 sm:$0xff]   ;;  %v2103_v9 = vld [vmem:[%s2627_s24 + $0x4c] ss:$16 sps:$4 sm:$0xff]  }
  0x8a   : > { %v2105_v10 = vld [vmem:[%s2627_s24 + $0x40] ss:$16 sps:$4 sm:$0xff]   ;;  %v2106_v11 = vld [vmem:[%s2627_s24 + $0x48] ss:$16 sps:$4 sm:$0xff]   ;;  %v2107_v12 = vld [vmem:[%s2627_s24 + $0x64] ss:$16 sps:$4 sm:$0xff]  }
  0x8b   : > { %1026 = vmatpush1.bf16.msra.mxu1 %v2033_v26  ;;  %v2109_v13 = vld [vmem:[%s2627_s24 + $0x6c] ss:$16 sps:$4 sm:$0xff]   ;;  %v2111_v14 = vld [vmem:[%s2627_s24 + $0x60] ss:$16 sps:$4 sm:$0xff]   ;;  %v2112_v15 = vld [vmem:[%s2627_s24 + $0x68] ss:$16 sps:$4 sm:$0xff]  }
  0x8c   : > { %1219 = vmatpush1.bf16.msra.mxu0 %v2034_v27  ;;  %1027 = vmatprep.subr.bf16.mxu1 %v2035_v28  ;;  %v2113_v16 = vld [vmem:[%s2627_s24 + $0x84] ss:$16 sps:$4 sm:$0xff]   ;;  %v2115_v17 = vld [vmem:[%s2627_s24 + $0x8c] ss:$16 sps:$4 sm:$0xff]   ;;  %v2117_v18 = vld [vmem:[%s2627_s24 + $0x80] ss:$16 sps:$4 sm:$0xff]  }
  0x8d   : > { %1220 = vmatprep.subr.bf16.mxu0 %v2037_v29  ;;  %v2118_v19 = vld [vmem:[%s2627_s24 + $0x88] ss:$16 sps:$4 sm:$0xff]   ;;  %v2119_v20 = vld [vmem:[%s2627_s24 + $0xa4] ss:$16 sps:$4 sm:$0xff]   ;;  %v2121_v21 = vld [vmem:[%s2627_s24 + $0xac] ss:$16 sps:$4 sm:$0xff]  }
  0x8e   : > { %v2123_v22 = vld [vmem:[%s2627_s24 + $0xa0] ss:$16 sps:$4 sm:$0xff]   ;;  %v2124_v23 = vld [vmem:[%s2627_s24 + $0xa8] ss:$16 sps:$4 sm:$0xff]   ;;  %v2125_v24 = vld [vmem:[%s2627_s24 + $0xc4] ss:$16 sps:$4 sm:$0xff]  }
  0x8f   : > { %1028 = vmatpush1.bf16.msra.mxu1 %v2039_v30  ;;  %v2127_v25 = vld [vmem:[%s2627_s24 + $0xcc] ss:$16 sps:$4 sm:$0xff]   ;;  %v2129_v26 = vld [vmem:[%s2627_s24 + $0xc0] ss:$16 sps:$4 sm:$0xff]   ;;  %v2130_v27 = vld [vmem:[%s2627_s24 + $0xc8] ss:$16 sps:$4 sm:$0xff]  }
  0x90   : > { %1221 = vmatpush1.bf16.msra.mxu0 %v2040_v31  ;;  %1029 = vmatprep.subr.bf16.mxu1 %v2041_v32  ;;  %v2131_v28 = vld [vmem:[%s2627_s24 + $0xe4] ss:$16 sps:$4 sm:$0xff]   ;;  %v2133_v29 = vld [vmem:[%s2627_s24 + $0xec] ss:$16 sps:$4 sm:$0xff]   ;;  %v2135_v30 = vld [vmem:[%s2627_s24 + $0xe0] ss:$16 sps:$4 sm:$0xff]  }
  0x91   : > { %1222 = vmatprep.subr.bf16.mxu0 %v2043_v33  ;;  %v2136_v31 = vld [vmem:[%s2627_s24 + $0xe8] ss:$16 sps:$4 sm:$0xff]   ;;  %v2137_v32 = vld [vmem:[%s2627_s24 + $0x104] ss:$16 sps:$4 sm:$0xff]   ;;  %v2139_v33 = vld [vmem:[%s2627_s24 + $0x10c] ss:$16 sps:$4 sm:$0xff]  }
  0x92   : > { %v2163_v49 = vld [vmem:[%s2627_s24 + $0x18c] ss:$16 sps:$4 sm:$0xff]   ;;  %v2166_v51 = vld [vmem:[%s2627_s24 + $0x188] ss:$16 sps:$4 sm:$0xff]   ;;  %s1860_s9 = sshll.u32 %s2527_s27, 12  ;;  %s1605_s18 = sshll.u32 %s2714_s26, 4  ;;  %s2783_s18 = int_to_ptr.vmem [resolvable:$true] %s1605_s18 }
  0x93   : > { %1030 = vmatpush1.bf16.msra.mxu1 %v2045_v34  ;;  %v2141_v34 = vld [vmem:[%s2627_s24 + $0x100] ss:$16 sps:$4 sm:$0xff]   ;;  %s2781_s8 = scalar_lea.hbm %s2832_s3, %s1860_s9  ;;  %s1592_s6 = scalar_lea.sflag [#allocation4], %s2624_s11 }
  0x94   : > { %1223 = vmatpush1.bf16.msra.mxu0 %v2046_v35  ;;  %1031 = vmatprep.subr.bf16.mxu1 %v2047_v36  ;;  %v2142_v35 = vld [vmem:[%s2627_s24 + $0x108] ss:$16 sps:$4 sm:$0xff]   ;;  %v2143_v36 = vld [vmem:[%s2627_s24 + $0x124] ss:$16 sps:$4 sm:$0xff]   ;;  %s2337_s10 = scalar_lea.vmem %s2783_s18, 4096  ;;  %p2847_p12 = scmp.ne.s32.totalorder %s2839_s21, 0 }
  0x95   : > { %1224 = vmatprep.subr.bf16.mxu0 %v2049_v37  ;;  %v2145_v37 = vld [vmem:[%s2627_s24 + $0x12c] ss:$16 sps:$4 sm:$0xff]   ;;  %p2338_p9 = scmp.ne.s32.totalorder %s2783_s18, %s2337_s10  ;;  %s2420_s27 = smov [#allocation8]  }
  0x96   : > { %s2341_s29 = sshll.u32 %s2420_s27, 4  ;;  %s2342_s29 = int_to_ptr.vmem [resolvable:$false] %s2341_s29 }
  0x97   : > { %1032 = vmatpush1.bf16.msra.mxu1 %v2051_v38  ;;  %v2147_v38 = vld [vmem:[%s2627_s24 + $0x120] ss:$16 sps:$4 sm:$0xff]   ;;  %p2339_p2 = pnand %p2338_p9, %p2847_p12  ;;  %s2343_s30 = scalar_lea.vmem %s2342_s29, 8192 }
  0x98   : > { %1225 = vmatpush1.bf16.msra.mxu0 %v2052_v39  ;;  %1033 = vmatprep.subr.bf16.mxu1 %v2053_v40  ;;  %v2148_v39 = vld [vmem:[%s2627_s24 + $0x128] ss:$16 sps:$4 sm:$0xff]   ;;  %v2149_v40 = vld [vmem:[%s2627_s24 + $0x144] ss:$16 sps:$4 sm:$0xff]   ;;  %p2344_p13 = scmp.lt.s32.totalorder %s2783_s18, %s2342_s29  ;;  %p2345_p3 = scmp.lt.s32.totalorder %s2343_s30, %s2337_s10 }
  0x99   : > { %1226 = vmatprep.subr.bf16.mxu0 %v2055_v41  ;;  %v2151_v41 = vld [vmem:[%s2627_s24 + $0x14c] ss:$16 sps:$4 sm:$0xff]   ;;  %p2340_p6 = pneg %p2339_p2 }
  0x9a   : > { %p2346_p1 = por %p2345_p3, %p2344_p13 }
  0x9b   : > { %1034 = vmatpush1.bf16.msra.mxu1 %v2057_v42  ;;  %v2153_v42 = vld [vmem:[%s2627_s24 + $0x140] ss:$16 sps:$4 sm:$0xff]  }
  0x9c   : > { %1227 = vmatpush1.bf16.msra.mxu0 %v2058_v43  ;;  %1035 = vmatprep.subr.bf16.mxu1 %v2059_v44  ;;  %v2154_v43 = vld [vmem:[%s2627_s24 + $0x148] ss:$16 sps:$4 sm:$0xff]   ;;  %v2155_v44 = vld [vmem:[%s2627_s24 + $0x164] ss:$16 sps:$4 sm:$0xff]   ;;  %p2347_p4 = pnand %p2346_p1, %p2340_p6 }
  0x9d   : > { %1228 = vmatprep.subr.bf16.mxu0 %v2061_v45  ;;  %v2157_v45 = vld [vmem:[%s2627_s24 + $0x16c] ss:$16 sps:$4 sm:$0xff]  }
  0x9f   : > { %1036 = vmatpush1.bf16.msra.mxu1 %v2063_v46  ;;  %v2159_v46 = vld [vmem:[%s2627_s24 + $0x160] ss:$16 sps:$4 sm:$0xff]  }
  0xa0   : > { %1229 = vmatpush1.bf16.msra.mxu0 %v2064_v47  ;;  %1037 = vmatprep.subr.bf16.mxu1 %v2065_v48  ;;  %v2160_v47 = vld [vmem:[%s2627_s24 + $0x168] ss:$16 sps:$4 sm:$0xff]   ;;  %v2161_v48 = vld [vmem:[%s2627_s24 + $0x184] ss:$16 sps:$4 sm:$0xff]  }
  0xa1   : > { %1230 = vmatprep.subr.bf16.mxu0 %v2067_v50  ;;  %v2165_v50 = vld [vmem:[%s2627_s24 + $0x180] ss:$16 sps:$4 sm:$0xff]  }
  0xa3   : > { %1038 = vmatpush1.bf16.msra.mxu1 %v2069_v52  ;;  %v2167_v52 = vld [vmem:[%s2627_s24 + $0x1a4] ss:$16 sps:$4 sm:$0xff]  }
  0xa4   : > { %1231 = vmatpush1.bf16.msra.mxu0 %v2070_v53  ;;  %1039 = vmatprep.subr.bf16.mxu1 %v2071_v54  ;;  %v2169_v53 = vld [vmem:[%s2627_s24 + $0x1ac] ss:$16 sps:$4 sm:$0xff]   ;;  %v2171_v54 = vld [vmem:[%s2627_s24 + $0x1a0] ss:$16 sps:$4 sm:$0xff]  }
  0xa5   : > { %1232 = vmatprep.subr.bf16.mxu0 %v2073_v55  ;;  %v2172_v55 = vld [vmem:[%s2627_s24 + $0x1a8] ss:$16 sps:$4 sm:$0xff]  }
  0xa7   : > { %1040 = vmatpush1.bf16.msra.mxu1 %v2075_v56  ;;  %v2173_v56 = vld [vmem:[%s2627_s24 + $0x1c4] ss:$16 sps:$4 sm:$0xff]  }
  0xa8   : > { %1233 = vmatpush1.bf16.msra.mxu0 %v2076_v57  ;;  %1041 = vmatprep.subr.bf16.mxu1 %v2077_v58  ;;  %v2175_v57 = vld [vmem:[%s2627_s24 + $0x1cc] ss:$16 sps:$4 sm:$0xff]   ;;  %v2177_v58 = vld [vmem:[%s2627_s24 + $0x1c0] ss:$16 sps:$4 sm:$0xff]  }
  0xa9   : > { %1234 = vmatprep.subr.bf16.mxu0 %v2079_v59  ;;  %v2178_v59 = vld [vmem:[%s2627_s24 + $0x1c8] ss:$16 sps:$4 sm:$0xff]  }
  0xab   : > { %1042 = vmatpush1.bf16.msra.mxu1 %v2081_v60  ;;  %v2179_v60 = vld [vmem:[%s2627_s24 + $0x1e4] ss:$16 sps:$4 sm:$0xff]  }
  0xac   : > { %1235 = vmatpush1.bf16.msra.mxu0 %v2082_v61  ;;  %1043 = vmatprep.subr.bf16.mxu1 %v2083_v62  ;;  %v2181_v61 = vld [vmem:[%s2627_s24 + $0x1ec] ss:$16 sps:$4 sm:$0xff]   ;;  %v2183_v62 = vld [vmem:[%s2627_s24 + $0x1e0] ss:$16 sps:$4 sm:$0xff]  }
  0xad   : > { %1236 = vmatprep.subr.bf16.mxu0 %v2085_v63  ;;  %v2184_v63 = vld [vmem:[%s2627_s24 + $0x1e8] ss:$16 sps:$4 sm:$0xff]  }
  0xaf   : > { %1044 = vmatpush1.bf16.msra.mxu1 %v2087_v0 }
  0xb0   : > { %1237 = vmatpush1.bf16.msra.mxu0 %v2088_v1 }
  0xb2   : > { %1046 = vmatmul.mubr.bf16.vlgmr.msra.gmra.mrb[0].mxu1 %v2089_v2 }
  0xb3   : > { %1239 = vmatmul.mubr.bf16.vlgmr.msra.gmra.mrb[0].mxu0 %v2092_v3  ;;  %1055 = vmatprep.mubr.bf16.mxu1 %v2095_v4 }
  0xb4   : > { %1248 = vmatprep.mubr.bf16.mxu0 %v2097_v5 }
  0xba   : > { %1056 = vmatmul.mubr.bf16.gmra.mrb[4].mxu1 %v2099_v6 }
  0xbb   : > { %1249 = vmatmul.mubr.bf16.gmra.mrb[4].mxu0 %v2100_v7  ;;  %1065 = vmatprep.mubr.bf16.mxu1 %v2101_v8 }
  0xbc   : > { %1258 = vmatprep.mubr.bf16.mxu0 %v2103_v9 }
  0xc2   : > { %1066 = vmatmul.mubr.bf16.gmra.mrb[8].mxu1 %v2105_v10 }
  0xc3   : > { %1259 = vmatmul.mubr.bf16.gmra.mrb[8].mxu0 %v2106_v11  ;;  %1075 = vmatprep.mubr.bf16.mxu1 %v2107_v12 }
  0xc4   : > { %1268 = vmatprep.mubr.bf16.mxu0 %v2109_v13 }
  0xca   : > { %1076 = vmatmul.mubr.bf16.gmra.mrb[12].mxu1 %v2111_v14 }
  0xcb   : > { %1269 = vmatmul.mubr.bf16.gmra.mrb[12].mxu0 %v2112_v15  ;;  %1085 = vmatprep.mubr.bf16.mxu1 %v2113_v16 }
  0xcc   : > { %1278 = vmatprep.mubr.bf16.mxu0 %v2115_v17 }
  0xd2   : > { %1086 = vmatmul.mubr.bf16.gmra.mrb[16].mxu1 %v2117_v18 }
  0xd3   : > { %1279 = vmatmul.mubr.bf16.gmra.mrb[16].mxu0 %v2118_v19  ;;  %1095 = vmatprep.mubr.bf16.mxu1 %v2119_v20 }
  0xd4   : > { %1288 = vmatprep.mubr.bf16.mxu0 %v2121_v21 }
  0xda   : > { %1096 = vmatmul.mubr.bf16.gmra.mrb[20].mxu1 %v2123_v22 }
  0xdb   : > { %1289 = vmatmul.mubr.bf16.gmra.mrb[20].mxu0 %v2124_v23  ;;  %1105 = vmatprep.mubr.bf16.mxu1 %v2125_v24 }
  0xdc   : > { %1298 = vmatprep.mubr.bf16.mxu0 %v2127_v25 }
  0xe2   : > { %1106 = vmatmul.mubr.bf16.gmra.mrb[24].mxu1 %v2129_v26 }
  0xe3   : > { %1299 = vmatmul.mubr.bf16.gmra.mrb[24].mxu0 %v2130_v27  ;;  %1115 = vmatprep.mubr.bf16.mxu1 %v2131_v28  ;;  %v1399_v27 = vld [vmem:[%s2640_s7] sm:$0xff] }
  0xe4   : > { %1308 = vmatprep.mubr.bf16.mxu0 %v2133_v29 }
  0xea   : > { %1116 = vmatmul.mubr.bf16.gmra.mrb[28].mxu1 %v2135_v30  ;;  %v1400_v30 = vld [vmem:[%s2640_s7 + $0x8] sm:$0xff] }
  0xeb   : > { %1309 = vmatmul.mubr.bf16.gmra.mrb[28].mxu0 %v2136_v31  ;;  %1125 = vmatprep.mubr.bf16.mxu1 %v2137_v32 }
  0xec   : > { %1318 = vmatprep.mubr.bf16.mxu0 %v2139_v33 }
  0xf2   : > { %1126 = vmatmul.mubr.bf16.gmra.mrb[32].mxu1 %v2141_v34 }
  0xf3   : > { %1319 = vmatmul.mubr.bf16.gmra.mrb[32].mxu0 %v2142_v35  ;;  %1135 = vmatprep.mubr.bf16.mxu1 %v2143_v36 }
  0xf4   : > { %1328 = vmatprep.mubr.bf16.mxu0 %v2145_v37 }
  0xfa   : > { %1136 = vmatmul.mubr.bf16.gmra.mrb[36].mxu1 %v2147_v38 }
  0xfb   : > { %1329 = vmatmul.mubr.bf16.gmra.mrb[36].mxu0 %v2148_v39  ;;  %1145 = vmatprep.mubr.bf16.mxu1 %v2149_v40 }
  0xfc   : > { %1338 = vmatprep.mubr.bf16.mxu0 %v2151_v41 }
 0x102   : > { %1146 = vmatmul.mubr.bf16.gmra.mrb[40].mxu1 %v2153_v42 }
 0x103   : > { %1339 = vmatmul.mubr.bf16.gmra.mrb[40].mxu0 %v2154_v43  ;;  %1155 = vmatprep.mubr.bf16.mxu1 %v2155_v44 }
 0x104   : > { %1348 = vmatprep.mubr.bf16.mxu0 %v2157_v45 }
 0x10a   : > { %1156 = vmatmul.mubr.bf16.gmra.mrb[44].mxu1 %v2159_v46 }
 0x10b   : > { %1349 = vmatmul.mubr.bf16.gmra.mrb[44].mxu0 %v2160_v47  ;;  %1165 = vmatprep.mubr.bf16.mxu1 %v2161_v48 }
 0x10c   : > { %1358 = vmatprep.mubr.bf16.mxu0 %v2163_v49  ;;  %v1401_v49 = vld [vmem:[%s2640_s7 + $0x10] sm:$0xff] }
 0x112   : > { %1166 = vmatmul.mubr.bf16.gmra.mrb[48].mxu1 %v2165_v50 }
 0x113   : > { %1359 = vmatmul.mubr.bf16.gmra.mrb[48].mxu0 %v2166_v51  ;;  %1175 = vmatprep.mubr.bf16.mxu1 %v2167_v52  ;;  %v1402_v52 = vld [vmem:[%s2640_s7 + $0x18] sm:$0xff] }
 0x114   : > { %1368 = vmatprep.mubr.bf16.mxu0 %v2169_v53 }
 0x11a   : > { %1176 = vmatmul.mubr.bf16.gmra.mrb[52].mxu1 %v2171_v54 }
 0x11b   : > { %1369 = vmatmul.mubr.bf16.gmra.mrb[52].mxu0 %v2172_v55  ;;  %1185 = vmatprep.mubr.bf16.mxu1 %v2173_v56 }
 0x11c   : > { %1378 = vmatprep.mubr.bf16.mxu0 %v2175_v57 }
 0x122   : > { %1186 = vmatmul.mubr.bf16.gmra.mrb[56].mxu1 %v2177_v58 }
 0x123   : > { %1379 = vmatmul.mubr.bf16.gmra.mrb[56].mxu0 %v2178_v59  ;;  %1195 = vmatprep.mubr.bf16.mxu1 %v2179_v60 }
 0x124   : > { %1388 = vmatprep.mubr.bf16.mxu0 %v2181_v61 }
 0x12a   : > { %1196 = vmatmul.mubr.bf16.gmra.mrb[60].mxu1 %v2183_v62 }
 0x12b   : > { %1389 = vmatmul.mubr.bf16.gmra.mrb[60].mxu0 %v2184_v63 }
 0x185   : > { %v1047_v0 = vpop.f32.mrb[0].mxu1 }
 0x186   : > { %v1240_v1 = vpop.f32.mrb[0].mxu0  ;;  %v1049_v3 = vpop.f32.mrb[1].mxu1 }
 0x187   : > { %v1241_v2 = vadd.f32 %v1240_v1, %v1047_v0  ;;  %v1242_v4 = vpop.f32.mrb[1].mxu0  ;;  %v1051_v6 = vpop.f32.mrb[2].mxu1 }
 0x188   : > { %v1243_v5 = vadd.f32 %v1242_v4, %v1049_v3  ;;  %v1244_v7 = vpop.f32.mrb[2].mxu0  ;;  %v1053_v9 = vpop.f32.mrb[3].mxu1 }
 0x189   : > { %v1245_v8 = vadd.f32 %v1244_v7, %v1051_v6  ;;  %v1246_v10 = vpop.f32.mrb[3].mxu0  ;;  %v1403_v7 = vld [vmem:[%s2640_s7 + $0x20] sm:$0xff] }
 0x18a   : > { %v1431_v11 = vmul.f32 1.442695, %v1243_v5  ;;  %v1247_v12 = vadd.f32 %v1246_v10, %v1053_v9  ;;  %v1404_v10 = vld [vmem:[%s2640_s7 + $0x28] sm:$0xff] }
 0x18c   : > { %2185 = vpow2.f32 %v1431_v11  ;;  %v1433_v13 = vmul.f32 1.442695, %v1247_v12 }
 0x18d   : > { %v1057_v14 = vpop.f32.mrb[4].mxu1 }
 0x18e   : > { %2187 = vpow2.f32 %v1433_v13  ;;  %v1250_v15 = vpop.f32.mrb[4].mxu0  ;;  %v1059_v17 = vpop.f32.mrb[5].mxu1 }
 0x18f   : > { %v1251_v16 = vadd.f32 %v1250_v15, %v1057_v14  ;;  %v1252_v18 = vpop.f32.mrb[5].mxu0  ;;  %v1061_v20 = vpop.f32.mrb[6].mxu1 }
 0x190   : > { %v1253_v19 = vadd.f32 %v1252_v18, %v1059_v17  ;;  %v1254_v21 = vpop.f32.mrb[6].mxu0  ;;  %v1063_v23 = vpop.f32.mrb[7].mxu1 }
 0x191   : > { %v1255_v22 = vadd.f32 %v1254_v21, %v1061_v20  ;;  %v1256_v24 = vpop.f32.mrb[7].mxu0 }
 0x192   : > { %v1435_v25 = vmul.f32 1.442695, %v1253_v19  ;;  %v1257_v26 = vadd.f32 %v1256_v24, %v1063_v23 }
 0x194   : > { %2189 = vpow2.f32 %v1435_v25  ;;  %v1437_v28 = vmul.f32 1.442695, %v1257_v26 }
 0x195   : > { %v1067_v31 = vpop.f32.mrb[8].mxu1 }
 0x196   : > { %v2186_v29 = vpop.eup %2185  ;;  %2191 = vpow2.f32 %v1437_v28  ;;  %v1260_v32 = vpop.f32.mrb[8].mxu0 }
 0x197   : > { %v1495_v33 = vmul.f32 %v2186_v29, %v1399_v27  ;;  %v1261_v34 = vadd.f32 %v1260_v32, %v1067_v31  ;;  %v1069_v35 = vpop.f32.mrb[9].mxu1  ;;  %v1262_v36 = vpop.f32.mrb[9].mxu0  ;;  %v1405_v29 = vld [vmem:[%s2640_s7 + $0x30] sm:$0xff]  ;;  %v1406_v32 = vld [vmem:[%s2640_s7 + $0x38] sm:$0xff] }
 0x198   : > { %v2188_v37 = vpop.eup %2187  ;;  %v1263_v38 = vadd.f32 %v1262_v36, %v1069_v35  ;;  %v1071_v39 = vpop.f32.mrb[10].mxu1 }
 0x199   : > { %v1264_v40 = vpop.f32.mrb[10].mxu0  ;;  %v1527_v41 = vadd.f32 %v1495_v33, %v1241_v2  ;;  %v1496_v42 = vmul.f32 %v2188_v37, %v1400_v30  ;;  %v1073_v44 = vpop.f32.mrb[11].mxu1 }
 0x19a   : > { %v1265_v43 = vadd.f32 %v1264_v40, %v1071_v39  ;;  %v1266_v45 = vpop.f32.mrb[11].mxu0  ;;  %v1439_v46 = vmul.f32 1.442695, %v1263_v38 }
 0x19b   : > { %v1267_v47 = vadd.f32 %v1266_v45, %v1073_v44  ;;  %1559 = vst [vmem:[%s2714_s26] sm:$0xff] %v1527_v41  ;;  %v1528_v48 = vadd.f32 %v1496_v42, %v1245_v8 }
 0x19c   : > { %2193 = vpow2.f32 %v1439_v46 }
 0x19d   : > { %v1441_v50 = vmul.f32 1.442695, %v1267_v47  ;;  %1560 = vst [vmem:[%s2714_s26 + $0x8] sm:$0xff] %v1528_v48  ;;  %v1077_v53 = vpop.f32.mrb[12].mxu1 }
 0x19e   : > { %v2190_v51 = vpop.eup %2189  ;;  %v1270_v54 = vpop.f32.mrb[12].mxu0 }
 0x19f   : > { %2195 = vpow2.f32 %v1441_v50  ;;  %v1497_v55 = vmul.f32 %v2190_v51, %v1401_v49  ;;  %v1271_v56 = vadd.f32 %v1270_v54, %v1077_v53  ;;  %v1079_v57 = vpop.f32.mrb[13].mxu1  ;;  %v1272_v58 = vpop.f32.mrb[13].mxu0  ;;  %v1407_v51 = vld [vmem:[%s2640_s7 + $0x40] sm:$0xff]  ;;  %v1408_v54 = vld [vmem:[%s2640_s7 + $0x48] sm:$0xff] }
 0x1a0   : > { %v2192_v59 = vpop.eup %2191  ;;  %v1273_v60 = vadd.f32 %v1272_v58, %v1079_v57  ;;  %v1081_v61 = vpop.f32.mrb[14].mxu1 }
 0x1a1   : > { %v1274_v62 = vpop.f32.mrb[14].mxu0  ;;  %v1529_v63 = vadd.f32 %v1497_v55, %v1251_v16  ;;  %v1498_v0 = vmul.f32 %v2192_v59, %v1402_v52  ;;  %v1083_v2 = vpop.f32.mrb[15].mxu1 }
 0x1a2   : > { %v1275_v1 = vadd.f32 %v1274_v62, %v1081_v61  ;;  %v1276_v3 = vpop.f32.mrb[15].mxu0  ;;  %v1443_v4 = vmul.f32 1.442695, %v1273_v60 }
 0x1a3   : > { %v1277_v5 = vadd.f32 %v1276_v3, %v1083_v2  ;;  %1561 = vst [vmem:[%s2714_s26 + $0x10] sm:$0xff] %v1529_v63  ;;  %v1530_v6 = vadd.f32 %v1498_v0, %v1255_v22 }
 0x1a4   : > { %2197 = vpow2.f32 %v1443_v4 }
 0x1a5   : > { %v1445_v8 = vmul.f32 1.442695, %v1277_v5  ;;  %1562 = vst [vmem:[%s2714_s26 + $0x18] sm:$0xff] %v1530_v6  ;;  %v1087_v11 = vpop.f32.mrb[16].mxu1 }
 0x1a6   : > { %v2194_v9 = vpop.eup %2193  ;;  %v1280_v12 = vpop.f32.mrb[16].mxu0 }
 0x1a7   : > { %2199 = vpow2.f32 %v1445_v8  ;;  %v1499_v13 = vmul.f32 %v2194_v9, %v1403_v7  ;;  %v1281_v14 = vadd.f32 %v1280_v12, %v1087_v11  ;;  %v1089_v15 = vpop.f32.mrb[17].mxu1  ;;  %v1282_v16 = vpop.f32.mrb[17].mxu0  ;;  %v1409_v9 = vld [vmem:[%s2640_s7 + $0x50] sm:$0xff]  ;;  %v1410_v12 = vld [vmem:[%s2640_s7 + $0x58] sm:$0xff] }
 0x1a8   : > { %v1283_v18 = vadd.f32 %v1282_v16, %v1089_v15  ;;  %v1091_v19 = vpop.f32.mrb[18].mxu1  ;;  %v1284_v20 = vpop.f32.mrb[18].mxu0 }
 0x1a9   : > { %v2196_v17 = vpop.eup %2195  ;;  %v1531_v21 = vadd.f32 %v1499_v13, %v1261_v34  ;;  %v1285_v23 = vadd.f32 %v1284_v20, %v1091_v19  ;;  %v1093_v24 = vpop.f32.mrb[19].mxu1 }
 0x1aa   : > { %v1500_v22 = vmul.f32 %v2196_v17, %v1404_v10  ;;  %v1286_v25 = vpop.f32.mrb[19].mxu0  ;;  %v1447_v26 = vmul.f32 1.442695, %v1283_v18 }
 0x1ab   : > { %v1287_v27 = vadd.f32 %v1286_v25, %v1093_v24  ;;  %1563 = vst [vmem:[%s2714_s26 + $0x20] sm:$0xff] %v1531_v21 }
 0x1ac   : > { %v1532_v28 = vadd.f32 %v1500_v22, %v1265_v43  ;;  %2201 = vpow2.f32 %v1447_v26 }
 0x1ad   : > { %v1449_v30 = vmul.f32 1.442695, %v1287_v27  ;;  %v1097_v33 = vpop.f32.mrb[20].mxu1 }
 0x1ae   : > { %1564 = vst [vmem:[%s2714_s26 + $0x28] sm:$0xff] %v1532_v28  ;;  %v2198_v31 = vpop.eup %2197  ;;  %v1290_v35 = vpop.f32.mrb[20].mxu0 }
 0x1af   : > { %2203 = vpow2.f32 %v1449_v30  ;;  %v1501_v36 = vmul.f32 %v2198_v31, %v1405_v29  ;;  %v1291_v34 = vadd.f32 %v1290_v35, %v1097_v33  ;;  %v1099_v37 = vpop.f32.mrb[21].mxu1  ;;  %v1292_v38 = vpop.f32.mrb[21].mxu0  ;;  %v1411_v31 = vld [vmem:[%s2640_s7 + $0x60] sm:$0xff]  ;;  %v1412_v35 = vld [vmem:[%s2640_s7 + $0x68] sm:$0xff] }
 0x1b0   : > { %v1293_v40 = vadd.f32 %v1292_v38, %v1099_v37  ;;  %v1101_v41 = vpop.f32.mrb[22].mxu1  ;;  %v1294_v42 = vpop.f32.mrb[22].mxu0 }
 0x1b1   : > { %v2200_v39 = vpop.eup %2199  ;;  %v1533_v43 = vadd.f32 %v1501_v36, %v1271_v56  ;;  %v1295_v45 = vadd.f32 %v1294_v42, %v1101_v41  ;;  %v1103_v46 = vpop.f32.mrb[23].mxu1 }
 0x1b2   : > { %v1502_v44 = vmul.f32 %v2200_v39, %v1406_v32  ;;  %v1296_v47 = vpop.f32.mrb[23].mxu0  ;;  %v1451_v48 = vmul.f32 1.442695, %v1293_v40 }
 0x1b3   : > { %v1297_v49 = vadd.f32 %v1296_v47, %v1103_v46  ;;  %1565 = vst [vmem:[%s2714_s26 + $0x30] sm:$0xff] %v1533_v43 }
 0x1b4   : > { %v1534_v50 = vadd.f32 %v1502_v44, %v1275_v1  ;;  %2205 = vpow2.f32 %v1451_v48 }
 0x1b5   : > { %v1453_v52 = vmul.f32 1.442695, %v1297_v49  ;;  %v1107_v55 = vpop.f32.mrb[24].mxu1 }
 0x1b6   : > { %1566 = vst [vmem:[%s2714_s26 + $0x38] sm:$0xff] %v1534_v50  ;;  %v2202_v53 = vpop.eup %2201  ;;  %v1300_v57 = vpop.f32.mrb[24].mxu0 }
 0x1b7   : > { %2207 = vpow2.f32 %v1453_v52  ;;  %v1503_v58 = vmul.f32 %v2202_v53, %v1407_v51  ;;  %v1301_v56 = vadd.f32 %v1300_v57, %v1107_v55  ;;  %v1109_v59 = vpop.f32.mrb[25].mxu1  ;;  %v1302_v60 = vpop.f32.mrb[25].mxu0  ;;  %v1413_v53 = vld [vmem:[%s2640_s7 + $0x70] sm:$0xff]  ;;  %v1414_v57 = vld [vmem:[%s2640_s7 + $0x78] sm:$0xff] }
 0x1b8   : > { %v1303_v62 = vadd.f32 %v1302_v60, %v1109_v59  ;;  %v1111_v63 = vpop.f32.mrb[26].mxu1  ;;  %v1304_v0 = vpop.f32.mrb[26].mxu0 }
 0x1b9   : > { %v2204_v61 = vpop.eup %2203  ;;  %v1535_v1 = vadd.f32 %v1503_v58, %v1281_v14  ;;  %v1305_v3 = vadd.f32 %v1304_v0, %v1111_v63  ;;  %v1113_v4 = vpop.f32.mrb[27].mxu1 }
 0x1ba   : > { %v1504_v2 = vmul.f32 %v2204_v61, %v1408_v54  ;;  %v1306_v5 = vpop.f32.mrb[27].mxu0  ;;  %v1455_v6 = vmul.f32 1.442695, %v1303_v62 }
 0x1bb   : > { %v1307_v7 = vadd.f32 %v1306_v5, %v1113_v4  ;;  %1567 = vst [vmem:[%s2714_s26 + $0x40] sm:$0xff] %v1535_v1 }
 0x1bc   : > { %v1536_v8 = vadd.f32 %v1504_v2, %v1285_v23  ;;  %2209 = vpow2.f32 %v1455_v6 }
 0x1bd   : > { %v1457_v10 = vmul.f32 1.442695, %v1307_v7  ;;  %v1117_v13 = vpop.f32.mrb[28].mxu1 }
 0x1be   : > { %1568 = vst [vmem:[%s2714_s26 + $0x48] sm:$0xff] %v1536_v8  ;;  %v2206_v11 = vpop.eup %2205  ;;  %v1310_v15 = vpop.f32.mrb[28].mxu0 }
 0x1bf   : > { %2211 = vpow2.f32 %v1457_v10  ;;  %v1505_v16 = vmul.f32 %v2206_v11, %v1409_v9  ;;  %v1311_v14 = vadd.f32 %v1310_v15, %v1117_v13  ;;  %v1119_v17 = vpop.f32.mrb[29].mxu1  ;;  %v1312_v18 = vpop.f32.mrb[29].mxu0  ;;  %v1415_v11 = vld [vmem:[%s2640_s7 + $0x80] sm:$0xff]  ;;  %v1416_v15 = vld [vmem:[%s2640_s7 + $0x88] sm:$0xff] }
 0x1c0   : > { %v1313_v20 = vadd.f32 %v1312_v18, %v1119_v17  ;;  %v1121_v21 = vpop.f32.mrb[30].mxu1  ;;  %v1314_v22 = vpop.f32.mrb[30].mxu0 }
 0x1c1   : > { %v2208_v19 = vpop.eup %2207  ;;  %v1537_v23 = vadd.f32 %v1505_v16, %v1291_v34  ;;  %v1315_v25 = vadd.f32 %v1314_v22, %v1121_v21  ;;  %v1123_v26 = vpop.f32.mrb[31].mxu1 }
 0x1c2   : > { %v1506_v24 = vmul.f32 %v2208_v19, %v1410_v12  ;;  %v1316_v27 = vpop.f32.mrb[31].mxu0  ;;  %v1459_v28 = vmul.f32 1.442695, %v1313_v20 }
 0x1c3   : > { %v1317_v29 = vadd.f32 %v1316_v27, %v1123_v26  ;;  %1569 = vst [vmem:[%s2714_s26 + $0x50] sm:$0xff] %v1537_v23 }
 0x1c4   : > { %v1538_v30 = vadd.f32 %v1506_v24, %v1295_v45  ;;  %2213 = vpow2.f32 %v1459_v28 }
 0x1c5   : > { %v1461_v32 = vmul.f32 1.442695, %v1317_v29  ;;  %v1127_v36 = vpop.f32.mrb[32].mxu1 }
 0x1c6   : > { %1570 = vst [vmem:[%s2714_s26 + $0x58] sm:$0xff] %v1538_v30  ;;  %v2210_v33 = vpop.eup %2209  ;;  %v1320_v37 = vpop.f32.mrb[32].mxu0 }
 0x1c7   : > { %2215 = vpow2.f32 %v1461_v32  ;;  %v1507_v38 = vmul.f32 %v2210_v33, %v1411_v31  ;;  %v1321_v34 = vadd.f32 %v1320_v37, %v1127_v36  ;;  %v1129_v39 = vpop.f32.mrb[33].mxu1  ;;  %v1322_v40 = vpop.f32.mrb[33].mxu0  ;;  %v1417_v33 = vld [vmem:[%s2640_s7 + $0x90] sm:$0xff]  ;;  %v1418_v37 = vld [vmem:[%s2640_s7 + $0x98] sm:$0xff] }
 0x1c8   : > { %v1323_v42 = vadd.f32 %v1322_v40, %v1129_v39  ;;  %v1131_v43 = vpop.f32.mrb[34].mxu1  ;;  %v1324_v44 = vpop.f32.mrb[34].mxu0 }
 0x1c9   : > { %v2212_v41 = vpop.eup %2211  ;;  %v1539_v45 = vadd.f32 %v1507_v38, %v1301_v56  ;;  %v1325_v47 = vadd.f32 %v1324_v44, %v1131_v43  ;;  %v1133_v48 = vpop.f32.mrb[35].mxu1 }
 0x1ca   : > { %v1508_v46 = vmul.f32 %v2212_v41, %v1412_v35  ;;  %v1326_v49 = vpop.f32.mrb[35].mxu0  ;;  %v1463_v50 = vmul.f32 1.442695, %v1323_v42 }
 0x1cb   : > { %v1327_v51 = vadd.f32 %v1326_v49, %v1133_v48  ;;  %1571 = vst [vmem:[%s2714_s26 + $0x60] sm:$0xff] %v1539_v45 }
 0x1cc   : > { %v1540_v52 = vadd.f32 %v1508_v46, %v1305_v3  ;;  %2217 = vpow2.f32 %v1463_v50 }
 0x1cd   : > { %v1465_v54 = vmul.f32 1.442695, %v1327_v51  ;;  %v1137_v58 = vpop.f32.mrb[36].mxu1 }
 0x1ce   : > { %1572 = vst [vmem:[%s2714_s26 + $0x68] sm:$0xff] %v1540_v52  ;;  %v2214_v55 = vpop.eup %2213  ;;  %v1330_v59 = vpop.f32.mrb[36].mxu0 }
 0x1cf   : > { %2219 = vpow2.f32 %v1465_v54  ;;  %v1509_v60 = vmul.f32 %v2214_v55, %v1413_v53  ;;  %v1331_v56 = vadd.f32 %v1330_v59, %v1137_v58  ;;  %v1139_v61 = vpop.f32.mrb[37].mxu1  ;;  %v1332_v62 = vpop.f32.mrb[37].mxu0  ;;  %v1419_v55 = vld [vmem:[%s2640_s7 + $0xa0] sm:$0xff]  ;;  %v1420_v59 = vld [vmem:[%s2640_s7 + $0xa8] sm:$0xff] }
 0x1d0   : > { %v1333_v0 = vadd.f32 %v1332_v62, %v1139_v61  ;;  %v1141_v1 = vpop.f32.mrb[38].mxu1  ;;  %v1334_v2 = vpop.f32.mrb[38].mxu0 }
 0x1d1   : > { %v2216_v63 = vpop.eup %2215  ;;  %v1541_v3 = vadd.f32 %v1509_v60, %v1311_v14  ;;  %v1335_v5 = vadd.f32 %v1334_v2, %v1141_v1  ;;  %v1143_v6 = vpop.f32.mrb[39].mxu1 }
 0x1d2   : > { %v1510_v4 = vmul.f32 %v2216_v63, %v1414_v57  ;;  %v1336_v7 = vpop.f32.mrb[39].mxu0  ;;  %v1467_v8 = vmul.f32 1.442695, %v1333_v0 }
 0x1d3   : > { %v1337_v9 = vadd.f32 %v1336_v7, %v1143_v6  ;;  %1573 = vst [vmem:[%s2714_s26 + $0x70] sm:$0xff] %v1541_v3 }
 0x1d4   : > { %v1542_v10 = vadd.f32 %v1510_v4, %v1315_v25  ;;  %2221 = vpow2.f32 %v1467_v8 }
 0x1d5   : > { %v1469_v12 = vmul.f32 1.442695, %v1337_v9  ;;  %v1147_v16 = vpop.f32.mrb[40].mxu1 }
 0x1d6   : > { %1574 = vst [vmem:[%s2714_s26 + $0x78] sm:$0xff] %v1542_v10  ;;  %v2218_v13 = vpop.eup %2217  ;;  %v1340_v17 = vpop.f32.mrb[40].mxu0 }
 0x1d7   : > { %2223 = vpow2.f32 %v1469_v12  ;;  %v1511_v18 = vmul.f32 %v2218_v13, %v1415_v11  ;;  %v1341_v14 = vadd.f32 %v1340_v17, %v1147_v16  ;;  %v1149_v19 = vpop.f32.mrb[41].mxu1  ;;  %v1342_v20 = vpop.f32.mrb[41].mxu0  ;;  %v1421_v13 = vld [vmem:[%s2640_s7 + $0xb0] sm:$0xff]  ;;  %v1422_v17 = vld [vmem:[%s2640_s7 + $0xb8] sm:$0xff] }
 0x1d8   : > { %v1343_v22 = vadd.f32 %v1342_v20, %v1149_v19  ;;  %v1151_v23 = vpop.f32.mrb[42].mxu1  ;;  %v1344_v24 = vpop.f32.mrb[42].mxu0 }
 0x1d9   : > { %v2220_v21 = vpop.eup %2219  ;;  %v1543_v25 = vadd.f32 %v1511_v18, %v1321_v34  ;;  %v1345_v27 = vadd.f32 %v1344_v24, %v1151_v23  ;;  %v1153_v28 = vpop.f32.mrb[43].mxu1 }
 0x1da   : > { %v1512_v26 = vmul.f32 %v2220_v21, %v1416_v15  ;;  %v1346_v29 = vpop.f32.mrb[43].mxu0  ;;  %v1471_v30 = vmul.f32 1.442695, %v1343_v22 }
 0x1db   : > { %v1347_v31 = vadd.f32 %v1346_v29, %v1153_v28  ;;  %1575 = vst [vmem:[%s2714_s26 + $0x80] sm:$0xff] %v1543_v25 }
 0x1dc   : > { %v1544_v32 = vadd.f32 %v1512_v26, %v1325_v47  ;;  %2225 = vpow2.f32 %v1471_v30 }
 0x1dd   : > { %v1473_v35 = vmul.f32 1.442695, %v1347_v31  ;;  %v1157_v38 = vpop.f32.mrb[44].mxu1 }
 0x1de   : > { %1576 = vst [vmem:[%s2714_s26 + $0x88] sm:$0xff] %v1544_v32  ;;  %v2222_v36 = vpop.eup %2221  ;;  %v1350_v39 = vpop.f32.mrb[44].mxu0 }
 0x1df   : > { %2227 = vpow2.f32 %v1473_v35  ;;  %v1513_v40 = vmul.f32 %v2222_v36, %v1417_v33  ;;  %v1351_v34 = vadd.f32 %v1350_v39, %v1157_v38  ;;  %v1159_v41 = vpop.f32.mrb[45].mxu1  ;;  %v1352_v42 = vpop.f32.mrb[45].mxu0  ;;  %v1423_v36 = vld [vmem:[%s2640_s7 + $0xc0] sm:$0xff]  ;;  %v1424_v39 = vld [vmem:[%s2640_s7 + $0xc8] sm:$0xff] }
 0x1e0   : > { %v1353_v44 = vadd.f32 %v1352_v42, %v1159_v41  ;;  %v1161_v45 = vpop.f32.mrb[46].mxu1  ;;  %v1354_v46 = vpop.f32.mrb[46].mxu0 }
 0x1e1   : > { %v2224_v43 = vpop.eup %2223  ;;  %v1545_v47 = vadd.f32 %v1513_v40, %v1331_v56  ;;  %v1355_v49 = vadd.f32 %v1354_v46, %v1161_v45  ;;  %v1163_v50 = vpop.f32.mrb[47].mxu1 }
 0x1e2   : > { %v1514_v48 = vmul.f32 %v2224_v43, %v1418_v37  ;;  %v1356_v51 = vpop.f32.mrb[47].mxu0  ;;  %v1475_v52 = vmul.f32 1.442695, %v1353_v44 }
 0x1e3   : > { %v1357_v53 = vadd.f32 %v1356_v51, %v1163_v50  ;;  %1577 = vst [vmem:[%s2714_s26 + $0x90] sm:$0xff] %v1545_v47 }
 0x1e4   : > { %v1546_v54 = vadd.f32 %v1514_v48, %v1335_v5  ;;  %2229 = vpow2.f32 %v1475_v52 }
 0x1e5   : > { %v1477_v57 = vmul.f32 1.442695, %v1357_v53  ;;  %v1167_v60 = vpop.f32.mrb[48].mxu1 }
 0x1e6   : > { %1578 = vst [vmem:[%s2714_s26 + $0x98] sm:$0xff] %v1546_v54  ;;  %v2226_v58 = vpop.eup %2225  ;;  %v1360_v61 = vpop.f32.mrb[48].mxu0 }
 0x1e7   : > { %2231 = vpow2.f32 %v1477_v57  ;;  %v1515_v62 = vmul.f32 %v2226_v58, %v1419_v55  ;;  %v1361_v56 = vadd.f32 %v1360_v61, %v1167_v60  ;;  %v1169_v63 = vpop.f32.mrb[49].mxu1  ;;  %v1362_v0 = vpop.f32.mrb[49].mxu0  ;;  %v1425_v58 = vld [vmem:[%s2640_s7 + $0xd0] sm:$0xff]  ;;  %v1426_v61 = vld [vmem:[%s2640_s7 + $0xd8] sm:$0xff] }
 0x1e8   : > { %v1363_v2 = vadd.f32 %v1362_v0, %v1169_v63  ;;  %v1171_v3 = vpop.f32.mrb[50].mxu1  ;;  %v1364_v4 = vpop.f32.mrb[50].mxu0 }
 0x1e9   : > { %v2228_v1 = vpop.eup %2227  ;;  %v1547_v5 = vadd.f32 %v1515_v62, %v1341_v14  ;;  %v1365_v7 = vadd.f32 %v1364_v4, %v1171_v3  ;;  %v1173_v8 = vpop.f32.mrb[51].mxu1 }
 0x1ea   : > { %v1516_v6 = vmul.f32 %v2228_v1, %v1420_v59  ;;  %v1366_v9 = vpop.f32.mrb[51].mxu0  ;;  %v1479_v10 = vmul.f32 1.442695, %v1363_v2 }
 0x1eb   : > { %v1367_v11 = vadd.f32 %v1366_v9, %v1173_v8  ;;  %1579 = vst [vmem:[%s2714_s26 + $0xa0] sm:$0xff] %v1547_v5 }
 0x1ec   : > { %v1548_v12 = vadd.f32 %v1516_v6, %v1345_v27  ;;  %2233 = vpow2.f32 %v1479_v10 }
 0x1ed   : > { %v1481_v15 = vmul.f32 1.442695, %v1367_v11  ;;  %v1177_v18 = vpop.f32.mrb[52].mxu1 }
 0x1ee   : > { %1580 = vst [vmem:[%s2714_s26 + $0xa8] sm:$0xff] %v1548_v12  ;;  %v2230_v16 = vpop.eup %2229  ;;  %v1370_v19 = vpop.f32.mrb[52].mxu0 }
 0x1ef   : > { %2235 = vpow2.f32 %v1481_v15  ;;  %v1517_v20 = vmul.f32 %v2230_v16, %v1421_v13  ;;  %v1371_v14 = vadd.f32 %v1370_v19, %v1177_v18  ;;  %v1179_v21 = vpop.f32.mrb[53].mxu1  ;;  %v1372_v22 = vpop.f32.mrb[53].mxu0  ;;  %v1427_v16 = vld [vmem:[%s2640_s7 + $0xe0] sm:$0xff]  ;;  %v1428_v19 = vld [vmem:[%s2640_s7 + $0xe8] sm:$0xff] }
 0x1f0   : > { %v1373_v24 = vadd.f32 %v1372_v22, %v1179_v21  ;;  %v1181_v25 = vpop.f32.mrb[54].mxu1  ;;  %v1374_v26 = vpop.f32.mrb[54].mxu0 }
 0x1f1   : > { %v2232_v23 = vpop.eup %2231  ;;  %v1549_v27 = vadd.f32 %v1517_v20, %v1351_v34  ;;  %v1375_v29 = vadd.f32 %v1374_v26, %v1181_v25  ;;  %v1183_v30 = vpop.f32.mrb[55].mxu1  ;;  %v1430_v26 = vld [vmem:[%s2640_s7 + $0xf8] sm:$0xff] }
 0x1f2   : > { %v1518_v28 = vmul.f32 %v2232_v23, %v1422_v17  ;;  %v1376_v31 = vpop.f32.mrb[55].mxu0  ;;  %v1483_v32 = vmul.f32 1.442695, %v1373_v24  ;;  %v1429_v24 = vld [vmem:[%s2640_s7 + $0xf0] sm:$0xff] }
 0x1f3   : > { %v1377_v33 = vadd.f32 %v1376_v31, %v1183_v30  ;;  %1581 = vst [vmem:[%s2714_s26 + $0xb0] sm:$0xff] %v1549_v27 }
 0x1f4   : > { %v1550_v35 = vadd.f32 %v1518_v28, %v1355_v49  ;;  %2237 = vpow2.f32 %v1483_v32 }
 0x1f5   : > { %v1485_v37 = vmul.f32 1.442695, %v1377_v33  ;;  %v1187_v40 = vpop.f32.mrb[56].mxu1 }
 0x1f6   : > { %1582 = vst [vmem:[%s2714_s26 + $0xb8] sm:$0xff] %v1550_v35  ;;  %v2234_v38 = vpop.eup %2233  ;;  %v1380_v41 = vpop.f32.mrb[56].mxu0 }
 0x1f7   : > { %2239 = vpow2.f32 %v1485_v37  ;;  %v1519_v42 = vmul.f32 %v2234_v38, %v1423_v36  ;;  %v1381_v34 = vadd.f32 %v1380_v41, %v1187_v40  ;;  %v1189_v43 = vpop.f32.mrb[57].mxu1  ;;  %v1382_v44 = vpop.f32.mrb[57].mxu0 }
 0x1f8   : > { %v1383_v46 = vadd.f32 %v1382_v44, %v1189_v43  ;;  %v1191_v47 = vpop.f32.mrb[58].mxu1  ;;  %v1384_v48 = vpop.f32.mrb[58].mxu0 }
 0x1f9   : > { %v2236_v45 = vpop.eup %2235  ;;  %v1551_v49 = vadd.f32 %v1519_v42, %v1361_v56  ;;  %v1385_v51 = vadd.f32 %v1384_v48, %v1191_v47  ;;  %v1193_v52 = vpop.f32.mrb[59].mxu1 }
 0x1fa   : > { %v1520_v50 = vmul.f32 %v2236_v45, %v1424_v39  ;;  %v1386_v53 = vpop.f32.mrb[59].mxu0  ;;  %v1487_v54 = vmul.f32 1.442695, %v1383_v46 }
 0x1fb   : > { %v1387_v55 = vadd.f32 %v1386_v53, %v1193_v52  ;;  %1583 = vst [vmem:[%s2714_s26 + $0xc0] sm:$0xff] %v1551_v49 }
 0x1fc   : > { %v1552_v57 = vadd.f32 %v1520_v50, %v1365_v7  ;;  %2241 = vpow2.f32 %v1487_v54 }
 0x1fd   : > { %v1489_v59 = vmul.f32 1.442695, %v1387_v55  ;;  %v1197_v62 = vpop.f32.mrb[60].mxu1 }
 0x1fe   : > { %1584 = vst [vmem:[%s2714_s26 + $0xc8] sm:$0xff] %v1552_v57  ;;  %v2238_v60 = vpop.eup %2237  ;;  %v1390_v63 = vpop.f32.mrb[60].mxu0 }
 0x1ff   : > { %2243 = vpow2.f32 %v1489_v59  ;;  %v1521_v0 = vmul.f32 %v2238_v60, %v1425_v58  ;;  %v1391_v56 = vadd.f32 %v1390_v63, %v1197_v62  ;;  %v1199_v1 = vpop.f32.mrb[61].mxu1  ;;  %v1392_v2 = vpop.f32.mrb[61].mxu0 }
 0x200   : > { %v1393_v4 = vadd.f32 %v1392_v2, %v1199_v1  ;;  %v1201_v5 = vpop.f32.mrb[62].mxu1  ;;  %v1394_v6 = vpop.f32.mrb[62].mxu0 }
 0x201   : > { %v2240_v3 = vpop.eup %2239  ;;  %v1553_v7 = vadd.f32 %v1521_v0, %v1371_v14  ;;  %v1395_v9 = vadd.f32 %v1394_v6, %v1201_v5  ;;  %v1203_v10 = vpop.f32.mrb[63].mxu1 }
 0x202   : > { %v1522_v8 = vmul.f32 %v2240_v3, %v1426_v61  ;;  %v1396_v11 = vpop.f32.mrb[63].mxu0  ;;  %v1491_v12 = vmul.f32 1.442695, %v1393_v4 }
 0x203   : > { %v1397_v13 = vadd.f32 %v1396_v11, %v1203_v10  ;;  %1585 = vst [vmem:[%s2714_s26 + $0xd0] sm:$0xff] %v1553_v7 }
 0x204   : > { %v1554_v15 = vadd.f32 %v1522_v8, %v1375_v29  ;;  %2245 = vpow2.f32 %v1491_v12 }
 0x205   : > { %v1493_v17 = vmul.f32 1.442695, %v1397_v13 }
 0x206   : > { %1586 = vst [vmem:[%s2714_s26 + $0xd8] sm:$0xff] %v1554_v15  ;;  %v2242_v18 = vpop.eup %2241 }
 0x207   : > { %2247 = vpow2.f32 %v1493_v17  ;;  %v1523_v20 = vmul.f32 %v2242_v18, %v1427_v16 }
 0x209   : > { %v2244_v14 = vpop.eup %2243  ;;  %v1555_v21 = vadd.f32 %v1523_v20, %v1381_v34 }
 0x20a   : > { %v1524_v22 = vmul.f32 %v2244_v14, %v1428_v19 }
 0x20b   : > { %1587 = vst [vmem:[%s2714_s26 + $0xe0] sm:$0xff] %v1555_v21 }
 0x20c   : > { %v1556_v23 = vadd.f32 %v1524_v22, %v1385_v51 }
 0x20e   : > { %1588 = vst [vmem:[%s2714_s26 + $0xe8] sm:$0xff] %v1556_v23  ;;  %v2246_v25 = vpop.eup %2245 }
 0x20f   : > { %v1525_v27 = vmul.f32 %v2246_v25, %v1429_v24 }
 0x211   : > { %v2248_v28 = vpop.eup %2247  ;;  %v1557_v29 = vadd.f32 %v1525_v27, %v1391_v56 }
 0x212   : > { %v1526_v30 = vmul.f32 %v2248_v28, %v1430_v26 }
 0x213   : > { %1589 = vst [vmem:[%s2714_s26 + $0xf0] sm:$0xff] %v1557_v29 }
 0x214   : > { %v1558_v31 = vadd.f32 %v1526_v30, %v1395_v9 }
 0x216   : > { %1590 = vst [vmem:[%s2714_s26 + $0xf8] sm:$0xff] %v1558_v31 }
 0x217   : > { %2350 = shalt.err (!%p2347_p4)
}
 0x218   : > { %s2351_s25 = scalar_lea.hbm %s2781_s8, 4096  ;;  %s2355_s23 = scalar_lea.hbm %s2832_s3, 8192 }
 0x219   : > { %p2352_p11 = scmp.ne.s32.totalorder %s2781_s8, %s2351_s25  ;;  %p2356_p5 = scmp.lt.u32.totalorder %s2781_s8, %s2832_s3 }
 0x21a   : > { %p2357_p0 = scmp.lt.u32.totalorder %s2355_s23, %s2351_s25  ;;  %p2359_p9 = scmp.lt.u32.totalorder %s2351_s25, %s2781_s8 }
 0x21b   : > { %p2353_p10 = pnand %p2352_p11, %p2847_p12 }
 0x21c   : > { %p2358_p7 = por %p2357_p0, %p2356_p5 }
 0x21d   : > { %p2354_p8 = pneg %p2353_p10 }
 0x21e   : > { %p2360_p2 = por %p2359_p9, %p2358_p7 }
 0x220   : > { %p2361_p6 = pnand %p2360_p2, %p2354_p8 }
 0x222   : > { %2364 = shalt.err (!%p2361_p6)
}
 0x223   : > { %s2421_s7 = smov 128   ;;  %s2422_s26 = smov 8  }
 0x224   : > { %1933 = dma.vmem_to_hbm [thread:$0]  (%p2847_p12), %s2783_s18, 4096, %s2781_s8, %s1592_s6, %s2421_s7, %s2421_s7, %s2422_s26  }
 0x225 PF: > { %s1620_s9 = sand.u32 1, %s2399_s12   ;;  %p2848_p13 = scmp.ne.s32.totalorder %s2840_s28, 0 }
 0x226   : > { %p2849_p3 = scmp.ge.s32.totalorder %s2411_s15, 2  ;;  %s1621_s20 = scalar_lea.sflag [#allocation4], %s1620_s9 }
 0x228   : > { %p1947_p1 = pnand %p2849_p3, %p2848_p13 }
 0x22a   : > { %2394 = dma.done.wait (!%p1947_p1), %s1621_s20, 4096  }
 0x22b   : > { %2396 = vsyncadd (!%p1947_p1), %s1621_s20, 4294963200  ;;  %p17_p4 = scmp.ge.s32.totalorder %s2464_s16, 4   ;;  %s2850_s12 = smov %s2403_s13 }
 0x22c   : > { %s2851_s13 = smov %s2407_s14  ;;  %s2852_s14 = smov %s2475_s19 }
 0x22d   : > { %s2853_s15 = smov %s2464_s16  ;;  %19 = sbr.rel (!%p17_p4) target bundleno = 6 (0x6), region = 92 }
 0x234   :  { %1626 = vsyncpa [#allocation3], 1 }
 0x235   :  { %1628 = vsyncpa [#allocation3 + $0x1], 1 }
 0x236   :  { %1629 = vsyncpa [#allocation6], 1 }
 0x237   :  { %1630 = vsyncpa [#allocation4], 1 }
 0x238   :  { %1632 = vsyncpa [#allocation4 + $0x1], 1 }

// kernel: vgae_forward.5
= control target key start
LH: loop header
LB: loop body
LE: loop exit
PB: predicated region body
PF: predicated region fallthrough
CT: control target
= control target key end

     0   :  { %8 = vsyncpa [#allocation3], 0  ;;  %s3159_s0 = inlined_call_operand.hbm [shape: bf16[512,512], index: 0, kind: input, shape index: {}]   ;;  %s3160_s1 = inlined_call_operand.hbm [shape: bf16[512,128], index: 1, kind: input, shape index: {}]   ;;  %s3161_s2 = inlined_call_operand.hbm [shape: bf16[128,256], index: 2, kind: input, shape index: {}]   ;;  %s3162_s3 = inlined_call_operand.hbm [shape: bf16[512,256], index: 3, kind: output, shape index: {}]  }
   0x1   :  { %10 = vsyncpa [#allocation3 + $0x1], 0 }
   0x2   :  { %11 = vsyncpa [#allocation6], 0 }
   0x3   :  { %12 = vsyncpa [#allocation4], 0 }
   0x4   :  { %14 = vsyncpa [#allocation4 + $0x1], 0  ;;  %s2711_s12 = smov 0   ;;  %s2713_s13 = smov 0  }
   0x5   :  { %s2715_s14 = smov 0   ;;  %s2717_s15 = smov 0  }
   0x6 LB: > { %s2732_s16 = sadd.s32 4294967295, %s2676_s15   ;;  %s1852_s17 = sadd.s32 4294967294, %s2676_s15   ;;  %s2676_s15 = sphi %s2717_s15, %s3182_s15   ;;  %s2672_s14 = sphi %s2715_s14, %s3181_s14   ;;  %s2668_s13 = sphi %s2713_s13, %s3180_s13   ;;  %s2664_s12 = sphi %s2711_s12, %s3179_s12  }
   0x7   : > { %p40_p0 = scmp.ne.s32.totalorder %s2668_s13, %s2664_s12  ;;  %p3163_p1 = scmp.eq.s32.totalorder %s2732_s16, 0 }
   0x8   : > { %p112_p3 = scmp.eq.s32.totalorder %s1852_s17, 1  ;;  %p1853_p5 = scmp.ge.s32.totalorder %s2676_s15, 1 }
   0x9   : > { %p2741_p4 = por %p3163_p1, %p40_p0  ;;  %p119_p7 = scmp.lt.s32.totalorder %s2676_s15, 3 }
   0xa   : > { %p2746_p6 = por %p112_p3, %p40_p0  ;;  %s2678_s21 = smov [#allocation5]  }
   0xb   : > { %s3166_s18 = scalar_select %p2741_p4, 1, 0 }
   0xc   : > { %s3167_s19 = scalar_select %p2746_p6, 1, 0 }
   0xd   : > { %p2751_p8 = pnand %p1853_p5, %p119_p7  ;;  %s131_s22 = sshll.u32 %s2678_s21, 4  ;;  %s2755_s22 = int_to_ptr.vmem [resolvable:$true] %s131_s22 }
   0xe   : > { %s2679_s24 = smov [#allocation7]   ;;  %s2520_s28 = scalar_lea.hbm %s3160_s1, 4096 }
   0xf   : > { %p2304_p9 = pneg %p2751_p8  ;;  %s144_s25 = sshll.u32 %s2679_s24, 4  ;;  %s2766_s25 = int_to_ptr.vmem [resolvable:$true] %s144_s25 }
  0x10   : > { %p2521_p12 = scmp.ne.s32.totalorder %s3160_s1, %s2520_s28  ;;  %p2527_p5 = scmp.lt.u32.totalorder %s2520_s28, %s3160_s1 }
  0x11   : > { %p2762_p11 = pnand %p2304_p9, %p3163_p1 }
  0x13   : > { %p2522_p13 = pneg %p2762_p11 }
  0x15   : > { %p2523_p0 = pnand %p2522_p13, %p2521_p12 }
  0x17   : > { %p2524_p3 = pneg %p2523_p0 }
  0x19   : > { %p2529_p7 = pnand %p2527_p5, %p2524_p3 }
  0x1b   : > { %2532 = shalt.err (!%p2529_p7)
}
  0x1c   : > { %s2533_s6 = scalar_lea.vmem %s2755_s22, 4096  ;;  %p2541_p2 = scmp.lt.s32.totalorder %s2755_s22, %s2755_s22 }
  0x1d   : > { %p2534_p9 = scmp.ne.s32.totalorder %s2755_s22, %s2533_s6  ;;  %p2542_p12 = scmp.lt.s32.totalorder %s2533_s6, %s2533_s6 }
  0x1f   : > { %p2536_p10 = pnand %p2534_p9, %p2522_p13  ;;  %p2543_p0 = por %p2542_p12, %p2541_p2 }
  0x21   : > { %p2537_p1 = pneg %p2536_p10 }
  0x23   : > { %p2544_p6 = pnand %p2543_p0, %p2537_p1 }
  0x25   : > { %2547 = shalt.err (!%p2544_p6)
}
  0x26   : > { %s2680_s7 = smov 64   ;;  %s2681_s8 = smov 4  }
  0x27   : > { %2307 = dma.hbm_to_vmem [thread:$0]  (!%p2762_p11), %s3160_s1, 4096, %s2755_s22, [#allocation6], %s2680_s7, %s2680_s7, %s2681_s8  }
  0x28   : > { %s2548_s21 = scalar_lea.hbm %s3161_s2, 2048 }
  0x29   : > { %p2549_p2 = scmp.ne.s32.totalorder %s3161_s2, %s2548_s21  ;;  %p2555_p10 = scmp.lt.u32.totalorder %s2548_s21, %s3161_s2 }
  0x2b   : > { %p2551_p1 = pnand %p2549_p2, %p2522_p13 }
  0x2d   : > { %p2552_p6 = pneg %p2551_p1 }
  0x2f   : > { %p2557_p3 = pnand %p2555_p10, %p2552_p6 }
  0x31   : > { %2560 = shalt.err (!%p2557_p3)
}
  0x32   : > { %s2561_s22 = scalar_lea.vmem %s2766_s25, 2048  ;;  %p2569_p12 = scmp.lt.s32.totalorder %s2766_s25, %s2766_s25 }
  0x33   : > { %p2562_p5 = scmp.ne.s32.totalorder %s2766_s25, %s2561_s22  ;;  %p2570_p0 = scmp.lt.s32.totalorder %s2561_s22, %s2561_s22 }
  0x35   : > { %p2564_p7 = pnand %p2562_p5, %p2522_p13  ;;  %p2571_p2 = por %p2570_p0, %p2569_p12 }
  0x37   : > { %p2565_p9 = pneg %p2564_p7 }
  0x39   : > { %p2572_p1 = pnand %p2571_p2, %p2565_p9 }
  0x3b   : > { %2575 = shalt.err (!%p2572_p1)
}
  0x3c   : > { %s2682_s29 = smov 128   ;;  %s2683_s30 = smov 8  }
  0x3d   : > { %2310 = dma.hbm_to_vmem [thread:$0]  (!%p2762_p11), %s3161_s2, 2048, %s2766_s25, [#allocation6], %s2682_s29, %s2682_s29, %s2683_s30  }
  0x3e   : > { %s2821_s6 = sadd.s32 1, %s2676_s15   ;;  %s27_s8 = sadd.s32 1, %s2672_s14 }
  0x3f   : > { %s24_s7 = ssub.s32 %s2676_s15, %s2821_s6  ;;  %p34_p6 = scmp.ne.s32.totalorder %s2672_s14, %s2668_s13 }
  0x40   : > { %p25_p13 = scmp.eq.s32.totalorder %s24_s7, 0  ;;  %p35_p10 = scmp.eq.s32.totalorder %s2676_s15, 0 }
  0x41   : > { %p3170_p5 = scmp.eq.s32.totalorder %s2732_s16, 1  ;;  %p2321_p9 = scmp.lt.s32.totalorder %s2676_s15, 2 }
  0x42   : > { %s2830_s9 = scalar_select %p25_p13, %s2672_s14, %s27_s8  }
  0x43   : > { %p36_p3 = por %p35_p10, %p34_p6  ;;  %p2834_p7 = por %p3170_p5, %p34_p6 }
  0x44   : > { %s158_s23 = sand.u32 1, %s2672_s14   ;;  %s2017_s25 = sshll.u32 %s2676_s15, 13 }
  0x45   : > { %s3171_s10 = scalar_select %p2834_p7, 1, 0 }
  0x46   : > { %s1857_s11 = sshll.u32 %s158_s23, 9  ;;  %s2844_s24 = scalar_lea.hbm %s3159_s0, %s2017_s25 }
  0x47   : > { %s162_s26 = scalar_lea.vmem [#allocation2], %s1857_s11  ;;  %p2848_p11 = pnand %p2321_p9, %p36_p3 }
  0x48   : > { %s170_s27 = sshll.u32 %s162_s26, 4  ;;  %s2852_s22 = scalar_lea.sflag [#allocation3], %s158_s23  ;;  %s2846_s27 = int_to_ptr.vmem [resolvable:$true] %s170_s27 }
  0x49   : > { %s2576_s29 = scalar_lea.hbm %s2844_s24, 8192  ;;  %p2578_p0 = pneg %p2848_p11 }
  0x4a   : > { %p2577_p12 = scmp.ne.s32.totalorder %s2844_s24, %s2576_s29  ;;  %s2581_s5 = scalar_lea.hbm %s3159_s0, 16384 }
  0x4b   : > { %p2582_p13 = scmp.lt.u32.totalorder %s2844_s24, %s3159_s0  ;;  %p2583_p6 = scmp.lt.u32.totalorder %s2581_s5, %s2576_s29 }
  0x4c   : > { %p2579_p2 = pnand %p2578_p0, %p2577_p12  ;;  %p2585_p3 = scmp.lt.u32.totalorder %s2576_s29, %s2844_s24 }
  0x4d   : > { %p2584_p10 = por %p2583_p6, %p2582_p13 }
  0x4e   : > { %p2580_p1 = pneg %p2579_p2 }
  0x4f   : > { %p2586_p5 = por %p2585_p3, %p2584_p10 }
  0x51   : > { %p2587_p9 = pnand %p2586_p5, %p2580_p1 }
  0x53   : > { %2590 = shalt.err (!%p2587_p9)
}
  0x54   : > { %s2591_s23 = scalar_lea.vmem %s2846_s27, 8192  ;;  %s2684_s11 = smov [#allocation2]  }
  0x55   : > { %p2592_p12 = scmp.ne.s32.totalorder %s2846_s27, %s2591_s23  ;;  %s2596_s25 = sshll.u32 %s2684_s11, 4  ;;  %s2597_s25 = int_to_ptr.vmem [resolvable:$false] %s2596_s25 }
  0x56   : > { %s2598_s17 = scalar_lea.vmem %s2597_s25, 16384  ;;  %p2599_p4 = scmp.lt.s32.totalorder %s2846_s27, %s2597_s25 }
  0x57   : > { %p2594_p2 = pnand %p2592_p12, %p2578_p0  ;;  %p2600_p13 = scmp.lt.s32.totalorder %s2598_s17, %s2591_s23 }
  0x59   : > { %p2595_p7 = pneg %p2594_p2  ;;  %p2601_p6 = por %p2600_p13, %p2599_p4 }
  0x5b   : > { %p2602_p10 = pnand %p2601_p6, %p2595_p7 }
  0x5d   : > { %2605 = shalt.err (!%p2602_p10)
}
  0x5e   : > { %s2685_s21 = smov 256   ;;  %s2686_s26 = smov 16  }
  0x5f   : > { %2314 = dma.hbm_to_vmem [thread:$0]  (!%p2848_p11), %s2844_s24, 8192, %s2846_s27, %s2852_s22, %s2685_s21, %s2685_s21, %s2686_s26  }
  0x60   : > { %182 = sbr.rel (%p2751_p8) target bundleno = 779 (0x30b), region = 32  ;;  %s2883_s29 = sand.u32 (!%p2751_p8), 1, %s2668_s13  }
  0x61   : > { %s1862_s30 = sshll.u32 (!%p2751_p8), %s2883_s29, 9  ;;  %s185_s4 = scalar_lea.sflag (!%p2751_p8), [#allocation3], %s2883_s29 }
  0x62   : > { %s2887_s5 = scalar_lea.vmem (!%p2751_p8), [#allocation2], %s1862_s30  ;;  %p3173_p4 = scmp.ne.s32.totalorder (!%p2751_p8), %s3166_s18, 0 }
  0x67   : > { %2651 = dma.done.wait (%p3173_p4), %s185_s4, 8192  }
  0x68   : > { %2653 = vsyncadd (%p3173_p4), %s185_s4, 4294959104  ;;  %p3174_p7 = scmp.eq.s32.totalorder %s2732_s16, 0 }
  0x6a   : > { %2655 = dma.done.wait (%p3174_p7), [#allocation6], 6144   ;;  %p3175_p8 = pmov %p3174_p7 }
  0x6b   : > { %v2368_v0 = vld [vmem:[#allocation5 + $0x40] sm:$0xff]   ;;  %v2370_v2 = vld [vmem:[#allocation5 + $0x48] sm:$0xff]   ;;  %v2372_v4 = vld [vmem:[#allocation5 + $0x50] sm:$0xff]   ;;  %s1865_s18 = sshll.u32 %s2883_s29, 8  ;;  %s2051_s24 = sshll.u32 %s2732_s16, 12 }
  0x6c   : > { %2657 = vsyncadd (%p3175_p8), [#allocation6], 4294961152  ;;  %v2369_v1 = vld [vmem:[#allocation5] sm:$0xff]   ;;  %2276 = vmatprep.subr.bf16.mxu1 %v2368_v0  ;;  %2052 = vmatprep.subr.bf16.mxu0 %v2368_v0  ;;  %v2371_v3 = vld [vmem:[#allocation5 + $0x8] sm:$0xff]   ;;  %s3074_s20 = scalar_lea.vmem [#allocation8], %s1865_s18  ;;  %s3111_s7 = scalar_lea.hbm %s3162_s3, %s2051_s24 }
  0x6d   : > { %2284 = vmatpush3.bf16.msra.mxu1 %v2369_v1  ;;  %2053 = vmatpush3.bf16.msra.mxu0 %v2369_v1  ;;  %v2373_v5 = vld [vmem:[#allocation5 + $0x10] sm:$0xff]   ;;  %v2374_v6 = vld [vmem:[#allocation5 + $0x58] sm:$0xff]   ;;  %v2376_v8 = vld [vmem:[#allocation5 + $0x60] sm:$0xff]   ;;  %s1760_s27 = sshll.u32 %s3074_s20, 4  ;;  %s1746_s8 = scalar_lea.sflag [#allocation4], %s2883_s29  ;;  %s3113_s27 = int_to_ptr.vmem [resolvable:$true] %s1760_s27 }
  0x6e   : > { %2277 = vmatprep.subr.bf16.mxu1 %v2370_v2  ;;  %2054 = vmatprep.subr.bf16.mxu0 %v2370_v2  ;;  %v2375_v7 = vld [vmem:[#allocation5 + $0x18] sm:$0xff]   ;;  %v2377_v9 = vld [vmem:[#allocation5 + $0x20] sm:$0xff]   ;;  %v2378_v10 = vld [vmem:[#allocation5 + $0x68] sm:$0xff]   ;;  %s2606_s16 = scalar_lea.vmem %s3113_s27, 4096  ;;  %p3176_p0 = scmp.ne.s32.totalorder %s3171_s10, 0 }
  0x6f   : > { %v2386_v11 = vld [vmem:[%s2887_s5 + $0x104] ss:$16 sps:$4 sm:$0xff]   ;;  %v2379_v12 = vld [vmem:[#allocation5 + $0x28] sm:$0xff]   ;;  %v2382_v15 = vld [vmem:[#allocation5 + $0x78] sm:$0xff]   ;;  %p2607_p11 = scmp.ne.s32.totalorder %s3113_s27, %s2606_s16  ;;  %s2688_s23 = smov [#allocation8]  }
  0x70   : > { %958 = vmatprep.mubr.bf16.mxu1 %v2386_v11  ;;  %v2380_v13 = vld [vmem:[#allocation5 + $0x70] sm:$0xff]   ;;  %v2383_v16 = vld [vmem:[#allocation5 + $0x38] sm:$0xff]   ;;  %v2387_v17 = vld [vmem:[#allocation5 + $0xc0] sm:$0xff]   ;;  %s2610_s11 = sshll.u32 %s2688_s23, 4  ;;  %s2611_s11 = int_to_ptr.vmem [resolvable:$false] %s2610_s11 }
  0x71   : > { %2285 = vmatpush3.bf16.msra.mxu1 %v2371_v3  ;;  %2055 = vmatpush3.bf16.msra.mxu0 %v2371_v3  ;;  %v2381_v14 = vld [vmem:[#allocation5 + $0x30] sm:$0xff]   ;;  %v2388_v19 = vld [vmem:[#allocation5 + $0x80] sm:$0xff]   ;;  %v2392_v21 = vld [vmem:[#allocation5 + $0xc8] sm:$0xff]   ;;  %p2608_p1 = pnand %p2607_p11, %p3176_p0  ;;  %s2612_s25 = scalar_lea.vmem %s2611_s11, 8192 }
  0x72   : > { %2278 = vmatprep.subr.bf16.mxu1 %v2372_v4  ;;  %2056 = vmatprep.subr.bf16.mxu0 %v2372_v4  ;;  %v2384_v18 = vld [vmem:[%s2887_s5 + $0x100] ss:$16 sps:$4 sm:$0xff]   ;;  %v2389_v20 = vld [vmem:[%s2887_s5 + $0x124] ss:$16 sps:$4 sm:$0xff]   ;;  %v2393_v22 = vld [vmem:[#allocation5 + $0x88] sm:$0xff]   ;;  %p2613_p5 = scmp.lt.s32.totalorder %s3113_s27, %s2611_s11  ;;  %p2614_p9 = scmp.lt.s32.totalorder %s2612_s25, %s2606_s16 }
  0x73   : > { %v2397_v23 = vld [vmem:[#allocation5 + $0xd0] sm:$0xff]   ;;  %v2402_v27 = vld [vmem:[#allocation5 + $0xd8] sm:$0xff]   ;;  %v2407_v31 = vld [vmem:[#allocation5 + $0xe0] sm:$0xff]   ;;  %p2609_p3 = pneg %p2608_p1 }
  0x74   : > { %v2391_v24 = vld [vmem:[%s2887_s5 + $0x120] ss:$16 sps:$4 sm:$0xff]   ;;  %v2394_v25 = vld [vmem:[%s2887_s5 + $0x144] ss:$16 sps:$4 sm:$0xff]   ;;  %v2403_v28 = vld [vmem:[#allocation5 + $0x98] sm:$0xff]   ;;  %p2615_p12 = por %p2614_p9, %p2613_p5 }
  0x75   : > { %2286 = vmatpush3.bf16.msra.mxu1 %v2373_v5  ;;  %2057 = vmatpush3.bf16.msra.mxu0 %v2373_v5  ;;  %v2398_v26 = vld [vmem:[#allocation5 + $0x90] sm:$0xff]   ;;  %v2408_v35 = vld [vmem:[#allocation5 + $0xa0] sm:$0xff]   ;;  %v2412_v36 = vld [vmem:[#allocation5 + $0xe8] sm:$0xff]  }
  0x76   : > { %2279 = vmatprep.subr.bf16.mxu1 %v2374_v6  ;;  %2058 = vmatprep.subr.bf16.mxu0 %v2374_v6  ;;  %v2424_v29 = vld [vmem:[%s2887_s5] ss:$16 sps:$4 sm:$0xff]   ;;  %v2426_v30 = vld [vmem:[%s2887_s5 + $0x4] ss:$16 sps:$4 sm:$0xff]   ;;  %v2413_v38 = vld [vmem:[#allocation5 + $0xa8] sm:$0xff]   ;;  %p2616_p2 = pnand %p2615_p12, %p2609_p3 }
  0x77   : > { %894 = vmatprep.mubr.bf16.mxu0 %v2426_v30  ;;  %v2396_v32 = vld [vmem:[%s2887_s5 + $0x140] ss:$16 sps:$4 sm:$0xff]   ;;  %v2430_v33 = vld [vmem:[%s2887_s5 + $0x24] ss:$16 sps:$4 sm:$0xff]   ;;  %v2422_v44 = vld [vmem:[#allocation5 + $0xf8] sm:$0xff]  }
  0x78   : > { %v2399_v34 = vld [vmem:[%s2887_s5 + $0x164] ss:$16 sps:$4 sm:$0xff]   ;;  %v2432_v37 = vld [vmem:[%s2887_s5 + $0x20] ss:$16 sps:$4 sm:$0xff]   ;;  %v2423_v46 = vld [vmem:[#allocation5 + $0xb8] sm:$0xff]  }
  0x79   : > { %2287 = vmatpush3.bf16.msra.mxu1 %v2375_v7  ;;  %2059 = vmatpush3.bf16.msra.mxu0 %v2375_v7  ;;  %v2436_v39 = vld [vmem:[%s2887_s5 + $0x44] ss:$16 sps:$4 sm:$0xff]   ;;  %v2401_v41 = vld [vmem:[%s2887_s5 + $0x160] ss:$16 sps:$4 sm:$0xff]   ;;  %v2429_v61 = vld [vmem:[%s2887_s5 + $0xc] ss:$16 sps:$4 sm:$0xff]  }
  0x7a   : > { %2280 = vmatprep.subr.bf16.mxu1 %v2376_v8  ;;  %2060 = vmatprep.subr.bf16.mxu0 %v2376_v8  ;;  %v2417_v40 = vld [vmem:[#allocation5 + $0xf0] sm:$0xff]   ;;  %v2427_v0 = vld [vmem:[%s2887_s5 + $0x8] ss:$16 sps:$4 sm:$0xff]   ;;  %v2433_v1 = vld [vmem:[%s2887_s5 + $0x2c] ss:$16 sps:$4 sm:$0xff]  }
  0x7b   : > { %v2404_v42 = vld [vmem:[%s2887_s5 + $0x184] ss:$16 sps:$4 sm:$0xff]   ;;  %v2438_v45 = vld [vmem:[%s2887_s5 + $0x40] ss:$16 sps:$4 sm:$0xff]   ;;  %v2435_v3 = vld [vmem:[%s2887_s5 + $0x28] ss:$16 sps:$4 sm:$0xff]  }
  0x7c   : > { %v2418_v43 = vld [vmem:[#allocation5 + $0xb0] sm:$0xff]   ;;  %v2439_v4 = vld [vmem:[%s2887_s5 + $0x4c] ss:$16 sps:$4 sm:$0xff]   ;;  %v2441_v5 = vld [vmem:[%s2887_s5 + $0x48] ss:$16 sps:$4 sm:$0xff]  }
  0x7d   : > { %2288 = vmatpush3.bf16.msra.mxu1 %v2377_v9  ;;  %2061 = vmatpush3.bf16.msra.mxu0 %v2377_v9  ;;  %v2442_v47 = vld [vmem:[%s2887_s5 + $0x64] ss:$16 sps:$4 sm:$0xff]   ;;  %v2406_v48 = vld [vmem:[%s2887_s5 + $0x180] ss:$16 sps:$4 sm:$0xff]   ;;  %v2445_v6 = vld [vmem:[%s2887_s5 + $0x6c] ss:$16 sps:$4 sm:$0xff]  }
  0x7e   : > { %2281 = vmatprep.subr.bf16.mxu1 %v2378_v10  ;;  %2062 = vmatprep.subr.bf16.mxu0 %v2378_v10  ;;  %v2409_v49 = vld [vmem:[%s2887_s5 + $0x1a4] ss:$16 sps:$4 sm:$0xff]   ;;  %v2444_v50 = vld [vmem:[%s2887_s5 + $0x60] ss:$16 sps:$4 sm:$0xff]   ;;  %v2447_v7 = vld [vmem:[%s2887_s5 + $0x68] ss:$16 sps:$4 sm:$0xff]  }
  0x7f   : > { %v2448_v51 = vld [vmem:[%s2887_s5 + $0x84] ss:$16 sps:$4 sm:$0xff]   ;;  %v2411_v52 = vld [vmem:[%s2887_s5 + $0x1a0] ss:$16 sps:$4 sm:$0xff]   ;;  %v2451_v8 = vld [vmem:[%s2887_s5 + $0x8c] ss:$16 sps:$4 sm:$0xff]  }
  0x80   : > { %v2414_v53 = vld [vmem:[%s2887_s5 + $0x1c4] ss:$16 sps:$4 sm:$0xff]   ;;  %v2450_v54 = vld [vmem:[%s2887_s5 + $0x80] ss:$16 sps:$4 sm:$0xff]   ;;  %v2453_v9 = vld [vmem:[%s2887_s5 + $0x88] ss:$16 sps:$4 sm:$0xff]  }
  0x81   : > { %2289 = vmatpush3.bf16.msra.mxu1 %v2379_v12  ;;  %2063 = vmatpush3.bf16.msra.mxu0 %v2379_v12  ;;  %v2454_v55 = vld [vmem:[%s2887_s5 + $0xa4] ss:$16 sps:$4 sm:$0xff]   ;;  %v2416_v56 = vld [vmem:[%s2887_s5 + $0x1c0] ss:$16 sps:$4 sm:$0xff]   ;;  %v2457_v10 = vld [vmem:[%s2887_s5 + $0xac] ss:$16 sps:$4 sm:$0xff]  }
  0x82   : > { %2282 = vmatprep.subr.bf16.mxu1 %v2380_v13  ;;  %2064 = vmatprep.subr.bf16.mxu0 %v2380_v13  ;;  %v2419_v57 = vld [vmem:[%s2887_s5 + $0x1e4] ss:$16 sps:$4 sm:$0xff]   ;;  %v2456_v58 = vld [vmem:[%s2887_s5 + $0xa0] ss:$16 sps:$4 sm:$0xff]   ;;  %v2459_v13 = vld [vmem:[%s2887_s5 + $0xa8] ss:$16 sps:$4 sm:$0xff]  }
  0x83   : > { %v2460_v59 = vld [vmem:[%s2887_s5 + $0xc4] ss:$16 sps:$4 sm:$0xff]   ;;  %v2421_v60 = vld [vmem:[%s2887_s5 + $0x1e0] ss:$16 sps:$4 sm:$0xff]   ;;  %v2478_v30 = vld [vmem:[%s2887_s5 + $0x14c] ss:$16 sps:$4 sm:$0xff]  }
  0x84   : > { %v2462_v62 = vld [vmem:[%s2887_s5 + $0xc0] ss:$16 sps:$4 sm:$0xff]   ;;  %v2466_v63 = vld [vmem:[%s2887_s5 + $0xe4] ss:$16 sps:$4 sm:$0xff]  }
  0x85   : > { %2290 = vmatpush3.bf16.msra.mxu1 %v2381_v14  ;;  %2065 = vmatpush3.bf16.msra.mxu0 %v2381_v14  ;;  %v2468_v2 = vld [vmem:[%s2887_s5 + $0xe0] ss:$16 sps:$4 sm:$0xff]   ;;  %v2498_v12 = vld [vmem:[#allocation7 + $0x4] ss:$8 sps:$4 sm:$0xff]  }
  0x86   : > { %2283 = vmatprep.subr.bf16.mxu1 %v2382_v15  ;;  %2066 = vmatprep.subr.bf16.mxu0 %v2382_v15  ;;  %v2496_v11 = vld [vmem:[#allocation7] ss:$8 sps:$4 sm:$0xff]   ;;  %v2463_v14 = vld [vmem:[%s2887_s5 + $0xcc] ss:$16 sps:$4 sm:$0xff]   ;;  %v2499_v15 = vld [vmem:[#allocation7 + $0x10] ss:$8 sps:$4 sm:$0xff]  }
  0x89   : > { %2291 = vmatpush3.bf16.msra.mxu1 %v2383_v16  ;;  %2067 = vmatpush3.bf16.msra.mxu0 %v2383_v16  ;;  %v2501_v16 = vld [vmem:[#allocation7 + $0x14] ss:$8 sps:$4 sm:$0xff]  }
  0x8a   : > { %2164 = vmatprep.subr.bf16.mxu1 %v2387_v17  ;;  %1328 = vmatprep.subr.bf16.mxu0 %v2498_v12  ;;  %v2465_v17 = vld [vmem:[%s2887_s5 + $0xc8] ss:$16 sps:$4 sm:$0xff]  }
  0x8c   : > { %959 = vmatmul.mubr.bf16.vlgmr.msra.gmra.mrb[0].mxu1 %v2384_v18  ;;  %895 = vmatmul.mubr.bf16.vlgmr.msra.gmra.mrb[0].mxu0 %v2424_v29  ;;  %v2469_v18 = vld [vmem:[%s2887_s5 + $0xec] ss:$16 sps:$4 sm:$0xff]   ;;  %v2477_v29 = vld [vmem:[%s2887_s5 + $0x128] ss:$16 sps:$4 sm:$0xff]  }
  0x8d   : > { %2165 = vmatpush3.bf16.msra.mxu1 %v2388_v19  ;;  %966 = vmatprep.mubr.bf16.mxu1 %v2389_v20  ;;  %v2502_v19 = vld [vmem:[#allocation7 + $0x20] ss:$8 sps:$4 sm:$0xff]   ;;  %v2504_v20 = vld [vmem:[#allocation7 + $0x24] ss:$8 sps:$4 sm:$0xff]  }
  0x8e   : > { %2166 = vmatprep.subr.bf16.mxu1 %v2392_v21  ;;  %902 = vmatprep.mubr.bf16.mxu0 %v2430_v33  ;;  %v2471_v21 = vld [vmem:[%s2887_s5 + $0xe8] ss:$16 sps:$4 sm:$0xff]  }
  0x8f   : > { %1329 = vmatpush1.bf16.msra.mxu0 %v2496_v11  ;;  %v2480_v33 = vld [vmem:[%s2887_s5 + $0x148] ss:$16 sps:$4 sm:$0xff]  }
  0x90   : > { %1330 = vmatprep.subr.bf16.mxu0 %v2501_v16 }
  0x91   : > { %2167 = vmatpush3.bf16.msra.mxu1 %v2393_v22  ;;  %v2472_v22 = vld [vmem:[%s2887_s5 + $0x10c] ss:$16 sps:$4 sm:$0xff]  }
  0x92   : > { %2168 = vmatprep.subr.bf16.mxu1 %v2397_v23  ;;  %v2505_v23 = vld [vmem:[#allocation7 + $0x30] ss:$8 sps:$4 sm:$0xff]  }
  0x93   : > { %1331 = vmatpush1.bf16.msra.mxu0 %v2499_v15 }
  0x94   : > { %967 = vmatmul.mubr.bf16.gmra.mrb[4].mxu1 %v2391_v24  ;;  %903 = vmatmul.mubr.bf16.gmra.mrb[4].mxu0 %v2432_v37  ;;  %v2507_v24 = vld [vmem:[#allocation7 + $0x34] ss:$8 sps:$4 sm:$0xff]   ;;  %v2483_v37 = vld [vmem:[%s2887_s5 + $0x168] ss:$16 sps:$4 sm:$0xff]  }
  0x95   : > { %974 = vmatprep.mubr.bf16.mxu1 %v2394_v25  ;;  %2169 = vmatpush3.bf16.msra.mxu1 %v2398_v26  ;;  %v2474_v25 = vld [vmem:[%s2887_s5 + $0x108] ss:$16 sps:$4 sm:$0xff]   ;;  %v2475_v26 = vld [vmem:[%s2887_s5 + $0x12c] ss:$16 sps:$4 sm:$0xff]  }
  0x96   : > { %2170 = vmatprep.subr.bf16.mxu1 %v2402_v27  ;;  %910 = vmatprep.mubr.bf16.mxu0 %v2436_v39  ;;  %v2508_v27 = vld [vmem:[#allocation7 + $0x40] ss:$8 sps:$4 sm:$0xff]   ;;  %v2519_v39 = vld [vmem:[#allocation7 + $0x74] ss:$8 sps:$4 sm:$0xff]  }
  0x97   : > { %1332 = vmatprep.subr.bf16.mxu0 %v2504_v20 }
  0x98   : > { %1333 = vmatpush1.bf16.msra.mxu0 %v2502_v19 }
  0x99   : > { %2171 = vmatpush3.bf16.msra.mxu1 %v2403_v28  ;;  %1334 = vmatprep.subr.bf16.mxu0 %v2507_v24  ;;  %v2510_v28 = vld [vmem:[#allocation7 + $0x44] ss:$8 sps:$4 sm:$0xff]  }
  0x9a   : > { %2172 = vmatprep.subr.bf16.mxu1 %v2407_v31  ;;  %v2511_v31 = vld [vmem:[#allocation7 + $0x50] ss:$8 sps:$4 sm:$0xff]  }
  0x9c   : > { %975 = vmatmul.mubr.bf16.gmra.mrb[8].mxu1 %v2396_v32  ;;  %911 = vmatmul.mubr.bf16.gmra.mrb[8].mxu0 %v2438_v45  ;;  %v2513_v32 = vld [vmem:[#allocation7 + $0x54] ss:$8 sps:$4 sm:$0xff]  }
  0x9d   : > { %982 = vmatprep.mubr.bf16.mxu1 %v2399_v34  ;;  %2173 = vmatpush3.bf16.msra.mxu1 %v2408_v35  ;;  %v2481_v34 = vld [vmem:[%s2887_s5 + $0x16c] ss:$16 sps:$4 sm:$0xff]   ;;  %v2514_v35 = vld [vmem:[#allocation7 + $0x60] ss:$8 sps:$4 sm:$0xff]  }
  0x9e   : > { %2174 = vmatprep.subr.bf16.mxu1 %v2412_v36  ;;  %918 = vmatprep.mubr.bf16.mxu0 %v2442_v47  ;;  %v2516_v36 = vld [vmem:[#allocation7 + $0x64] ss:$8 sps:$4 sm:$0xff]  }
  0x9f   : > { %1335 = vmatpush1.bf16.msra.mxu0 %v2505_v23  ;;  %v2490_v45 = vld [vmem:[%s2887_s5 + $0x1cc] ss:$16 sps:$4 sm:$0xff]  }
  0xa0   : > { %1336 = vmatprep.subr.bf16.mxu0 %v2510_v28  ;;  %v2493_v47 = vld [vmem:[%s2887_s5 + $0x1ec] ss:$16 sps:$4 sm:$0xff]  }
  0xa1   : > { %2175 = vmatpush3.bf16.msra.mxu1 %v2413_v38  ;;  %v2484_v38 = vld [vmem:[%s2887_s5 + $0x18c] ss:$16 sps:$4 sm:$0xff]  }
  0xa2   : > { %2176 = vmatprep.subr.bf16.mxu1 %v2417_v40  ;;  %v2517_v40 = vld [vmem:[#allocation7 + $0x70] ss:$8 sps:$4 sm:$0xff]  }
  0xa3   : > { %1337 = vmatpush1.bf16.msra.mxu0 %v2508_v27 }
  0xa4   : > { %983 = vmatmul.mubr.bf16.gmra.mrb[12].mxu1 %v2401_v41  ;;  %919 = vmatmul.mubr.bf16.gmra.mrb[12].mxu0 %v2444_v50  ;;  %v2486_v41 = vld [vmem:[%s2887_s5 + $0x188] ss:$16 sps:$4 sm:$0xff]  }
  0xa5   : > { %990 = vmatprep.mubr.bf16.mxu1 %v2404_v42  ;;  %2177 = vmatpush3.bf16.msra.mxu1 %v2418_v43  ;;  %v2487_v42 = vld [vmem:[%s2887_s5 + $0x1ac] ss:$16 sps:$4 sm:$0xff]   ;;  %v2687_v43 = vmov 0  }
  0xa6   : > { %2178 = vmatprep.subr.bf16.mxu1 %v2422_v44  ;;  %926 = vmatprep.mubr.bf16.mxu0 %v2448_v51  ;;  %v2489_v44 = vld [vmem:[%s2887_s5 + $0x1a8] ss:$16 sps:$4 sm:$0xff]  }
  0xa7   : > { %1338 = vmatprep.subr.bf16.mxu0 %v2513_v32 }
  0xa8   : > { %1339 = vmatpush1.bf16.msra.mxu0 %v2511_v31 }
  0xa9   : > { %2179 = vmatpush3.bf16.msra.mxu1 %v2423_v46  ;;  %1340 = vmatprep.subr.bf16.mxu0 %v2516_v36  ;;  %v2492_v46 = vld [vmem:[%s2887_s5 + $0x1c8] ss:$16 sps:$4 sm:$0xff]  }
  0xac   : > { %991 = vmatmul.mubr.bf16.gmra.mrb[16].mxu1 %v2406_v48  ;;  %927 = vmatmul.mubr.bf16.gmra.mrb[16].mxu0 %v2450_v54  ;;  %v2495_v48 = vld [vmem:[%s2887_s5 + $0x1e8] ss:$16 sps:$4 sm:$0xff]  }
  0xad   : > { %998 = vmatprep.mubr.bf16.mxu1 %v2409_v49  ;;  %934 = vmatprep.mubr.bf16.mxu0 %v2454_v55 }
  0xae   : > { %1341 = vmatpush1.bf16.msra.mxu0 %v2514_v35 }
  0xaf   : > { %1342 = vmatprep.subr.bf16.mxu0 %v2519_v39 }
  0xb2   : > { %1343 = vmatpush1.bf16.msra.mxu0 %v2517_v40 }
  0xb4   : > { %999 = vmatmul.mubr.bf16.gmra.mrb[20].mxu1 %v2411_v52  ;;  %935 = vmatmul.mubr.bf16.gmra.mrb[20].mxu0 %v2456_v58 }
  0xb5   : > { %1006 = vmatprep.mubr.bf16.mxu1 %v2414_v53  ;;  %942 = vmatprep.mubr.bf16.mxu0 %v2460_v59 }
  0xbc   : > { %1007 = vmatmul.mubr.bf16.gmra.mrb[24].mxu1 %v2416_v56  ;;  %943 = vmatmul.mubr.bf16.gmra.mrb[24].mxu0 %v2462_v62 }
  0xbd   : > { %1014 = vmatprep.mubr.bf16.mxu1 %v2419_v57  ;;  %950 = vmatprep.mubr.bf16.mxu0 %v2466_v63 }
  0xc4   : > { %1015 = vmatmul.mubr.bf16.gmra.mrb[28].mxu1 %v2421_v60  ;;  %951 = vmatmul.mubr.bf16.gmra.mrb[28].mxu0 %v2468_v2 }
  0xc5   : > { %1055 = vmatprep.mubr.bf16.mxu1 %v2429_v61  ;;  %1360 = vmatprep.mubr.bf16.mxu0 %v2687_v43 }
  0xcc   : > { %1056 = vmatmul.mubr.bf16.vlgmr.msra.gmra.mrb[32].mxu1 %v2427_v0 }
  0xcd   : > { %1063 = vmatprep.mubr.bf16.mxu1 %v2433_v1 }
  0xd4   : > { %1064 = vmatmul.mubr.bf16.gmra.mrb[36].mxu1 %v2435_v3 }
  0xd5   : > { %1071 = vmatprep.mubr.bf16.mxu1 %v2439_v4 }
  0xdc   : > { %1072 = vmatmul.mubr.bf16.gmra.mrb[40].mxu1 %v2441_v5 }
  0xdd   : > { %1079 = vmatprep.mubr.bf16.mxu1 %v2445_v6 }
  0xe4   : > { %1080 = vmatmul.mubr.bf16.gmra.mrb[44].mxu1 %v2447_v7 }
  0xe5   : > { %1087 = vmatprep.mubr.bf16.mxu1 %v2451_v8 }
  0xec   : > { %1088 = vmatmul.mubr.bf16.gmra.mrb[48].mxu1 %v2453_v9 }
  0xed   : > { %1095 = vmatprep.mubr.bf16.mxu1 %v2457_v10 }
  0xf4   : > { %1096 = vmatmul.mubr.bf16.gmra.mrb[52].mxu1 %v2459_v13 }
  0xf5   : > { %1103 = vmatprep.mubr.bf16.mxu1 %v2463_v14 }
  0xfc   : > { %1104 = vmatmul.mubr.bf16.gmra.mrb[56].mxu1 %v2465_v17 }
  0xfd   : > { %1111 = vmatprep.mubr.bf16.mxu1 %v2469_v18 }
 0x104   : > { %1112 = vmatmul.mubr.bf16.gmra.mrb[60].mxu1 %v2471_v21 }
 0x105   : > { %1119 = vmatprep.mubr.bf16.mxu1 %v2472_v22 }
 0x10c   : > { %1120 = vmatmul.mubr.bf16.gmra.mrb[64].mxu1 %v2474_v25 }
 0x10d   : > { %1127 = vmatprep.mubr.bf16.mxu1 %v2475_v26 }
 0x114   : > { %1128 = vmatmul.mubr.bf16.gmra.mrb[68].mxu1 %v2477_v29 }
 0x115   : > { %1135 = vmatprep.mubr.bf16.mxu1 %v2478_v30 }
 0x11c   : > { %1136 = vmatmul.mubr.bf16.gmra.mrb[72].mxu1 %v2480_v33 }
 0x11d   : > { %1143 = vmatprep.mubr.bf16.mxu1 %v2481_v34 }
 0x124   : > { %1144 = vmatmul.mubr.bf16.gmra.mrb[76].mxu1 %v2483_v37 }
 0x125   : > { %1151 = vmatprep.mubr.bf16.mxu1 %v2484_v38 }
 0x12c   : > { %1152 = vmatmul.mubr.bf16.gmra.mrb[80].mxu1 %v2486_v41 }
 0x12d   : > { %1159 = vmatprep.mubr.bf16.mxu1 %v2487_v42 }
 0x134   : > { %1160 = vmatmul.mubr.bf16.gmra.mrb[84].mxu1 %v2489_v44 }
 0x135   : > { %1167 = vmatprep.mubr.bf16.mxu1 %v2490_v45 }
 0x13c   : > { %1168 = vmatmul.mubr.bf16.gmra.mrb[88].mxu1 %v2492_v46 }
 0x13d   : > { %1175 = vmatprep.mubr.bf16.mxu1 %v2493_v47 }
 0x144   : > { %1176 = vmatmul.mubr.bf16.gmra.mrb[92].mxu1 %v2495_v48 }
 0x15f   : > { %v2116_v49 = vpop.f32.mrb[0].mxu1  ;;  %v2068_v61 = vpop.f32.mrb[0].mxu0 }
 0x160   : > { %v2117_v50 = vpop.f32.mrb[1].mxu1  ;;  %v2069_v62 = vpop.f32.mrb[1].mxu0 }
 0x161   : > { %v2962_v51 = vadd.f32 %v2117_v50, %v2116_v49  ;;  %v2119_v52 = vpop.f32.mrb[2].mxu1  ;;  %v2970_v63 = vadd.f32 %v2069_v62, %v2068_v61  ;;  %v2071_v0 = vpop.f32.mrb[2].mxu0 }
 0x162   : > { %v2120_v53 = vpop.f32.mrb[3].mxu1  ;;  %v2072_v1 = vpop.f32.mrb[3].mxu0 }
 0x163   : > { %v2964_v54 = vadd.f32 %v2120_v53, %v2119_v52  ;;  %v2972_v3 = vadd.f32 %v2072_v1, %v2071_v0 }
 0x167   : > { %v2122_v55 = vpop.f32.mrb[4].mxu1  ;;  %v2074_v9 = vpop.f32.mrb[4].mxu0 }
 0x168   : > { %v2123_v56 = vpop.f32.mrb[5].mxu1  ;;  %v2075_v10 = vpop.f32.mrb[5].mxu0 }
 0x169   : > { %v2966_v57 = vadd.f32 %v2123_v56, %v2122_v55  ;;  %v2125_v58 = vpop.f32.mrb[6].mxu1  ;;  %v2978_v11 = vadd.f32 %v2075_v10, %v2074_v9  ;;  %v2077_v12 = vpop.f32.mrb[6].mxu0 }
 0x16a   : > { %v2126_v59 = vpop.f32.mrb[7].mxu1  ;;  %v2078_v13 = vpop.f32.mrb[7].mxu0 }
 0x16b   : > { %v2968_v60 = vadd.f32 %v2126_v59, %v2125_v58  ;;  %v2980_v15 = vadd.f32 %v2078_v13, %v2077_v12 }
 0x16f   : > { %v2128_v2 = vpop.f32.mrb[8].mxu1  ;;  %v2080_v21 = vpop.f32.mrb[8].mxu0 }
 0x170   : > { %v2129_v4 = vpop.f32.mrb[9].mxu1  ;;  %v2081_v22 = vpop.f32.mrb[9].mxu0 }
 0x171   : > { %v2974_v5 = vadd.f32 %v2129_v4, %v2128_v2  ;;  %v2131_v6 = vpop.f32.mrb[10].mxu1  ;;  %v2986_v23 = vadd.f32 %v2081_v22, %v2080_v21  ;;  %v2083_v24 = vpop.f32.mrb[10].mxu0 }
 0x172   : > { %v2132_v7 = vpop.f32.mrb[11].mxu1  ;;  %v2084_v25 = vpop.f32.mrb[11].mxu0 }
 0x173   : > { %v2976_v8 = vadd.f32 %v2132_v7, %v2131_v6  ;;  %v2988_v27 = vadd.f32 %v2084_v25, %v2083_v24 }
 0x177   : > { %v2134_v14 = vpop.f32.mrb[12].mxu1  ;;  %v2086_v33 = vpop.f32.mrb[12].mxu0 }
 0x178   : > { %v2135_v16 = vpop.f32.mrb[13].mxu1  ;;  %v2087_v34 = vpop.f32.mrb[13].mxu0 }
 0x179   : > { %v2982_v17 = vadd.f32 %v2135_v16, %v2134_v14  ;;  %v2137_v18 = vpop.f32.mrb[14].mxu1  ;;  %v2994_v35 = vadd.f32 %v2087_v34, %v2086_v33  ;;  %v2089_v36 = vpop.f32.mrb[14].mxu0 }
 0x17a   : > { %v2138_v19 = vpop.f32.mrb[15].mxu1  ;;  %v2090_v37 = vpop.f32.mrb[15].mxu0 }
 0x17b   : > { %v2984_v20 = vadd.f32 %v2138_v19, %v2137_v18  ;;  %v2996_v39 = vadd.f32 %v2090_v37, %v2089_v36 }
 0x17f   : > { %v2140_v26 = vpop.f32.mrb[16].mxu1  ;;  %v2092_v46 = vpop.f32.mrb[16].mxu0 }
 0x180   : > { %v2141_v28 = vpop.f32.mrb[17].mxu1  ;;  %v2093_v47 = vpop.f32.mrb[17].mxu0 }
 0x181   : > { %v2990_v29 = vadd.f32 %v2141_v28, %v2140_v26  ;;  %v2143_v30 = vpop.f32.mrb[18].mxu1  ;;  %v3002_v48 = vadd.f32 %v2093_v47, %v2092_v46  ;;  %v2095_v49 = vpop.f32.mrb[18].mxu0 }
 0x182   : > { %v2144_v31 = vpop.f32.mrb[19].mxu1  ;;  %v2096_v50 = vpop.f32.mrb[19].mxu0 }
 0x183   : > { %v2992_v32 = vadd.f32 %v2144_v31, %v2143_v30  ;;  %v3004_v53 = vadd.f32 %v2096_v50, %v2095_v49 }
 0x187   : > { %v2146_v38 = vpop.f32.mrb[20].mxu1  ;;  %v2098_v62 = vpop.f32.mrb[20].mxu0 }
 0x188   : > { %v2147_v40 = vpop.f32.mrb[21].mxu1  ;;  %v2099_v0 = vpop.f32.mrb[21].mxu0 }
 0x189   : > { %v2998_v41 = vadd.f32 %v2147_v40, %v2146_v38  ;;  %v2149_v42 = vpop.f32.mrb[22].mxu1  ;;  %v3010_v1 = vadd.f32 %v2099_v0, %v2098_v62  ;;  %v2101_v2 = vpop.f32.mrb[22].mxu0 }
 0x18a   : > { %v2150_v44 = vpop.f32.mrb[23].mxu1  ;;  %v2102_v4 = vpop.f32.mrb[23].mxu0 }
 0x18b   : > { %v3000_v45 = vadd.f32 %v2150_v44, %v2149_v42  ;;  %v3012_v7 = vadd.f32 %v2102_v4, %v2101_v2 }
 0x18f   : > { %v2152_v52 = vpop.f32.mrb[24].mxu1  ;;  %v2104_v16 = vpop.f32.mrb[24].mxu0 }
 0x190   : > { %v2153_v55 = vpop.f32.mrb[25].mxu1  ;;  %v2105_v18 = vpop.f32.mrb[25].mxu0 }
 0x191   : > { %v3006_v56 = vadd.f32 %v2153_v55, %v2152_v52  ;;  %v2155_v58 = vpop.f32.mrb[26].mxu1  ;;  %v3018_v19 = vadd.f32 %v2105_v18, %v2104_v16  ;;  %v2107_v21 = vpop.f32.mrb[26].mxu0 }
 0x192   : > { %v2156_v59 = vpop.f32.mrb[27].mxu1  ;;  %v2108_v22 = vpop.f32.mrb[27].mxu0 }
 0x193   : > { %v3008_v61 = vadd.f32 %v2156_v59, %v2155_v58  ;;  %v3020_v25 = vadd.f32 %v2108_v22, %v2107_v21 }
 0x197   : > { %v2158_v6 = vpop.f32.mrb[28].mxu1  ;;  %v2110_v36 = vpop.f32.mrb[28].mxu0 }
 0x198   : > { %v2159_v9 = vpop.f32.mrb[29].mxu1  ;;  %v2111_v37 = vpop.f32.mrb[29].mxu0 }
 0x199   : > { %v3014_v10 = vadd.f32 %v2159_v9, %v2158_v6  ;;  %v2161_v12 = vpop.f32.mrb[30].mxu1  ;;  %v3024_v40 = vadd.f32 %v2111_v37, %v2110_v36  ;;  %v2113_v42 = vpop.f32.mrb[30].mxu0 }
 0x19a   : > { %v2162_v13 = vpop.f32.mrb[31].mxu1  ;;  %v2114_v44 = vpop.f32.mrb[31].mxu0 }
 0x19b   : > { %v3016_v14 = vadd.f32 %v2162_v13, %v2161_v12  ;;  %v3026_v50 = vadd.f32 %v2114_v44, %v2113_v42 }
 0x19f   : > { %v2180_v24 = vpop.f32.mrb[32].mxu1 }
 0x1a0   : > { %v2181_v26 = vpop.f32.mrb[33].mxu1 }
 0x1a1   : > { %v2182_v28 = vadd.f32 %v2181_v26, %v2180_v24  ;;  %v2183_v30 = vpop.f32.mrb[34].mxu1 }
 0x1a2   : > { %v2184_v31 = vpop.f32.mrb[35].mxu1 }
 0x1a3   : > { %v1058_v33 = vadd.f32 %v2182_v28, %v2970_v63  ;;  %v2185_v34 = vadd.f32 %v2184_v31, %v2183_v30 }
 0x1a5   : > { %v1061_v38 = vadd.f32 %v2185_v34, %v2972_v3  ;;  %v1184_v46 = vmax.f32 %v1058_v33, 0.0 }
 0x1a7   : > { %v1185_v47 = vmax.f32 %v1061_v38, 0.0  ;;  %v2186_v49 = vpop.f32.mrb[36].mxu1 }
 0x1a8   : > { %v2187_v52 = vpop.f32.mrb[37].mxu1 }
 0x1a9   : > { %v1216_v55 = vpack.c.bf16 %v1185_v47, %v1184_v46  ;;  %v2188_v58 = vadd.f32 %v2187_v52, %v2186_v49  ;;  %v2189_v59 = vpop.f32.mrb[38].mxu1 }
 0x1aa   : > { %v2190_v62 = vpop.f32.mrb[39].mxu1 }
 0x1ab   : > { %v1066_v63 = vadd.f32 %v2188_v58, %v2978_v11  ;;  %v2191_v0 = vadd.f32 %v2190_v62, %v2189_v59  ;;  %1361 = vmatmul.mubr.bf16.vlgmr.msra.gmra.mrb[32].mxu0 %v1216_v55 }
 0x1ac   : > { %1370 = vmatprep.mubr.bf16.mxu0 %v2687_v43 }
 0x1ad   : > { %v1069_v3 = vadd.f32 %v2191_v0, %v2980_v15  ;;  %v1186_v2 = vmax.f32 %v1066_v63, 0.0 }
 0x1af   : > { %v1187_v4 = vmax.f32 %v1069_v3, 0.0  ;;  %v2192_v6 = vpop.f32.mrb[40].mxu1 }
 0x1b0   : > { %v2193_v9 = vpop.f32.mrb[41].mxu1 }
 0x1b1   : > { %v2194_v12 = vadd.f32 %v2193_v9, %v2192_v6  ;;  %v2195_v13 = vpop.f32.mrb[42].mxu1  ;;  %v1217_v16 = vpack.c.bf16 %v1187_v4, %v1186_v2 }
 0x1b2   : > { %v2196_v18 = vpop.f32.mrb[43].mxu1 }
 0x1b3   : > { %v1074_v21 = vadd.f32 %v2194_v12, %v2986_v23  ;;  %v2197_v22 = vadd.f32 %v2196_v18, %v2195_v13  ;;  %1371 = vmatmul.mubr.bf16.gmra.mrb[36].mxu0 %v1217_v16 }
 0x1b4   : > { %1380 = vmatprep.mubr.bf16.mxu0 %v2687_v43 }
 0x1b5   : > { %v1077_v11 = vadd.f32 %v2197_v22, %v2988_v27  ;;  %v1188_v24 = vmax.f32 %v1074_v21, 0.0 }
 0x1b7   : > { %v1189_v26 = vmax.f32 %v1077_v11, 0.0  ;;  %v2198_v28 = vpop.f32.mrb[44].mxu1 }
 0x1b8   : > { %v2199_v15 = vpop.f32.mrb[45].mxu1 }
 0x1b9   : > { %v2200_v30 = vadd.f32 %v2199_v15, %v2198_v28  ;;  %v2201_v31 = vpop.f32.mrb[46].mxu1  ;;  %v1218_v33 = vpack.c.bf16 %v1189_v26, %v1188_v24 }
 0x1ba   : > { %v2202_v34 = vpop.f32.mrb[47].mxu1 }
 0x1bb   : > { %v1082_v36 = vadd.f32 %v2200_v30, %v2994_v35  ;;  %v2203_v37 = vadd.f32 %v2202_v34, %v2201_v31  ;;  %1381 = vmatmul.mubr.bf16.gmra.mrb[40].mxu0 %v1218_v33 }
 0x1bc   : > { %1390 = vmatprep.mubr.bf16.mxu0 %v2687_v43 }
 0x1bd   : > { %v1085_v23 = vadd.f32 %v2203_v37, %v2996_v39  ;;  %v1190_v38 = vmax.f32 %v1082_v36, 0.0 }
 0x1bf   : > { %v1191_v42 = vmax.f32 %v1085_v23, 0.0  ;;  %v2204_v44 = vpop.f32.mrb[48].mxu1 }
 0x1c0   : > { %v2205_v27 = vpop.f32.mrb[49].mxu1 }
 0x1c1   : > { %v2206_v46 = vadd.f32 %v2205_v27, %v2204_v44  ;;  %v2207_v47 = vpop.f32.mrb[50].mxu1  ;;  %v1219_v49 = vpack.c.bf16 %v1191_v42, %v1190_v38 }
 0x1c2   : > { %v2208_v52 = vpop.f32.mrb[51].mxu1 }
 0x1c3   : > { %v1090_v55 = vadd.f32 %v2206_v46, %v3002_v48  ;;  %v2209_v58 = vadd.f32 %v2208_v52, %v2207_v47  ;;  %1391 = vmatmul.mubr.bf16.gmra.mrb[44].mxu0 %v1219_v49 }
 0x1c4   : > { %1400 = vmatprep.mubr.bf16.mxu0 %v2687_v43 }
 0x1c5   : > { %v1093_v35 = vadd.f32 %v2209_v58, %v3004_v53  ;;  %v1192_v59 = vmax.f32 %v1090_v55, 0.0 }
 0x1c7   : > { %v1193_v62 = vmax.f32 %v1093_v35, 0.0  ;;  %v2210_v63 = vpop.f32.mrb[52].mxu1 }
 0x1c8   : > { %v2211_v39 = vpop.f32.mrb[53].mxu1 }
 0x1c9   : > { %v2212_v0 = vadd.f32 %v2211_v39, %v2210_v63  ;;  %v2213_v3 = vpop.f32.mrb[54].mxu1  ;;  %v1220_v2 = vpack.c.bf16 %v1193_v62, %v1192_v59 }
 0x1ca   : > { %v2214_v4 = vpop.f32.mrb[55].mxu1 }
 0x1cb   : > { %v1098_v6 = vadd.f32 %v2212_v0, %v3010_v1  ;;  %v2215_v9 = vadd.f32 %v2214_v4, %v2213_v3  ;;  %1401 = vmatmul.mubr.bf16.gmra.mrb[48].mxu0 %v1220_v2 }
 0x1cc   : > { %1410 = vmatprep.mubr.bf16.mxu0 %v2687_v43 }
 0x1cd   : > { %v1101_v48 = vadd.f32 %v2215_v9, %v3012_v7  ;;  %v1194_v12 = vmax.f32 %v1098_v6, 0.0 }
 0x1cf   : > { %v1195_v13 = vmax.f32 %v1101_v48, 0.0  ;;  %v2216_v16 = vpop.f32.mrb[56].mxu1 }
 0x1d0   : > { %v2217_v53 = vpop.f32.mrb[57].mxu1 }
 0x1d1   : > { %v2218_v18 = vadd.f32 %v2217_v53, %v2216_v16  ;;  %v2219_v21 = vpop.f32.mrb[58].mxu1  ;;  %v1221_v22 = vpack.c.bf16 %v1195_v13, %v1194_v12 }
 0x1d2   : > { %v2220_v11 = vpop.f32.mrb[59].mxu1 }
 0x1d3   : > { %v1106_v24 = vadd.f32 %v2218_v18, %v3018_v19  ;;  %v2221_v26 = vadd.f32 %v2220_v11, %v2219_v21  ;;  %1411 = vmatmul.mubr.bf16.gmra.mrb[52].mxu0 %v1221_v22 }
 0x1d4   : > { %1420 = vmatprep.mubr.bf16.mxu0 %v2687_v43 }
 0x1d5   : > { %v1109_v1 = vadd.f32 %v2221_v26, %v3020_v25  ;;  %v1196_v28 = vmax.f32 %v1106_v24, 0.0 }
 0x1d7   : > { %v1197_v15 = vmax.f32 %v1109_v1, 0.0  ;;  %v2222_v30 = vpop.f32.mrb[60].mxu1 }
 0x1d8   : > { %v2223_v7 = vpop.f32.mrb[61].mxu1 }
 0x1d9   : > { %v2224_v31 = vadd.f32 %v2223_v7, %v2222_v30  ;;  %v2225_v33 = vpop.f32.mrb[62].mxu1  ;;  %v1222_v34 = vpack.c.bf16 %v1197_v15, %v1196_v28 }
 0x1da   : > { %v2226_v36 = vpop.f32.mrb[63].mxu1 }
 0x1db   : > { %v1114_v37 = vadd.f32 %v2224_v31, %v3024_v40  ;;  %v2227_v23 = vadd.f32 %v2226_v36, %v2225_v33  ;;  %1421 = vmatmul.mubr.bf16.gmra.mrb[56].mxu0 %v1222_v34 }
 0x1dc   : > { %1430 = vmatprep.mubr.bf16.mxu0 %v2687_v43 }
 0x1dd   : > { %v1117_v19 = vadd.f32 %v2227_v23, %v3026_v50  ;;  %v1198_v38 = vmax.f32 %v1114_v37, 0.0 }
 0x1df   : > { %v1199_v42 = vmax.f32 %v1117_v19, 0.0  ;;  %v2228_v44 = vpop.f32.mrb[64].mxu1 }
 0x1e0   : > { %v2229_v25 = vpop.f32.mrb[65].mxu1 }
 0x1e1   : > { %v2230_v27 = vadd.f32 %v2229_v25, %v2228_v44  ;;  %v2231_v46 = vpop.f32.mrb[66].mxu1  ;;  %v1223_v47 = vpack.c.bf16 %v1199_v42, %v1198_v38 }
 0x1e2   : > { %v2232_v49 = vpop.f32.mrb[67].mxu1 }
 0x1e3   : > { %v1122_v52 = vadd.f32 %v2230_v27, %v2962_v51  ;;  %v2233_v55 = vadd.f32 %v2232_v49, %v2231_v46  ;;  %1431 = vmatmul.mubr.bf16.gmra.mrb[60].mxu0 %v1223_v47 }
 0x1e4   : > { %1440 = vmatprep.mubr.bf16.mxu0 %v2687_v43 }
 0x1e5   : > { %v1125_v40 = vadd.f32 %v2233_v55, %v2964_v54  ;;  %v1200_v58 = vmax.f32 %v1122_v52, 0.0 }
 0x1e7   : > { %v1201_v35 = vmax.f32 %v1125_v40, 0.0  ;;  %v2234_v59 = vpop.f32.mrb[68].mxu1 }
 0x1e8   : > { %v2235_v50 = vpop.f32.mrb[69].mxu1 }
 0x1e9   : > { %v2236_v62 = vadd.f32 %v2235_v50, %v2234_v59  ;;  %v2237_v63 = vpop.f32.mrb[70].mxu1  ;;  %v1224_v39 = vpack.c.bf16 %v1201_v35, %v1200_v58 }
 0x1ea   : > { %v2238_v0 = vpop.f32.mrb[71].mxu1 }
 0x1eb   : > { %v1130_v3 = vadd.f32 %v2236_v62, %v2966_v57  ;;  %v2239_v2 = vadd.f32 %v2238_v0, %v2237_v63  ;;  %1441 = vmatmul.mubr.bf16.gmra.mrb[64].mxu0 %v1224_v39 }
 0x1ec   : > { %1450 = vmatprep.mubr.bf16.mxu0 %v2687_v43 }
 0x1ed   : > { %v1133_v51 = vadd.f32 %v2239_v2, %v2968_v60  ;;  %v1202_v4 = vmax.f32 %v1130_v3, 0.0 }
 0x1ef   : > { %v1203_v6 = vmax.f32 %v1133_v51, 0.0  ;;  %v2240_v9 = vpop.f32.mrb[72].mxu1 }
 0x1f0   : > { %v2241_v54 = vpop.f32.mrb[73].mxu1 }
 0x1f1   : > { %v2242_v48 = vadd.f32 %v2241_v54, %v2240_v9  ;;  %v2243_v12 = vpop.f32.mrb[74].mxu1  ;;  %v1225_v13 = vpack.c.bf16 %v1203_v6, %v1202_v4 }
 0x1f2   : > { %v2244_v16 = vpop.f32.mrb[75].mxu1 }
 0x1f3   : > { %v1138_v53 = vadd.f32 %v2242_v48, %v2974_v5  ;;  %v2245_v18 = vadd.f32 %v2244_v16, %v2243_v12  ;;  %1451 = vmatmul.mubr.bf16.gmra.mrb[68].mxu0 %v1225_v13 }
 0x1f4   : > { %1460 = vmatprep.mubr.bf16.mxu0 %v2687_v43 }
 0x1f5   : > { %v1141_v57 = vadd.f32 %v2245_v18, %v2976_v8  ;;  %v1204_v21 = vmax.f32 %v1138_v53, 0.0 }
 0x1f7   : > { %v1205_v22 = vmax.f32 %v1141_v57, 0.0  ;;  %v2246_v11 = vpop.f32.mrb[76].mxu1 }
 0x1f8   : > { %v2247_v60 = vpop.f32.mrb[77].mxu1 }
 0x1f9   : > { %v2248_v24 = vadd.f32 %v2247_v60, %v2246_v11  ;;  %v2249_v26 = vpop.f32.mrb[78].mxu1  ;;  %v1226_v1 = vpack.c.bf16 %v1205_v22, %v1204_v21 }
 0x1fa   : > { %v2250_v28 = vpop.f32.mrb[79].mxu1 }
 0x1fb   : > { %v1146_v15 = vadd.f32 %v2248_v24, %v2982_v17  ;;  %v2251_v30 = vadd.f32 %v2250_v28, %v2249_v26  ;;  %1461 = vmatmul.mubr.bf16.gmra.mrb[72].mxu0 %v1226_v1 }
 0x1fc   : > { %1470 = vmatprep.mubr.bf16.mxu0 %v2687_v43 }
 0x1fd   : > { %v1149_v5 = vadd.f32 %v2251_v30, %v2984_v20  ;;  %v1206_v7 = vmax.f32 %v1146_v15, 0.0 }
 0x1ff   : > { %v1207_v31 = vmax.f32 %v1149_v5, 0.0  ;;  %v2252_v33 = vpop.f32.mrb[80].mxu1 }
 0x200   : > { %v2253_v8 = vpop.f32.mrb[81].mxu1 }
 0x201   : > { %v2254_v34 = vadd.f32 %v2253_v8, %v2252_v33  ;;  %v2255_v36 = vpop.f32.mrb[82].mxu1  ;;  %v1227_v37 = vpack.c.bf16 %v1207_v31, %v1206_v7 }
 0x202   : > { %v2256_v23 = vpop.f32.mrb[83].mxu1 }
 0x203   : > { %v1154_v19 = vadd.f32 %v2254_v34, %v2990_v29  ;;  %v2257_v38 = vadd.f32 %v2256_v23, %v2255_v36  ;;  %1471 = vmatmul.mubr.bf16.gmra.mrb[76].mxu0 %v1227_v37 }
 0x204   : > { %1480 = vmatprep.mubr.bf16.mxu0 %v2687_v43 }
 0x205   : > { %v1157_v17 = vadd.f32 %v2257_v38, %v2992_v32  ;;  %v1208_v42 = vmax.f32 %v1154_v19, 0.0 }
 0x207   : > { %v1209_v44 = vmax.f32 %v1157_v17, 0.0  ;;  %v2258_v25 = vpop.f32.mrb[84].mxu1 }
 0x208   : > { %v2259_v20 = vpop.f32.mrb[85].mxu1 }
 0x209   : > { %v2260_v27 = vadd.f32 %v2259_v20, %v2258_v25  ;;  %v2261_v46 = vpop.f32.mrb[86].mxu1  ;;  %v1228_v47 = vpack.c.bf16 %v1209_v44, %v1208_v42 }
 0x20a   : > { %v2262_v49 = vpop.f32.mrb[87].mxu1 }
 0x20b   : > { %v1162_v52 = vadd.f32 %v2260_v27, %v2998_v41  ;;  %v2263_v55 = vadd.f32 %v2262_v49, %v2261_v46  ;;  %1481 = vmatmul.mubr.bf16.gmra.mrb[80].mxu0 %v1228_v47 }
 0x20c   : > { %1490 = vmatprep.mubr.bf16.mxu0 %v2687_v43 }
 0x20d   : > { %v1165_v29 = vadd.f32 %v2263_v55, %v3000_v45  ;;  %v1210_v40 = vmax.f32 %v1162_v52, 0.0 }
 0x20f   : > { %v1211_v58 = vmax.f32 %v1165_v29, 0.0  ;;  %v2264_v35 = vpop.f32.mrb[88].mxu1 }
 0x210   : > { %v2265_v32 = vpop.f32.mrb[89].mxu1 }
 0x211   : > { %v2266_v59 = vadd.f32 %v2265_v32, %v2264_v35  ;;  %v2267_v50 = vpop.f32.mrb[90].mxu1  ;;  %v1229_v62 = vpack.c.bf16 %v1211_v58, %v1210_v40 }
 0x212   : > { %v2268_v63 = vpop.f32.mrb[91].mxu1 }
 0x213   : > { %v1170_v39 = vadd.f32 %v2266_v59, %v3006_v56  ;;  %v2269_v0 = vadd.f32 %v2268_v63, %v2267_v50  ;;  %1491 = vmatmul.mubr.bf16.gmra.mrb[84].mxu0 %v1229_v62 }
 0x214   : > { %1500 = vmatprep.mubr.bf16.mxu0 %v2687_v43 }
 0x215   : > { %v1173_v41 = vadd.f32 %v2269_v0, %v3008_v61  ;;  %v1212_v3 = vmax.f32 %v1170_v39, 0.0 }
 0x217   : > { %v1213_v2 = vmax.f32 %v1173_v41, 0.0  ;;  %v2270_v45 = vpop.f32.mrb[92].mxu1 }
 0x218   : > { %v2271_v51 = vpop.f32.mrb[93].mxu1 }
 0x219   : > { %v2272_v4 = vadd.f32 %v2271_v51, %v2270_v45  ;;  %v2273_v6 = vpop.f32.mrb[94].mxu1  ;;  %v1230_v9 = vpack.c.bf16 %v1213_v2, %v1212_v3 }
 0x21a   : > { %v2274_v54 = vpop.f32.mrb[95].mxu1 }
 0x21b   : > { %v1178_v48 = vadd.f32 %v2272_v4, %v3014_v10  ;;  %v2275_v12 = vadd.f32 %v2274_v54, %v2273_v6  ;;  %1501 = vmatmul.mubr.bf16.gmra.mrb[88].mxu0 %v1230_v9 }
 0x21c   : > { %1510 = vmatprep.mubr.bf16.mxu0 %v2687_v43 }
 0x21d   : > { %v1181_v56 = vadd.f32 %v2275_v12, %v3016_v14  ;;  %v1214_v13 = vmax.f32 %v1178_v48, 0.0 }
 0x21f   : > { %v1215_v16 = vmax.f32 %v1181_v56, 0.0 }
 0x221   : > { %v1231_v61 = vpack.c.bf16 %v1215_v16, %v1214_v13 }
 0x223   : > { %1511 = vmatmul.mubr.bf16.gmra.mrb[92].mxu0 %v1231_v61 }
 0x27e   : > { %v1362_v53 = vpop.f32.mrb[32].mxu0 }
 0x27f   : > { %v1364_v18 = vpop.f32.mrb[33].mxu0 }
 0x280   : > { %v2018_v57 = vpack.c.bf16 %v1364_v18, %v1362_v53  ;;  %v1366_v21 = vpop.f32.mrb[34].mxu0 }
 0x281   : > { %v1368_v22 = vpop.f32.mrb[35].mxu0 }
 0x282   : > { %1713 = vst [vmem:[%s3074_s20] sm:$0xff] %v2018_v57  ;;  %v2019_v43 = vpack.c.bf16 %v1368_v22, %v1366_v21 }
 0x284   : > { %1714 = vst [vmem:[%s3074_s20 + $0x8] sm:$0xff] %v2019_v43 }
 0x286   : > { %v1372_v10 = vpop.f32.mrb[36].mxu0 }
 0x287   : > { %v1374_v14 = vpop.f32.mrb[37].mxu0 }
 0x288   : > { %v2020_v11 = vpack.c.bf16 %v1374_v14, %v1372_v10  ;;  %v1376_v60 = vpop.f32.mrb[38].mxu0 }
 0x289   : > { %v1378_v24 = vpop.f32.mrb[39].mxu0 }
 0x28a   : > { %1715 = vst [vmem:[%s3074_s20 + $0x10] sm:$0xff] %v2020_v11  ;;  %v2021_v26 = vpack.c.bf16 %v1378_v24, %v1376_v60 }
 0x28c   : > { %1716 = vst [vmem:[%s3074_s20 + $0x18] sm:$0xff] %v2021_v26 }
 0x28e   : > { %v1382_v1 = vpop.f32.mrb[40].mxu0 }
 0x28f   : > { %v1384_v28 = vpop.f32.mrb[41].mxu0 }
 0x290   : > { %v2022_v15 = vpack.c.bf16 %v1384_v28, %v1382_v1  ;;  %v1386_v30 = vpop.f32.mrb[42].mxu0 }
 0x291   : > { %v1388_v5 = vpop.f32.mrb[43].mxu0 }
 0x292   : > { %1717 = vst [vmem:[%s3074_s20 + $0x20] sm:$0xff] %v2022_v15  ;;  %v2023_v7 = vpack.c.bf16 %v1388_v5, %v1386_v30 }
 0x294   : > { %1718 = vst [vmem:[%s3074_s20 + $0x28] sm:$0xff] %v2023_v7 }
 0x296   : > { %v1392_v31 = vpop.f32.mrb[44].mxu0 }
 0x297   : > { %v1394_v33 = vpop.f32.mrb[45].mxu0 }
 0x298   : > { %v2024_v8 = vpack.c.bf16 %v1394_v33, %v1392_v31  ;;  %v1396_v34 = vpop.f32.mrb[46].mxu0 }
 0x299   : > { %v1398_v36 = vpop.f32.mrb[47].mxu0 }
 0x29a   : > { %1719 = vst [vmem:[%s3074_s20 + $0x30] sm:$0xff] %v2024_v8  ;;  %v2025_v37 = vpack.c.bf16 %v1398_v36, %v1396_v34 }
 0x29c   : > { %1720 = vst [vmem:[%s3074_s20 + $0x38] sm:$0xff] %v2025_v37 }
 0x29e   : > { %v1402_v23 = vpop.f32.mrb[48].mxu0 }
 0x29f   : > { %v1404_v19 = vpop.f32.mrb[49].mxu0 }
 0x2a0   : > { %v2026_v38 = vpack.c.bf16 %v1404_v19, %v1402_v23  ;;  %v1406_v17 = vpop.f32.mrb[50].mxu0 }
 0x2a1   : > { %v1408_v42 = vpop.f32.mrb[51].mxu0 }
 0x2a2   : > { %1721 = vst [vmem:[%s3074_s20 + $0x40] sm:$0xff] %v2026_v38  ;;  %v2027_v44 = vpack.c.bf16 %v1408_v42, %v1406_v17 }
 0x2a4   : > { %1722 = vst [vmem:[%s3074_s20 + $0x48] sm:$0xff] %v2027_v44 }
 0x2a6   : > { %v1412_v25 = vpop.f32.mrb[52].mxu0 }
 0x2a7   : > { %v1414_v20 = vpop.f32.mrb[53].mxu0 }
 0x2a8   : > { %v2028_v27 = vpack.c.bf16 %v1414_v20, %v1412_v25  ;;  %v1416_v46 = vpop.f32.mrb[54].mxu0 }
 0x2a9   : > { %v1418_v47 = vpop.f32.mrb[55].mxu0 }
 0x2aa   : > { %1723 = vst [vmem:[%s3074_s20 + $0x50] sm:$0xff] %v2028_v27  ;;  %v2029_v49 = vpack.c.bf16 %v1418_v47, %v1416_v46 }
 0x2ac   : > { %1724 = vst [vmem:[%s3074_s20 + $0x58] sm:$0xff] %v2029_v49 }
 0x2ae   : > { %v1422_v52 = vpop.f32.mrb[56].mxu0 }
 0x2af   : > { %v1424_v55 = vpop.f32.mrb[57].mxu0 }
 0x2b0   : > { %v2030_v29 = vpack.c.bf16 %v1424_v55, %v1422_v52  ;;  %v1426_v40 = vpop.f32.mrb[58].mxu0 }
 0x2b1   : > { %v1428_v58 = vpop.f32.mrb[59].mxu0 }
 0x2b2   : > { %1725 = vst [vmem:[%s3074_s20 + $0x60] sm:$0xff] %v2030_v29  ;;  %v2031_v35 = vpack.c.bf16 %v1428_v58, %v1426_v40 }
 0x2b4   : > { %1726 = vst [vmem:[%s3074_s20 + $0x68] sm:$0xff] %v2031_v35 }
 0x2b6   : > { %v1432_v32 = vpop.f32.mrb[60].mxu0 }
 0x2b7   : > { %v1434_v59 = vpop.f32.mrb[61].mxu0 }
 0x2b8   : > { %v2032_v50 = vpack.c.bf16 %v1434_v59, %v1432_v32  ;;  %v1436_v62 = vpop.f32.mrb[62].mxu0 }
 0x2b9   : > { %v1438_v63 = vpop.f32.mrb[63].mxu0 }
 0x2ba   : > { %1727 = vst [vmem:[%s3074_s20 + $0x70] sm:$0xff] %v2032_v50  ;;  %v2033_v39 = vpack.c.bf16 %v1438_v63, %v1436_v62 }
 0x2bc   : > { %1728 = vst [vmem:[%s3074_s20 + $0x78] sm:$0xff] %v2033_v39 }
 0x2be   : > { %v1442_v0 = vpop.f32.mrb[64].mxu0 }
 0x2bf   : > { %v1444_v41 = vpop.f32.mrb[65].mxu0 }
 0x2c0   : > { %v2034_v3 = vpack.c.bf16 %v1444_v41, %v1442_v0  ;;  %v1446_v2 = vpop.f32.mrb[66].mxu0 }
 0x2c1   : > { %v1448_v45 = vpop.f32.mrb[67].mxu0 }
 0x2c2   : > { %1729 = vst [vmem:[%s3074_s20 + $0x80] sm:$0xff] %v2034_v3  ;;  %v2035_v51 = vpack.c.bf16 %v1448_v45, %v1446_v2 }
 0x2c4   : > { %1730 = vst [vmem:[%s3074_s20 + $0x88] sm:$0xff] %v2035_v51 }
 0x2c6   : > { %v1452_v4 = vpop.f32.mrb[68].mxu0 }
 0x2c7   : > { %v1454_v6 = vpop.f32.mrb[69].mxu0 }
 0x2c8   : > { %v2036_v9 = vpack.c.bf16 %v1454_v6, %v1452_v4  ;;  %v1456_v54 = vpop.f32.mrb[70].mxu0 }
 0x2c9   : > { %v1458_v48 = vpop.f32.mrb[71].mxu0 }
 0x2ca   : > { %1731 = vst [vmem:[%s3074_s20 + $0x90] sm:$0xff] %v2036_v9  ;;  %v2037_v12 = vpack.c.bf16 %v1458_v48, %v1456_v54 }
 0x2cc   : > { %1732 = vst [vmem:[%s3074_s20 + $0x98] sm:$0xff] %v2037_v12 }
 0x2ce   : > { %v1462_v56 = vpop.f32.mrb[72].mxu0 }
 0x2cf   : > { %v1464_v13 = vpop.f32.mrb[73].mxu0 }
 0x2d0   : > { %v2038_v16 = vpack.c.bf16 %v1464_v13, %v1462_v56  ;;  %v1466_v61 = vpop.f32.mrb[74].mxu0 }
 0x2d1   : > { %v1468_v53 = vpop.f32.mrb[75].mxu0 }
 0x2d2   : > { %1733 = vst [vmem:[%s3074_s20 + $0xa0] sm:$0xff] %v2038_v16  ;;  %v2039_v18 = vpack.c.bf16 %v1468_v53, %v1466_v61 }
 0x2d4   : > { %1734 = vst [vmem:[%s3074_s20 + $0xa8] sm:$0xff] %v2039_v18 }
 0x2d6   : > { %v1472_v57 = vpop.f32.mrb[76].mxu0 }
 0x2d7   : > { %v1474_v21 = vpop.f32.mrb[77].mxu0 }
 0x2d8   : > { %v2040_v22 = vpack.c.bf16 %v1474_v21, %v1472_v57  ;;  %v1476_v43 = vpop.f32.mrb[78].mxu0 }
 0x2d9   : > { %v1478_v10 = vpop.f32.mrb[79].mxu0 }
 0x2da   : > { %1735 = vst [vmem:[%s3074_s20 + $0xb0] sm:$0xff] %v2040_v22  ;;  %v2041_v14 = vpack.c.bf16 %v1478_v10, %v1476_v43 }
 0x2dc   : > { %1736 = vst [vmem:[%s3074_s20 + $0xb8] sm:$0xff] %v2041_v14 }
 0x2de   : > { %v1482_v11 = vpop.f32.mrb[80].mxu0 }
 0x2df   : > { %v1484_v60 = vpop.f32.mrb[81].mxu0 }
 0x2e0   : > { %v2042_v24 = vpack.c.bf16 %v1484_v60, %v1482_v11  ;;  %v1486_v26 = vpop.f32.mrb[82].mxu0 }
 0x2e1   : > { %v1488_v1 = vpop.f32.mrb[83].mxu0 }
 0x2e2   : > { %1737 = vst [vmem:[%s3074_s20 + $0xc0] sm:$0xff] %v2042_v24  ;;  %v2043_v28 = vpack.c.bf16 %v1488_v1, %v1486_v26 }
 0x2e4   : > { %1738 = vst [vmem:[%s3074_s20 + $0xc8] sm:$0xff] %v2043_v28 }
 0x2e6   : > { %v1492_v15 = vpop.f32.mrb[84].mxu0 }
 0x2e7   : > { %v1494_v30 = vpop.f32.mrb[85].mxu0 }
 0x2e8   : > { %v2044_v5 = vpack.c.bf16 %v1494_v30, %v1492_v15  ;;  %v1496_v7 = vpop.f32.mrb[86].mxu0 }
 0x2e9   : > { %v1498_v31 = vpop.f32.mrb[87].mxu0 }
 0x2ea   : > { %1739 = vst [vmem:[%s3074_s20 + $0xd0] sm:$0xff] %v2044_v5  ;;  %v2045_v33 = vpack.c.bf16 %v1498_v31, %v1496_v7 }
 0x2ec   : > { %1740 = vst [vmem:[%s3074_s20 + $0xd8] sm:$0xff] %v2045_v33 }
 0x2ee   : > { %v1502_v8 = vpop.f32.mrb[88].mxu0 }
 0x2ef   : > { %v1504_v34 = vpop.f32.mrb[89].mxu0 }
 0x2f0   : > { %v2046_v36 = vpack.c.bf16 %v1504_v34, %v1502_v8  ;;  %v1506_v37 = vpop.f32.mrb[90].mxu0 }
 0x2f1   : > { %v1508_v23 = vpop.f32.mrb[91].mxu0 }
 0x2f2   : > { %1741 = vst [vmem:[%s3074_s20 + $0xe0] sm:$0xff] %v2046_v36  ;;  %v2047_v19 = vpack.c.bf16 %v1508_v23, %v1506_v37 }
 0x2f4   : > { %1742 = vst [vmem:[%s3074_s20 + $0xe8] sm:$0xff] %v2047_v19 }
 0x2f6   : > { %v1512_v38 = vpop.f32.mrb[92].mxu0 }
 0x2f7   : > { %v1514_v17 = vpop.f32.mrb[93].mxu0 }
 0x2f8   : > { %v2048_v42 = vpack.c.bf16 %v1514_v17, %v1512_v38  ;;  %v1516_v44 = vpop.f32.mrb[94].mxu0 }
 0x2f9   : > { %v1518_v25 = vpop.f32.mrb[95].mxu0 }
 0x2fa   : > { %1743 = vst [vmem:[%s3074_s20 + $0xf0] sm:$0xff] %v2048_v42  ;;  %v2049_v20 = vpack.c.bf16 %v1518_v25, %v1516_v44 }
 0x2fc   : > { %1744 = vst [vmem:[%s3074_s20 + $0xf8] sm:$0xff] %v2049_v20 }
 0x2fd   : > { %2619 = shalt.err (!%p2616_p2)
}
 0x2fe   : > { %s2620_s17 = scalar_lea.hbm %s3111_s7, 4096  ;;  %s2624_s30 = scalar_lea.hbm %s3162_s3, 8192 }
 0x2ff   : > { %p2621_p13 = scmp.ne.s32.totalorder %s3111_s7, %s2620_s17  ;;  %p2625_p4 = scmp.lt.u32.totalorder %s3111_s7, %s3162_s3 }
 0x300   : > { %p2626_p7 = scmp.lt.u32.totalorder %s2624_s30, %s2620_s17  ;;  %p2628_p11 = scmp.lt.u32.totalorder %s2620_s17, %s3111_s7 }
 0x301   : > { %p2622_p6 = pnand %p2621_p13, %p3176_p0 }
 0x302   : > { %p2627_p8 = por %p2626_p7, %p2625_p4 }
 0x303   : > { %p2623_p10 = pneg %p2622_p6 }
 0x304   : > { %p2629_p1 = por %p2628_p11, %p2627_p8 }
 0x306   : > { %p2630_p3 = pnand %p2629_p1, %p2623_p10 }
 0x308   : > { %2633 = shalt.err (!%p2630_p3)
}
 0x309   : > { %s2689_s18 = smov 128   ;;  %s2690_s20 = smov 8  }
 0x30a   : > { %2302 = dma.vmem_to_hbm [thread:$0]  (%p3176_p0), %s3113_s27, 4096, %s3111_s7, %s1746_s8, %s2689_s18, %s2689_s18, %s2690_s20  }
 0x30b PF: > { %s1775_s24 = sand.u32 1, %s2664_s12   ;;  %p3177_p5 = scmp.ne.s32.totalorder %s3167_s19, 0 }
 0x30c   : > { %p3178_p9 = scmp.ge.s32.totalorder %s2676_s15, 2  ;;  %s1776_s28 = scalar_lea.sflag [#allocation4], %s1775_s24 }
 0x30e   : > { %p2316_p12 = pnand %p3178_p9, %p3177_p5 }
 0x310   : > { %2659 = dma.done.wait (!%p2316_p12), %s1776_s28, 4096  }
 0x311   : > { %2661 = vsyncadd (!%p2316_p12), %s1776_s28, 4294963200  ;;  %p17_p2 = scmp.ge.s32.totalorder %s2821_s6, 4   ;;  %s3179_s12 = smov %s2668_s13 }
 0x312   : > { %s3180_s13 = smov %s2672_s14  ;;  %s3181_s14 = smov %s2830_s9 }
 0x313   : > { %s3182_s15 = smov %s2821_s6  ;;  %19 = sbr.rel (!%p17_p2) target bundleno = 6 (0x6), region = 85 }
 0x31a   :  { %1781 = vsyncpa [#allocation3], 1 }
 0x31b   :  { %1783 = vsyncpa [#allocation3 + $0x1], 1 }
 0x31c   :  { %1784 = vsyncpa [#allocation6], 1 }
 0x31d   :  { %1785 = vsyncpa [#allocation4], 1 }
 0x31e   :  { %1787 = vsyncpa [#allocation4 + $0x1], 1 }

// kernel: vgae_forward.7
= control target key start
LH: loop header
LB: loop body
LE: loop exit
PB: predicated region body
PF: predicated region fallthrough
CT: control target
= control target key end

     0   :  { %7 = vsyncpa [#allocation3], 0  ;;  %s5409_s0 = inlined_call_operand.hbm [shape: f32[512,128], index: 0, kind: input, shape index: {}, may-alias: {0,1}]   ;;  %s5410_s1 = inlined_call_operand.hbm [shape: f32[512,128], index: 1, kind: input, shape index: {}, may-alias: {0,1}]   ;;  %s5411_s2 = inlined_call_operand.hbm [shape: f32[512,512], index: 2, kind: output, shape index: {}]  }
   0x1   :  { %8 = vsyncpa [#allocation6], 0 }
   0x2   :  { %9 = vsyncpa [#allocation4], 0  ;;  %s4619_s9 = smov [#allocation2]   ;;  %s4547_s13 = scalar_lea.hbm %s5409_s0, 8192 }
   0x3   :  { %s15_s10 = sshll.u32 %s4619_s9, 4  ;;  %p4548_p0 = scmp.ne.s32.totalorder %s5409_s0, %s4547_s13  ;;  %s16_s10 = int_to_ptr.vmem [resolvable:$true] %s15_s10 }
   0x4   :  { %p4551_p1 = scmp.lt.u32.totalorder %s4547_s13, %s5409_s0 }
   0x6   :  { %p4553_p2 = pnand %p4551_p1, %p4548_p0 }
   0x8   :  { %4556 = shalt.err (!%p4553_p2)
}
   0x9   :  { %s4557_s18 = scalar_lea.vmem %s16_s10, 8192  ;;  %p4562_p4 = scmp.lt.s32.totalorder %s16_s10, %s16_s10 }
   0xa   :  { %p4558_p3 = scmp.ne.s32.totalorder %s16_s10, %s4557_s18  ;;  %p4563_p5 = scmp.lt.s32.totalorder %s4557_s18, %s4557_s18 }
   0xc   :  { %p4564_p6 = por %p4563_p5, %p4562_p4 }
   0xe   :  { %p4565_p7 = pnand %p4564_p6, %p4558_p3 }
  0x10   :  { %4568 = shalt.err (!%p4565_p7)
}
  0x11   :  { %s4620_s19 = smov 128   ;;  %s4621_s20 = smov 8  }
  0x12   :  { %21 = dma.hbm_to_vmem [thread:$0]  %s5409_s0, 8192, %s16_s10, [#allocation3], %s4620_s19, %s4620_s19, %s4621_s20  }
  0x13   :  { %s4622_s23 = smov [#allocation5]   ;;  %s4569_s27 = scalar_lea.hbm %s5410_s1, 8192 }
  0x14   :  { %s27_s24 = sshll.u32 %s4622_s23, 4  ;;  %p4570_p8 = scmp.ne.s32.totalorder %s5410_s1, %s4569_s27  ;;  %s28_s24 = int_to_ptr.vmem [resolvable:$true] %s27_s24 }
  0x15   :  { %p4573_p9 = scmp.lt.u32.totalorder %s4569_s27, %s5410_s1 }
  0x17   :  { %p4575_p10 = pnand %p4573_p9, %p4570_p8 }
  0x19   :  { %4578 = shalt.err (!%p4575_p10)
}
  0x1a   :  { %s4579_s4 = scalar_lea.vmem %s28_s24, 8192  ;;  %p4584_p12 = scmp.lt.s32.totalorder %s28_s24, %s28_s24 }
  0x1b   :  { %p4580_p11 = scmp.ne.s32.totalorder %s28_s24, %s4579_s4  ;;  %p4585_p13 = scmp.lt.s32.totalorder %s4579_s4, %s4579_s4 }
  0x1d   :  { %p4586_p0 = por %p4585_p13, %p4584_p12 }
  0x1f   :  { %p4587_p1 = pnand %p4586_p0, %p4580_p11 }
  0x21   :  { %4590 = shalt.err (!%p4587_p1)
}
  0x22   :  { %33 = dma.hbm_to_vmem [thread:$0]  %s5410_s1, 8192, %s28_s24, [#allocation6], %s4620_s19, %s4620_s19, %s4621_s20  }
  0x23   :  { %4613 = dma.done.wait [#allocation3], 8192  }
  0x24   :  { %4614 = vsyncadd [#allocation3], 4294959104 }
  0x25   :  { %4615 = dma.done.wait [#allocation6], 8192  }
  0x26   :  { %4616 = vsyncadd [#allocation6], 4294959104  ;;  %v120_v0 = vld [vmem:[#allocation5 + $0x80] sm:$0xff]  ;;  %v121_v1 = vld [vmem:[#allocation5 + $0x88] sm:$0xff]  ;;  %s4623_s1 = smov [#allocation7]  }
  0x27   :  { %v152_v2 = vld [vmem:[#allocation5 + $0x180] sm:$0xff]  ;;  %v3452_v3 = vpack.c.bf16 %v121_v1, %v120_v0  ;;  %v153_v4 = vld [vmem:[#allocation5 + $0x188] sm:$0xff]  ;;  %v122_v11 = vld [vmem:[#allocation5 + $0x90] sm:$0xff]  ;;  %s2863_s6 = sshll.u32 %s4623_s1, 4  ;;  %s2864_s6 = int_to_ptr.vmem [resolvable:$true] %s2863_s6 }
  0x28   :  { %v104_v5 = vld [vmem:[#allocation5] sm:$0xff]  ;;  %v105_v6 = vld [vmem:[#allocation5 + $0x8] sm:$0xff]  ;;  %v3484_v7 = vpack.c.bf16 %v153_v4, %v152_v2  ;;  %v123_v13 = vld [vmem:[#allocation5 + $0x98] sm:$0xff]  ;;  %s4591_s7 = scalar_lea.vmem %s2864_s6, 32768  ;;  %p4596_p3 = scmp.lt.s32.totalorder %s2864_s6, %s2864_s6 }
  0x29   :  { %v3454_v8 = vpack.c.bf16 %v105_v6, %v104_v5  ;;  %v136_v9 = vld [vmem:[#allocation5 + $0x100] sm:$0xff]  ;;  %v137_v10 = vld [vmem:[#allocation5 + $0x108] sm:$0xff]  ;;  %3453 = vmatprep.subr.bf16.mxu0 %v3452_v3  ;;  %v154_v14 = vld [vmem:[#allocation5 + $0x190] sm:$0xff]  ;;  %v3456_v16 = vpack.c.bf16 %v123_v13, %v122_v11  ;;  %p4592_p2 = scmp.ne.s32.totalorder %s2864_s6, %s4591_s7  ;;  %p4597_p4 = scmp.lt.s32.totalorder %s4591_s7, %s4591_s7 }
  0x2a   :  { %v3486_v12 = vpack.c.bf16 %v137_v10, %v136_v9  ;;  %v155_v15 = vld [vmem:[#allocation5 + $0x198] sm:$0xff]  ;;  %3485 = vmatprep.subr.bf16.mxu1 %v3484_v7  ;;  %v106_v18 = vld [vmem:[#allocation5 + $0x10] sm:$0xff]  ;;  %v124_v22 = vld [vmem:[#allocation5 + $0xa0] sm:$0xff] }
  0x2b   :  { %3455 = vmatpush3.bf16.xpose.msra.mxu0 %v3454_v8  ;;  %v3488_v17 = vpack.c.bf16 %v155_v15, %v154_v14  ;;  %v107_v19 = vld [vmem:[#allocation5 + $0x18] sm:$0xff]  ;;  %v138_v20 = vld [vmem:[#allocation5 + $0x110] sm:$0xff]  ;;  %v125_v23 = vld [vmem:[#allocation5 + $0xa8] sm:$0xff]  ;;  %p4598_p5 = por %p4597_p4, %p4596_p3 }
  0x2c   :  { %3487 = vmatpush3.bf16.xpose.msra.mxu1 %v3486_v12  ;;  %3457 = vmatprep.subr.bf16.mxu0 %v3456_v16  ;;  %v139_v21 = vld [vmem:[#allocation5 + $0x118] sm:$0xff]  ;;  %v156_v24 = vld [vmem:[#allocation5 + $0x1a0] sm:$0xff]  ;;  %v157_v25 = vld [vmem:[#allocation5 + $0x1a8] sm:$0xff]  ;;  %v3458_v26 = vpack.c.bf16 %v107_v19, %v106_v18  ;;  %v3460_v28 = vpack.c.bf16 %v125_v23, %v124_v22 }
  0x2d   :  { %3489 = vmatprep.subr.bf16.mxu1 %v3488_v17  ;;  %v3490_v27 = vpack.c.bf16 %v139_v21, %v138_v20  ;;  %v3492_v29 = vpack.c.bf16 %v157_v25, %v156_v24  ;;  %v108_v30 = vld [vmem:[#allocation5 + $0x20] sm:$0xff]  ;;  %v109_v31 = vld [vmem:[#allocation5 + $0x28] sm:$0xff]  ;;  %v126_v34 = vld [vmem:[#allocation5 + $0xb0] sm:$0xff]  ;;  %p4599_p6 = pnand %p4598_p5, %p4592_p2 }
  0x2e   :  { %v140_v32 = vld [vmem:[#allocation5 + $0x120] sm:$0xff]  ;;  %v141_v33 = vld [vmem:[#allocation5 + $0x128] sm:$0xff]  ;;  %v127_v35 = vld [vmem:[#allocation5 + $0xb8] sm:$0xff]  ;;  %v3462_v38 = vpack.c.bf16 %v109_v31, %v108_v30 }
  0x2f   :  { %v158_v36 = vld [vmem:[#allocation5 + $0x1b0] sm:$0xff]  ;;  %v159_v37 = vld [vmem:[#allocation5 + $0x1b8] sm:$0xff]  ;;  %v3494_v39 = vpack.c.bf16 %v141_v33, %v140_v32  ;;  %v3464_v40 = vpack.c.bf16 %v127_v35, %v126_v34  ;;  %v4665_v45 = vld [vmem:[#allocation2] sm:$0xff] }
  0x30   :  { %v3496_v41 = vpack.c.bf16 %v159_v37, %v158_v36  ;;  %v110_v42 = vld [vmem:[#allocation5 + $0x30] sm:$0xff]  ;;  %v111_v43 = vld [vmem:[#allocation5 + $0x38] sm:$0xff]  ;;  %v128_v47 = vld [vmem:[#allocation5 + $0xc0] sm:$0xff]  ;;  %3164 = vmatprep.mubr.f32.mxu0 %v4665_v45  ;;  %3324 = vmatprep.mubr.f32.mxu1 %v4665_v45 }
  0x31   :  { %v142_v44 = vld [vmem:[#allocation5 + $0x130] sm:$0xff]  ;;  %v143_v46 = vld [vmem:[#allocation5 + $0x138] sm:$0xff]  ;;  %v129_v48 = vld [vmem:[#allocation5 + $0xc8] sm:$0xff]  ;;  %v3466_v51 = vpack.c.bf16 %v111_v43, %v110_v42 }
  0x32   :  { %v160_v49 = vld [vmem:[#allocation5 + $0x1c0] sm:$0xff]  ;;  %v161_v50 = vld [vmem:[#allocation5 + $0x1c8] sm:$0xff]  ;;  %v3498_v52 = vpack.c.bf16 %v143_v46, %v142_v44  ;;  %v3468_v53 = vpack.c.bf16 %v129_v48, %v128_v47  ;;  %v130_v59 = vld [vmem:[#allocation5 + $0xd0] sm:$0xff] }
  0x33   :  { %3459 = vmatpush3.bf16.xpose.msra.mxu0 %v3458_v26  ;;  %v3500_v54 = vpack.c.bf16 %v161_v50, %v160_v49  ;;  %v112_v55 = vld [vmem:[#allocation5 + $0x40] sm:$0xff]  ;;  %v113_v56 = vld [vmem:[#allocation5 + $0x48] sm:$0xff]  ;;  %v131_v60 = vld [vmem:[#allocation5 + $0xd8] sm:$0xff] }
  0x34   :  { %3491 = vmatpush3.bf16.xpose.msra.mxu1 %v3490_v27  ;;  %3461 = vmatprep.subr.bf16.mxu0 %v3460_v28  ;;  %v144_v57 = vld [vmem:[#allocation5 + $0x140] sm:$0xff]  ;;  %v145_v58 = vld [vmem:[#allocation5 + $0x148] sm:$0xff]  ;;  %v162_v61 = vld [vmem:[#allocation5 + $0x1d0] sm:$0xff]  ;;  %v3470_v63 = vpack.c.bf16 %v113_v56, %v112_v55  ;;  %v3472_v1 = vpack.c.bf16 %v131_v60, %v130_v59 }
  0x35   :  { %3493 = vmatprep.subr.bf16.mxu1 %v3492_v29  ;;  %v163_v62 = vld [vmem:[#allocation5 + $0x1d8] sm:$0xff]  ;;  %v3502_v0 = vpack.c.bf16 %v145_v58, %v144_v57  ;;  %v114_v3 = vld [vmem:[#allocation5 + $0x50] sm:$0xff]  ;;  %v132_v7 = vld [vmem:[#allocation5 + $0xe0] sm:$0xff] }
  0x36   :  { %v3504_v2 = vpack.c.bf16 %v163_v62, %v162_v61  ;;  %v115_v4 = vld [vmem:[#allocation5 + $0x58] sm:$0xff]  ;;  %v146_v5 = vld [vmem:[#allocation5 + $0x150] sm:$0xff]  ;;  %v133_v8 = vld [vmem:[#allocation5 + $0xe8] sm:$0xff] }
  0x37   :  { %v147_v6 = vld [vmem:[#allocation5 + $0x158] sm:$0xff]  ;;  %v164_v9 = vld [vmem:[#allocation5 + $0x1e0] sm:$0xff]  ;;  %v165_v10 = vld [vmem:[#allocation5 + $0x1e8] sm:$0xff]  ;;  %v3474_v11 = vpack.c.bf16 %v115_v4, %v114_v3  ;;  %v3476_v13 = vpack.c.bf16 %v133_v8, %v132_v7 }
  0x38   :  { %v3506_v12 = vpack.c.bf16 %v147_v6, %v146_v5  ;;  %v3508_v14 = vpack.c.bf16 %v165_v10, %v164_v9  ;;  %v116_v15 = vld [vmem:[#allocation5 + $0x60] sm:$0xff]  ;;  %v117_v16 = vld [vmem:[#allocation5 + $0x68] sm:$0xff]  ;;  %v134_v19 = vld [vmem:[#allocation5 + $0xf0] sm:$0xff] }
  0x39   :  { %v148_v17 = vld [vmem:[#allocation5 + $0x160] sm:$0xff]  ;;  %v149_v18 = vld [vmem:[#allocation5 + $0x168] sm:$0xff]  ;;  %v135_v20 = vld [vmem:[#allocation5 + $0xf8] sm:$0xff]  ;;  %v3478_v23 = vpack.c.bf16 %v117_v16, %v116_v15 }
  0x3a   :  { %v166_v21 = vld [vmem:[#allocation5 + $0x1f0] sm:$0xff]  ;;  %v167_v22 = vld [vmem:[#allocation5 + $0x1f8] sm:$0xff]  ;;  %v3510_v24 = vpack.c.bf16 %v149_v18, %v148_v17  ;;  %v3480_v25 = vpack.c.bf16 %v135_v20, %v134_v19  ;;  %v41_v33 = vld [vmem:[#allocation2 + $0x8] sm:$0xff] }
  0x3b   :  { %3463 = vmatpush3.bf16.xpose.msra.mxu0 %v3462_v38  ;;  %v3512_v26 = vpack.c.bf16 %v167_v22, %v166_v21  ;;  %v118_v27 = vld [vmem:[#allocation5 + $0x70] sm:$0xff]  ;;  %v119_v28 = vld [vmem:[#allocation5 + $0x78] sm:$0xff]  ;;  %v44_v36 = vld [vmem:[#allocation2 + $0x20] sm:$0xff] }
  0x3c   :  { %3495 = vmatpush3.bf16.xpose.msra.mxu1 %v3494_v39  ;;  %3465 = vmatprep.subr.bf16.mxu0 %v3464_v40  ;;  %v150_v29 = vld [vmem:[#allocation5 + $0x170] sm:$0xff]  ;;  %v151_v30 = vld [vmem:[#allocation5 + $0x178] sm:$0xff]  ;;  %v3482_v31 = vpack.c.bf16 %v119_v28, %v118_v27  ;;  %v45_v37 = vld [vmem:[#allocation2 + $0x28] sm:$0xff] }
  0x3d   :  { %3497 = vmatprep.subr.bf16.mxu1 %v3496_v41  ;;  %v3514_v32 = vpack.c.bf16 %v151_v30, %v150_v29  ;;  %v42_v34 = vld [vmem:[#allocation2 + $0x10] sm:$0xff]  ;;  %v43_v35 = vld [vmem:[#allocation2 + $0x18] sm:$0xff]  ;;  %v48_v40 = vld [vmem:[#allocation2 + $0x40] sm:$0xff] }
  0x3e   :  { %v46_v38 = vld [vmem:[#allocation2 + $0x30] sm:$0xff]  ;;  %v47_v39 = vld [vmem:[#allocation2 + $0x38] sm:$0xff]  ;;  %v49_v41 = vld [vmem:[#allocation2 + $0x48] sm:$0xff] }
  0x3f   :  { %v50_v42 = vld [vmem:[#allocation2 + $0x50] sm:$0xff]  ;;  %v51_v43 = vld [vmem:[#allocation2 + $0x58] sm:$0xff]  ;;  %v52_v44 = vld [vmem:[#allocation2 + $0x60] sm:$0xff] }
  0x40   :  { %v54_v46 = vld [vmem:[#allocation2 + $0x70] sm:$0xff]  ;;  %v55_v47 = vld [vmem:[#allocation2 + $0x78] sm:$0xff]  ;;  %v56_v48 = vld [vmem:[#allocation2 + $0x80] sm:$0xff] }
  0x41   :  { %v57_v49 = vld [vmem:[#allocation2 + $0x88] sm:$0xff]  ;;  %v58_v50 = vld [vmem:[#allocation2 + $0x90] sm:$0xff]  ;;  %v63_v55 = vld [vmem:[#allocation2 + $0xb8] sm:$0xff] }
  0x42   :  { %v64_v56 = vld [vmem:[#allocation2 + $0xc0] sm:$0xff]  ;;  %v65_v57 = vld [vmem:[#allocation2 + $0xc8] sm:$0xff]  ;;  %v66_v58 = vld [vmem:[#allocation2 + $0xd0] sm:$0xff] }
  0x43   :  { %3467 = vmatpush3.bf16.xpose.msra.mxu0 %v3466_v51  ;;  %v59_v51 = vld [vmem:[#allocation2 + $0x98] sm:$0xff]  ;;  %v68_v60 = vld [vmem:[#allocation2 + $0xe0] sm:$0xff]  ;;  %v69_v61 = vld [vmem:[#allocation2 + $0xe8] sm:$0xff] }
  0x44   :  { %3499 = vmatpush3.bf16.xpose.msra.mxu1 %v3498_v52  ;;  %3469 = vmatprep.subr.bf16.mxu0 %v3468_v53  ;;  %v60_v52 = vld [vmem:[#allocation2 + $0xa0] sm:$0xff]  ;;  %v61_v53 = vld [vmem:[#allocation2 + $0xa8] sm:$0xff]  ;;  %v67_v59 = vld [vmem:[#allocation2 + $0xd8] sm:$0xff] }
  0x45   :  { %3501 = vmatprep.subr.bf16.mxu1 %v3500_v54  ;;  %v62_v54 = vld [vmem:[#allocation2 + $0xb0] sm:$0xff]  ;;  %v75_v3 = vld [vmem:[#allocation2 + $0x118] sm:$0xff]  ;;  %v76_v4 = vld [vmem:[#allocation2 + $0x120] sm:$0xff] }
  0x46   :  { %v70_v62 = vld [vmem:[#allocation2 + $0xf0] sm:$0xff]  ;;  %v77_v5 = vld [vmem:[#allocation2 + $0x128] sm:$0xff]  ;;  %v79_v7 = vld [vmem:[#allocation2 + $0x138] sm:$0xff] }
  0x47   :  { %v78_v6 = vld [vmem:[#allocation2 + $0x130] sm:$0xff]  ;;  %v80_v8 = vld [vmem:[#allocation2 + $0x140] sm:$0xff]  ;;  %v81_v9 = vld [vmem:[#allocation2 + $0x148] sm:$0xff] }
  0x48   :  { %v82_v10 = vld [vmem:[#allocation2 + $0x150] sm:$0xff]  ;;  %v87_v15 = vld [vmem:[#allocation2 + $0x178] sm:$0xff]  ;;  %v88_v16 = vld [vmem:[#allocation2 + $0x180] sm:$0xff] }
  0x49   :  { %v89_v17 = vld [vmem:[#allocation2 + $0x188] sm:$0xff]  ;;  %v90_v18 = vld [vmem:[#allocation2 + $0x190] sm:$0xff]  ;;  %v91_v19 = vld [vmem:[#allocation2 + $0x198] sm:$0xff] }
  0x4a   :  { %v92_v20 = vld [vmem:[#allocation2 + $0x1a0] sm:$0xff]  ;;  %v93_v21 = vld [vmem:[#allocation2 + $0x1a8] sm:$0xff]  ;;  %v94_v22 = vld [vmem:[#allocation2 + $0x1b0] sm:$0xff] }
  0x4b   :  { %3471 = vmatpush3.bf16.xpose.msra.mxu0 %v3470_v63  ;;  %v71_v63 = vld [vmem:[#allocation2 + $0xf8] sm:$0xff] }
  0x4c   :  { %3503 = vmatpush3.bf16.xpose.msra.mxu1 %v3502_v0  ;;  %3473 = vmatprep.subr.bf16.mxu0 %v3472_v1  ;;  %v72_v0 = vld [vmem:[#allocation2 + $0x100] sm:$0xff]  ;;  %v73_v1 = vld [vmem:[#allocation2 + $0x108] sm:$0xff] }
  0x4d   :  { %3505 = vmatprep.subr.bf16.mxu1 %v3504_v2  ;;  %v74_v2 = vld [vmem:[#allocation2 + $0x110] sm:$0xff] }
  0x53   :  { %3475 = vmatpush3.bf16.xpose.msra.mxu0 %v3474_v11  ;;  %v83_v11 = vld [vmem:[#allocation2 + $0x158] sm:$0xff] }
  0x54   :  { %3507 = vmatpush3.bf16.xpose.msra.mxu1 %v3506_v12  ;;  %3477 = vmatprep.subr.bf16.mxu0 %v3476_v13  ;;  %v84_v12 = vld [vmem:[#allocation2 + $0x160] sm:$0xff]  ;;  %v85_v13 = vld [vmem:[#allocation2 + $0x168] sm:$0xff] }
  0x55   :  { %3509 = vmatprep.subr.bf16.mxu1 %v3508_v14  ;;  %v86_v14 = vld [vmem:[#allocation2 + $0x170] sm:$0xff] }
  0x5b   :  { %3479 = vmatpush3.bf16.xpose.msra.mxu0 %v3478_v23 }
  0x5c   :  { %3511 = vmatpush3.bf16.xpose.msra.mxu1 %v3510_v24  ;;  %3481 = vmatprep.subr.bf16.mxu0 %v3480_v25 }
  0x5d   :  { %3513 = vmatprep.subr.bf16.mxu1 %v3512_v26 }
  0x63   :  { %3483 = vmatpush3.bf16.xpose.msra.mxu0 %v3482_v31  ;;  %v95_v31 = vld [vmem:[#allocation2 + $0x1b8] sm:$0xff] }
  0x64   :  { %3515 = vmatpush3.bf16.xpose.msra.mxu1 %v3514_v32 }
  0x6a   :  { %3165 = vmatmul.mubr.f32.vlgmr.msra.gmra.mrb[0].mxu0 %v4665_v45 }
  0x6b   :  { %3325 = vmatmul.mubr.f32.vlgmr.msra.gmra.mrb[0].mxu1 %v4665_v45  ;;  %3166 = vmatprep.mubr.f32.mxu0 %v41_v33  ;;  %v53_v45 = vld [vmem:[#allocation2 + $0x68] sm:$0xff] }
  0x6c   :  { %3326 = vmatprep.mubr.f32.mxu1 %v41_v33 }
  0x6e   :  { %3167 = vmatmul.mubr.f32.gmra.mrb[2].mxu0 %v41_v33 }
  0x6f   :  { %3327 = vmatmul.mubr.f32.gmra.mrb[2].mxu1 %v41_v33  ;;  %3168 = vmatprep.mubr.f32.mxu0 %v42_v34 }
  0x70   :  { %3328 = vmatprep.mubr.f32.mxu1 %v42_v34 }
  0x72   :  { %3169 = vmatmul.mubr.f32.gmra.mrb[4].mxu0 %v42_v34 }
  0x73   :  { %3329 = vmatmul.mubr.f32.gmra.mrb[4].mxu1 %v42_v34  ;;  %3170 = vmatprep.mubr.f32.mxu0 %v43_v35 }
  0x74   :  { %3330 = vmatprep.mubr.f32.mxu1 %v43_v35 }
  0x76   :  { %3171 = vmatmul.mubr.f32.gmra.mrb[6].mxu0 %v43_v35 }
  0x77   :  { %3331 = vmatmul.mubr.f32.gmra.mrb[6].mxu1 %v43_v35  ;;  %3172 = vmatprep.mubr.f32.mxu0 %v44_v36 }
  0x78   :  { %3332 = vmatprep.mubr.f32.mxu1 %v44_v36 }
  0x7a   :  { %3173 = vmatmul.mubr.f32.gmra.mrb[8].mxu0 %v44_v36 }
  0x7b   :  { %3333 = vmatmul.mubr.f32.gmra.mrb[8].mxu1 %v44_v36  ;;  %3174 = vmatprep.mubr.f32.mxu0 %v45_v37 }
  0x7c   :  { %3334 = vmatprep.mubr.f32.mxu1 %v45_v37 }
  0x7e   :  { %3175 = vmatmul.mubr.f32.gmra.mrb[10].mxu0 %v45_v37 }
  0x7f   :  { %3335 = vmatmul.mubr.f32.gmra.mrb[10].mxu1 %v45_v37  ;;  %3176 = vmatprep.mubr.f32.mxu0 %v46_v38 }
  0x80   :  { %3336 = vmatprep.mubr.f32.mxu1 %v46_v38 }
  0x82   :  { %3177 = vmatmul.mubr.f32.gmra.mrb[12].mxu0 %v46_v38 }
  0x83   :  { %3337 = vmatmul.mubr.f32.gmra.mrb[12].mxu1 %v46_v38  ;;  %3178 = vmatprep.mubr.f32.mxu0 %v47_v39 }
  0x84   :  { %3338 = vmatprep.mubr.f32.mxu1 %v47_v39 }
  0x86   :  { %3179 = vmatmul.mubr.f32.gmra.mrb[14].mxu0 %v47_v39 }
  0x87   :  { %3339 = vmatmul.mubr.f32.gmra.mrb[14].mxu1 %v47_v39  ;;  %3180 = vmatprep.mubr.f32.mxu0 %v48_v40 }
  0x88   :  { %3340 = vmatprep.mubr.f32.mxu1 %v48_v40 }
  0x8a   :  { %3181 = vmatmul.mubr.f32.gmra.mrb[16].mxu0 %v48_v40 }
  0x8b   :  { %3341 = vmatmul.mubr.f32.gmra.mrb[16].mxu1 %v48_v40  ;;  %3182 = vmatprep.mubr.f32.mxu0 %v49_v41  ;;  %v96_v40 = vld [vmem:[#allocation2 + $0x1c0] sm:$0xff] }
  0x8c   :  { %3342 = vmatprep.mubr.f32.mxu1 %v49_v41 }
  0x8e   :  { %3183 = vmatmul.mubr.f32.gmra.mrb[18].mxu0 %v49_v41 }
  0x8f   :  { %3343 = vmatmul.mubr.f32.gmra.mrb[18].mxu1 %v49_v41  ;;  %3184 = vmatprep.mubr.f32.mxu0 %v50_v42 }
  0x90   :  { %3344 = vmatprep.mubr.f32.mxu1 %v50_v42 }
  0x92   :  { %3185 = vmatmul.mubr.f32.gmra.mrb[20].mxu0 %v50_v42 }
  0x93   :  { %3345 = vmatmul.mubr.f32.gmra.mrb[20].mxu1 %v50_v42  ;;  %3186 = vmatprep.mubr.f32.mxu0 %v51_v43 }
  0x94   :  { %3346 = vmatprep.mubr.f32.mxu1 %v51_v43 }
  0x96   :  { %3187 = vmatmul.mubr.f32.gmra.mrb[22].mxu0 %v51_v43 }
  0x97   :  { %3347 = vmatmul.mubr.f32.gmra.mrb[22].mxu1 %v51_v43  ;;  %3188 = vmatprep.mubr.f32.mxu0 %v52_v44 }
  0x98   :  { %3348 = vmatprep.mubr.f32.mxu1 %v52_v44 }
  0x9a   :  { %3189 = vmatmul.mubr.f32.gmra.mrb[24].mxu0 %v52_v44 }
  0x9b   :  { %3349 = vmatmul.mubr.f32.gmra.mrb[24].mxu1 %v52_v44  ;;  %3190 = vmatprep.mubr.f32.mxu0 %v53_v45 }
  0x9c   :  { %3350 = vmatprep.mubr.f32.mxu1 %v53_v45 }
  0x9e   :  { %3191 = vmatmul.mubr.f32.gmra.mrb[26].mxu0 %v53_v45 }
  0x9f   :  { %3351 = vmatmul.mubr.f32.gmra.mrb[26].mxu1 %v53_v45  ;;  %3192 = vmatprep.mubr.f32.mxu0 %v54_v46 }
  0xa0   :  { %3352 = vmatprep.mubr.f32.mxu1 %v54_v46 }
  0xa2   :  { %3193 = vmatmul.mubr.f32.gmra.mrb[28].mxu0 %v54_v46 }
  0xa3   :  { %3353 = vmatmul.mubr.f32.gmra.mrb[28].mxu1 %v54_v46  ;;  %3194 = vmatprep.mubr.f32.mxu0 %v55_v47 }
  0xa4   :  { %3354 = vmatprep.mubr.f32.mxu1 %v55_v47 }
  0xa6   :  { %3195 = vmatmul.mubr.f32.gmra.mrb[30].mxu0 %v55_v47 }
  0xa7   :  { %3355 = vmatmul.mubr.f32.gmra.mrb[30].mxu1 %v55_v47  ;;  %3196 = vmatprep.mubr.f32.mxu0 %v56_v48 }
  0xa8   :  { %3356 = vmatprep.mubr.f32.mxu1 %v56_v48 }
  0xaa   :  { %3197 = vmatmul.mubr.f32.gmra.mrb[32].mxu0 %v56_v48 }
  0xab   :  { %3357 = vmatmul.mubr.f32.gmra.mrb[32].mxu1 %v56_v48  ;;  %3198 = vmatprep.mubr.f32.mxu0 %v57_v49 }
  0xac   :  { %3358 = vmatprep.mubr.f32.mxu1 %v57_v49 }
  0xae   :  { %3199 = vmatmul.mubr.f32.gmra.mrb[34].mxu0 %v57_v49 }
  0xaf   :  { %3359 = vmatmul.mubr.f32.gmra.mrb[34].mxu1 %v57_v49  ;;  %3200 = vmatprep.mubr.f32.mxu0 %v58_v50  ;;  %v97_v49 = vld [vmem:[#allocation2 + $0x1c8] sm:$0xff] }
  0xb0   :  { %3360 = vmatprep.mubr.f32.mxu1 %v58_v50 }
  0xb2   :  { %3201 = vmatmul.mubr.f32.gmra.mrb[36].mxu0 %v58_v50 }
  0xb3   :  { %3361 = vmatmul.mubr.f32.gmra.mrb[36].mxu1 %v58_v50  ;;  %3202 = vmatprep.mubr.f32.mxu0 %v59_v51 }
  0xb4   :  { %3362 = vmatprep.mubr.f32.mxu1 %v59_v51 }
  0xb6   :  { %3203 = vmatmul.mubr.f32.gmra.mrb[38].mxu0 %v59_v51 }
  0xb7   :  { %3363 = vmatmul.mubr.f32.gmra.mrb[38].mxu1 %v59_v51  ;;  %3204 = vmatprep.mubr.f32.mxu0 %v60_v52 }
  0xb8   :  { %3364 = vmatprep.mubr.f32.mxu1 %v60_v52 }
  0xba   :  { %3205 = vmatmul.mubr.f32.gmra.mrb[40].mxu0 %v60_v52 }
  0xbb   :  { %3365 = vmatmul.mubr.f32.gmra.mrb[40].mxu1 %v60_v52  ;;  %3206 = vmatprep.mubr.f32.mxu0 %v61_v53 }
  0xbc   :  { %3366 = vmatprep.mubr.f32.mxu1 %v61_v53 }
  0xbe   :  { %3207 = vmatmul.mubr.f32.gmra.mrb[42].mxu0 %v61_v53 }
  0xbf   :  { %3367 = vmatmul.mubr.f32.gmra.mrb[42].mxu1 %v61_v53  ;;  %3208 = vmatprep.mubr.f32.mxu0 %v62_v54 }
  0xc0   :  { %3368 = vmatprep.mubr.f32.mxu1 %v62_v54 }
  0xc2   :  { %3209 = vmatmul.mubr.f32.gmra.mrb[44].mxu0 %v62_v54 }
  0xc3   :  { %3369 = vmatmul.mubr.f32.gmra.mrb[44].mxu1 %v62_v54  ;;  %3210 = vmatprep.mubr.f32.mxu0 %v63_v55 }
  0xc4   :  { %3370 = vmatprep.mubr.f32.mxu1 %v63_v55 }
  0xc6   :  { %3211 = vmatmul.mubr.f32.gmra.mrb[46].mxu0 %v63_v55 }
  0xc7   :  { %3371 = vmatmul.mubr.f32.gmra.mrb[46].mxu1 %v63_v55  ;;  %3212 = vmatprep.mubr.f32.mxu0 %v64_v56 }
  0xc8   :  { %3372 = vmatprep.mubr.f32.mxu1 %v64_v56 }
  0xca   :  { %3213 = vmatmul.mubr.f32.gmra.mrb[48].mxu0 %v64_v56 }
  0xcb   :  { %3373 = vmatmul.mubr.f32.gmra.mrb[48].mxu1 %v64_v56  ;;  %3214 = vmatprep.mubr.f32.mxu0 %v65_v57 }
  0xcc   :  { %3374 = vmatprep.mubr.f32.mxu1 %v65_v57 }
  0xce   :  { %3215 = vmatmul.mubr.f32.gmra.mrb[50].mxu0 %v65_v57 }
  0xcf   :  { %3375 = vmatmul.mubr.f32.gmra.mrb[50].mxu1 %v65_v57  ;;  %3216 = vmatprep.mubr.f32.mxu0 %v66_v58 }
  0xd0   :  { %3376 = vmatprep.mubr.f32.mxu1 %v66_v58 }
  0xd2   :  { %3217 = vmatmul.mubr.f32.gmra.mrb[52].mxu0 %v66_v58 }
  0xd3   :  { %3377 = vmatmul.mubr.f32.gmra.mrb[52].mxu1 %v66_v58  ;;  %3218 = vmatprep.mubr.f32.mxu0 %v67_v59 }
  0xd4   :  { %3378 = vmatprep.mubr.f32.mxu1 %v67_v59 }
  0xd6   :  { %3219 = vmatmul.mubr.f32.gmra.mrb[54].mxu0 %v67_v59 }
  0xd7   :  { %3379 = vmatmul.mubr.f32.gmra.mrb[54].mxu1 %v67_v59  ;;  %3220 = vmatprep.mubr.f32.mxu0 %v68_v60 }
  0xd8   :  { %3380 = vmatprep.mubr.f32.mxu1 %v68_v60 }
  0xda   :  { %3221 = vmatmul.mubr.f32.gmra.mrb[56].mxu0 %v68_v60 }
  0xdb   :  { %3381 = vmatmul.mubr.f32.gmra.mrb[56].mxu1 %v68_v60  ;;  %3222 = vmatprep.mubr.f32.mxu0 %v69_v61  ;;  %v98_v60 = vld [vmem:[#allocation2 + $0x1d0] sm:$0xff] }
  0xdc   :  { %3382 = vmatprep.mubr.f32.mxu1 %v69_v61 }
  0xde   :  { %3223 = vmatmul.mubr.f32.gmra.mrb[58].mxu0 %v69_v61 }
  0xdf   :  { %3383 = vmatmul.mubr.f32.gmra.mrb[58].mxu1 %v69_v61  ;;  %3224 = vmatprep.mubr.f32.mxu0 %v70_v62 }
  0xe0   :  { %3384 = vmatprep.mubr.f32.mxu1 %v70_v62 }
  0xe2   :  { %3225 = vmatmul.mubr.f32.gmra.mrb[60].mxu0 %v70_v62 }
  0xe3   :  { %3385 = vmatmul.mubr.f32.gmra.mrb[60].mxu1 %v70_v62  ;;  %3226 = vmatprep.mubr.f32.mxu0 %v71_v63 }
  0xe4   :  { %3386 = vmatprep.mubr.f32.mxu1 %v71_v63 }
  0xe6   :  { %3227 = vmatmul.mubr.f32.gmra.mrb[62].mxu0 %v71_v63 }
  0xe7   :  { %3387 = vmatmul.mubr.f32.gmra.mrb[62].mxu1 %v71_v63  ;;  %3228 = vmatprep.mubr.f32.mxu0 %v72_v0 }
  0xe8   :  { %3388 = vmatprep.mubr.f32.mxu1 %v72_v0 }
  0xea   :  { %3229 = vmatmul.mubr.f32.gmra.mrb[64].mxu0 %v72_v0 }
  0xeb   :  { %3389 = vmatmul.mubr.f32.gmra.mrb[64].mxu1 %v72_v0  ;;  %3230 = vmatprep.mubr.f32.mxu0 %v73_v1 }
  0xec   :  { %3390 = vmatprep.mubr.f32.mxu1 %v73_v1 }
  0xee   :  { %3231 = vmatmul.mubr.f32.gmra.mrb[66].mxu0 %v73_v1 }
  0xef   :  { %3391 = vmatmul.mubr.f32.gmra.mrb[66].mxu1 %v73_v1  ;;  %3232 = vmatprep.mubr.f32.mxu0 %v74_v2 }
  0xf0   :  { %3392 = vmatprep.mubr.f32.mxu1 %v74_v2 }
  0xf2   :  { %3233 = vmatmul.mubr.f32.gmra.mrb[68].mxu0 %v74_v2 }
  0xf3   :  { %3393 = vmatmul.mubr.f32.gmra.mrb[68].mxu1 %v74_v2  ;;  %3234 = vmatprep.mubr.f32.mxu0 %v75_v3 }
  0xf4   :  { %3394 = vmatprep.mubr.f32.mxu1 %v75_v3 }
  0xf6   :  { %3235 = vmatmul.mubr.f32.gmra.mrb[70].mxu0 %v75_v3 }
  0xf7   :  { %3395 = vmatmul.mubr.f32.gmra.mrb[70].mxu1 %v75_v3  ;;  %3236 = vmatprep.mubr.f32.mxu0 %v76_v4 }
  0xf8   :  { %3396 = vmatprep.mubr.f32.mxu1 %v76_v4 }
  0xfa   :  { %3237 = vmatmul.mubr.f32.gmra.mrb[72].mxu0 %v76_v4 }
  0xfb   :  { %3397 = vmatmul.mubr.f32.gmra.mrb[72].mxu1 %v76_v4  ;;  %3238 = vmatprep.mubr.f32.mxu0 %v77_v5 }
  0xfc   :  { %3398 = vmatprep.mubr.f32.mxu1 %v77_v5 }
  0xfe   :  { %3239 = vmatmul.mubr.f32.gmra.mrb[74].mxu0 %v77_v5 }
  0xff   :  { %3399 = vmatmul.mubr.f32.gmra.mrb[74].mxu1 %v77_v5  ;;  %3240 = vmatprep.mubr.f32.mxu0 %v78_v6 }
 0x100   :  { %3400 = vmatprep.mubr.f32.mxu1 %v78_v6 }
 0x102   :  { %3241 = vmatmul.mubr.f32.gmra.mrb[76].mxu0 %v78_v6 }
 0x103   :  { %3401 = vmatmul.mubr.f32.gmra.mrb[76].mxu1 %v78_v6  ;;  %3242 = vmatprep.mubr.f32.mxu0 %v79_v7 }
 0x104   :  { %3402 = vmatprep.mubr.f32.mxu1 %v79_v7 }
 0x106   :  { %3243 = vmatmul.mubr.f32.gmra.mrb[78].mxu0 %v79_v7 }
 0x107   :  { %3403 = vmatmul.mubr.f32.gmra.mrb[78].mxu1 %v79_v7  ;;  %3244 = vmatprep.mubr.f32.mxu0 %v80_v8 }
 0x108   :  { %3404 = vmatprep.mubr.f32.mxu1 %v80_v8 }
 0x10a   :  { %3245 = vmatmul.mubr.f32.gmra.mrb[80].mxu0 %v80_v8 }
 0x10b   :  { %3405 = vmatmul.mubr.f32.gmra.mrb[80].mxu1 %v80_v8  ;;  %3246 = vmatprep.mubr.f32.mxu0 %v81_v9 }
 0x10c   :  { %3406 = vmatprep.mubr.f32.mxu1 %v81_v9 }
 0x10e   :  { %3247 = vmatmul.mubr.f32.gmra.mrb[82].mxu0 %v81_v9 }
 0x10f   :  { %3407 = vmatmul.mubr.f32.gmra.mrb[82].mxu1 %v81_v9  ;;  %3248 = vmatprep.mubr.f32.mxu0 %v82_v10  ;;  %v99_v9 = vld [vmem:[#allocation2 + $0x1d8] sm:$0xff] }
 0x110   :  { %3408 = vmatprep.mubr.f32.mxu1 %v82_v10 }
 0x112   :  { %3249 = vmatmul.mubr.f32.gmra.mrb[84].mxu0 %v82_v10 }
 0x113   :  { %3409 = vmatmul.mubr.f32.gmra.mrb[84].mxu1 %v82_v10  ;;  %3250 = vmatprep.mubr.f32.mxu0 %v83_v11 }
 0x114   :  { %3410 = vmatprep.mubr.f32.mxu1 %v83_v11 }
 0x116   :  { %3251 = vmatmul.mubr.f32.gmra.mrb[86].mxu0 %v83_v11 }
 0x117   :  { %3411 = vmatmul.mubr.f32.gmra.mrb[86].mxu1 %v83_v11  ;;  %3252 = vmatprep.mubr.f32.mxu0 %v84_v12 }
 0x118   :  { %3412 = vmatprep.mubr.f32.mxu1 %v84_v12 }
 0x11a   :  { %3253 = vmatmul.mubr.f32.gmra.mrb[88].mxu0 %v84_v12 }
 0x11b   :  { %3413 = vmatmul.mubr.f32.gmra.mrb[88].mxu1 %v84_v12  ;;  %3254 = vmatprep.mubr.f32.mxu0 %v85_v13 }
 0x11c   :  { %3414 = vmatprep.mubr.f32.mxu1 %v85_v13 }
 0x11e   :  { %3255 = vmatmul.mubr.f32.gmra.mrb[90].mxu0 %v85_v13 }
 0x11f   :  { %3415 = vmatmul.mubr.f32.gmra.mrb[90].mxu1 %v85_v13  ;;  %3256 = vmatprep.mubr.f32.mxu0 %v86_v14 }
 0x120   :  { %3416 = vmatprep.mubr.f32.mxu1 %v86_v14 }
 0x122   :  { %3257 = vmatmul.mubr.f32.gmra.mrb[92].mxu0 %v86_v14 }
 0x123   :  { %3417 = vmatmul.mubr.f32.gmra.mrb[92].mxu1 %v86_v14  ;;  %3258 = vmatprep.mubr.f32.mxu0 %v87_v15 }
 0x124   :  { %3418 = vmatprep.mubr.f32.mxu1 %v87_v15 }
 0x126   :  { %3259 = vmatmul.mubr.f32.gmra.mrb[94].mxu0 %v87_v15 }
 0x127   :  { %3419 = vmatmul.mubr.f32.gmra.mrb[94].mxu1 %v87_v15  ;;  %3260 = vmatprep.mubr.f32.mxu0 %v88_v16 }
 0x128   :  { %3420 = vmatprep.mubr.f32.mxu1 %v88_v16 }
 0x12a   :  { %3261 = vmatmul.mubr.f32.gmra.mrb[96].mxu0 %v88_v16 }
 0x12b   :  { %3421 = vmatmul.mubr.f32.gmra.mrb[96].mxu1 %v88_v16  ;;  %3262 = vmatprep.mubr.f32.mxu0 %v89_v17 }
 0x12c   :  { %3422 = vmatprep.mubr.f32.mxu1 %v89_v17 }
 0x12e   :  { %3263 = vmatmul.mubr.f32.gmra.mrb[98].mxu0 %v89_v17 }
 0x12f   :  { %3423 = vmatmul.mubr.f32.gmra.mrb[98].mxu1 %v89_v17  ;;  %3264 = vmatprep.mubr.f32.mxu0 %v90_v18 }
 0x130   :  { %3424 = vmatprep.mubr.f32.mxu1 %v90_v18 }
 0x132   :  { %3265 = vmatmul.mubr.f32.gmra.mrb[100].mxu0 %v90_v18 }
 0x133   :  { %3425 = vmatmul.mubr.f32.gmra.mrb[100].mxu1 %v90_v18  ;;  %3266 = vmatprep.mubr.f32.mxu0 %v91_v19 }
 0x134   :  { %3426 = vmatprep.mubr.f32.mxu1 %v91_v19 }
 0x136   :  { %3267 = vmatmul.mubr.f32.gmra.mrb[102].mxu0 %v91_v19 }
 0x137   :  { %3427 = vmatmul.mubr.f32.gmra.mrb[102].mxu1 %v91_v19  ;;  %3268 = vmatprep.mubr.f32.mxu0 %v92_v20 }
 0x138   :  { %3428 = vmatprep.mubr.f32.mxu1 %v92_v20 }
 0x13a   :  { %3269 = vmatmul.mubr.f32.gmra.mrb[104].mxu0 %v92_v20 }
 0x13b   :  { %3429 = vmatmul.mubr.f32.gmra.mrb[104].mxu1 %v92_v20  ;;  %3270 = vmatprep.mubr.f32.mxu0 %v93_v21 }
 0x13c   :  { %3430 = vmatprep.mubr.f32.mxu1 %v93_v21 }
 0x13d   :  { %v234_v23 = vpop.f32.mrb[0].mxu0 }
 0x13e   :  { %v2876_v24 = vmul.f32 -1.442695, %v234_v23  ;;  %v683_v25 = vpop.f32.mrb[0].mxu1  ;;  %v236_v26 = vpop.f32.mrb[1].mxu0  ;;  %3271 = vmatmul.mubr.f32.gmra.mrb[106].mxu0 %v93_v21 }
 0x13f   :  { %v2878_v27 = vmul.f32 -1.442695, %v683_v25  ;;  %v2877_v28 = vmul.f32 -1.442695, %v236_v26  ;;  %v685_v29 = vpop.f32.mrb[1].mxu1  ;;  %3431 = vmatmul.mubr.f32.gmra.mrb[106].mxu1 %v93_v21  ;;  %3272 = vmatprep.mubr.f32.mxu0 %v94_v22 }
 0x140   :  { %3523 = vpow2.f32 %v2876_v24  ;;  %v2879_v30 = vmul.f32 -1.442695, %v685_v29  ;;  %3432 = vmatprep.mubr.f32.mxu1 %v94_v22 }
 0x141   :  { %3525 = vpow2.f32 %v2878_v27  ;;  %v240_v32 = vpop.f32.mrb[2].mxu0 }
 0x142   :  { %3527 = vpow2.f32 %v2877_v28  ;;  %v2880_v33 = vmul.f32 -1.442695, %v240_v32  ;;  %v689_v34 = vpop.f32.mrb[2].mxu1  ;;  %v242_v35 = vpop.f32.mrb[3].mxu0  ;;  %3273 = vmatmul.mubr.f32.gmra.mrb[108].mxu0 %v94_v22 }
 0x143   :  { %3529 = vpow2.f32 %v2879_v30  ;;  %v2882_v36 = vmul.f32 -1.442695, %v689_v34  ;;  %v2881_v37 = vmul.f32 -1.442695, %v242_v35  ;;  %v691_v38 = vpop.f32.mrb[3].mxu1  ;;  %3433 = vmatmul.mubr.f32.gmra.mrb[108].mxu1 %v94_v22  ;;  %3274 = vmatprep.mubr.f32.mxu0 %v95_v31  ;;  %v100_v22 = vld [vmem:[#allocation2 + $0x1e0] sm:$0xff] }
 0x144   :  { %3531 = vpow2.f32 %v2880_v33  ;;  %v2883_v39 = vmul.f32 -1.442695, %v691_v38  ;;  %3434 = vmatprep.mubr.f32.mxu1 %v95_v31 }
 0x145   :  { %3533 = vpow2.f32 %v2882_v36  ;;  %v246_v41 = vpop.f32.mrb[4].mxu0 }
 0x146   :  { %3535 = vpow2.f32 %v2881_v37  ;;  %v2884_v42 = vmul.f32 -1.442695, %v246_v41  ;;  %v695_v43 = vpop.f32.mrb[4].mxu1  ;;  %v248_v44 = vpop.f32.mrb[5].mxu0  ;;  %3275 = vmatmul.mubr.f32.gmra.mrb[110].mxu0 %v95_v31  ;;  %v101_v37 = vld [vmem:[#allocation2 + $0x1e8] sm:$0xff] }
 0x147   :  { %3537 = vpow2.f32 %v2883_v39  ;;  %v2886_v45 = vmul.f32 -1.442695, %v695_v43  ;;  %v2885_v46 = vmul.f32 -1.442695, %v248_v44  ;;  %v697_v47 = vpop.f32.mrb[5].mxu1  ;;  %3435 = vmatmul.mubr.f32.gmra.mrb[110].mxu1 %v95_v31  ;;  %3276 = vmatprep.mubr.f32.mxu0 %v96_v40 }
 0x148   :  { %3539 = vpow2.f32 %v2884_v42  ;;  %v2887_v48 = vmul.f32 -1.442695, %v697_v47  ;;  %3436 = vmatprep.mubr.f32.mxu1 %v96_v40 }
 0x149   :  { %3541 = vpow2.f32 %v2886_v45  ;;  %v252_v50 = vpop.f32.mrb[6].mxu0 }
 0x14a   :  { %v3524_v51 = vpop.eup %3523  ;;  %3543 = vpow2.f32 %v2885_v46  ;;  %v2888_v52 = vmul.f32 -1.442695, %v252_v50  ;;  %v701_v53 = vpop.f32.mrb[6].mxu1  ;;  %3277 = vmatmul.mubr.f32.gmra.mrb[112].mxu0 %v96_v40  ;;  %v102_v50 = vld [vmem:[#allocation2 + $0x1f0] sm:$0xff] }
 0x14b   :  { %v4671_v54 = vpop.f32.mrb[7].mxu0  ;;  %v3526_v55 = vpop.eup %3525  ;;  %v1834_v56 = vadd.f32 1.0, %v3524_v51  ;;  %3545 = vpow2.f32 %v2887_v48  ;;  %3437 = vmatmul.mubr.f32.gmra.mrb[112].mxu1 %v96_v40  ;;  %3278 = vmatprep.mubr.f32.mxu0 %v97_v49  ;;  %v2890_v28 = vmul.f32 -1.442695, %v701_v53 }
 0x14c   :  { %v4673_v57 = vpop.f32.mrb[7].mxu1  ;;  %v3528_v58 = vpop.eup %3527  ;;  %v1836_v59 = vadd.f32 1.0, %v3526_v55  ;;  %3547 = vpow2.f32 %v2888_v52  ;;  %3438 = vmatprep.mubr.f32.mxu1 %v97_v49  ;;  %v2889_v33 = vmul.f32 -1.442695, %v4671_v54 }
 0x14d   :  { %v3530_v61 = vpop.eup %3529  ;;  %3549 = vrcp.f32 %v1834_v56  ;;  %v1835_v62 = vadd.f32 1.0, %v3528_v58  ;;  %v4675_v63 = vpop.f32.mrb[8].mxu0  ;;  %v2891_v36 = vmul.f32 -1.442695, %v4673_v57 }
 0x14e   :  { %v3532_v0 = vpop.eup %3531  ;;  %3551 = vrcp.f32 %v1836_v59  ;;  %v1837_v1 = vadd.f32 1.0, %v3530_v61  ;;  %v4677_v2 = vpop.f32.mrb[8].mxu1  ;;  %3279 = vmatmul.mubr.f32.gmra.mrb[114].mxu0 %v97_v49  ;;  %v2892_v39 = vmul.f32 -1.442695, %v4675_v63  ;;  %v103_v63 = vld [vmem:[#allocation2 + $0x1f8] sm:$0xff] }
 0x14f   :  { %v4679_v3 = vpop.f32.mrb[9].mxu0  ;;  %v3534_v4 = vpop.eup %3533  ;;  %3553 = vrcp.f32 %v1835_v62  ;;  %v1838_v5 = vadd.f32 1.0, %v3532_v0  ;;  %3439 = vmatmul.mubr.f32.gmra.mrb[114].mxu1 %v97_v49  ;;  %3280 = vmatprep.mubr.f32.mxu0 %v98_v60  ;;  %v2894_v42 = vmul.f32 -1.442695, %v4677_v2 }
 0x150   :  { %v4681_v6 = vpop.f32.mrb[9].mxu1  ;;  %v3536_v7 = vpop.eup %3535  ;;  %3555 = vrcp.f32 %v1837_v1  ;;  %v1840_v8 = vadd.f32 1.0, %v3534_v4  ;;  %3440 = vmatprep.mubr.f32.mxu1 %v98_v60  ;;  %v2893_v46 = vmul.f32 -1.442695, %v4679_v3 }
 0x151   :  { %v3538_v10 = vpop.eup %3537  ;;  %3557 = vrcp.f32 %v1838_v5  ;;  %v1839_v11 = vadd.f32 1.0, %v3536_v7  ;;  %v4683_v12 = vpop.f32.mrb[10].mxu0  ;;  %v2895_v49 = vmul.f32 -1.442695, %v4681_v6 }
 0x152   :  { %v3540_v13 = vpop.eup %3539  ;;  %3559 = vrcp.f32 %v1840_v8  ;;  %v1841_v14 = vadd.f32 1.0, %v3538_v10  ;;  %v4685_v15 = vpop.f32.mrb[10].mxu1  ;;  %3281 = vmatmul.mubr.f32.gmra.mrb[116].mxu0 %v98_v60  ;;  %v2896_v52 = vmul.f32 -1.442695, %v4683_v12 }
 0x153   :  { %v4687_v16 = vpop.f32.mrb[11].mxu0  ;;  %v3542_v17 = vpop.eup %3541  ;;  %3561 = vrcp.f32 %v1839_v11  ;;  %v1842_v18 = vadd.f32 1.0, %v3540_v13  ;;  %3441 = vmatmul.mubr.f32.gmra.mrb[116].mxu1 %v98_v60  ;;  %3282 = vmatprep.mubr.f32.mxu0 %v99_v9  ;;  %v2898_v55 = vmul.f32 -1.442695, %v4685_v15 }
 0x154   :  { %v4689_v19 = vpop.f32.mrb[11].mxu1  ;;  %v3544_v20 = vpop.eup %3543  ;;  %3563 = vrcp.f32 %v1841_v14  ;;  %v1844_v21 = vadd.f32 1.0, %v3542_v17  ;;  %3442 = vmatprep.mubr.f32.mxu1 %v99_v9  ;;  %v2897_v59 = vmul.f32 -1.442695, %v4687_v16 }
 0x155   :  { %v3546_v23 = vpop.eup %3545  ;;  %3565 = vrcp.f32 %v1842_v18  ;;  %v1843_v24 = vadd.f32 1.0, %v3544_v20  ;;  %v4691_v25 = vpop.f32.mrb[12].mxu0  ;;  %v2899_v62 = vmul.f32 -1.442695, %v4689_v19 }
 0x156   :  { %v3548_v26 = vpop.eup %3547  ;;  %3567 = vrcp.f32 %v1844_v21  ;;  %v1845_v27 = vadd.f32 1.0, %v3546_v23  ;;  %v4693_v29 = vpop.f32.mrb[12].mxu1  ;;  %3283 = vmatmul.mubr.f32.gmra.mrb[118].mxu0 %v99_v9  ;;  %v2900_v1 = vmul.f32 -1.442695, %v4691_v25 }
 0x157   :  { %v4695_v30 = vpop.f32.mrb[13].mxu0  ;;  %v3550_v31 = vpop.eup %3549  ;;  %3569 = vrcp.f32 %v1843_v24  ;;  %v1846_v32 = vadd.f32 1.0, %v3548_v26  ;;  %3443 = vmatmul.mubr.f32.gmra.mrb[118].mxu1 %v99_v9  ;;  %3284 = vmatprep.mubr.f32.mxu0 %v100_v22  ;;  %v2902_v4 = vmul.f32 -1.442695, %v4693_v29 }
 0x158   :  { %v4698_v34 = vpop.f32.mrb[13].mxu1  ;;  %v3552_v35 = vpop.eup %3551  ;;  %2602 = vst [vmem:[#allocation7] sm:$0xff] %v3550_v31  ;;  %3571 = vrcp.f32 %v1845_v27  ;;  %3444 = vmatprep.mubr.f32.mxu1 %v100_v22 }
 0x159   :  { %v3554_v38 = vpop.eup %3553  ;;  %2604 = vst [vmem:[#allocation7 + $0x10] sm:$0xff] %v3552_v35  ;;  %3573 = vrcp.f32 %v1846_v32  ;;  %v4702_v40 = vpop.f32.mrb[14].mxu0 }
 0x15a   :  { %v3556_v41 = vpop.eup %3555  ;;  %2603 = vst [vmem:[#allocation7 + $0x8] sm:$0xff] %v3554_v38  ;;  %3575 = vpow2.f32 %v2890_v28  ;;  %v4705_v43 = vpop.f32.mrb[14].mxu1  ;;  %3285 = vmatmul.mubr.f32.gmra.mrb[120].mxu0 %v100_v22 }
 0x15b   :  { %v4707_v44 = vpop.f32.mrb[15].mxu0  ;;  %v3558_v45 = vpop.eup %3557  ;;  %2605 = vst [vmem:[#allocation7 + $0x18] sm:$0xff] %v3556_v41  ;;  %3577 = vpow2.f32 %v2889_v33  ;;  %3445 = vmatmul.mubr.f32.gmra.mrb[120].mxu1 %v100_v22  ;;  %3286 = vmatprep.mubr.f32.mxu0 %v101_v37 }
 0x15c   :  { %v4710_v47 = vpop.f32.mrb[15].mxu1  ;;  %v3560_v48 = vpop.eup %3559  ;;  %2606 = vst [vmem:[#allocation7 + $0x20] sm:$0xff] %v3558_v45  ;;  %3579 = vpow2.f32 %v2891_v36  ;;  %3446 = vmatprep.mubr.f32.mxu1 %v101_v37 }
 0x15d   :  { %v3562_v51 = vpop.eup %3561  ;;  %2608 = vst [vmem:[#allocation7 + $0x30] sm:$0xff] %v3560_v48  ;;  %3581 = vpow2.f32 %v2892_v39  ;;  %v4714_v53 = vpop.f32.mrb[16].mxu0 }
 0x15e   :  { %v3564_v54 = vpop.eup %3563  ;;  %2607 = vst [vmem:[#allocation7 + $0x28] sm:$0xff] %v3562_v51  ;;  %3583 = vpow2.f32 %v2894_v42  ;;  %v4717_v56 = vpop.f32.mrb[16].mxu1  ;;  %3287 = vmatmul.mubr.f32.gmra.mrb[122].mxu0 %v101_v37 }
 0x15f   :  { %v4719_v57 = vpop.f32.mrb[17].mxu0  ;;  %v3566_v58 = vpop.eup %3565  ;;  %2609 = vst [vmem:[#allocation7 + $0x38] sm:$0xff] %v3564_v54  ;;  %3585 = vpow2.f32 %v2893_v46  ;;  %3447 = vmatmul.mubr.f32.gmra.mrb[122].mxu1 %v101_v37  ;;  %3288 = vmatprep.mubr.f32.mxu0 %v102_v50 }
 0x160   :  { %v4722_v60 = vpop.f32.mrb[17].mxu1  ;;  %v3568_v61 = vpop.eup %3567  ;;  %2610 = vst [vmem:[#allocation7 + $0x40] sm:$0xff] %v3566_v58  ;;  %3587 = vpow2.f32 %v2895_v49  ;;  %3448 = vmatprep.mubr.f32.mxu1 %v102_v50  ;;  %v2903_v58 = vmul.f32 -1.442695, %v4698_v34  ;;  %v2905_v34 = vmul.f32 -1.442695, %v4707_v44 }
 0x161   :  { %v3570_v0 = vpop.eup %3569  ;;  %2612 = vst [vmem:[#allocation7 + $0x50] sm:$0xff] %v3568_v61  ;;  %3589 = vpow2.f32 %v2896_v52  ;;  %v4726_v2 = vpop.f32.mrb[18].mxu0  ;;  %v2901_v52 = vmul.f32 -1.442695, %v4695_v30  ;;  %v2906_v30 = vmul.f32 -1.442695, %v4705_v43 }
 0x162   :  { %v3572_v3 = vpop.eup %3571  ;;  %2611 = vst [vmem:[#allocation7 + $0x48] sm:$0xff] %v3570_v0  ;;  %3591 = vpow2.f32 %v2898_v55  ;;  %v4729_v5 = vpop.f32.mrb[18].mxu1  ;;  %3289 = vmatmul.mubr.f32.gmra.mrb[124].mxu0 %v102_v50  ;;  %v2910_v44 = vmul.f32 -1.442695, %v4717_v56 }
 0x163   :  { %v4731_v6 = vpop.f32.mrb[19].mxu0  ;;  %v3574_v7 = vpop.eup %3573  ;;  %2613 = vst [vmem:[#allocation7 + $0x58] sm:$0xff] %v3572_v3  ;;  %3593 = vpow2.f32 %v2897_v59  ;;  %3449 = vmatmul.mubr.f32.gmra.mrb[124].mxu1 %v102_v50  ;;  %3290 = vmatprep.mubr.f32.mxu0 %v103_v63 }
 0x164   :  { %v4733_v8 = vpop.f32.mrb[19].mxu1  ;;  %v3576_v9 = vpop.eup %3575  ;;  %2614 = vst [vmem:[#allocation7 + $0x60] sm:$0xff] %v3574_v7  ;;  %3595 = vpow2.f32 %v2899_v62  ;;  %3450 = vmatprep.mubr.f32.mxu1 %v103_v63  ;;  %v2904_v62 = vmul.f32 -1.442695, %v4702_v40  ;;  %v2907_v40 = vmul.f32 -1.442695, %v4710_v47 }
 0x165   :  { %v3578_v10 = vpop.eup %3577  ;;  %v1848_v11 = vadd.f32 1.0, %v3576_v9  ;;  %3597 = vpow2.f32 %v2900_v1  ;;  %v4735_v12 = vpop.f32.mrb[20].mxu0  ;;  %v2909_v47 = vmul.f32 -1.442695, %v4719_v57  ;;  %v2914_v57 = vmul.f32 -1.442695, %v4729_v5 }
 0x166   :  { %v3580_v13 = vpop.eup %3579  ;;  %v1847_v14 = vadd.f32 1.0, %v3578_v10  ;;  %3599 = vpow2.f32 %v2902_v4  ;;  %v4737_v15 = vpop.f32.mrb[20].mxu1  ;;  %3291 = vmatmul.mubr.f32.gmra.mrb[126].mxu0 %v103_v63 }
 0x167   :  { %v4739_v16 = vpop.f32.mrb[21].mxu0  ;;  %v3582_v17 = vpop.eup %3581  ;;  %3601 = vrcp.f32 %v1848_v11  ;;  %v1849_v18 = vadd.f32 1.0, %v3580_v13  ;;  %3451 = vmatmul.mubr.f32.gmra.mrb[126].mxu1 %v103_v63  ;;  %v2908_v11 = vmul.f32 -1.442695, %v4714_v53  ;;  %v2911_v53 = vmul.f32 -1.442695, %v4722_v60 }
 0x168   :  { %v4741_v19 = vpop.f32.mrb[21].mxu1  ;;  %v3584_v20 = vpop.eup %3583  ;;  %3603 = vrcp.f32 %v1847_v14  ;;  %v1850_v21 = vadd.f32 1.0, %v3582_v17  ;;  %v2913_v60 = vmul.f32 -1.442695, %v4731_v6 }
 0x169   :  { %v3586_v22 = vpop.eup %3585  ;;  %3605 = vrcp.f32 %v1849_v18  ;;  %v1852_v23 = vadd.f32 1.0, %v3584_v20  ;;  %v4743_v24 = vpop.f32.mrb[22].mxu0 }
 0x16a   :  { %v3588_v25 = vpop.eup %3587  ;;  %3607 = vrcp.f32 %v1850_v21  ;;  %v1851_v26 = vadd.f32 1.0, %v3586_v22  ;;  %v4745_v27 = vpop.f32.mrb[22].mxu1 }
 0x16b   :  { %v4747_v28 = vpop.f32.mrb[23].mxu0  ;;  %v3590_v29 = vpop.eup %3589  ;;  %3609 = vrcp.f32 %v1852_v23  ;;  %v1853_v31 = vadd.f32 1.0, %v3588_v25  ;;  %v2912_v23 = vmul.f32 -1.442695, %v4726_v2 }
 0x16c   :  { %v4749_v32 = vpop.f32.mrb[23].mxu1  ;;  %v3592_v33 = vpop.eup %3591  ;;  %3611 = vrcp.f32 %v1851_v26  ;;  %v1854_v35 = vadd.f32 1.0, %v3590_v29 }
 0x16d   :  { %v3594_v36 = vpop.eup %3593  ;;  %3613 = vrcp.f32 %v1853_v31  ;;  %v1856_v37 = vadd.f32 1.0, %v3592_v33  ;;  %v4751_v38 = vpop.f32.mrb[24].mxu0 }
 0x16e   :  { %v3596_v39 = vpop.eup %3595  ;;  %3615 = vrcp.f32 %v1854_v35  ;;  %v1855_v41 = vadd.f32 1.0, %v3594_v36  ;;  %v4753_v42 = vpop.f32.mrb[24].mxu1 }
 0x16f   :  { %v4755_v45 = vpop.f32.mrb[25].mxu0  ;;  %v3598_v46 = vpop.eup %3597  ;;  %3617 = vrcp.f32 %v1856_v37  ;;  %v1857_v48 = vadd.f32 1.0, %v3596_v39 }
 0x170   :  { %v4757_v49 = vpop.f32.mrb[25].mxu1  ;;  %v3600_v50 = vpop.eup %3599  ;;  %3619 = vrcp.f32 %v1855_v41  ;;  %v1858_v51 = vadd.f32 1.0, %v3598_v46 }
 0x171   :  { %v3602_v54 = vpop.eup %3601  ;;  %3621 = vrcp.f32 %v1857_v48  ;;  %v1860_v55 = vadd.f32 1.0, %v3600_v50  ;;  %v4761_v59 = vpop.f32.mrb[26].mxu0 }
 0x172   :  { %v3604_v61 = vpop.eup %3603  ;;  %2616 = vst [vmem:[#allocation7 + $0x70] sm:$0xff] %v3602_v54  ;;  %3623 = vrcp.f32 %v1858_v51  ;;  %v4764_v63 = vpop.f32.mrb[26].mxu1 }
 0x173   :  { %v4766_v0 = vpop.f32.mrb[27].mxu0  ;;  %v3606_v1 = vpop.eup %3605  ;;  %2615 = vst [vmem:[#allocation7 + $0x68] sm:$0xff] %v3604_v61  ;;  %3625 = vrcp.f32 %v1860_v55 }
 0x174   :  { %v4769_v3 = vpop.f32.mrb[27].mxu1  ;;  %v3608_v4 = vpop.eup %3607  ;;  %2617 = vst [vmem:[#allocation7 + $0x78] sm:$0xff] %v3606_v1  ;;  %3627 = vpow2.f32 %v2901_v52 }
 0x175   :  { %v3610_v7 = vpop.eup %3609  ;;  %2618 = vst [vmem:[#allocation7 + $0x80] sm:$0xff] %v3608_v4  ;;  %3629 = vpow2.f32 %v2903_v58  ;;  %v4773_v9 = vpop.f32.mrb[28].mxu0 }
 0x176   :  { %v3612_v10 = vpop.eup %3611  ;;  %2620 = vst [vmem:[#allocation7 + $0x90] sm:$0xff] %v3610_v7  ;;  %3631 = vpow2.f32 %v2904_v62  ;;  %v4776_v43 = vpop.f32.mrb[28].mxu1 }
 0x177   :  { %v4778_v13 = vpop.f32.mrb[29].mxu0  ;;  %v3614_v14 = vpop.eup %3613  ;;  %2619 = vst [vmem:[#allocation7 + $0x88] sm:$0xff] %v3612_v10  ;;  %3633 = vpow2.f32 %v2906_v30 }
 0x178   :  { %v4781_v17 = vpop.f32.mrb[29].mxu1  ;;  %v3616_v18 = vpop.eup %3615  ;;  %2621 = vst [vmem:[#allocation7 + $0x98] sm:$0xff] %v3614_v14  ;;  %3635 = vpow2.f32 %v2905_v34 }
 0x179   :  { %v3618_v20 = vpop.eup %3617  ;;  %2622 = vst [vmem:[#allocation7 + $0xa0] sm:$0xff] %v3616_v18  ;;  %3637 = vpow2.f32 %v2907_v40  ;;  %v4785_v21 = vpop.f32.mrb[30].mxu0 }
 0x17a   :  { %v3620_v22 = vpop.eup %3619  ;;  %2624 = vst [vmem:[#allocation7 + $0xb0] sm:$0xff] %v3618_v20  ;;  %3639 = vpow2.f32 %v2908_v11  ;;  %v4788_v56 = vpop.f32.mrb[30].mxu1 }
 0x17b   :  { %v4790_v25 = vpop.f32.mrb[31].mxu0  ;;  %v3622_v26 = vpop.eup %3621  ;;  %2623 = vst [vmem:[#allocation7 + $0xa8] sm:$0xff] %v3620_v22  ;;  %3641 = vpow2.f32 %v2910_v44 }
 0x17c   :  { %v4793_v29 = vpop.f32.mrb[31].mxu1  ;;  %v3624_v31 = vpop.eup %3623  ;;  %2625 = vst [vmem:[#allocation7 + $0xb8] sm:$0xff] %v3622_v26  ;;  %3643 = vpow2.f32 %v2909_v47 }
 0x17d   :  { %v3626_v33 = vpop.eup %3625  ;;  %2626 = vst [vmem:[#allocation7 + $0xc0] sm:$0xff] %v3624_v31  ;;  %3645 = vpow2.f32 %v2911_v53  ;;  %v4796_v2 = vpop.f32.mrb[32].mxu0 }
 0x17e   :  { %v3628_v35 = vpop.eup %3627  ;;  %2628 = vst [vmem:[#allocation7 + $0xd0] sm:$0xff] %v3626_v33  ;;  %3647 = vpow2.f32 %v2912_v23  ;;  %v4798_v36 = vpop.f32.mrb[32].mxu1  ;;  %v2915_v33 = vmul.f32 -1.442695, %v4733_v8  ;;  %v2917_v8 = vmul.f32 -1.442695, %v4739_v16 }
 0x17f   :  { %v4800_v37 = vpop.f32.mrb[33].mxu0  ;;  %v3630_v5 = vpop.eup %3629  ;;  %v1859_v39 = vadd.f32 1.0, %v3628_v35  ;;  %3649 = vpow2.f32 %v2914_v57  ;;  %v2922_v16 = vmul.f32 -1.442695, %v4745_v27  ;;  %v2924_v27 = vmul.f32 -1.442695, %v4751_v38 }
 0x180   :  { %v4802_v41 = vpop.f32.mrb[33].mxu1  ;;  %v3632_v46 = vpop.eup %3631  ;;  %v1861_v48 = vadd.f32 1.0, %v3630_v5  ;;  %3651 = vpow2.f32 %v2913_v60 }
 0x181   :  { %v3634_v6 = vpop.eup %3633  ;;  %3653 = vrcp.f32 %v1859_v39  ;;  %v1862_v50 = vadd.f32 1.0, %v3632_v46  ;;  %v4804_v51 = vpop.f32.mrb[34].mxu0 }
 0x182   :  { %v3636_v52 = vpop.eup %3635  ;;  %3655 = vrcp.f32 %v1861_v48  ;;  %v1864_v54 = vadd.f32 1.0, %v3634_v6  ;;  %v4806_v55 = vpop.f32.mrb[34].mxu1  ;;  %v2916_v48 = vmul.f32 -1.442695, %v4735_v12 }
 0x183   :  { %v4808_v58 = vpop.f32.mrb[35].mxu0  ;;  %v3638_v61 = vpop.eup %3637  ;;  %3657 = vrcp.f32 %v1862_v50  ;;  %v1863_v62 = vadd.f32 1.0, %v3636_v52  ;;  %v2918_v52 = vmul.f32 -1.442695, %v4737_v15  ;;  %v2920_v15 = vmul.f32 -1.442695, %v4743_v24 }
 0x184   :  { %v4810_v1 = vpop.f32.mrb[35].mxu1  ;;  %v3640_v30 = vpop.eup %3639  ;;  %3659 = vrcp.f32 %v1864_v54  ;;  %v1865_v4 = vadd.f32 1.0, %v3638_v61 }
 0x185   :  { %v3642_v34 = vpop.eup %3641  ;;  %3661 = vrcp.f32 %v1863_v62  ;;  %v1866_v7 = vadd.f32 1.0, %v3640_v30  ;;  %v4812_v40 = vpop.f32.mrb[36].mxu0  ;;  %v2919_v30 = vmul.f32 -1.442695, %v4741_v19  ;;  %v2921_v19 = vmul.f32 -1.442695, %v4747_v28 }
 0x186   :  { %v3644_v10 = vpop.eup %3643  ;;  %3663 = vrcp.f32 %v1865_v4  ;;  %v1868_v11 = vadd.f32 1.0, %v3642_v34  ;;  %v4814_v14 = vpop.f32.mrb[36].mxu1  ;;  %v2926_v28 = vmul.f32 -1.442695, %v4753_v42 }
 0x187   :  { %v4816_v44 = vpop.f32.mrb[37].mxu0  ;;  %v3646_v18 = vpop.eup %3645  ;;  %3665 = vrcp.f32 %v1866_v7  ;;  %v1867_v47 = vadd.f32 1.0, %v3644_v10 }
 0x188   :  { %v4818_v20 = vpop.f32.mrb[37].mxu1  ;;  %v3648_v53 = vpop.eup %3647  ;;  %3667 = vrcp.f32 %v1868_v11  ;;  %v1869_v22 = vadd.f32 1.0, %v3646_v18 }
 0x189   :  { %v3650_v23 = vpop.eup %3649  ;;  %3669 = vrcp.f32 %v1867_v47  ;;  %v1870_v26 = vadd.f32 1.0, %v3648_v53  ;;  %v4820_v57 = vpop.f32.mrb[38].mxu0  ;;  %v2923_v53 = vmul.f32 -1.442695, %v4749_v32  ;;  %v2925_v32 = vmul.f32 -1.442695, %v4755_v45 }
 0x18a   :  { %v3652_v31 = vpop.eup %3651  ;;  %3671 = vrcp.f32 %v1869_v22  ;;  %v1872_v60 = vadd.f32 1.0, %v3650_v23  ;;  %v4823_v35 = vpop.f32.mrb[38].mxu1 }
 0x18b   :  { %v4825_v5 = vpop.f32.mrb[39].mxu0  ;;  %v3654_v39 = vpop.eup %3653  ;;  %3673 = vrcp.f32 %v1870_v26  ;;  %v1871_v46 = vadd.f32 1.0, %v3652_v31 }
 0x18c   :  { %v4828_v6 = vpop.f32.mrb[39].mxu1  ;;  %v3656_v50 = vpop.eup %3655  ;;  %2627 = vst [vmem:[#allocation7 + $0xc8] sm:$0xff] %v3654_v39  ;;  %3675 = vrcp.f32 %v1872_v60 }
 0x18d   :  { %v3658_v54 = vpop.eup %3657  ;;  %2629 = vst [vmem:[#allocation7 + $0xd8] sm:$0xff] %v3656_v50  ;;  %3677 = vrcp.f32 %v1871_v46  ;;  %v4832_v61 = vpop.f32.mrb[40].mxu0  ;;  %v2927_v46 = vmul.f32 -1.442695, %v4757_v49 }
 0x18e   :  { %v3660_v62 = vpop.eup %3659  ;;  %2630 = vst [vmem:[#allocation7 + $0xe0] sm:$0xff] %v3658_v54  ;;  %3679 = vpow2.f32 %v2915_v33  ;;  %v4835_v12 = vpop.f32.mrb[40].mxu1 }
 0x18f   :  { %v4837_v4 = vpop.f32.mrb[41].mxu0  ;;  %v3662_v34 = vpop.eup %3661  ;;  %2632 = vst [vmem:[#allocation7 + $0xf0] sm:$0xff] %v3660_v62  ;;  %3681 = vpow2.f32 %v2916_v48 }
 0x190   :  { %v4840_v7 = vpop.f32.mrb[41].mxu1  ;;  %v3664_v10 = vpop.eup %3663  ;;  %2631 = vst [vmem:[#allocation7 + $0xe8] sm:$0xff] %v3662_v34  ;;  %3683 = vpow2.f32 %v2918_v52 }
 0x191   :  { %v3666_v11 = vpop.eup %3665  ;;  %2633 = vst [vmem:[#allocation7 + $0xf8] sm:$0xff] %v3664_v10  ;;  %3685 = vpow2.f32 %v2917_v8  ;;  %v4844_v18 = vpop.f32.mrb[42].mxu0 }
 0x192   :  { %v3668_v47 = vpop.eup %3667  ;;  %2634 = vst [vmem:[#allocation7 + $0x100] sm:$0xff] %v3666_v11  ;;  %3687 = vpow2.f32 %v2919_v30  ;;  %v4847_v24 = vpop.f32.mrb[42].mxu1 }
 0x193   :  { %v4849_v22 = vpop.f32.mrb[43].mxu0  ;;  %v3670_v23 = vpop.eup %3669  ;;  %2636 = vst [vmem:[#allocation7 + $0x110] sm:$0xff] %v3668_v47  ;;  %3689 = vpow2.f32 %v2920_v15 }
 0x194   :  { %v4852_v26 = vpop.f32.mrb[43].mxu1  ;;  %v3672_v31 = vpop.eup %3671  ;;  %2635 = vst [vmem:[#allocation7 + $0x108] sm:$0xff] %v3670_v23  ;;  %3691 = vpow2.f32 %v2922_v16 }
 0x195   :  { %v3674_v60 = vpop.eup %3673  ;;  %2637 = vst [vmem:[#allocation7 + $0x118] sm:$0xff] %v3672_v31  ;;  %3693 = vpow2.f32 %v2921_v19  ;;  %v4856_v33 = vpop.f32.mrb[44].mxu0 }
 0x196   :  { %v3676_v39 = vpop.eup %3675  ;;  %2638 = vst [vmem:[#allocation7 + $0x120] sm:$0xff] %v3674_v60  ;;  %3695 = vpow2.f32 %v2923_v53  ;;  %v4859_v38 = vpop.f32.mrb[44].mxu1 }
 0x197   :  { %v4861_v48 = vpop.f32.mrb[45].mxu0  ;;  %v3678_v50 = vpop.eup %3677  ;;  %2640 = vst [vmem:[#allocation7 + $0x130] sm:$0xff] %v3676_v39  ;;  %3697 = vpow2.f32 %v2924_v27 }
 0x198   :  { %v4863_v42 = vpop.f32.mrb[45].mxu1  ;;  %v3680_v52 = vpop.eup %3679  ;;  %2639 = vst [vmem:[#allocation7 + $0x128] sm:$0xff] %v3678_v50  ;;  %3699 = vpow2.f32 %v2926_v28 }
 0x199   :  { %v3682_v45 = vpop.eup %3681  ;;  %v1873_v54 = vadd.f32 1.0, %v3680_v52  ;;  %3701 = vpow2.f32 %v2925_v32  ;;  %v4865_v8 = vpop.f32.mrb[46].mxu0 }
 0x19a   :  { %v3684_v62 = vpop.eup %3683  ;;  %v1874_v30 = vadd.f32 1.0, %v3682_v45  ;;  %3703 = vpow2.f32 %v2927_v46  ;;  %v4867_v49 = vpop.f32.mrb[46].mxu1 }
 0x19b   :  { %v4869_v34 = vpop.f32.mrb[47].mxu0  ;;  %v3686_v15 = vpop.eup %3685  ;;  %3705 = vrcp.f32 %v1873_v54  ;;  %v1876_v10 = vadd.f32 1.0, %v3684_v62 }
 0x19c   :  { %v4871_v16 = vpop.f32.mrb[47].mxu1  ;;  %v3688_v11 = vpop.eup %3687  ;;  %3707 = vrcp.f32 %v1874_v30  ;;  %v1875_v19 = vadd.f32 1.0, %v3686_v15 }
 0x19d   :  { %v3690_v47 = vpop.eup %3689  ;;  %3709 = vrcp.f32 %v1876_v10  ;;  %v1877_v53 = vadd.f32 1.0, %v3688_v11  ;;  %v4873_v23 = vpop.f32.mrb[48].mxu0 }
 0x19e   :  { %v3692_v27 = vpop.eup %3691  ;;  %3711 = vrcp.f32 %v1875_v19  ;;  %v1878_v31 = vadd.f32 1.0, %v3690_v47  ;;  %v4875_v28 = vpop.f32.mrb[48].mxu1 }
 0x19f   :  { %v4877_v60 = vpop.f32.mrb[49].mxu0  ;;  %v3694_v32 = vpop.eup %3693  ;;  %3713 = vrcp.f32 %v1877_v53  ;;  %v1880_v39 = vadd.f32 1.0, %v3692_v27 }
 0x1a0   :  { %v4879_v46 = vpop.f32.mrb[49].mxu1  ;;  %v3696_v50 = vpop.eup %3695  ;;  %3715 = vrcp.f32 %v1878_v31  ;;  %v1879_v52 = vadd.f32 1.0, %v3694_v32  ;;  %v2928_v32 = vmul.f32 -1.442695, %v4761_v59  ;;  %v2931_v59 = vmul.f32 -1.442695, %v4769_v3 }
 0x1a1   :  { %v3698_v45 = vpop.eup %3697  ;;  %3717 = vrcp.f32 %v1880_v39  ;;  %v1881_v54 = vadd.f32 1.0, %v3696_v50  ;;  %v4881_v62 = vpop.f32.mrb[50].mxu0 }
 0x1a2   :  { %v3700_v30 = vpop.eup %3699  ;;  %3719 = vrcp.f32 %v1879_v52  ;;  %v1882_v15 = vadd.f32 1.0, %v3698_v45  ;;  %v4883_v10 = vpop.f32.mrb[50].mxu1  ;;  %v2930_v52 = vmul.f32 -1.442695, %v4764_v63  ;;  %v2932_v63 = vmul.f32 -1.442695, %v4773_v9 }
 0x1a3   :  { %5412 = vst [vmem:[#allocation11_spill] sm:$0xff] %v4883_v10  ;;  %v4885_v11 = vpop.f32.mrb[51].mxu0  ;;  %v3702_v19 = vpop.eup %3701  ;;  %3721 = vrcp.f32 %v1881_v54  ;;  %v1884_v47 = vadd.f32 1.0, %v3700_v30  ;;  %v2929_v54 = vmul.f32 -1.442695, %v4766_v0 }
 0x1a4   :  { %v4887_v53 = vpop.f32.mrb[51].mxu1  ;;  %v3704_v27 = vpop.eup %3703  ;;  %3723 = vrcp.f32 %v1882_v15  ;;  %v1883_v31 = vadd.f32 1.0, %v3702_v19  ;;  %v2934_v0 = vmul.f32 -1.442695, %v4776_v43  ;;  %v2935_v9 = vmul.f32 -1.442695, %v4781_v17 }
 0x1a5   :  { %5413 = vst [vmem:[#allocation12_spill] sm:$0xff] %v4887_v53  ;;  %v3706_v39 = vpop.eup %3705  ;;  %3725 = vrcp.f32 %v1884_v47  ;;  %v1885_v50 = vadd.f32 1.0, %v3704_v27  ;;  %v4891_v45 = vpop.f32.mrb[52].mxu0  ;;  %v2936_v43 = vmul.f32 -1.442695, %v4785_v21 }
 0x1a6   :  { %v3708_v10 = vpop.eup %3707  ;;  %2641 = vst [vmem:[#allocation7 + $0x138] sm:$0xff] %v3706_v39  ;;  %3727 = vrcp.f32 %v1883_v31  ;;  %v4894_v30 = vpop.f32.mrb[52].mxu1  ;;  %v2939_v21 = vmul.f32 -1.442695, %v4793_v29 }
 0x1a7   :  { %v4896_v53 = vpop.f32.mrb[53].mxu0  ;;  %v3710_v15 = vpop.eup %3709  ;;  %2642 = vst [vmem:[#allocation7 + $0x140] sm:$0xff] %v3708_v10  ;;  %3729 = vrcp.f32 %v1885_v50  ;;  %v2933_v10 = vmul.f32 -1.442695, %v4778_v13  ;;  %v2938_v13 = vmul.f32 -1.442695, %v4788_v56 }
 0x1a8   :  { %v4899_v19 = vpop.f32.mrb[53].mxu1  ;;  %v3712_v47 = vpop.eup %3711  ;;  %2644 = vst [vmem:[#allocation7 + $0x150] sm:$0xff] %v3710_v15  ;;  %3731 = vpow2.f32 %v2928_v32  ;;  %v2940_v56 = vmul.f32 -1.442695, %v4796_v2 }
 0x1a9   :  { %v3714_v27 = vpop.eup %3713  ;;  %2643 = vst [vmem:[#allocation7 + $0x148] sm:$0xff] %v3712_v47  ;;  %3733 = vpow2.f32 %v2930_v52  ;;  %v4903_v31 = vpop.f32.mrb[54].mxu0 }
 0x1aa   :  { %v3716_v39 = vpop.eup %3715  ;;  %2645 = vst [vmem:[#allocation7 + $0x158] sm:$0xff] %v3714_v27  ;;  %3735 = vpow2.f32 %v2929_v54  ;;  %v4906_v3 = vpop.f32.mrb[54].mxu1 }
 0x1ab   :  { %v4908_v50 = vpop.f32.mrb[55].mxu0  ;;  %v3718_v15 = vpop.eup %3717  ;;  %2646 = vst [vmem:[#allocation7 + $0x160] sm:$0xff] %v3716_v39  ;;  %3737 = vpow2.f32 %v2931_v59  ;;  %v2937_v59 = vmul.f32 -1.442695, %v4790_v25 }
 0x1ac   :  { %v4911_v32 = vpop.f32.mrb[55].mxu1  ;;  %v3720_v52 = vpop.eup %3719  ;;  %2648 = vst [vmem:[#allocation7 + $0x170] sm:$0xff] %v3718_v15  ;;  %3739 = vpow2.f32 %v2932_v63 }
 0x1ad   :  { %v3722_v47 = vpop.eup %3721  ;;  %2647 = vst [vmem:[#allocation7 + $0x168] sm:$0xff] %v3720_v52  ;;  %3741 = vpow2.f32 %v2934_v0  ;;  %v4915_v54 = vpop.f32.mrb[56].mxu0 }
 0x1ae   :  { %v3724_v27 = vpop.eup %3723  ;;  %2649 = vst [vmem:[#allocation7 + $0x178] sm:$0xff] %v3722_v47  ;;  %3743 = vpow2.f32 %v2933_v10  ;;  %v4918_v17 = vpop.f32.mrb[56].mxu1 }
 0x1af   :  { %v4920_v39 = vpop.f32.mrb[57].mxu0  ;;  %v3726_v15 = vpop.eup %3725  ;;  %2650 = vst [vmem:[#allocation7 + $0x180] sm:$0xff] %v3724_v27  ;;  %3745 = vpow2.f32 %v2935_v9 }
 0x1b0   :  { %v4923_v63 = vpop.f32.mrb[57].mxu1  ;;  %v3728_v0 = vpop.eup %3727  ;;  %2652 = vst [vmem:[#allocation7 + $0x190] sm:$0xff] %v3726_v15  ;;  %3747 = vpow2.f32 %v2936_v43 }
 0x1b1   :  { %5414 = vst [vmem:[#allocation13_spill] sm:$0xff] %v4923_v63  ;;  %v3730_v52 = vpop.eup %3729  ;;  %2651 = vst [vmem:[#allocation7 + $0x188] sm:$0xff] %v3728_v0  ;;  %3749 = vpow2.f32 %v2938_v13  ;;  %v4926_v25 = vpop.f32.mrb[58].mxu0 }
 0x1b2   :  { %5415 = vst [vmem:[#allocation14_spill] sm:$0xff] %v4926_v25  ;;  %v3732_v10 = vpop.eup %3731  ;;  %2653 = vst [vmem:[#allocation7 + $0x198] sm:$0xff] %v3730_v52  ;;  %3751 = vpow2.f32 %v2937_v59  ;;  %v4928_v47 = vpop.f32.mrb[58].mxu1 }
 0x1b3   :  { %5416 = vst [vmem:[#allocation15_spill] sm:$0xff] %v4928_v47  ;;  %v4930_v9 = vpop.f32.mrb[59].mxu0  ;;  %v3734_v29 = vpop.eup %3733  ;;  %v1886_v27 = vadd.f32 1.0, %v3732_v10  ;;  %3753 = vpow2.f32 %v2939_v21 }
 0x1b4   :  { %5417 = vst [vmem:[#allocation16_spill] sm:$0xff] %v4930_v9  ;;  %v4932_v63 = vpop.f32.mrb[59].mxu1  ;;  %v3736_v43 = vpop.eup %3735  ;;  %v1888_v15 = vadd.f32 1.0, %v3734_v29  ;;  %3755 = vpow2.f32 %v2940_v56 }
 0x1b5   :  { %5418 = vst [vmem:[#allocation17_spill] sm:$0xff] %v4932_v63  ;;  %v3738_v2 = vpop.eup %3737  ;;  %3757 = vrcp.f32 %v1886_v27  ;;  %v1887_v13 = vadd.f32 1.0, %v3736_v43  ;;  %v4934_v0 = vpop.f32.mrb[60].mxu0 }
 0x1b6   :  { %5419 = vst [vmem:[#allocation18_spill] sm:$0xff] %v4934_v0  ;;  %v3740_v25 = vpop.eup %3739  ;;  %3759 = vrcp.f32 %v1888_v15  ;;  %v1889_v59 = vadd.f32 1.0, %v3738_v2  ;;  %v4936_v52 = vpop.f32.mrb[60].mxu1 }
 0x1b7   :  { %5420 = vst [vmem:[#allocation19_spill] sm:$0xff] %v4936_v52  ;;  %v4938_v47 = vpop.f32.mrb[61].mxu0  ;;  %v3742_v9 = vpop.eup %3741  ;;  %3761 = vrcp.f32 %v1887_v13  ;;  %v1890_v21 = vadd.f32 1.0, %v3740_v25 }
 0x1b8   :  { %5421 = vst [vmem:[#allocation20_spill] sm:$0xff] %v4938_v47  ;;  %v4940_v10 = vpop.f32.mrb[61].mxu1  ;;  %v3744_v63 = vpop.eup %3743  ;;  %3763 = vrcp.f32 %v1889_v59  ;;  %v1892_v56 = vadd.f32 1.0, %v3742_v9 }
 0x1b9   :  { %5422 = vst [vmem:[#allocation21_spill] sm:$0xff] %v4940_v10  ;;  %v3746_v29 = vpop.eup %3745  ;;  %3765 = vrcp.f32 %v1890_v21  ;;  %v1891_v27 = vadd.f32 1.0, %v3744_v63  ;;  %v4942_v43 = vpop.f32.mrb[62].mxu0 }
 0x1ba   :  { %5423 = vst [vmem:[#allocation22_spill] sm:$0xff] %v4942_v43  ;;  %v3748_v0 = vpop.eup %3747  ;;  %3767 = vrcp.f32 %v1892_v56  ;;  %v1893_v15 = vadd.f32 1.0, %v3746_v29  ;;  %v4944_v2 = vpop.f32.mrb[62].mxu1  ;;  %v2942_v29 = vmul.f32 -1.442695, %v4798_v36 }
 0x1bb   :  { %5424 = vst [vmem:[#allocation23_spill] sm:$0xff] %v4944_v2  ;;  %v4946_v52 = vpop.f32.mrb[63].mxu0  ;;  %v3750_v47 = vpop.eup %3749  ;;  %3769 = vrcp.f32 %v1891_v27  ;;  %v1894_v25 = vadd.f32 1.0, %v3748_v0 }
 0x1bc   :  { %5425 = vst [vmem:[#allocation24_spill] sm:$0xff] %v4946_v52  ;;  %v4948_v13 = vpop.f32.mrb[63].mxu1  ;;  %v3752_v10 = vpop.eup %3751  ;;  %3771 = vrcp.f32 %v1893_v15  ;;  %v1896_v9 = vadd.f32 1.0, %v3750_v47  ;;  %v2941_v15 = vmul.f32 -1.442695, %v4800_v37 }
 0x1bd   :  { %v3754_v59 = vpop.eup %3753  ;;  %3773 = vrcp.f32 %v1894_v25  ;;  %v1895_v63 = vadd.f32 1.0, %v3752_v10  ;;  %v4950_v21 = vpop.f32.mrb[64].mxu0  ;;  %v2943_v10 = vmul.f32 -1.442695, %v4802_v41  ;;  %v2945_v37 = vmul.f32 -1.442695, %v4808_v58 }
 0x1be   :  { %v3756_v43 = vpop.eup %3755  ;;  %3775 = vrcp.f32 %v1896_v9  ;;  %v1897_v56 = vadd.f32 1.0, %v3754_v59  ;;  %v4953_v2 = vpop.f32.mrb[64].mxu1  ;;  %v2944_v9 = vmul.f32 -1.442695, %v4804_v51  ;;  %v2947_v41 = vmul.f32 -1.442695, %v4810_v1 }
 0x1bf   :  { %v4955_v52 = vpop.f32.mrb[65].mxu0  ;;  %v3758_v0 = vpop.eup %3757  ;;  %3777 = vrcp.f32 %v1895_v63  ;;  %v1898_v27 = vadd.f32 1.0, %v3756_v43  ;;  %v2946_v63 = vmul.f32 -1.442695, %v4806_v55  ;;  %v2948_v51 = vmul.f32 -1.442695, %v4812_v40 }
 0x1c0   :  { %v3760_v47 = vpop.eup %3759  ;;  %2654 = vst [vmem:[#allocation7 + $0x1a0] sm:$0xff] %v3758_v0  ;;  %3779 = vrcp.f32 %v1897_v56  ;;  %v4960_v36 = vpop.f32.mrb[65].mxu1  ;;  %v2949_v1 = vmul.f32 -1.442695, %v4816_v44  ;;  %v2951_v40 = vmul.f32 -1.442695, %v4818_v20 }
 0x1c1   :  { %v3762_v25 = vpop.eup %3761  ;;  %2656 = vst [vmem:[#allocation7 + $0x1b0] sm:$0xff] %v3760_v47  ;;  %3781 = vrcp.f32 %v1898_v27  ;;  %v4966_v27 = vpop.f32.mrb[66].mxu0 }
 0x1c2   :  { %v3764_v59 = vpop.eup %3763  ;;  %2655 = vst [vmem:[#allocation7 + $0x1a8] sm:$0xff] %v3762_v25  ;;  %3783 = vpow2.f32 %v2942_v29  ;;  %v4968_v29 = vpop.f32.mrb[66].mxu1 }
 0x1c3   :  { %v3766_v43 = vpop.eup %3765  ;;  %2657 = vst [vmem:[#allocation7 + $0x1b8] sm:$0xff] %v3764_v59  ;;  %3785 = vpow2.f32 %v2941_v15  ;;  %v2950_v15 = vmul.f32 -1.442695, %v4814_v14  ;;  %v4971_v58 = vpop.f32.mrb[67].mxu0  ;;  %v2952_v59 = vmul.f32 -1.442695, %v4820_v57 }
 0x1c4   :  { %v3768_v56 = vpop.eup %3767  ;;  %2658 = vst [vmem:[#allocation7 + $0x1c0] sm:$0xff] %v3766_v43  ;;  %3787 = vpow2.f32 %v2943_v10  ;;  %v4973_v47 = vpop.f32.mrb[67].mxu1 }
 0x1c5   :  { %v3770_v0 = vpop.eup %3769  ;;  %2660 = vst [vmem:[#allocation7 + $0x1d0] sm:$0xff] %v3768_v56  ;;  %3789 = vpow2.f32 %v2944_v9  ;;  %v4978_v14 = vpop.f32.mrb[68].mxu0 }
 0x1c6   :  { %v3772_v55 = vpop.eup %3771  ;;  %2659 = vst [vmem:[#allocation7 + $0x1c8] sm:$0xff] %v3770_v0  ;;  %3791 = vpow2.f32 %v2946_v63  ;;  %v4980_v63 = vpop.f32.mrb[68].mxu1 }
 0x1c7   :  { %v3774_v10 = vpop.eup %3773  ;;  %2661 = vst [vmem:[#allocation7 + $0x1d8] sm:$0xff] %v3772_v55  ;;  %3793 = vpow2.f32 %v2945_v37  ;;  %v2954_v37 = vmul.f32 -1.442695, %v4823_v35  ;;  %v4983_v44 = vpop.f32.mrb[69].mxu0 }
 0x1c8   :  { %v3776_v25 = vpop.eup %3775  ;;  %2662 = vst [vmem:[#allocation7 + $0x1e0] sm:$0xff] %v3774_v10  ;;  %3795 = vpow2.f32 %v2947_v41  ;;  %v4985_v56 = vpop.f32.mrb[69].mxu1 }
 0x1c9   :  { %v3778_v9 = vpop.eup %3777  ;;  %2664 = vst [vmem:[#allocation7 + $0x1f0] sm:$0xff] %v3776_v25  ;;  %3797 = vpow2.f32 %v2948_v51  ;;  %5426 = vst [vmem:[#allocation25_spill] sm:$0xff] %v4985_v56  ;;  %v4987_v51 = vpop.f32.mrb[70].mxu0 }
 0x1ca   :  { %v3780_v43 = vpop.eup %3779  ;;  %2663 = vst [vmem:[#allocation7 + $0x1e8] sm:$0xff] %v3778_v9  ;;  %3799 = vpow2.f32 %v2950_v15  ;;  %5427 = vst [vmem:[#allocation26_spill] sm:$0xff] %v4987_v51  ;;  %v4989_v55 = vpop.f32.mrb[70].mxu1 }
 0x1cb   :  { %v3782_v41 = vpop.eup %3781  ;;  %2665 = vst [vmem:[#allocation7 + $0x1f8] sm:$0xff] %v3780_v43  ;;  %3801 = vpow2.f32 %v2949_v1  ;;  %5428 = vst [vmem:[#allocation27_spill] sm:$0xff] %v4989_v55  ;;  %v4991_v35 = vpop.f32.mrb[71].mxu0 }
 0x1cc   :  { %v3784_v20 = vpop.eup %3783  ;;  %2666 = vst [vmem:[#allocation7 + $0x200] sm:$0xff] %v3782_v41  ;;  %3803 = vpow2.f32 %v2951_v40  ;;  %5429 = vst [vmem:[#allocation28_spill] sm:$0xff] %v4991_v35  ;;  %v4993_v43 = vpop.f32.mrb[71].mxu1 }
 0x1cd   :  { %v3786_v57 = vpop.eup %3785  ;;  %v1900_v0 = vadd.f32 1.0, %v3784_v20  ;;  %3805 = vpow2.f32 %v2952_v59  ;;  %5430 = vst [vmem:[#allocation29_spill] sm:$0xff] %v4993_v43 }
 0x1ce   :  { %v3788_v15 = vpop.eup %3787  ;;  %v1899_v10 = vadd.f32 1.0, %v3786_v57  ;;  %3807 = vpow2.f32 %v2954_v37 }
 0x1cf   :  { %v3790_v25 = vpop.eup %3789  ;;  %3809 = vrcp.f32 %v1900_v0  ;;  %v1901_v9 = vadd.f32 1.0, %v3788_v15 }
 0x1d0   :  { %v3792_v1 = vpop.eup %3791  ;;  %3811 = vrcp.f32 %v1899_v10  ;;  %v1902_v40 = vadd.f32 1.0, %v3790_v25 }
 0x1d1   :  { %v3794_v41 = vpop.eup %3793  ;;  %3813 = vrcp.f32 %v1901_v9  ;;  %v1904_v59 = vadd.f32 1.0, %v3792_v1 }
 0x1d2   :  { %v3796_v20 = vpop.eup %3795  ;;  %3815 = vrcp.f32 %v1902_v40  ;;  %v1903_v51 = vadd.f32 1.0, %v3794_v41  ;;  %v2953_v40 = vmul.f32 -1.442695, %v4825_v5  ;;  %v2957_v5 = vmul.f32 -1.442695, %v4837_v4 }
 0x1d3   :  { %v3798_v55 = vpop.eup %3797  ;;  %3817 = vrcp.f32 %v1904_v59  ;;  %v1905_v57 = vadd.f32 1.0, %v3796_v20  ;;  %v2956_v20 = vmul.f32 -1.442695, %v4832_v61  ;;  %v2960_v61 = vmul.f32 -1.442695, %v4844_v18 }
 0x1d4   :  { %v3800_v37 = vpop.eup %3799  ;;  %3819 = vrcp.f32 %v1903_v51  ;;  %v1906_v35 = vadd.f32 1.0, %v3798_v55  ;;  %v2955_v51 = vmul.f32 -1.442695, %v4828_v6  ;;  %v2959_v6 = vmul.f32 -1.442695, %v4840_v7 }
 0x1d5   :  { %v3802_v56 = vpop.eup %3801  ;;  %3821 = vrcp.f32 %v1905_v57  ;;  %v1908_v0 = vadd.f32 1.0, %v3800_v37  ;;  %v2961_v7 = vmul.f32 -1.442695, %v4849_v22  ;;  %v2963_v18 = vmul.f32 -1.442695, %v4852_v26 }
 0x1d6   :  { %v3804_v15 = vpop.eup %3803  ;;  %3823 = vrcp.f32 %v1906_v35  ;;  %v1907_v43 = vadd.f32 1.0, %v3802_v56  ;;  %v2958_v56 = vmul.f32 -1.442695, %v4835_v12  ;;  %v2965_v26 = vmul.f32 -1.442695, %v4861_v48 }
 0x1d7   :  { %v3806_v10 = vpop.eup %3805  ;;  %3825 = vrcp.f32 %v1908_v0  ;;  %v1909_v25 = vadd.f32 1.0, %v3804_v15  ;;  %v5002_v0 = vpop.f32.mrb[72].mxu0 }
 0x1d8   :  { %v3808_v9 = vpop.eup %3807  ;;  %3827 = vrcp.f32 %v1907_v43  ;;  %v1910_v1 = vadd.f32 1.0, %v3806_v10  ;;  %v5004_v15 = vpop.f32.mrb[72].mxu1  ;;  %v2962_v10 = vmul.f32 -1.442695, %v4847_v24 }
 0x1d9   :  { %v3810_v41 = vpop.eup %3809  ;;  %3829 = vrcp.f32 %v1909_v25  ;;  %v1912_v59 = vadd.f32 1.0, %v3808_v9  ;;  %v5007_v4 = vpop.f32.mrb[73].mxu0 }
 0x1da   :  { %v3812_v55 = vpop.eup %3811  ;;  %2668 = vst [vmem:[#allocation7 + $0x210] sm:$0xff] %v3810_v41  ;;  %3831 = vrcp.f32 %v1910_v1  ;;  %v5009_v25 = vpop.f32.mrb[73].mxu1  ;;  %v2964_v41 = vmul.f32 -1.442695, %v4856_v33 }
 0x1db   :  { %v3814_v35 = vpop.eup %3813  ;;  %2667 = vst [vmem:[#allocation7 + $0x208] sm:$0xff] %v3812_v55  ;;  %3833 = vrcp.f32 %v1912_v59  ;;  %v5014_v24 = vpop.f32.mrb[74].mxu0  ;;  %v2966_v55 = vmul.f32 -1.442695, %v4859_v38 }
 0x1dc   :  { %v3816_v57 = vpop.eup %3815  ;;  %2669 = vst [vmem:[#allocation7 + $0x218] sm:$0xff] %v3814_v35  ;;  %3835 = vpow2.f32 %v2953_v40  ;;  %v5016_v59 = vpop.f32.mrb[74].mxu1 }
 0x1dd   :  { %v3818_v43 = vpop.eup %3817  ;;  %2670 = vst [vmem:[#allocation7 + $0x220] sm:$0xff] %v3816_v57  ;;  %3837 = vpow2.f32 %v2955_v51  ;;  %v5019_v22 = vpop.f32.mrb[75].mxu0 }
 0x1de   :  { %v3820_v37 = vpop.eup %3819  ;;  %2672 = vst [vmem:[#allocation7 + $0x230] sm:$0xff] %v3818_v43  ;;  %3839 = vpow2.f32 %v2956_v20  ;;  %v5021_v20 = vpop.f32.mrb[75].mxu1 }
 0x1df   :  { %v3822_v12 = vpop.eup %3821  ;;  %2671 = vst [vmem:[#allocation7 + $0x228] sm:$0xff] %v3820_v37  ;;  %3841 = vpow2.f32 %v2958_v56  ;;  %v5024_v57 = vpop.f32.mrb[76].mxu0 }
 0x1e0   :  { %v3824_v9 = vpop.eup %3823  ;;  %2673 = vst [vmem:[#allocation7 + $0x238] sm:$0xff] %v3822_v12  ;;  %3843 = vpow2.f32 %v2957_v5  ;;  %v5026_v5 = vpop.f32.mrb[76].mxu1 }
 0x1e1   :  { %v3826_v1 = vpop.eup %3825  ;;  %2674 = vst [vmem:[#allocation7 + $0x240] sm:$0xff] %v3824_v9  ;;  %3845 = vpow2.f32 %v2959_v6  ;;  %v5028_v6 = vpop.f32.mrb[77].mxu0 }
 0x1e2   :  { %v3828_v40 = vpop.eup %3827  ;;  %2676 = vst [vmem:[#allocation7 + $0x250] sm:$0xff] %v3826_v1  ;;  %3847 = vpow2.f32 %v2960_v61  ;;  %v5030_v12 = vpop.f32.mrb[77].mxu1 }
 0x1e3   :  { %v3830_v51 = vpop.eup %3829  ;;  %2675 = vst [vmem:[#allocation7 + $0x248] sm:$0xff] %v3828_v40  ;;  %3849 = vpow2.f32 %v2962_v10  ;;  %v5032_v1 = vpop.f32.mrb[78].mxu0 }
 0x1e4   :  { %v3832_v35 = vpop.eup %3831  ;;  %2677 = vst [vmem:[#allocation7 + $0x258] sm:$0xff] %v3830_v51  ;;  %3851 = vpow2.f32 %v2961_v7 }
 0x1e5   :  { %v3834_v56 = vpop.eup %3833  ;;  %2678 = vst [vmem:[#allocation7 + $0x260] sm:$0xff] %v3832_v35  ;;  %3853 = vpow2.f32 %v2963_v18 }
 0x1e6   :  { %v3836_v33 = vpop.eup %3835  ;;  %2680 = vst [vmem:[#allocation7 + $0x270] sm:$0xff] %v3834_v56  ;;  %3855 = vpow2.f32 %v2964_v41 }
 0x1e7   :  { %v3838_v38 = vpop.eup %3837  ;;  %v1911_v43 = vadd.f32 1.0, %v3836_v33  ;;  %3857 = vpow2.f32 %v2966_v55 }
 0x1e8   :  { %v3840_v37 = vpop.eup %3839  ;;  %v1913_v61 = vadd.f32 1.0, %v3838_v38  ;;  %3859 = vpow2.f32 %v2965_v26 }
 0x1e9   :  { %v3842_v48 = vpop.eup %3841  ;;  %3861 = vrcp.f32 %v1911_v43  ;;  %v1914_v10 = vadd.f32 1.0, %v3840_v37 }
 0x1ea   :  { %v3844_v9 = vpop.eup %3843  ;;  %3863 = vrcp.f32 %v1913_v61  ;;  %v1916_v7 = vadd.f32 1.0, %v3842_v48 }
 0x1eb   :  { %v3846_v18 = vpop.eup %3845  ;;  %3865 = vrcp.f32 %v1914_v10  ;;  %v1915_v40 = vadd.f32 1.0, %v3844_v9 }
 0x1ec   :  { %v3848_v41 = vpop.eup %3847  ;;  %3867 = vrcp.f32 %v1916_v7  ;;  %v1917_v51 = vadd.f32 1.0, %v3846_v18  ;;  %v2967_v7 = vmul.f32 -1.442695, %v4863_v42  ;;  %v2971_v42 = vmul.f32 -1.442695, %v4871_v16 }
 0x1ed   :  { %v3850_v55 = vpop.eup %3849  ;;  %3869 = vrcp.f32 %v1915_v40  ;;  %v1918_v35 = vadd.f32 1.0, %v3848_v41  ;;  %v2968_v41 = vmul.f32 -1.442695, %v4865_v8  ;;  %v2972_v8 = vmul.f32 -1.442695, %v4873_v23 }
 0x1ee   :  { %v3852_v26 = vpop.eup %3851  ;;  %3871 = vrcp.f32 %v1917_v51  ;;  %v1920_v56 = vadd.f32 1.0, %v3850_v55  ;;  %v2970_v55 = vmul.f32 -1.442695, %v4867_v49 }
 0x1ef   :  { %v3854_v33 = vpop.eup %3853  ;;  %3873 = vrcp.f32 %v1918_v35  ;;  %v1919_v38 = vadd.f32 1.0, %v3852_v26  ;;  %v2969_v26 = vmul.f32 -1.442695, %v4869_v34  ;;  %v2974_v34 = vmul.f32 -1.442695, %v4875_v28 }
 0x1f0   :  { %v3856_v43 = vpop.eup %3855  ;;  %3875 = vrcp.f32 %v1920_v56  ;;  %v1921_v37 = vadd.f32 1.0, %v3854_v33  ;;  %v5038_v56 = vpop.f32.mrb[78].mxu1 }
 0x1f1   :  { %v3858_v61 = vpop.eup %3857  ;;  %3877 = vrcp.f32 %v1919_v38  ;;  %v1922_v48 = vadd.f32 1.0, %v3856_v43  ;;  %v5042_v43 = vpop.f32.mrb[79].mxu0 }
 0x1f2   :  { %v3860_v10 = vpop.eup %3859  ;;  %3879 = vrcp.f32 %v1921_v37  ;;  %v1924_v9 = vadd.f32 1.0, %v3858_v61  ;;  %v5044_v49 = vpop.f32.mrb[79].mxu1 }
 0x1f3   :  { %v3862_v18 = vpop.eup %3861  ;;  %3881 = vrcp.f32 %v1922_v48  ;;  %v1923_v40 = vadd.f32 1.0, %v3860_v10  ;;  %v2973_v48 = vmul.f32 -1.442695, %v4877_v60  ;;  %v2975_v10 = vmul.f32 -1.442695, %v4879_v46 }
 0x1f4   :  { %v3864_v51 = vpop.eup %3863  ;;  %2679 = vst [vmem:[#allocation7 + $0x268] sm:$0xff] %v3862_v18  ;;  %3883 = vrcp.f32 %v1924_v9  ;;  %v2976_v9 = vmul.f32 -1.442695, %v4881_v62  ;;  %v5052_v18 = vpop.f32.mrb[80].mxu1  ;;  %v2977_v46 = vmul.f32 -1.442695, %v4885_v11 }
 0x1f5   :  { %v3866_v35 = vpop.eup %3865  ;;  %2681 = vst [vmem:[#allocation7 + $0x278] sm:$0xff] %v3864_v51  ;;  %3885 = vrcp.f32 %v1923_v40  ;;  %v5431_v40 = vld [vmem:[#allocation11_spill] sm:$0xff]  ;;  %v5057_v51 = vpop.f32.mrb[81].mxu1  ;;  %v5432_v62 = vld [vmem:[#allocation12_spill] sm:$0xff] }
 0x1f6   :  { %v3868_v33 = vpop.eup %3867  ;;  %2682 = vst [vmem:[#allocation7 + $0x280] sm:$0xff] %v3866_v35  ;;  %3887 = vpow2.f32 %v2967_v7  ;;  %v5050_v7 = vpop.f32.mrb[80].mxu0 }
 0x1f7   :  { %v3870_v38 = vpop.eup %3869  ;;  %2684 = vst [vmem:[#allocation7 + $0x290] sm:$0xff] %v3868_v33  ;;  %3889 = vpow2.f32 %v2968_v41  ;;  %v2978_v41 = vmul.f32 -1.442695, %v5431_v40  ;;  %v5055_v60 = vpop.f32.mrb[81].mxu0 }
 0x1f8   :  { %v3872_v37 = vpop.eup %3871  ;;  %2683 = vst [vmem:[#allocation7 + $0x288] sm:$0xff] %v3870_v38  ;;  %3891 = vpow2.f32 %v2970_v55  ;;  %v5063_v38 = vpop.f32.mrb[82].mxu1 }
 0x1f9   :  { %v3874_v61 = vpop.eup %3873  ;;  %2685 = vst [vmem:[#allocation7 + $0x298] sm:$0xff] %v3872_v37  ;;  %3893 = vpow2.f32 %v2969_v26  ;;  %v2979_v26 = vmul.f32 -1.442695, %v5432_v62 }
 0x1fa   :  { %v3876_v16 = vpop.eup %3875  ;;  %2686 = vst [vmem:[#allocation7 + $0x2a0] sm:$0xff] %v3874_v61  ;;  %3895 = vpow2.f32 %v2971_v42  ;;  %v5061_v42 = vpop.f32.mrb[82].mxu0 }
 0x1fb   :  { %v3878_v23 = vpop.eup %3877  ;;  %2688 = vst [vmem:[#allocation7 + $0x2b0] sm:$0xff] %v3876_v16  ;;  %3897 = vpow2.f32 %v2972_v8  ;;  %v5065_v37 = vpop.f32.mrb[83].mxu0 }
 0x1fc   :  { %v3880_v28 = vpop.eup %3879  ;;  %2687 = vst [vmem:[#allocation7 + $0x2a8] sm:$0xff] %v3878_v23  ;;  %3899 = vpow2.f32 %v2974_v34  ;;  %v5067_v34 = vpop.f32.mrb[83].mxu1 }
 0x1fd   :  { %v3882_v55 = vpop.eup %3881  ;;  %2689 = vst [vmem:[#allocation7 + $0x2b8] sm:$0xff] %v3880_v28  ;;  %3901 = vpow2.f32 %v2973_v48  ;;  %v5071_v28 = vpop.f32.mrb[84].mxu1 }
 0x1fe   :  { %v3884_v35 = vpop.eup %3883  ;;  %2690 = vst [vmem:[#allocation7 + $0x2c0] sm:$0xff] %v3882_v55  ;;  %3903 = vpow2.f32 %v2975_v10  ;;  %5434 = vst [vmem:[#allocation12_spill] sm:$0xff] %v5071_v28 }
 0x1ff   :  { %v3886_v33 = vpop.eup %3885  ;;  %2692 = vst [vmem:[#allocation7 + $0x2d0] sm:$0xff] %v3884_v35  ;;  %3905 = vpow2.f32 %v2976_v9  ;;  %v5069_v9 = vpop.f32.mrb[84].mxu0 }
 0x200   :  { %v3888_v8 = vpop.eup %3887  ;;  %2691 = vst [vmem:[#allocation7 + $0x2c8] sm:$0xff] %v3886_v33  ;;  %3907 = vpow2.f32 %v2978_v41  ;;  %5433 = vst [vmem:[#allocation11_spill] sm:$0xff] %v5069_v9 }
 0x201   :  { %v3890_v11 = vpop.eup %3889  ;;  %v1925_v61 = vadd.f32 1.0, %v3888_v8  ;;  %3909 = vpow2.f32 %v2977_v46 }
 0x202   :  { %v3892_v48 = vpop.eup %3891  ;;  %v1926_v16 = vadd.f32 1.0, %v3890_v11  ;;  %3911 = vpow2.f32 %v2979_v26 }
 0x203   :  { %v3894_v10 = vpop.eup %3893  ;;  %3913 = vrcp.f32 %v1925_v61  ;;  %v1928_v23 = vadd.f32 1.0, %v3892_v48 }
 0x204   :  { %v3896_v40 = vpop.eup %3895  ;;  %3915 = vrcp.f32 %v1926_v16  ;;  %v1927_v41 = vadd.f32 1.0, %v3894_v10 }
 0x205   :  { %v3898_v55 = vpop.eup %3897  ;;  %3917 = vrcp.f32 %v1928_v23  ;;  %v1929_v35 = vadd.f32 1.0, %v3896_v40 }
 0x206   :  { %v3900_v62 = vpop.eup %3899  ;;  %3919 = vrcp.f32 %v1927_v41  ;;  %v1930_v33 = vadd.f32 1.0, %v3898_v55  ;;  %v2980_v41 = vmul.f32 -1.442695, %v4891_v45  ;;  %v2984_v45 = vmul.f32 -1.442695, %v4903_v31 }
 0x207   :  { %v3902_v46 = vpop.eup %3901  ;;  %3921 = vrcp.f32 %v1929_v35  ;;  %v1932_v8 = vadd.f32 1.0, %v3900_v62  ;;  %v2982_v62 = vmul.f32 -1.442695, %v4894_v30 }
 0x208   :  { %v3904_v26 = vpop.eup %3903  ;;  %3923 = vrcp.f32 %v1930_v33  ;;  %v1931_v11 = vadd.f32 1.0, %v3902_v46  ;;  %v2981_v46 = vmul.f32 -1.442695, %v4896_v53 }
 0x209   :  { %v3906_v61 = vpop.eup %3905  ;;  %3925 = vrcp.f32 %v1932_v8  ;;  %v1933_v48 = vadd.f32 1.0, %v3904_v26 }
 0x20a   :  { %v3908_v9 = vpop.eup %3907  ;;  %3927 = vrcp.f32 %v1931_v11  ;;  %v1934_v28 = vadd.f32 1.0, %v3906_v61  ;;  %v5080_v11 = vpop.f32.mrb[85].mxu1  ;;  %v2986_v61 = vmul.f32 -1.442695, %v4906_v3 }
 0x20b   :  { %v3910_v16 = vpop.eup %3909  ;;  %3929 = vrcp.f32 %v1933_v48  ;;  %v1936_v10 = vadd.f32 1.0, %v3908_v9  ;;  %v2983_v9 = vmul.f32 -1.442695, %v4899_v19  ;;  %v2985_v48 = vmul.f32 -1.442695, %v4908_v50 }
 0x20c   :  { %v3912_v23 = vpop.eup %3911  ;;  %3931 = vrcp.f32 %v1934_v28  ;;  %v1935_v40 = vadd.f32 1.0, %v3910_v16  ;;  %v5078_v28 = vpop.f32.mrb[85].mxu0  ;;  %v2987_v16 = vmul.f32 -1.442695, %v4911_v32  ;;  %v2989_v32 = vmul.f32 -1.442695, %v4920_v39 }
 0x20d   :  { %v3914_v55 = vpop.eup %3913  ;;  %3933 = vrcp.f32 %v1936_v10  ;;  %v1937_v35 = vadd.f32 1.0, %v3912_v23  ;;  %v2988_v10 = vmul.f32 -1.442695, %v4915_v54  ;;  %v5086_v23 = vpop.f32.mrb[86].mxu0  ;;  %v5435_v54 = vld [vmem:[#allocation13_spill] sm:$0xff] }
 0x20e   :  { %v3916_v33 = vpop.eup %3915  ;;  %2693 = vst [vmem:[#allocation7 + $0x2d8] sm:$0xff] %v3914_v55  ;;  %3935 = vrcp.f32 %v1935_v40  ;;  %v5088_v40 = vpop.f32.mrb[86].mxu1 }
 0x20f   :  { %v3918_v8 = vpop.eup %3917  ;;  %2694 = vst [vmem:[#allocation7 + $0x2e0] sm:$0xff] %v3916_v33  ;;  %3937 = vrcp.f32 %v1937_v35  ;;  %v5091_v50 = vpop.f32.mrb[87].mxu0  ;;  %v2991_v33 = vmul.f32 -1.442695, %v5435_v54 }
 0x210   :  { %v3920_v26 = vpop.eup %3919  ;;  %2696 = vst [vmem:[#allocation7 + $0x2f0] sm:$0xff] %v3918_v8  ;;  %3939 = vpow2.f32 %v2980_v41  ;;  %v2990_v41 = vmul.f32 -1.442695, %v4918_v17  ;;  %v5093_v55 = vpop.f32.mrb[87].mxu1  ;;  %v5436_v8 = vld [vmem:[#allocation14_spill] sm:$0xff] }
 0x211   :  { %v3922_v30 = vpop.eup %3921  ;;  %2695 = vst [vmem:[#allocation7 + $0x2e8] sm:$0xff] %v3920_v26  ;;  %3941 = vpow2.f32 %v2982_v62  ;;  %v5098_v17 = vpop.f32.mrb[88].mxu0 }
 0x212   :  { %v3924_v53 = vpop.eup %3923  ;;  %2697 = vst [vmem:[#allocation7 + $0x2f8] sm:$0xff] %v3922_v30  ;;  %3943 = vpow2.f32 %v2981_v46  ;;  %v5100_v26 = vpop.f32.mrb[88].mxu1 }
 0x213   :  { %v3926_v19 = vpop.eup %3925  ;;  %2698 = vst [vmem:[#allocation7 + $0x300] sm:$0xff] %v3924_v53  ;;  %3945 = vpow2.f32 %v2983_v9  ;;  %v2992_v9 = vmul.f32 -1.442695, %v5436_v8  ;;  %v5102_v30 = vpop.f32.mrb[89].mxu0 }
 0x214   :  { %v3928_v31 = vpop.eup %3927  ;;  %2700 = vst [vmem:[#allocation7 + $0x310] sm:$0xff] %v3926_v19  ;;  %3947 = vpow2.f32 %v2984_v45  ;;  %v5104_v39 = vpop.f32.mrb[89].mxu1 }
 0x215   :  { %v3930_v3 = vpop.eup %3929  ;;  %2699 = vst [vmem:[#allocation7 + $0x308] sm:$0xff] %v3928_v31  ;;  %3949 = vpow2.f32 %v2986_v61  ;;  %v5106_v31 = vpop.f32.mrb[90].mxu0 }
 0x216   :  { %v3932_v35 = vpop.eup %3931  ;;  %2701 = vst [vmem:[#allocation7 + $0x318] sm:$0xff] %v3930_v3  ;;  %3951 = vpow2.f32 %v2985_v48  ;;  %5437 = vst [vmem:[#allocation13_spill] sm:$0xff] %v5106_v31 }
 0x217   :  { %v3934_v62 = vpop.eup %3933  ;;  %2702 = vst [vmem:[#allocation7 + $0x320] sm:$0xff] %v3932_v35  ;;  %3953 = vpow2.f32 %v2987_v16  ;;  %v5110_v35 = vpop.f32.mrb[91].mxu0 }
 0x218   :  { %v3936_v46 = vpop.eup %3935  ;;  %2704 = vst [vmem:[#allocation7 + $0x330] sm:$0xff] %v3934_v62  ;;  %3955 = vpow2.f32 %v2988_v10  ;;  %v5108_v10 = vpop.f32.mrb[90].mxu1  ;;  %5439 = vst [vmem:[#allocation30_spill] sm:$0xff] %v5110_v35 }
 0x219   :  { %v3938_v45 = vpop.eup %3937  ;;  %2703 = vst [vmem:[#allocation7 + $0x328] sm:$0xff] %v3936_v46  ;;  %3957 = vpow2.f32 %v2990_v41  ;;  %5438 = vst [vmem:[#allocation14_spill] sm:$0xff] %v5108_v10 }
 0x21a   :  { %v3940_v61 = vpop.eup %3939  ;;  %2705 = vst [vmem:[#allocation7 + $0x338] sm:$0xff] %v3938_v45  ;;  %3959 = vpow2.f32 %v2989_v32 }
 0x21b   :  { %v3942_v53 = vpop.eup %3941  ;;  %v1938_v48 = vadd.f32 1.0, %v3940_v61  ;;  %3961 = vpow2.f32 %v2991_v33 }
 0x21c   :  { %v3944_v19 = vpop.eup %3943  ;;  %v1940_v16 = vadd.f32 1.0, %v3942_v53  ;;  %3963 = vpow2.f32 %v2992_v9 }
 0x21d   :  { %v3946_v3 = vpop.eup %3945  ;;  %3965 = vrcp.f32 %v1938_v48  ;;  %v1939_v41 = vadd.f32 1.0, %v3944_v19 }
 0x21e   :  { %v3948_v62 = vpop.eup %3947  ;;  %3967 = vrcp.f32 %v1940_v16  ;;  %v1941_v54 = vadd.f32 1.0, %v3946_v3 }
 0x21f   :  { %v3950_v46 = vpop.eup %3949  ;;  %3969 = vrcp.f32 %v1939_v41  ;;  %v1942_v32 = vadd.f32 1.0, %v3948_v62 }
 0x220   :  { %v3952_v8 = vpop.eup %3951  ;;  %3971 = vrcp.f32 %v1941_v54  ;;  %v1944_v33 = vadd.f32 1.0, %v3950_v46  ;;  %v5440_v54 = vld [vmem:[#allocation15_spill] sm:$0xff] }
 0x221   :  { %v3954_v45 = vpop.eup %3953  ;;  %3973 = vrcp.f32 %v1942_v32  ;;  %v1943_v9 = vadd.f32 1.0, %v3952_v8  ;;  %v2994_v46 = vmul.f32 -1.442695, %v5440_v54  ;;  %v5441_v8 = vld [vmem:[#allocation16_spill] sm:$0xff] }
 0x222   :  { %v3956_v61 = vpop.eup %3955  ;;  %3975 = vrcp.f32 %v1944_v33  ;;  %v1945_v53 = vadd.f32 1.0, %v3954_v45  ;;  %v2993_v33 = vmul.f32 -1.442695, %v5441_v8  ;;  %v5446_v54 = vld [vmem:[#allocation20_spill] sm:$0xff]  ;;  %v5447_v8 = vld [vmem:[#allocation21_spill] sm:$0xff] }
 0x223   :  { %v3958_v10 = vpop.eup %3957  ;;  %3977 = vrcp.f32 %v1943_v9  ;;  %v1946_v48 = vadd.f32 1.0, %v3956_v61  ;;  %v5442_v9 = vld [vmem:[#allocation17_spill] sm:$0xff] }
 0x224   :  { %v3960_v19 = vpop.eup %3959  ;;  %3979 = vrcp.f32 %v1945_v53  ;;  %v1948_v35 = vadd.f32 1.0, %v3958_v10  ;;  %v2995_v61 = vmul.f32 -1.442695, %v5442_v9  ;;  %v5443_v10 = vld [vmem:[#allocation18_spill] sm:$0xff] }
 0x225   :  { %v3962_v16 = vpop.eup %3961  ;;  %3981 = vrcp.f32 %v1946_v48  ;;  %v1947_v3 = vadd.f32 1.0, %v3960_v19  ;;  %v2996_v48 = vmul.f32 -1.442695, %v5443_v10  ;;  %v5116_v19 = vpop.f32.mrb[91].mxu1  ;;  %v5448_v9 = vld [vmem:[#allocation22_spill] sm:$0xff] }
 0x226   :  { %v3964_v41 = vpop.eup %3963  ;;  %3983 = vrcp.f32 %v1948_v35  ;;  %v1949_v62 = vadd.f32 1.0, %v3962_v16  ;;  %5444 = vst [vmem:[#allocation15_spill] sm:$0xff] %v5116_v19  ;;  %v5445_v16 = vld [vmem:[#allocation19_spill] sm:$0xff]  ;;  %v3000_v10 = vmul.f32 -1.442695, %v5448_v9  ;;  %v5122_v19 = vpop.f32.mrb[92].mxu0 }
 0x227   :  { %v3966_v31 = vpop.eup %3965  ;;  %3985 = vrcp.f32 %v1947_v3  ;;  %v1950_v32 = vadd.f32 1.0, %v3964_v41  ;;  %v2998_v3 = vmul.f32 -1.442695, %v5445_v16  ;;  %v5127_v16 = vpop.f32.mrb[93].mxu0 }
 0x228   :  { %v3968_v45 = vpop.eup %3967  ;;  %2706 = vst [vmem:[#allocation7 + $0x340] sm:$0xff] %v3966_v31  ;;  %3987 = vrcp.f32 %v1949_v62  ;;  %v2997_v31 = vmul.f32 -1.442695, %v5446_v54  ;;  %v5451_v54 = vld [vmem:[#allocation24_spill] sm:$0xff] }
 0x229   :  { %v3970_v53 = vpop.eup %3969  ;;  %2708 = vst [vmem:[#allocation7 + $0x350] sm:$0xff] %v3968_v45  ;;  %3989 = vrcp.f32 %v1950_v32  ;;  %v2999_v45 = vmul.f32 -1.442695, %v5447_v8  ;;  %v3003_v8 = vmul.f32 -1.442695, %v4948_v13 }
 0x22a   :  { %v3972_v35 = vpop.eup %3971  ;;  %2707 = vst [vmem:[#allocation7 + $0x348] sm:$0xff] %v3970_v53  ;;  %3991 = vpow2.f32 %v2994_v46  ;;  %v5124_v46 = vpop.f32.mrb[92].mxu1 }
 0x22b   :  { %v3974_v41 = vpop.eup %3973  ;;  %2709 = vst [vmem:[#allocation7 + $0x358] sm:$0xff] %v3972_v35  ;;  %3993 = vpow2.f32 %v2993_v33  ;;  %v5449_v33 = vld [vmem:[#allocation23_spill] sm:$0xff] }
 0x22c   :  { %v3976_v62 = vpop.eup %3975  ;;  %2710 = vst [vmem:[#allocation7 + $0x360] sm:$0xff] %v3974_v41  ;;  %3995 = vpow2.f32 %v2995_v61  ;;  %v3002_v35 = vmul.f32 -1.442695, %v5449_v33  ;;  %v5129_v41 = vpop.f32.mrb[93].mxu1 }
 0x22d   :  { %v3978_v32 = vpop.eup %3977  ;;  %2712 = vst [vmem:[#allocation7 + $0x370] sm:$0xff] %v3976_v62  ;;  %3997 = vpow2.f32 %v2996_v48  ;;  %5450 = vst [vmem:[#allocation16_spill] sm:$0xff] %v5129_v41  ;;  %v3001_v48 = vmul.f32 -1.442695, %v5451_v54  ;;  %v5136_v33 = vpop.f32.mrb[94].mxu1 }
 0x22e   :  { %v3980_v53 = vpop.eup %3979  ;;  %2711 = vst [vmem:[#allocation7 + $0x368] sm:$0xff] %v3978_v32  ;;  %3999 = vpow2.f32 %v2998_v3  ;;  %v3004_v3 = vmul.f32 -1.442695, %v4950_v21  ;;  %v5134_v32 = vpop.f32.mrb[94].mxu0  ;;  %5452 = vst [vmem:[#allocation17_spill] sm:$0xff] %v5136_v33 }
 0x22f   :  { %v3982_v61 = vpop.eup %3981  ;;  %2713 = vst [vmem:[#allocation7 + $0x378] sm:$0xff] %v3980_v53  ;;  %4001 = vpow2.f32 %v2997_v31  ;;  %v3006_v31 = vmul.f32 -1.442695, %v4953_v2  ;;  %v5139_v53 = vpop.f32.mrb[95].mxu0 }
 0x230   :  { %v3984_v62 = vpop.eup %3983  ;;  %2714 = vst [vmem:[#allocation7 + $0x380] sm:$0xff] %v3982_v61  ;;  %4003 = vpow2.f32 %v2999_v45  ;;  %5453 = vst [vmem:[#allocation18_spill] sm:$0xff] %v5139_v53  ;;  %v5141_v61 = vpop.f32.mrb[95].mxu1 }
 0x231   :  { %v3986_v9 = vpop.eup %3985  ;;  %2716 = vst [vmem:[#allocation7 + $0x390] sm:$0xff] %v3984_v62  ;;  %4005 = vpow2.f32 %v3000_v10  ;;  %5454 = vst [vmem:[#allocation19_spill] sm:$0xff] %v5141_v61  ;;  %v5143_v54 = vpop.f32.mrb[96].mxu0 }
 0x232   :  { %v3988_v41 = vpop.eup %3987  ;;  %2715 = vst [vmem:[#allocation7 + $0x388] sm:$0xff] %v3986_v9  ;;  %4007 = vpow2.f32 %v3002_v35  ;;  %5455 = vst [vmem:[#allocation20_spill] sm:$0xff] %v5143_v54  ;;  %v5145_v62 = vpop.f32.mrb[96].mxu1 }
 0x233   :  { %v3990_v45 = vpop.eup %3989  ;;  %2717 = vst [vmem:[#allocation7 + $0x398] sm:$0xff] %v3988_v41  ;;  %4009 = vpow2.f32 %v3001_v48  ;;  %5456 = vst [vmem:[#allocation21_spill] sm:$0xff] %v5145_v62  ;;  %v5147_v2 = vpop.f32.mrb[97].mxu0 }
 0x234   :  { %v3992_v13 = vpop.eup %3991  ;;  %2718 = vst [vmem:[#allocation7 + $0x3a0] sm:$0xff] %v3990_v45  ;;  %4011 = vpow2.f32 %v3003_v8  ;;  %5457 = vst [vmem:[#allocation22_spill] sm:$0xff] %v5147_v2  ;;  %v5149_v41 = vpop.f32.mrb[97].mxu1 }
 0x235   :  { %v3994_v21 = vpop.eup %3993  ;;  %v1952_v10 = vadd.f32 1.0, %v3992_v13  ;;  %4013 = vpow2.f32 %v3004_v3  ;;  %5458 = vst [vmem:[#allocation23_spill] sm:$0xff] %v5149_v41 }
 0x236   :  { %v3996_v35 = vpop.eup %3995  ;;  %v1951_v9 = vadd.f32 1.0, %v3994_v21  ;;  %4015 = vpow2.f32 %v3006_v31 }
 0x237   :  { %v3998_v53 = vpop.eup %3997  ;;  %4017 = vrcp.f32 %v1952_v10  ;;  %v1953_v61 = vadd.f32 1.0, %v3996_v35 }
 0x238   :  { %v4000_v48 = vpop.eup %3999  ;;  %4019 = vrcp.f32 %v1951_v9  ;;  %v1954_v8 = vadd.f32 1.0, %v3998_v53 }
 0x239   :  { %v4002_v45 = vpop.eup %4001  ;;  %4021 = vrcp.f32 %v1953_v61  ;;  %v1956_v3 = vadd.f32 1.0, %v4000_v48 }
 0x23a   :  { %v4004_v13 = vpop.eup %4003  ;;  %4023 = vrcp.f32 %v1954_v8  ;;  %v1955_v54 = vadd.f32 1.0, %v4002_v45  ;;  %v3005_v8 = vmul.f32 -1.442695, %v4955_v52  ;;  %v3009_v52 = vmul.f32 -1.442695, %v4971_v58 }
 0x23b   :  { %v4006_v62 = vpop.eup %4005  ;;  %4025 = vrcp.f32 %v1956_v3  ;;  %v1957_v21 = vadd.f32 1.0, %v4004_v13  ;;  %v3008_v13 = vmul.f32 -1.442695, %v4966_v27  ;;  %v3012_v27 = vmul.f32 -1.442695, %v4978_v14  ;;  %v5459_v14 = vld [vmem:[#allocation25_spill] sm:$0xff] }
 0x23c   :  { %v4008_v31 = vpop.eup %4007  ;;  %4027 = vrcp.f32 %v1955_v54  ;;  %v1958_v2 = vadd.f32 1.0, %v4006_v62  ;;  %v3007_v54 = vmul.f32 -1.442695, %v4960_v36  ;;  %v3011_v36 = vmul.f32 -1.442695, %v4973_v47 }
 0x23d   :  { %v4010_v33 = vpop.eup %4009  ;;  %4029 = vrcp.f32 %v1957_v21  ;;  %v1960_v10 = vadd.f32 1.0, %v4008_v31  ;;  %v3013_v47 = vmul.f32 -1.442695, %v4983_v44 }
 0x23e   :  { %v4012_v35 = vpop.eup %4011  ;;  %4031 = vrcp.f32 %v1958_v2  ;;  %v1959_v41 = vadd.f32 1.0, %v4010_v33  ;;  %v3010_v33 = vmul.f32 -1.442695, %v4968_v29 }
 0x23f   :  { %v4014_v9 = vpop.eup %4013  ;;  %4033 = vrcp.f32 %v1960_v10  ;;  %v1961_v53 = vadd.f32 1.0, %v4012_v35  ;;  %v5158_v10 = vpop.f32.mrb[98].mxu0 }
 0x240   :  { %v4016_v61 = vpop.eup %4015  ;;  %4035 = vrcp.f32 %v1959_v41  ;;  %v1962_v48 = vadd.f32 1.0, %v4014_v9  ;;  %v5160_v35 = vpop.f32.mrb[98].mxu1  ;;  %v3014_v9 = vmul.f32 -1.442695, %v4980_v63 }
 0x241   :  { %v4018_v45 = vpop.eup %4017  ;;  %4037 = vrcp.f32 %v1961_v53  ;;  %v1964_v3 = vadd.f32 1.0, %v4016_v61  ;;  %v5163_v58 = vpop.f32.mrb[99].mxu0 }
 0x242   :  { %v4020_v62 = vpop.eup %4019  ;;  %2720 = vst [vmem:[#allocation7 + $0x3b0] sm:$0xff] %v4018_v45  ;;  %4039 = vrcp.f32 %v1962_v48  ;;  %v5165_v53 = vpop.f32.mrb[99].mxu1 }
 0x243   :  { %v4022_v2 = vpop.eup %4021  ;;  %2719 = vst [vmem:[#allocation7 + $0x3a8] sm:$0xff] %v4020_v62  ;;  %4041 = vrcp.f32 %v1964_v3  ;;  %v5460_v3 = vld [vmem:[#allocation26_spill] sm:$0xff]  ;;  %v5170_v63 = vpop.f32.mrb[100].mxu0 }
 0x244   :  { %v4024_v21 = vpop.eup %4023  ;;  %2721 = vst [vmem:[#allocation7 + $0x3b8] sm:$0xff] %v4022_v2  ;;  %4043 = vpow2.f32 %v3005_v8  ;;  %v3015_v8 = vmul.f32 -1.442695, %v5459_v14  ;;  %v5172_v62 = vpop.f32.mrb[100].mxu1  ;;  %v5461_v2 = vld [vmem:[#allocation27_spill] sm:$0xff] }
 0x245   :  { %v4026_v41 = vpop.eup %4025  ;;  %2722 = vst [vmem:[#allocation7 + $0x3c0] sm:$0xff] %v4024_v21  ;;  %4045 = vpow2.f32 %v3007_v54  ;;  %v3016_v54 = vmul.f32 -1.442695, %v5460_v3  ;;  %v5175_v44 = vpop.f32.mrb[101].mxu0 }
 0x246   :  { %v4028_v31 = vpop.eup %4027  ;;  %2724 = vst [vmem:[#allocation7 + $0x3d0] sm:$0xff] %v4026_v41  ;;  %4047 = vpow2.f32 %v3008_v13  ;;  %v5177_v21 = vpop.f32.mrb[101].mxu1  ;;  %v5462_v41 = vld [vmem:[#allocation28_spill] sm:$0xff] }
 0x247   :  { %v4030_v29 = vpop.eup %4029  ;;  %2723 = vst [vmem:[#allocation7 + $0x3c8] sm:$0xff] %v4028_v31  ;;  %4049 = vpow2.f32 %v3010_v33  ;;  %v3018_v33 = vmul.f32 -1.442695, %v5461_v2 }
 0x248   :  { %v4032_v61 = vpop.eup %4031  ;;  %2725 = vst [vmem:[#allocation7 + $0x3d8] sm:$0xff] %v4030_v29  ;;  %4051 = vpow2.f32 %v3009_v52  ;;  %v5180_v29 = vpop.f32.mrb[102].mxu0 }
 0x249   :  { %v4034_v48 = vpop.eup %4033  ;;  %2726 = vst [vmem:[#allocation7 + $0x3e0] sm:$0xff] %v4032_v61  ;;  %4053 = vpow2.f32 %v3011_v36  ;;  %v3017_v36 = vmul.f32 -1.442695, %v5462_v41  ;;  %5463 = vst [vmem:[#allocation24_spill] sm:$0xff] %v5180_v29  ;;  %v5184_v14 = vpop.f32.mrb[103].mxu0 }
 0x24a   :  { %v4036_v45 = vpop.eup %4035  ;;  %2728 = vst [vmem:[#allocation7 + $0x3f0] sm:$0xff] %v4034_v48  ;;  %4055 = vpow2.f32 %v3012_v27  ;;  %5465 = vst [vmem:[#allocation26_spill] sm:$0xff] %v5184_v14 }
 0x24b   :  { %v4038_v13 = vpop.eup %4037  ;;  %2727 = vst [vmem:[#allocation7 + $0x3e8] sm:$0xff] %v4036_v45  ;;  %4057 = vpow2.f32 %v3014_v9  ;;  %v5182_v9 = vpop.f32.mrb[102].mxu1 }
 0x24c   :  { %v4040_v52 = vpop.eup %4039  ;;  %2729 = vst [vmem:[#allocation7 + $0x3f8] sm:$0xff] %v4038_v13  ;;  %4059 = vpow2.f32 %v3013_v47  ;;  %5464 = vst [vmem:[#allocation25_spill] sm:$0xff] %v5182_v9  ;;  %v5186_v47 = vpop.f32.mrb[103].mxu1 }
 0x24d   :  { %v4042_v31 = vpop.eup %4041  ;;  %2730 = vst [vmem:[#allocation7 + $0x400] sm:$0xff] %v4040_v52  ;;  %4061 = vpow2.f32 %v3015_v8  ;;  %5466 = vst [vmem:[#allocation27_spill] sm:$0xff] %v5186_v47  ;;  %v5188_v52 = vpop.f32.mrb[104].mxu0 }
 0x24e   :  { %v4044_v27 = vpop.eup %4043  ;;  %2732 = vst [vmem:[#allocation7 + $0x410] sm:$0xff] %v4042_v31  ;;  %4063 = vpow2.f32 %v3016_v54  ;;  %5467 = vst [vmem:[#allocation28_spill] sm:$0xff] %v5188_v52 }
 0x24f   :  { %v4046_v61 = vpop.eup %4045  ;;  %v1963_v48 = vadd.f32 1.0, %v4044_v27  ;;  %4065 = vpow2.f32 %v3018_v33 }
 0x250   :  { %v4048_v45 = vpop.eup %4047  ;;  %v1965_v3 = vadd.f32 1.0, %v4046_v61  ;;  %4067 = vpow2.f32 %v3017_v36 }
 0x251   :  { %v4050_v13 = vpop.eup %4049  ;;  %4069 = vrcp.f32 %v1963_v48  ;;  %v1966_v8 = vadd.f32 1.0, %v4048_v45 }
 0x252   :  { %v4052_v2 = vpop.eup %4051  ;;  %4071 = vrcp.f32 %v1965_v3  ;;  %v1968_v54 = vadd.f32 1.0, %v4050_v13 }
 0x253   :  { %v4054_v41 = vpop.eup %4053  ;;  %4073 = vrcp.f32 %v1966_v8  ;;  %v1967_v31 = vadd.f32 1.0, %v4052_v2 }
 0x254   :  { %v4056_v27 = vpop.eup %4055  ;;  %4075 = vrcp.f32 %v1968_v54  ;;  %v1969_v33 = vadd.f32 1.0, %v4054_v41  ;;  %v5468_v54 = vld [vmem:[#allocation29_spill] sm:$0xff] }
 0x255   :  { %v4058_v14 = vpop.eup %4057  ;;  %4077 = vrcp.f32 %v1967_v31  ;;  %v1970_v61 = vadd.f32 1.0, %v4056_v27  ;;  %v3019_v41 = vmul.f32 -1.442695, %v5468_v54  ;;  %v3020_v27 = vmul.f32 -1.442695, %v5002_v0 }
 0x256   :  { %v4060_v36 = vpop.eup %4059  ;;  %4079 = vrcp.f32 %v1969_v33  ;;  %v1972_v47 = vadd.f32 1.0, %v4058_v14  ;;  %v3022_v33 = vmul.f32 -1.442695, %v5004_v15  ;;  %v3024_v0 = vmul.f32 -1.442695, %v5014_v24 }
 0x257   :  { %v4062_v9 = vpop.eup %4061  ;;  %4081 = vrcp.f32 %v1970_v61  ;;  %v1971_v48 = vadd.f32 1.0, %v4060_v36  ;;  %v5194_v61 = vpop.f32.mrb[104].mxu1 }
 0x258   :  { %v4064_v45 = vpop.eup %4063  ;;  %4083 = vrcp.f32 %v1972_v47  ;;  %v1973_v3 = vadd.f32 1.0, %v4062_v9  ;;  %v3021_v9 = vmul.f32 -1.442695, %v5007_v4  ;;  %v5200_v15 = vpop.f32.mrb[105].mxu1  ;;  %v3026_v4 = vmul.f32 -1.442695, %v5016_v59 }
 0x259   :  { %v4066_v13 = vpop.eup %4065  ;;  %4085 = vrcp.f32 %v1971_v48  ;;  %v1974_v52 = vadd.f32 1.0, %v4064_v45 }
 0x25a   :  { %v4068_v8 = vpop.eup %4067  ;;  %4087 = vrcp.f32 %v1973_v3  ;;  %v1976_v2 = vadd.f32 1.0, %v4066_v13  ;;  %v3025_v13 = vmul.f32 -1.442695, %v5019_v22 }
 0x25b   :  { %v4070_v29 = vpop.eup %4069  ;;  %4089 = vrcp.f32 %v1974_v52  ;;  %v1975_v31 = vadd.f32 1.0, %v4068_v8  ;;  %v3023_v52 = vmul.f32 -1.442695, %v5009_v25  ;;  %v3027_v8 = vmul.f32 -1.442695, %v5021_v20 }
 0x25c   :  { %v4072_v14 = vpop.eup %4071  ;;  %2731 = vst [vmem:[#allocation7 + $0x408] sm:$0xff] %v4070_v29  ;;  %4091 = vrcp.f32 %v1976_v2  ;;  %v5198_v29 = vpop.f32.mrb[105].mxu0  ;;  %v3028_v2 = vmul.f32 -1.442695, %v5024_v57  ;;  %v3029_v20 = vmul.f32 -1.442695, %v5028_v6 }
 0x25d   :  { %v4074_v47 = vpop.eup %4073  ;;  %2733 = vst [vmem:[#allocation7 + $0x418] sm:$0xff] %v4072_v14  ;;  %4093 = vrcp.f32 %v1975_v31  ;;  %v5206_v54 = vpop.f32.mrb[106].mxu0  ;;  %v3030_v31 = vmul.f32 -1.442695, %v5026_v5  ;;  %v3031_v57 = vmul.f32 -1.442695, %v5030_v12 }
 0x25e   :  { %v4076_v36 = vpop.eup %4075  ;;  %2734 = vst [vmem:[#allocation7 + $0x420] sm:$0xff] %v4074_v47  ;;  %4095 = vpow2.f32 %v3019_v41  ;;  %v5208_v41 = vpop.f32.mrb[106].mxu1 }
 0x25f   :  { %v4078_v48 = vpop.eup %4077  ;;  %2736 = vst [vmem:[#allocation7 + $0x430] sm:$0xff] %v4076_v36  ;;  %4097 = vpow2.f32 %v3020_v27  ;;  %v5211_v22 = vpop.f32.mrb[107].mxu0 }
 0x260   :  { %v4080_v45 = vpop.eup %4079  ;;  %2735 = vst [vmem:[#allocation7 + $0x428] sm:$0xff] %v4078_v48  ;;  %4099 = vpow2.f32 %v3022_v33  ;;  %v5213_v27 = vpop.f32.mrb[107].mxu1 }
 0x261   :  { %v4082_v3 = vpop.eup %4081  ;;  %2737 = vst [vmem:[#allocation7 + $0x438] sm:$0xff] %v4080_v45  ;;  %4101 = vpow2.f32 %v3021_v9  ;;  %v5217_v9 = vpop.f32.mrb[108].mxu0 }
 0x262   :  { %v4084_v25 = vpop.eup %4083  ;;  %2738 = vst [vmem:[#allocation7 + $0x440] sm:$0xff] %v4082_v3  ;;  %4103 = vpow2.f32 %v3023_v52  ;;  %v5219_v5 = vpop.f32.mrb[108].mxu1 }
 0x263   :  { %v4086_v24 = vpop.eup %4085  ;;  %2740 = vst [vmem:[#allocation7 + $0x450] sm:$0xff] %v4084_v25  ;;  %4105 = vpow2.f32 %v3024_v0  ;;  %v5221_v52 = vpop.f32.mrb[109].mxu0 }
 0x264   :  { %v4088_v59 = vpop.eup %4087  ;;  %2739 = vst [vmem:[#allocation7 + $0x448] sm:$0xff] %v4086_v24  ;;  %4107 = vpow2.f32 %v3026_v4  ;;  %v5223_v48 = vpop.f32.mrb[109].mxu1 }
 0x265   :  { %v4090_v14 = vpop.eup %4089  ;;  %2741 = vst [vmem:[#allocation7 + $0x458] sm:$0xff] %v4088_v59  ;;  %4109 = vpow2.f32 %v3025_v13  ;;  %v5225_v13 = vpop.f32.mrb[110].mxu0 }
 0x266   :  { %v4092_v33 = vpop.eup %4091  ;;  %2742 = vst [vmem:[#allocation7 + $0x460] sm:$0xff] %v4090_v14  ;;  %4111 = vpow2.f32 %v3027_v8  ;;  %v5227_v25 = vpop.f32.mrb[110].mxu1 }
 0x267   :  { %v4094_v47 = vpop.eup %4093  ;;  %2744 = vst [vmem:[#allocation7 + $0x470] sm:$0xff] %v4092_v33  ;;  %4113 = vpow2.f32 %v3028_v2 }
 0x268   :  { %v4096_v36 = vpop.eup %4095  ;;  %2743 = vst [vmem:[#allocation7 + $0x468] sm:$0xff] %v4094_v47  ;;  %4115 = vpow2.f32 %v3030_v31 }
 0x269   :  { %v4098_v6 = vpop.eup %4097  ;;  %v1977_v0 = vadd.f32 1.0, %v4096_v36  ;;  %4117 = vpow2.f32 %v3029_v20 }
 0x26a   :  { %v4100_v45 = vpop.eup %4099  ;;  %v1978_v4 = vadd.f32 1.0, %v4098_v6  ;;  %4119 = vpow2.f32 %v3031_v57 }
 0x26b   :  { %v4102_v12 = vpop.eup %4101  ;;  %4121 = vrcp.f32 %v1977_v0  ;;  %v1980_v3 = vadd.f32 1.0, %v4100_v45 }
 0x26c   :  { %v4104_v8 = vpop.eup %4103  ;;  %4123 = vrcp.f32 %v1978_v4  ;;  %v1979_v24 = vadd.f32 1.0, %v4102_v12 }
 0x26d   :  { %v4106_v2 = vpop.eup %4105  ;;  %4125 = vrcp.f32 %v1980_v3  ;;  %v1981_v59 = vadd.f32 1.0, %v4104_v8 }
 0x26e   :  { %v4108_v31 = vpop.eup %4107  ;;  %4127 = vrcp.f32 %v1979_v24  ;;  %v1982_v14 = vadd.f32 1.0, %v4106_v2  ;;  %v3032_v24 = vmul.f32 -1.442695, %v5032_v1  ;;  %v3036_v1 = vmul.f32 -1.442695, %v5050_v7 }
 0x26f   :  { %v4110_v20 = vpop.eup %4109  ;;  %4129 = vrcp.f32 %v1981_v59  ;;  %v1984_v33 = vadd.f32 1.0, %v4108_v31  ;;  %v3034_v31 = vmul.f32 -1.442695, %v5038_v56 }
 0x270   :  { %v4112_v57 = vpop.eup %4111  ;;  %4131 = vrcp.f32 %v1982_v14  ;;  %v1983_v47 = vadd.f32 1.0, %v4110_v20  ;;  %v3033_v20 = vmul.f32 -1.442695, %v5042_v43 }
 0x271   :  { %v4114_v36 = vpop.eup %4113  ;;  %4133 = vrcp.f32 %v1984_v33  ;;  %v1985_v6 = vadd.f32 1.0, %v4112_v57  ;;  %v3035_v57 = vmul.f32 -1.442695, %v5044_v49 }
 0x272   :  { %v4116_v0 = vpop.eup %4115  ;;  %4135 = vrcp.f32 %v1983_v47  ;;  %v1986_v45 = vadd.f32 1.0, %v4114_v36  ;;  %v5234_v36 = vpop.f32.mrb[111].mxu0 }
 0x273   :  { %v4118_v4 = vpop.eup %4117  ;;  %4137 = vrcp.f32 %v1985_v6  ;;  %v1988_v12 = vadd.f32 1.0, %v4116_v0  ;;  %v5236_v6 = vpop.f32.mrb[111].mxu1  ;;  %v3038_v0 = vmul.f32 -1.442695, %v5052_v18 }
 0x274   :  { %v4120_v3 = vpop.eup %4119  ;;  %4139 = vrcp.f32 %v1986_v45  ;;  %v1987_v8 = vadd.f32 1.0, %v4118_v4  ;;  %v3037_v45 = vmul.f32 -1.442695, %v5055_v60  ;;  %v3039_v4 = vmul.f32 -1.442695, %v5057_v51 }
 0x275   :  { %v4122_v2 = vpop.eup %4121  ;;  %4141 = vrcp.f32 %v1988_v12  ;;  %v1989_v59 = vadd.f32 1.0, %v4120_v3  ;;  %v3040_v12 = vmul.f32 -1.442695, %v5061_v42  ;;  %v5242_v3 = vpop.f32.mrb[112].mxu0  ;;  %v3041_v51 = vmul.f32 -1.442695, %v5065_v37 }
 0x276   :  { %v4124_v14 = vpop.eup %4123  ;;  %2745 = vst [vmem:[#allocation7 + $0x478] sm:$0xff] %v4122_v2  ;;  %4143 = vrcp.f32 %v1987_v8  ;;  %v5244_v8 = vpop.f32.mrb[112].mxu1  ;;  %v3043_v42 = vmul.f32 -1.442695, %v5067_v34 }
 0x277   :  { %v4126_v33 = vpop.eup %4125  ;;  %2746 = vst [vmem:[#allocation7 + $0x480] sm:$0xff] %v4124_v14  ;;  %4145 = vrcp.f32 %v1989_v59  ;;  %v5247_v60 = vpop.f32.mrb[113].mxu0 }
 0x278   :  { %v4128_v47 = vpop.eup %4127  ;;  %2748 = vst [vmem:[#allocation7 + $0x490] sm:$0xff] %v4126_v33  ;;  %4147 = vpow2.f32 %v3032_v24  ;;  %v3042_v24 = vmul.f32 -1.442695, %v5063_v38  ;;  %v5249_v2 = vpop.f32.mrb[113].mxu1 }
 0x279   :  { %v4130_v56 = vpop.eup %4129  ;;  %2747 = vst [vmem:[#allocation7 + $0x488] sm:$0xff] %v4128_v47  ;;  %4149 = vpow2.f32 %v3034_v31  ;;  %v5254_v38 = vpop.f32.mrb[114].mxu0 }
 0x27a   :  { %v4132_v43 = vpop.eup %4131  ;;  %2749 = vst [vmem:[#allocation7 + $0x498] sm:$0xff] %v4130_v56  ;;  %4151 = vpow2.f32 %v3033_v20  ;;  %v5469_v20 = vld [vmem:[#allocation11_spill] sm:$0xff] }
 0x27b   :  { %v4134_v49 = vpop.eup %4133  ;;  %2750 = vst [vmem:[#allocation7 + $0x4a0] sm:$0xff] %v4132_v43  ;;  %4153 = vpow2.f32 %v3035_v57  ;;  %v3044_v33 = vmul.f32 -1.442695, %v5469_v20  ;;  %v5256_v57 = vpop.f32.mrb[114].mxu1 }
 0x27c   :  { %v4136_v7 = vpop.eup %4135  ;;  %2752 = vst [vmem:[#allocation7 + $0x4b0] sm:$0xff] %v4134_v49  ;;  %4155 = vpow2.f32 %v3036_v1  ;;  %v5258_v1 = vpop.f32.mrb[115].mxu0 }
 0x27d   :  { %v4138_v18 = vpop.eup %4137  ;;  %2751 = vst [vmem:[#allocation7 + $0x4a8] sm:$0xff] %v4136_v7  ;;  %4157 = vpow2.f32 %v3038_v0  ;;  %v5260_v37 = vpop.f32.mrb[115].mxu1 }
 0x27e   :  { %v4140_v59 = vpop.eup %4139  ;;  %2753 = vst [vmem:[#allocation7 + $0x4b8] sm:$0xff] %v4138_v18  ;;  %4159 = vpow2.f32 %v3037_v45  ;;  %v5262_v49 = vpop.f32.mrb[116].mxu0 }
 0x27f   :  { %v4142_v31 = vpop.eup %4141  ;;  %2754 = vst [vmem:[#allocation7 + $0x4c0] sm:$0xff] %v4140_v59  ;;  %4161 = vpow2.f32 %v3039_v4  ;;  %v5264_v4 = vpop.f32.mrb[116].mxu1 }
 0x280   :  { %v4144_v14 = vpop.eup %4143  ;;  %2756 = vst [vmem:[#allocation7 + $0x4d0] sm:$0xff] %v4142_v31  ;;  %4163 = vpow2.f32 %v3040_v12  ;;  %5470 = vst [vmem:[#allocation29_spill] sm:$0xff] %v5264_v4  ;;  %v5266_v18 = vpop.f32.mrb[117].mxu0 }
 0x281   :  { %v4146_v47 = vpop.eup %4145  ;;  %2755 = vst [vmem:[#allocation7 + $0x4c8] sm:$0xff] %v4144_v14  ;;  %4165 = vpow2.f32 %v3042_v24  ;;  %5471 = vst [vmem:[#allocation11_spill] sm:$0xff] %v5266_v18 }
 0x282   :  { %v4148_v56 = vpop.eup %4147  ;;  %2757 = vst [vmem:[#allocation7 + $0x4d8] sm:$0xff] %v4146_v47  ;;  %4167 = vpow2.f32 %v3041_v51 }
 0x283   :  { %v4150_v34 = vpop.eup %4149  ;;  %v1990_v0 = vadd.f32 1.0, %v4148_v56  ;;  %4169 = vpow2.f32 %v3043_v42 }
 0x284   :  { %v4152_v43 = vpop.eup %4151  ;;  %v1992_v45 = vadd.f32 1.0, %v4150_v34  ;;  %4171 = vpow2.f32 %v3044_v33 }
 0x285   :  { %v4154_v7 = vpop.eup %4153  ;;  %4173 = vrcp.f32 %v1990_v0  ;;  %v1991_v12 = vadd.f32 1.0, %v4152_v43 }
 0x286   :  { %v4156_v24 = vpop.eup %4155  ;;  %4175 = vrcp.f32 %v1992_v45  ;;  %v1993_v59 = vadd.f32 1.0, %v4154_v7 }
 0x287   :  { %v4158_v31 = vpop.eup %4157  ;;  %4177 = vrcp.f32 %v1991_v12  ;;  %v1994_v51 = vadd.f32 1.0, %v4156_v24 }
 0x288   :  { %v4160_v14 = vpop.eup %4159  ;;  %4179 = vrcp.f32 %v1993_v59  ;;  %v1996_v42 = vadd.f32 1.0, %v4158_v31  ;;  %v5472_v59 = vld [vmem:[#allocation12_spill] sm:$0xff] }
 0x289   :  { %v4162_v20 = vpop.eup %4161  ;;  %4181 = vrcp.f32 %v1994_v51  ;;  %v1995_v33 = vadd.f32 1.0, %v4160_v14  ;;  %v3046_v31 = vmul.f32 -1.442695, %v5472_v59  ;;  %v3045_v14 = vmul.f32 -1.442695, %v5078_v28 }
 0x28a   :  { %v4164_v47 = vpop.eup %4163  ;;  %4183 = vrcp.f32 %v1996_v42  ;;  %v1997_v56 = vadd.f32 1.0, %v4162_v20  ;;  %v3047_v20 = vmul.f32 -1.442695, %v5080_v11  ;;  %v3049_v28 = vmul.f32 -1.442695, %v5091_v50 }
 0x28b   :  { %v4166_v34 = vpop.eup %4165  ;;  %4185 = vrcp.f32 %v1995_v33  ;;  %v1998_v0 = vadd.f32 1.0, %v4164_v47  ;;  %v3048_v47 = vmul.f32 -1.442695, %v5086_v23  ;;  %v3051_v11 = vmul.f32 -1.442695, %v5093_v55 }
 0x28c   :  { %v4168_v43 = vpop.eup %4167  ;;  %4187 = vrcp.f32 %v1997_v56  ;;  %v2000_v18 = vadd.f32 1.0, %v4166_v34  ;;  %v5272_v56 = vpop.f32.mrb[117].mxu1  ;;  %v3050_v34 = vmul.f32 -1.442695, %v5088_v40  ;;  %v3052_v23 = vmul.f32 -1.442695, %v5098_v17 }
 0x28d   :  { %v4170_v45 = vpop.eup %4169  ;;  %4189 = vrcp.f32 %v1998_v0  ;;  %v1999_v7 = vadd.f32 1.0, %v4168_v43  ;;  %v3053_v55 = vmul.f32 -1.442695, %v5102_v30  ;;  %v3055_v17 = vmul.f32 -1.442695, %v5104_v39 }
 0x28e   :  { %v4172_v12 = vpop.eup %4171  ;;  %4191 = vrcp.f32 %v2000_v18  ;;  %v2001_v24 = vadd.f32 1.0, %v4170_v45  ;;  %v5278_v45 = vpop.f32.mrb[118].mxu0 }
 0x28f   :  { %v4174_v4 = vpop.eup %4173  ;;  %4193 = vrcp.f32 %v1999_v7  ;;  %v2002_v51 = vadd.f32 1.0, %v4172_v12  ;;  %v5280_v7 = vpop.f32.mrb[118].mxu1  ;;  %v3054_v12 = vmul.f32 -1.442695, %v5100_v26 }
 0x290   :  { %v4176_v42 = vpop.eup %4175  ;;  %2758 = vst [vmem:[#allocation7 + $0x4e0] sm:$0xff] %v4174_v4  ;;  %4195 = vrcp.f32 %v2001_v24  ;;  %v5283_v50 = vpop.f32.mrb[119].mxu0 }
 0x291   :  { %v4178_v33 = vpop.eup %4177  ;;  %2760 = vst [vmem:[#allocation7 + $0x4f0] sm:$0xff] %v4176_v42  ;;  %4197 = vrcp.f32 %v2002_v51  ;;  %v5285_v24 = vpop.f32.mrb[119].mxu1 }
 0x292   :  { %v4180_v18 = vpop.eup %4179  ;;  %2759 = vst [vmem:[#allocation7 + $0x4e8] sm:$0xff] %v4178_v33  ;;  %4199 = vpow2.f32 %v3046_v31  ;;  %v5290_v26 = vpop.f32.mrb[120].mxu0 }
 0x293   :  { %v4182_v0 = vpop.eup %4181  ;;  %2761 = vst [vmem:[#allocation7 + $0x4f8] sm:$0xff] %v4180_v18  ;;  %4201 = vpow2.f32 %v3045_v14  ;;  %v5473_v14 = vld [vmem:[#allocation13_spill] sm:$0xff]  ;;  %v5295_v30 = vpop.f32.mrb[121].mxu0 }
 0x294   :  { %v4184_v4 = vpop.eup %4183  ;;  %2762 = vst [vmem:[#allocation7 + $0x500] sm:$0xff] %v4182_v0  ;;  %4203 = vpow2.f32 %v3047_v20  ;;  %v3056_v42 = vmul.f32 -1.442695, %v5473_v14  ;;  %v5292_v20 = vpop.f32.mrb[120].mxu1 }
 0x295   :  { %v4186_v43 = vpop.eup %4185  ;;  %2764 = vst [vmem:[#allocation7 + $0x510] sm:$0xff] %v4184_v4  ;;  %4205 = vpow2.f32 %v3048_v47  ;;  %v5474_v47 = vld [vmem:[#allocation14_spill] sm:$0xff] }
 0x296   :  { %v4188_v40 = vpop.eup %4187  ;;  %2763 = vst [vmem:[#allocation7 + $0x508] sm:$0xff] %v4186_v43  ;;  %4207 = vpow2.f32 %v3050_v34  ;;  %v3058_v18 = vmul.f32 -1.442695, %v5474_v47  ;;  %v5297_v34 = vpop.f32.mrb[121].mxu1 }
 0x297   :  { %v4190_v59 = vpop.eup %4189  ;;  %2765 = vst [vmem:[#allocation7 + $0x518] sm:$0xff] %v4188_v40  ;;  %4209 = vpow2.f32 %v3049_v28  ;;  %v5301_v43 = vpop.f32.mrb[122].mxu1 }
 0x298   :  { %v4192_v31 = vpop.eup %4191  ;;  %2766 = vst [vmem:[#allocation7 + $0x520] sm:$0xff] %v4190_v59  ;;  %4211 = vpow2.f32 %v3051_v11  ;;  %v5299_v11 = vpop.f32.mrb[122].mxu0  ;;  %5475 = vst [vmem:[#allocation12_spill] sm:$0xff] %v5301_v43 }
 0x299   :  { %v4194_v51 = vpop.eup %4193  ;;  %2768 = vst [vmem:[#allocation7 + $0x530] sm:$0xff] %v4192_v31  ;;  %4213 = vpow2.f32 %v3052_v23 }
 0x29a   :  { %v4196_v33 = vpop.eup %4195  ;;  %2767 = vst [vmem:[#allocation7 + $0x528] sm:$0xff] %v4194_v51  ;;  %4215 = vpow2.f32 %v3054_v12  ;;  %v5303_v12 = vpop.f32.mrb[123].mxu0 }
 0x29b   :  { %v4198_v0 = vpop.eup %4197  ;;  %2769 = vst [vmem:[#allocation7 + $0x538] sm:$0xff] %v4196_v33  ;;  %4217 = vpow2.f32 %v3053_v55  ;;  %5476 = vst [vmem:[#allocation13_spill] sm:$0xff] %v5303_v12  ;;  %v5305_v51 = vpop.f32.mrb[123].mxu1 }
 0x29c   :  { %v4200_v39 = vpop.eup %4199  ;;  %2770 = vst [vmem:[#allocation7 + $0x540] sm:$0xff] %v4198_v0  ;;  %4219 = vpow2.f32 %v3055_v17  ;;  %5477 = vst [vmem:[#allocation14_spill] sm:$0xff] %v5305_v51 }
 0x29d   :  { %v4202_v28 = vpop.eup %4201  ;;  %v2004_v4 = vadd.f32 1.0, %v4200_v39  ;;  %4221 = vpow2.f32 %v3056_v42 }
 0x29e   :  { %v4204_v23 = vpop.eup %4203  ;;  %v2003_v40 = vadd.f32 1.0, %v4202_v28  ;;  %4223 = vpow2.f32 %v3058_v18 }
 0x29f   :  { %v4206_v59 = vpop.eup %4205  ;;  %4225 = vrcp.f32 %v2004_v4  ;;  %v2005_v31 = vadd.f32 1.0, %v4204_v23 }
 0x2a0   :  { %v4208_v55 = vpop.eup %4207  ;;  %4227 = vrcp.f32 %v2003_v40  ;;  %v2006_v17 = vadd.f32 1.0, %v4206_v59 }
 0x2a1   :  { %v4210_v14 = vpop.eup %4209  ;;  %4229 = vrcp.f32 %v2005_v31  ;;  %v2008_v42 = vadd.f32 1.0, %v4208_v55 }
 0x2a2   :  { %v4212_v33 = vpop.eup %4211  ;;  %4231 = vrcp.f32 %v2006_v17  ;;  %v2007_v47 = vadd.f32 1.0, %v4210_v14  ;;  %v5478_v17 = vld [vmem:[#allocation30_spill] sm:$0xff] }
 0x2a3   :  { %v4214_v0 = vpop.eup %4213  ;;  %4233 = vrcp.f32 %v2008_v42  ;;  %v2009_v39 = vadd.f32 1.0, %v4212_v33  ;;  %v3057_v14 = vmul.f32 -1.442695, %v5478_v17  ;;  %v5479_v33 = vld [vmem:[#allocation15_spill] sm:$0xff] }
 0x2a4   :  { %v4216_v18 = vpop.eup %4215  ;;  %4235 = vrcp.f32 %v2007_v47  ;;  %v2010_v28 = vadd.f32 1.0, %v4214_v0  ;;  %v3059_v47 = vmul.f32 -1.442695, %v5479_v33  ;;  %v5482_v33 = vld [vmem:[#allocation18_spill] sm:$0xff] }
 0x2a5   :  { %v4218_v12 = vpop.eup %4217  ;;  %4237 = vrcp.f32 %v2009_v39  ;;  %v2012_v4 = vadd.f32 1.0, %v4216_v18  ;;  %v3060_v39 = vmul.f32 -1.442695, %v5122_v19  ;;  %v3064_v19 = vmul.f32 -1.442695, %v5134_v32  ;;  %v5483_v32 = vld [vmem:[#allocation19_spill] sm:$0xff] }
 0x2a6   :  { %v4220_v23 = vpop.eup %4219  ;;  %4239 = vrcp.f32 %v2010_v28  ;;  %v2011_v51 = vadd.f32 1.0, %v4218_v12  ;;  %v3062_v12 = vmul.f32 -1.442695, %v5124_v46 }
 0x2a7   :  { %v4222_v40 = vpop.eup %4221  ;;  %4241 = vrcp.f32 %v2012_v4  ;;  %v2013_v59 = vadd.f32 1.0, %v4220_v23  ;;  %v5480_v23 = vld [vmem:[#allocation16_spill] sm:$0xff] }
 0x2a8   :  { %v4224_v31 = vpop.eup %4223  ;;  %4243 = vrcp.f32 %v2011_v51  ;;  %v2014_v55 = vadd.f32 1.0, %v4222_v40  ;;  %v3061_v51 = vmul.f32 -1.442695, %v5127_v16  ;;  %v3063_v40 = vmul.f32 -1.442695, %v5480_v23 }
 0x2a9   :  { %v4226_v43 = vpop.eup %4225  ;;  %4245 = vrcp.f32 %v2013_v59  ;;  %v2016_v42 = vadd.f32 1.0, %v4224_v31  ;;  %v5316_v31 = vpop.f32.mrb[124].mxu1 }
 0x2aa   :  { %v4228_v0 = vpop.eup %4227  ;;  %2772 = vst [vmem:[#allocation7 + $0x550] sm:$0xff] %v4226_v43  ;;  %4247 = vrcp.f32 %v2014_v55  ;;  %v5314_v43 = vpop.f32.mrb[124].mxu0  ;;  %v5481_v55 = vld [vmem:[#allocation17_spill] sm:$0xff] }
 0x2ab   :  { %v4230_v18 = vpop.eup %4229  ;;  %2771 = vst [vmem:[#allocation7 + $0x548] sm:$0xff] %v4228_v0  ;;  %4249 = vrcp.f32 %v2016_v42  ;;  %v3066_v17 = vmul.f32 -1.442695, %v5481_v55  ;;  %v5319_v16 = vpop.f32.mrb[125].mxu0 }
 0x2ac   :  { %v4232_v28 = vpop.eup %4231  ;;  %2773 = vst [vmem:[#allocation7 + $0x558] sm:$0xff] %v4230_v18  ;;  %4251 = vpow2.f32 %v3057_v14  ;;  %v5321_v14 = vpop.f32.mrb[125].mxu1 }
 0x2ad   :  { %v4234_v4 = vpop.eup %4233  ;;  %2774 = vst [vmem:[#allocation7 + $0x560] sm:$0xff] %v4232_v28  ;;  %4253 = vpow2.f32 %v3059_v47  ;;  %v3065_v47 = vmul.f32 -1.442695, %v5482_v33  ;;  %v5328_v23 = vpop.f32.mrb[126].mxu1  ;;  %v5490_v33 = vld [vmem:[#allocation22_spill] sm:$0xff] }
 0x2ae   :  { %v4236_v59 = vpop.eup %4235  ;;  %2776 = vst [vmem:[#allocation7 + $0x570] sm:$0xff] %v4234_v4  ;;  %4255 = vpow2.f32 %v3060_v39  ;;  %v3067_v39 = vmul.f32 -1.442695, %v5483_v32  ;;  %v5326_v4 = vpop.f32.mrb[126].mxu0  ;;  %5486 = vst [vmem:[#allocation15_spill] sm:$0xff] %v5328_v23 }
 0x2af   :  { %v4238_v46 = vpop.eup %4237  ;;  %2775 = vst [vmem:[#allocation7 + $0x568] sm:$0xff] %v4236_v59  ;;  %4257 = vpow2.f32 %v3062_v12  ;;  %v5484_v12 = vld [vmem:[#allocation20_spill] sm:$0xff]  ;;  %5485 = vst [vmem:[#allocation30_spill] sm:$0xff] %v5326_v4  ;;  %v5331_v55 = vpop.f32.mrb[127].mxu0 }
 0x2b0   :  { %v4240_v42 = vpop.eup %4239  ;;  %2777 = vst [vmem:[#allocation7 + $0x578] sm:$0xff] %v4238_v46  ;;  %4259 = vpow2.f32 %v3061_v51  ;;  %v3068_v28 = vmul.f32 -1.442695, %v5484_v12  ;;  %v5487_v51 = vld [vmem:[#allocation21_spill] sm:$0xff]  ;;  %5488 = vst [vmem:[#allocation16_spill] sm:$0xff] %v5331_v55 }
 0x2b1   :  { %v4242_v0 = vpop.eup %4241  ;;  %2778 = vst [vmem:[#allocation7 + $0x580] sm:$0xff] %v4240_v42  ;;  %4261 = vpow2.f32 %v3063_v40  ;;  %v3070_v46 = vmul.f32 -1.442695, %v5487_v51  ;;  %v5333_v42 = vpop.f32.mrb[127].mxu1 }
 0x2b2   :  { %v4244_v18 = vpop.eup %4243  ;;  %2780 = vst [vmem:[#allocation7 + $0x590] sm:$0xff] %v4242_v0  ;;  %4263 = vpow2.f32 %v3064_v19  ;;  %5489 = vst [vmem:[#allocation17_spill] sm:$0xff] %v5333_v42  ;;  %v3069_v19 = vmul.f32 -1.442695, %v5490_v33 }
 0x2b3   :  { %v4246_v59 = vpop.eup %4245  ;;  %2779 = vst [vmem:[#allocation7 + $0x588] sm:$0xff] %v4244_v18  ;;  %4265 = vpow2.f32 %v3066_v17 }
 0x2b4   :  { %v4248_v40 = vpop.eup %4247  ;;  %2781 = vst [vmem:[#allocation7 + $0x598] sm:$0xff] %v4246_v59  ;;  %4267 = vpow2.f32 %v3065_v47 }
 0x2b5   :  { %v4250_v0 = vpop.eup %4249  ;;  %2782 = vst [vmem:[#allocation7 + $0x5a0] sm:$0xff] %v4248_v40  ;;  %4269 = vpow2.f32 %v3067_v39 }
 0x2b6   :  { %v4252_v32 = vpop.eup %4251  ;;  %2784 = vst [vmem:[#allocation7 + $0x5b0] sm:$0xff] %v4250_v0  ;;  %4271 = vpow2.f32 %v3068_v28 }
 0x2b7   :  { %v4254_v12 = vpop.eup %4253  ;;  %v2015_v18 = vadd.f32 1.0, %v4252_v32  ;;  %4273 = vpow2.f32 %v3070_v46 }
 0x2b8   :  { %v4256_v17 = vpop.eup %4255  ;;  %v2017_v51 = vadd.f32 1.0, %v4254_v12  ;;  %4275 = vpow2.f32 %v3069_v19 }
 0x2b9   :  { %v4258_v55 = vpop.eup %4257  ;;  %4277 = vrcp.f32 %v2015_v18  ;;  %v2018_v42 = vadd.f32 1.0, %v4256_v17 }
 0x2ba   :  { %v4260_v23 = vpop.eup %4259  ;;  %4279 = vrcp.f32 %v2017_v51  ;;  %v2020_v47 = vadd.f32 1.0, %v4258_v55 }
 0x2bb   :  { %v4262_v59 = vpop.eup %4261  ;;  %4281 = vrcp.f32 %v2018_v42  ;;  %v2019_v33 = vadd.f32 1.0, %v4260_v23 }
 0x2bc   :  { %v4264_v40 = vpop.eup %4263  ;;  %4283 = vrcp.f32 %v2020_v47  ;;  %v2021_v39 = vadd.f32 1.0, %v4262_v59  ;;  %v5491_v47 = vld [vmem:[#allocation23_spill] sm:$0xff] }
 0x2bd   :  { %v4266_v0 = vpop.eup %4265  ;;  %4285 = vrcp.f32 %v2019_v33  ;;  %v2022_v28 = vadd.f32 1.0, %v4264_v40  ;;  %v3071_v59 = vmul.f32 -1.442695, %v5491_v47  ;;  %v3072_v40 = vmul.f32 -1.442695, %v5158_v10 }
 0x2be   :  { %v4268_v32 = vpop.eup %4267  ;;  %4287 = vrcp.f32 %v2021_v39  ;;  %v2024_v46 = vadd.f32 1.0, %v4266_v0  ;;  %v3074_v0 = vmul.f32 -1.442695, %v5160_v35  ;;  %v3076_v10 = vmul.f32 -1.442695, %v5170_v63 }
 0x2bf   :  { %v4270_v12 = vpop.eup %4269  ;;  %4289 = vrcp.f32 %v2022_v28  ;;  %v2023_v19 = vadd.f32 1.0, %v4268_v32  ;;  %v3073_v32 = vmul.f32 -1.442695, %v5163_v58  ;;  %v3078_v35 = vmul.f32 -1.442695, %v5172_v62 }
 0x2c0   :  { %v4272_v18 = vpop.eup %4271  ;;  %4291 = vrcp.f32 %v2024_v46  ;;  %v2025_v17 = vadd.f32 1.0, %v4270_v12  ;;  %v3075_v12 = vmul.f32 -1.442695, %v5165_v53  ;;  %v3077_v58 = vmul.f32 -1.442695, %v5175_v44 }
 0x2c1   :  { %v4274_v51 = vpop.eup %4273  ;;  %4293 = vrcp.f32 %v2023_v19  ;;  %v2026_v55 = vadd.f32 1.0, %v4272_v18  ;;  %v3079_v53 = vmul.f32 -1.442695, %v5177_v21 }
 0x2c2   :  { %v4276_v42 = vpop.eup %4275  ;;  %4295 = vrcp.f32 %v2025_v17  ;;  %v2028_v23 = vadd.f32 1.0, %v4274_v51 }
 0x2c3   :  { %v4278_v4 = vpop.eup %4277  ;;  %4297 = vrcp.f32 %v2026_v55  ;;  %v2027_v33 = vadd.f32 1.0, %v4276_v42  ;;  %v5492_v55 = vld [vmem:[#allocation24_spill] sm:$0xff] }
 0x2c4   :  { %v4280_v39 = vpop.eup %4279  ;;  %2783 = vst [vmem:[#allocation7 + $0x5a8] sm:$0xff] %v4278_v4  ;;  %4299 = vrcp.f32 %v2028_v23  ;;  %v3080_v63 = vmul.f32 -1.442695, %v5492_v55  ;;  %v5493_v23 = vld [vmem:[#allocation25_spill] sm:$0xff] }
 0x2c5   :  { %v4282_v28 = vpop.eup %4281  ;;  %2785 = vst [vmem:[#allocation7 + $0x5b8] sm:$0xff] %v4280_v39  ;;  %4301 = vrcp.f32 %v2027_v33  ;;  %v3082_v62 = vmul.f32 -1.442695, %v5493_v23 }
 0x2c6   :  { %v4284_v46 = vpop.eup %4283  ;;  %2786 = vst [vmem:[#allocation7 + $0x5c0] sm:$0xff] %v4282_v28  ;;  %4303 = vpow2.f32 %v3071_v59  ;;  %v5494_v59 = vld [vmem:[#allocation26_spill] sm:$0xff] }
 0x2c7   :  { %v4286_v19 = vpop.eup %4285  ;;  %2788 = vst [vmem:[#allocation7 + $0x5d0] sm:$0xff] %v4284_v46  ;;  %4305 = vpow2.f32 %v3072_v40  ;;  %v3081_v44 = vmul.f32 -1.442695, %v5494_v59  ;;  %v5495_v40 = vld [vmem:[#allocation27_spill] sm:$0xff] }
 0x2c8   :  { %v4288_v18 = vpop.eup %4287  ;;  %2787 = vst [vmem:[#allocation7 + $0x5c8] sm:$0xff] %v4286_v19  ;;  %4307 = vpow2.f32 %v3074_v0  ;;  %v3083_v21 = vmul.f32 -1.442695, %v5495_v40 }
 0x2c9   :  { %v4290_v4 = vpop.eup %4289  ;;  %2789 = vst [vmem:[#allocation7 + $0x5d8] sm:$0xff] %v4288_v18  ;;  %4309 = vpow2.f32 %v3073_v32 }
 0x2ca   :  { %v4292_v17 = vpop.eup %4291  ;;  %2790 = vst [vmem:[#allocation7 + $0x5e0] sm:$0xff] %v4290_v4  ;;  %4311 = vpow2.f32 %v3075_v12 }
 0x2cb   :  { %v4294_v51 = vpop.eup %4293  ;;  %2792 = vst [vmem:[#allocation7 + $0x5f0] sm:$0xff] %v4292_v17  ;;  %4313 = vpow2.f32 %v3076_v10 }
 0x2cc   :  { %v4296_v42 = vpop.eup %4295  ;;  %2791 = vst [vmem:[#allocation7 + $0x5e8] sm:$0xff] %v4294_v51  ;;  %4315 = vpow2.f32 %v3078_v35 }
 0x2cd   :  { %v4298_v47 = vpop.eup %4297  ;;  %2793 = vst [vmem:[#allocation7 + $0x5f8] sm:$0xff] %v4296_v42  ;;  %4317 = vpow2.f32 %v3077_v58 }
 0x2ce   :  { %v4300_v33 = vpop.eup %4299  ;;  %2794 = vst [vmem:[#allocation7 + $0x600] sm:$0xff] %v4298_v47  ;;  %4319 = vpow2.f32 %v3079_v53 }
 0x2cf   :  { %v4302_v39 = vpop.eup %4301  ;;  %2796 = vst [vmem:[#allocation7 + $0x610] sm:$0xff] %v4300_v33  ;;  %4321 = vpow2.f32 %v3080_v63 }
 0x2d0   :  { %v4304_v0 = vpop.eup %4303  ;;  %2795 = vst [vmem:[#allocation7 + $0x608] sm:$0xff] %v4302_v39  ;;  %4323 = vpow2.f32 %v3082_v62  ;;  %v5496_v39 = vld [vmem:[#allocation28_spill] sm:$0xff] }
 0x2d1   :  { %v4306_v28 = vpop.eup %4305  ;;  %v2029_v32 = vadd.f32 1.0, %v4304_v0  ;;  %4325 = vpow2.f32 %v3081_v44  ;;  %v3084_v0 = vmul.f32 -1.442695, %v5496_v39 }
 0x2d2   :  { %v4308_v46 = vpop.eup %4307  ;;  %v2030_v12 = vadd.f32 1.0, %v4306_v28  ;;  %4327 = vpow2.f32 %v3083_v21 }
 0x2d3   :  { %v4310_v19 = vpop.eup %4309  ;;  %4329 = vrcp.f32 %v2029_v32  ;;  %v2032_v10 = vadd.f32 1.0, %v4308_v46  ;;  %v3086_v46 = vmul.f32 -1.442695, %v5194_v61  ;;  %v3090_v61 = vmul.f32 -1.442695, %v5208_v41 }
 0x2d4   :  { %v4312_v18 = vpop.eup %4311  ;;  %4331 = vrcp.f32 %v2030_v12  ;;  %v2031_v35 = vadd.f32 1.0, %v4310_v19  ;;  %v3085_v19 = vmul.f32 -1.442695, %v5198_v29  ;;  %v3089_v29 = vmul.f32 -1.442695, %v5211_v22 }
 0x2d5   :  { %v4314_v4 = vpop.eup %4313  ;;  %4333 = vrcp.f32 %v2032_v10  ;;  %v2033_v58 = vadd.f32 1.0, %v4312_v18  ;;  %v3087_v18 = vmul.f32 -1.442695, %v5200_v15  ;;  %v3091_v15 = vmul.f32 -1.442695, %v5213_v27 }
 0x2d6   :  { %v4316_v17 = vpop.eup %4315  ;;  %4335 = vrcp.f32 %v2031_v35  ;;  %v2034_v53 = vadd.f32 1.0, %v4314_v4  ;;  %v3088_v4 = vmul.f32 -1.442695, %v5206_v54  ;;  %v3092_v54 = vmul.f32 -1.442695, %v5217_v9 }
 0x2d7   :  { %v4318_v51 = vpop.eup %4317  ;;  %4337 = vrcp.f32 %v2033_v58  ;;  %v2036_v55 = vadd.f32 1.0, %v4316_v17  ;;  %v3094_v41 = vmul.f32 -1.442695, %v5219_v5  ;;  %v3093_v22 = vmul.f32 -1.442695, %v5221_v52 }
 0x2d8   :  { %v4320_v63 = vpop.eup %4319  ;;  %4339 = vrcp.f32 %v2034_v53  ;;  %v2035_v42 = vadd.f32 1.0, %v4318_v51  ;;  %v3095_v27 = vmul.f32 -1.442695, %v5223_v48  ;;  %v3096_v9 = vmul.f32 -1.442695, %v5225_v13 }
 0x2d9   :  { %v4322_v23 = vpop.eup %4321  ;;  %4341 = vrcp.f32 %v2036_v55  ;;  %v2037_v62 = vadd.f32 1.0, %v4320_v63 }
 0x2da   :  { %v4324_v47 = vpop.eup %4323  ;;  %4343 = vrcp.f32 %v2035_v42  ;;  %v2038_v59 = vadd.f32 1.0, %v4322_v23 }
 0x2db   :  { %v4326_v44 = vpop.eup %4325  ;;  %4345 = vrcp.f32 %v2037_v62  ;;  %v2040_v33 = vadd.f32 1.0, %v4324_v47 }
 0x2dc   :  { %v4328_v40 = vpop.eup %4327  ;;  %4347 = vrcp.f32 %v2038_v59  ;;  %v2039_v21 = vadd.f32 1.0, %v4326_v44 }
 0x2dd   :  { %v4330_v28 = vpop.eup %4329  ;;  %4349 = vrcp.f32 %v2040_v33  ;;  %v2041_v32 = vadd.f32 1.0, %v4328_v40 }
 0x2de   :  { %v4332_v12 = vpop.eup %4331  ;;  %2797 = vst [vmem:[#allocation7 + $0x618] sm:$0xff] %v4330_v28  ;;  %4351 = vrcp.f32 %v2039_v21 }
 0x2df   :  { %v4334_v10 = vpop.eup %4333  ;;  %2798 = vst [vmem:[#allocation7 + $0x620] sm:$0xff] %v4332_v12  ;;  %4353 = vrcp.f32 %v2041_v32 }
 0x2e0   :  { %v4336_v35 = vpop.eup %4335  ;;  %2800 = vst [vmem:[#allocation7 + $0x630] sm:$0xff] %v4334_v10  ;;  %4355 = vpow2.f32 %v3084_v0 }
 0x2e1   :  { %v4338_v58 = vpop.eup %4337  ;;  %2799 = vst [vmem:[#allocation7 + $0x628] sm:$0xff] %v4336_v35  ;;  %4357 = vpow2.f32 %v3086_v46 }
 0x2e2   :  { %v4340_v17 = vpop.eup %4339  ;;  %2801 = vst [vmem:[#allocation7 + $0x638] sm:$0xff] %v4338_v58  ;;  %4359 = vpow2.f32 %v3085_v19 }
 0x2e3   :  { %v4342_v53 = vpop.eup %4341  ;;  %2802 = vst [vmem:[#allocation7 + $0x640] sm:$0xff] %v4340_v17  ;;  %4361 = vpow2.f32 %v3087_v18 }
 0x2e4   :  { %v4344_v51 = vpop.eup %4343  ;;  %2804 = vst [vmem:[#allocation7 + $0x650] sm:$0xff] %v4342_v53  ;;  %4363 = vpow2.f32 %v3088_v4  ;;  %v3098_v53 = vmul.f32 -1.442695, %v5227_v25  ;;  %v3102_v25 = vmul.f32 -1.442695, %v5244_v8 }
 0x2e5   :  { %v4346_v55 = vpop.eup %4345  ;;  %2803 = vst [vmem:[#allocation7 + $0x648] sm:$0xff] %v4344_v51  ;;  %4365 = vpow2.f32 %v3090_v61  ;;  %v3106_v8 = vmul.f32 -1.442695, %v5256_v57 }
 0x2e6   :  { %v4348_v63 = vpop.eup %4347  ;;  %2805 = vst [vmem:[#allocation7 + $0x658] sm:$0xff] %v4346_v55  ;;  %4367 = vpow2.f32 %v3089_v29 }
 0x2e7   :  { %v4350_v42 = vpop.eup %4349  ;;  %2806 = vst [vmem:[#allocation7 + $0x660] sm:$0xff] %v4348_v63  ;;  %4369 = vpow2.f32 %v3091_v15 }
 0x2e8   :  { %v4352_v23 = vpop.eup %4351  ;;  %2808 = vst [vmem:[#allocation7 + $0x670] sm:$0xff] %v4350_v42  ;;  %4371 = vpow2.f32 %v3092_v54  ;;  %v3097_v54 = vmul.f32 -1.442695, %v5234_v36  ;;  %v3101_v36 = vmul.f32 -1.442695, %v5247_v60 }
 0x2e9   :  { %v4354_v62 = vpop.eup %4353  ;;  %2807 = vst [vmem:[#allocation7 + $0x668] sm:$0xff] %v4352_v23  ;;  %4373 = vpow2.f32 %v3094_v41  ;;  %v3099_v41 = vmul.f32 -1.442695, %v5236_v6  ;;  %v3103_v6 = vmul.f32 -1.442695, %v5249_v2 }
 0x2ea   :  { %v4356_v47 = vpop.eup %4355  ;;  %2809 = vst [vmem:[#allocation7 + $0x678] sm:$0xff] %v4354_v62  ;;  %4375 = vpow2.f32 %v3093_v22  ;;  %v3100_v22 = vmul.f32 -1.442695, %v5242_v3  ;;  %v3104_v3 = vmul.f32 -1.442695, %v5254_v38 }
 0x2eb   :  { %v4358_v5 = vpop.eup %4357  ;;  %v2042_v59 = vadd.f32 1.0, %v4356_v47  ;;  %4377 = vpow2.f32 %v3095_v27  ;;  %v3105_v60 = vmul.f32 -1.442695, %v5258_v1  ;;  %v3107_v2 = vmul.f32 -1.442695, %v5260_v37 }
 0x2ec   :  { %v4360_v52 = vpop.eup %4359  ;;  %v2044_v44 = vadd.f32 1.0, %v4358_v5  ;;  %4379 = vpow2.f32 %v3096_v9  ;;  %v3108_v38 = vmul.f32 -1.442695, %v5262_v49 }
 0x2ed   :  { %v4362_v33 = vpop.eup %4361  ;;  %4381 = vrcp.f32 %v2042_v59  ;;  %v2043_v48 = vadd.f32 1.0, %v4360_v52 }
 0x2ee   :  { %v4364_v40 = vpop.eup %4363  ;;  %4383 = vrcp.f32 %v2044_v44  ;;  %v2045_v21 = vadd.f32 1.0, %v4362_v33  ;;  %v5497_v44 = vld [vmem:[#allocation29_spill] sm:$0xff] }
 0x2ef   :  { %v4366_v39 = vpop.eup %4365  ;;  %4385 = vrcp.f32 %v2043_v48  ;;  %v2046_v13 = vadd.f32 1.0, %v4364_v40  ;;  %v3110_v57 = vmul.f32 -1.442695, %v5497_v44 }
 0x2f0   :  { %v4368_v0 = vpop.eup %4367  ;;  %4387 = vrcp.f32 %v2045_v21  ;;  %v2048_v28 = vadd.f32 1.0, %v4366_v39 }
 0x2f1   :  { %v4370_v32 = vpop.eup %4369  ;;  %4389 = vrcp.f32 %v2046_v13  ;;  %v2047_v46 = vadd.f32 1.0, %v4368_v0 }
 0x2f2   :  { %v4372_v12 = vpop.eup %4371  ;;  %4391 = vrcp.f32 %v2048_v28  ;;  %v2049_v19 = vadd.f32 1.0, %v4370_v32 }
 0x2f3   :  { %v4374_v10 = vpop.eup %4373  ;;  %4393 = vrcp.f32 %v2047_v46  ;;  %v2050_v18 = vadd.f32 1.0, %v4372_v12 }
 0x2f4   :  { %v4376_v35 = vpop.eup %4375  ;;  %4395 = vrcp.f32 %v2049_v19  ;;  %v2052_v4 = vadd.f32 1.0, %v4374_v10 }
 0x2f5   :  { %v4378_v58 = vpop.eup %4377  ;;  %4397 = vrcp.f32 %v2050_v18  ;;  %v2051_v61 = vadd.f32 1.0, %v4376_v35 }
 0x2f6   :  { %v4380_v17 = vpop.eup %4379  ;;  %4399 = vrcp.f32 %v2052_v4  ;;  %v2053_v29 = vadd.f32 1.0, %v4378_v58 }
 0x2f7   :  { %v4382_v15 = vpop.eup %4381  ;;  %4401 = vrcp.f32 %v2051_v61  ;;  %v2054_v51 = vadd.f32 1.0, %v4380_v17 }
 0x2f8   :  { %v4384_v55 = vpop.eup %4383  ;;  %2810 = vst [vmem:[#allocation7 + $0x680] sm:$0xff] %v4382_v15  ;;  %4403 = vrcp.f32 %v2053_v29 }
 0x2f9   :  { %v4386_v63 = vpop.eup %4385  ;;  %2812 = vst [vmem:[#allocation7 + $0x690] sm:$0xff] %v4384_v55  ;;  %4405 = vrcp.f32 %v2054_v51 }
 0x2fa   :  { %v4388_v42 = vpop.eup %4387  ;;  %2811 = vst [vmem:[#allocation7 + $0x688] sm:$0xff] %v4386_v63  ;;  %4407 = vpow2.f32 %v3098_v53 }
 0x2fb   :  { %v4390_v27 = vpop.eup %4389  ;;  %2813 = vst [vmem:[#allocation7 + $0x698] sm:$0xff] %v4388_v42  ;;  %4409 = vpow2.f32 %v3097_v54  ;;  %v5498_v54 = vld [vmem:[#allocation11_spill] sm:$0xff] }
 0x2fc   :  { %v4392_v23 = vpop.eup %4391  ;;  %2814 = vst [vmem:[#allocation7 + $0x6a0] sm:$0xff] %v4390_v27  ;;  %4411 = vpow2.f32 %v3099_v41  ;;  %v3109_v55 = vmul.f32 -1.442695, %v5498_v54 }
 0x2fd   :  { %v4394_v9 = vpop.eup %4393  ;;  %2816 = vst [vmem:[#allocation7 + $0x6b0] sm:$0xff] %v4392_v23  ;;  %4413 = vpow2.f32 %v3100_v22  ;;  %v3111_v22 = vmul.f32 -1.442695, %v5272_v56  ;;  %v3115_v56 = vmul.f32 -1.442695, %v5285_v24 }
 0x2fe   :  { %v4396_v62 = vpop.eup %4395  ;;  %2815 = vst [vmem:[#allocation7 + $0x6a8] sm:$0xff] %v4394_v9  ;;  %4415 = vpow2.f32 %v3102_v25  ;;  %v3112_v25 = vmul.f32 -1.442695, %v5278_v45  ;;  %v3116_v45 = vmul.f32 -1.442695, %v5290_v26 }
 0x2ff   :  { %v4398_v47 = vpop.eup %4397  ;;  %2817 = vst [vmem:[#allocation7 + $0x6b8] sm:$0xff] %v4396_v62  ;;  %4417 = vpow2.f32 %v3101_v36  ;;  %v3114_v36 = vmul.f32 -1.442695, %v5280_v7  ;;  %v3118_v7 = vmul.f32 -1.442695, %v5292_v20 }
 0x300   :  { %v4400_v5 = vpop.eup %4399  ;;  %2818 = vst [vmem:[#allocation7 + $0x6c0] sm:$0xff] %v4398_v47  ;;  %4419 = vpow2.f32 %v3103_v6  ;;  %v3113_v6 = vmul.f32 -1.442695, %v5283_v50  ;;  %v3117_v50 = vmul.f32 -1.442695, %v5295_v30 }
 0x301   :  { %v4402_v59 = vpop.eup %4401  ;;  %2820 = vst [vmem:[#allocation7 + $0x6d0] sm:$0xff] %v4400_v5  ;;  %4421 = vpow2.f32 %v3104_v3  ;;  %v3119_v24 = vmul.f32 -1.442695, %v5297_v34  ;;  %v3120_v26 = vmul.f32 -1.442695, %v5299_v11 }
 0x302   :  { %v4404_v52 = vpop.eup %4403  ;;  %2819 = vst [vmem:[#allocation7 + $0x6c8] sm:$0xff] %v4402_v59  ;;  %4423 = vpow2.f32 %v3106_v8 }
 0x303   :  { %v4406_v33 = vpop.eup %4405  ;;  %2821 = vst [vmem:[#allocation7 + $0x6d8] sm:$0xff] %v4404_v52  ;;  %4425 = vpow2.f32 %v3105_v60 }
 0x304   :  { %v4408_v48 = vpop.eup %4407  ;;  %2822 = vst [vmem:[#allocation7 + $0x6e0] sm:$0xff] %v4406_v33  ;;  %4427 = vpow2.f32 %v3107_v2  ;;  %v5499_v2 = vld [vmem:[#allocation12_spill] sm:$0xff] }
 0x305   :  { %v4410_v1 = vpop.eup %4409  ;;  %v2056_v40 = vadd.f32 1.0, %v4408_v48  ;;  %4429 = vpow2.f32 %v3108_v38  ;;  %v3122_v20 = vmul.f32 -1.442695, %v5499_v2  ;;  %v5500_v38 = vld [vmem:[#allocation13_spill] sm:$0xff] }
 0x306   :  { %v4412_v37 = vpop.eup %4411  ;;  %v2055_v21 = vadd.f32 1.0, %v4410_v1  ;;  %4431 = vpow2.f32 %v3110_v57  ;;  %v3121_v30 = vmul.f32 -1.442695, %v5500_v38 }
 0x307   :  { %v4414_v39 = vpop.eup %4413  ;;  %4433 = vrcp.f32 %v2056_v40  ;;  %v2057_v49 = vadd.f32 1.0, %v4412_v37 }
 0x308   :  { %v4416_v13 = vpop.eup %4415  ;;  %4435 = vrcp.f32 %v2055_v21  ;;  %v2058_v0 = vadd.f32 1.0, %v4414_v39 }
 0x309   :  { %v4418_v28 = vpop.eup %4417  ;;  %4437 = vrcp.f32 %v2057_v49  ;;  %v2060_v32 = vadd.f32 1.0, %v4416_v13 }
 0x30a   :  { %v4420_v46 = vpop.eup %4419  ;;  %4439 = vrcp.f32 %v2058_v0  ;;  %v2059_v12 = vadd.f32 1.0, %v4418_v28 }
 0x30b   :  { %v4422_v19 = vpop.eup %4421  ;;  %4441 = vrcp.f32 %v2060_v32  ;;  %v2061_v10 = vadd.f32 1.0, %v4420_v46 }
 0x30c   :  { %v4424_v18 = vpop.eup %4423  ;;  %4443 = vrcp.f32 %v2059_v12  ;;  %v2062_v35 = vadd.f32 1.0, %v4422_v19 }
 0x30d   :  { %v4426_v4 = vpop.eup %4425  ;;  %4445 = vrcp.f32 %v2061_v10  ;;  %v2064_v58 = vadd.f32 1.0, %v4424_v18 }
 0x30e   :  { %v4428_v61 = vpop.eup %4427  ;;  %4447 = vrcp.f32 %v2062_v35  ;;  %v2063_v17 = vadd.f32 1.0, %v4426_v4 }
 0x30f   :  { %v4430_v29 = vpop.eup %4429  ;;  %4449 = vrcp.f32 %v2064_v58  ;;  %v2065_v53 = vadd.f32 1.0, %v4428_v61 }
 0x310   :  { %v4432_v15 = vpop.eup %4431  ;;  %4451 = vrcp.f32 %v2063_v17  ;;  %v2066_v51 = vadd.f32 1.0, %v4430_v29  ;;  %v5501_v17 = vld [vmem:[#allocation14_spill] sm:$0xff] }
 0x311   :  { %v4434_v41 = vpop.eup %4433  ;;  %4453 = vrcp.f32 %v2065_v53  ;;  %v2068_v63 = vadd.f32 1.0, %v4432_v15  ;;  %v3123_v29 = vmul.f32 -1.442695, %v5501_v17 }
 0x312   :  { %v4436_v42 = vpop.eup %4435  ;;  %2824 = vst [vmem:[#allocation7 + $0x6f0] sm:$0xff] %v4434_v41  ;;  %4455 = vrcp.f32 %v2066_v51  ;;  %v3124_v51 = vmul.f32 -1.442695, %v5314_v43 }
 0x313   :  { %v4438_v27 = vpop.eup %4437  ;;  %2823 = vst [vmem:[#allocation7 + $0x6e8] sm:$0xff] %v4436_v42  ;;  %4457 = vrcp.f32 %v2068_v63  ;;  %v3125_v63 = vmul.f32 -1.442695, %v5319_v16  ;;  %v3127_v42 = vmul.f32 -1.442695, %v5321_v14 }
 0x314   :  { %v4440_v23 = vpop.eup %4439  ;;  %2825 = vst [vmem:[#allocation7 + $0x6f8] sm:$0xff] %v4438_v27  ;;  %4459 = vpow2.f32 %v3109_v55  ;;  %v3126_v55 = vmul.f32 -1.442695, %v5316_v31  ;;  %v5502_v27 = vld [vmem:[#allocation30_spill] sm:$0xff] }
 0x315   :  { %v4442_v9 = vpop.eup %4441  ;;  %2826 = vst [vmem:[#allocation7 + $0x700] sm:$0xff] %v4440_v23  ;;  %4461 = vpow2.f32 %v3111_v22  ;;  %v3128_v43 = vmul.f32 -1.442695, %v5502_v27  ;;  %v5503_v23 = vld [vmem:[#allocation15_spill] sm:$0xff] }
 0x316   :  { %v4444_v3 = vpop.eup %4443  ;;  %2828 = vst [vmem:[#allocation7 + $0x710] sm:$0xff] %v4442_v9  ;;  %4463 = vpow2.f32 %v3112_v25  ;;  %v3130_v31 = vmul.f32 -1.442695, %v5503_v23  ;;  %v5504_v9 = vld [vmem:[#allocation16_spill] sm:$0xff] }
 0x317   :  { %v4446_v62 = vpop.eup %4445  ;;  %2827 = vst [vmem:[#allocation7 + $0x708] sm:$0xff] %v4444_v3  ;;  %4465 = vpow2.f32 %v3114_v36  ;;  %v3129_v16 = vmul.f32 -1.442695, %v5504_v9  ;;  %v5505_v3 = vld [vmem:[#allocation17_spill] sm:$0xff] }
 0x318   :  { %v4448_v8 = vpop.eup %4447  ;;  %2829 = vst [vmem:[#allocation7 + $0x718] sm:$0xff] %v4446_v62  ;;  %4467 = vpow2.f32 %v3113_v6  ;;  %v3131_v14 = vmul.f32 -1.442695, %v5505_v3 }
 0x319   :  { %v4450_v47 = vpop.eup %4449  ;;  %2830 = vst [vmem:[#allocation7 + $0x720] sm:$0xff] %v4448_v8  ;;  %4469 = vpow2.f32 %v3115_v56 }
 0x31a   :  { %v4452_v60 = vpop.eup %4451  ;;  %2832 = vst [vmem:[#allocation7 + $0x730] sm:$0xff] %v4450_v47  ;;  %4471 = vpow2.f32 %v3116_v45 }
 0x31b   :  { %v4454_v5 = vpop.eup %4453  ;;  %2831 = vst [vmem:[#allocation7 + $0x728] sm:$0xff] %v4452_v60  ;;  %4473 = vpow2.f32 %v3118_v7 }
 0x31c   :  { %v4456_v59 = vpop.eup %4455  ;;  %2833 = vst [vmem:[#allocation7 + $0x738] sm:$0xff] %v4454_v5  ;;  %4475 = vpow2.f32 %v3117_v50 }
 0x31d   :  { %v4458_v52 = vpop.eup %4457  ;;  %2834 = vst [vmem:[#allocation7 + $0x740] sm:$0xff] %v4456_v59  ;;  %4477 = vpow2.f32 %v3119_v24 }
 0x31e   :  { %v4460_v44 = vpop.eup %4459  ;;  %2836 = vst [vmem:[#allocation7 + $0x750] sm:$0xff] %v4458_v52  ;;  %4479 = vpow2.f32 %v3120_v26 }
 0x31f   :  { %v4462_v34 = vpop.eup %4461  ;;  %v2067_v57 = vadd.f32 1.0, %v4460_v44  ;;  %4481 = vpow2.f32 %v3122_v20 }
 0x320   :  { %v4464_v11 = vpop.eup %4463  ;;  %v2069_v33 = vadd.f32 1.0, %v4462_v34  ;;  %4483 = vpow2.f32 %v3121_v30 }
 0x321   :  { %v4466_v48 = vpop.eup %4465  ;;  %4485 = vrcp.f32 %v2067_v57  ;;  %v2070_v1 = vadd.f32 1.0, %v4464_v11 }
 0x322   :  { %v4468_v40 = vpop.eup %4467  ;;  %4487 = vrcp.f32 %v2069_v33  ;;  %v2072_v37 = vadd.f32 1.0, %v4466_v48 }
 0x323   :  { %v4470_v21 = vpop.eup %4469  ;;  %4489 = vrcp.f32 %v2070_v1  ;;  %v2071_v39 = vadd.f32 1.0, %v4468_v40 }
 0x324   :  { %v4472_v49 = vpop.eup %4471  ;;  %4491 = vrcp.f32 %v2072_v37  ;;  %v2073_v13 = vadd.f32 1.0, %v4470_v21 }
 0x325   :  { %v4474_v0 = vpop.eup %4473  ;;  %4493 = vrcp.f32 %v2071_v39  ;;  %v2074_v28 = vadd.f32 1.0, %v4472_v49 }
 0x326   :  { %v4476_v32 = vpop.eup %4475  ;;  %4495 = vrcp.f32 %v2073_v13  ;;  %v2076_v46 = vadd.f32 1.0, %v4474_v0 }
 0x327   :  { %v4478_v12 = vpop.eup %4477  ;;  %4497 = vrcp.f32 %v2074_v28  ;;  %v2075_v19 = vadd.f32 1.0, %v4476_v32 }
 0x328   :  { %v4480_v10 = vpop.eup %4479  ;;  %4499 = vrcp.f32 %v2076_v46  ;;  %v2077_v18 = vadd.f32 1.0, %v4478_v12 }
 0x329   :  { %v4482_v35 = vpop.eup %4481  ;;  %4501 = vrcp.f32 %v2075_v19  ;;  %v2078_v4 = vadd.f32 1.0, %v4480_v10 }
 0x32a   :  { %v4484_v58 = vpop.eup %4483  ;;  %4503 = vrcp.f32 %v2077_v18  ;;  %v2080_v61 = vadd.f32 1.0, %v4482_v35 }
 0x32b   :  { %v4486_v53 = vpop.eup %4485  ;;  %4505 = vrcp.f32 %v2078_v4  ;;  %v2079_v15 = vadd.f32 1.0, %v4484_v58 }
 0x32c   :  { %v4488_v54 = vpop.eup %4487  ;;  %2835 = vst [vmem:[#allocation7 + $0x748] sm:$0xff] %v4486_v53  ;;  %4507 = vrcp.f32 %v2080_v61 }
 0x32d   :  { %v4490_v41 = vpop.eup %4489  ;;  %2837 = vst [vmem:[#allocation7 + $0x758] sm:$0xff] %v4488_v54  ;;  %4509 = vrcp.f32 %v2079_v15 }
 0x32e   :  { %v4492_v22 = vpop.eup %4491  ;;  %2838 = vst [vmem:[#allocation7 + $0x760] sm:$0xff] %v4490_v41  ;;  %4511 = vpow2.f32 %v3123_v29 }
 0x32f   :  { %v4494_v25 = vpop.eup %4493  ;;  %2840 = vst [vmem:[#allocation7 + $0x770] sm:$0xff] %v4492_v22  ;;  %4513 = vpow2.f32 %v3124_v51 }
 0x330   :  { %v4496_v36 = vpop.eup %4495  ;;  %2839 = vst [vmem:[#allocation7 + $0x768] sm:$0xff] %v4494_v25  ;;  %4515 = vpow2.f32 %v3126_v55 }
 0x331   :  { %v4498_v6 = vpop.eup %4497  ;;  %2841 = vst [vmem:[#allocation7 + $0x778] sm:$0xff] %v4496_v36  ;;  %4517 = vpow2.f32 %v3125_v63 }
 0x332   :  { %v4500_v56 = vpop.eup %4499  ;;  %2842 = vst [vmem:[#allocation7 + $0x780] sm:$0xff] %v4498_v6  ;;  %4519 = vpow2.f32 %v3127_v42 }
 0x333   :  { %v4502_v45 = vpop.eup %4501  ;;  %2844 = vst [vmem:[#allocation7 + $0x790] sm:$0xff] %v4500_v56  ;;  %4521 = vpow2.f32 %v3128_v43 }
 0x334   :  { %v4504_v62 = vpop.eup %4503  ;;  %2843 = vst [vmem:[#allocation7 + $0x788] sm:$0xff] %v4502_v45  ;;  %4523 = vpow2.f32 %v3130_v31 }
 0x335   :  { %v4506_v7 = vpop.eup %4505  ;;  %2845 = vst [vmem:[#allocation7 + $0x798] sm:$0xff] %v4504_v62  ;;  %4525 = vpow2.f32 %v3129_v16 }
 0x336   :  { %v4508_v8 = vpop.eup %4507  ;;  %2846 = vst [vmem:[#allocation7 + $0x7a0] sm:$0xff] %v4506_v7  ;;  %4527 = vpow2.f32 %v3131_v14 }
 0x337   :  { %v4510_v50 = vpop.eup %4509  ;;  %2848 = vst [vmem:[#allocation7 + $0x7b0] sm:$0xff] %v4508_v8 }
 0x338   :  { %v4512_v47 = vpop.eup %4511  ;;  %2847 = vst [vmem:[#allocation7 + $0x7a8] sm:$0xff] %v4510_v50 }
 0x339   :  { %v4514_v24 = vpop.eup %4513  ;;  %v2081_v60 = vadd.f32 1.0, %v4512_v47 }
 0x33a   :  { %v4516_v26 = vpop.eup %4515  ;;  %v2082_v5 = vadd.f32 1.0, %v4514_v24 }
 0x33b   :  { %v4518_v2 = vpop.eup %4517  ;;  %4529 = vrcp.f32 %v2081_v60  ;;  %v2084_v20 = vadd.f32 1.0, %v4516_v26 }
 0x33c   :  { %v4520_v59 = vpop.eup %4519  ;;  %4531 = vrcp.f32 %v2082_v5  ;;  %v2083_v38 = vadd.f32 1.0, %v4518_v2 }
 0x33d   :  { %v4522_v30 = vpop.eup %4521  ;;  %4533 = vrcp.f32 %v2084_v20  ;;  %v2085_v52 = vadd.f32 1.0, %v4520_v59 }
 0x33e   :  { %v4524_v44 = vpop.eup %4523  ;;  %4535 = vrcp.f32 %v2083_v38  ;;  %v2086_v34 = vadd.f32 1.0, %v4522_v30 }
 0x33f   :  { %v4526_v57 = vpop.eup %4525  ;;  %4537 = vrcp.f32 %v2085_v52  ;;  %v2088_v11 = vadd.f32 1.0, %v4524_v44 }
 0x340   :  { %v4528_v33 = vpop.eup %4527  ;;  %4539 = vrcp.f32 %v2086_v34  ;;  %v2087_v48 = vadd.f32 1.0, %v4526_v57 }
 0x341   :  { %4541 = vrcp.f32 %v2088_v11  ;;  %v2089_v1 = vadd.f32 1.0, %v4528_v33 }
 0x342   :  { %4543 = vrcp.f32 %v2087_v48 }
 0x343   :  { %4545 = vrcp.f32 %v2089_v1 }
 0x345   :  { %v4530_v40 = vpop.eup %4529 }
 0x346   :  { %v4532_v37 = vpop.eup %4531  ;;  %2849 = vst [vmem:[#allocation7 + $0x7b8] sm:$0xff] %v4530_v40 }
 0x347   :  { %v4534_v21 = vpop.eup %4533  ;;  %2850 = vst [vmem:[#allocation7 + $0x7c0] sm:$0xff] %v4532_v37 }
 0x348   :  { %v4536_v39 = vpop.eup %4535  ;;  %2852 = vst [vmem:[#allocation7 + $0x7d0] sm:$0xff] %v4534_v21 }
 0x349   :  { %v4538_v49 = vpop.eup %4537  ;;  %2851 = vst [vmem:[#allocation7 + $0x7c8] sm:$0xff] %v4536_v39 }
 0x34a   :  { %v4540_v13 = vpop.eup %4539  ;;  %2853 = vst [vmem:[#allocation7 + $0x7d8] sm:$0xff] %v4538_v49 }
 0x34b   :  { %v4542_v0 = vpop.eup %4541  ;;  %2854 = vst [vmem:[#allocation7 + $0x7e0] sm:$0xff] %v4540_v13 }
 0x34c   :  { %v4544_v28 = vpop.eup %4543  ;;  %2856 = vst [vmem:[#allocation7 + $0x7f0] sm:$0xff] %v4542_v0 }
 0x34d   :  { %v4546_v32 = vpop.eup %4545  ;;  %2855 = vst [vmem:[#allocation7 + $0x7e8] sm:$0xff] %v4544_v28 }
 0x34e   :  { %2857 = vst [vmem:[#allocation7 + $0x7f8] sm:$0xff] %v4546_v32 }
 0x34f   :  { %4602 = shalt.err (!%p4599_p6)
}
 0x350   :  { %s4603_s10 = scalar_lea.hbm %s5411_s2, 32768 }
 0x351   :  { %p4604_p7 = scmp.ne.s32.totalorder %s5411_s2, %s4603_s10  ;;  %p4607_p8 = scmp.lt.u32.totalorder %s4603_s10, %s5411_s2 }
 0x353   :  { %p4609_p9 = pnand %p4607_p8, %p4604_p7 }
 0x355   :  { %4612 = shalt.err (!%p4609_p9)
}
 0x356   :  { %s4624_s15 = smov 512   ;;  %s4625_s16 = smov 32  }
 0x357   :  { %2869 = dma.vmem_to_hbm [thread:$0]  %s2864_s6, 32768, %s5411_s2, [#allocation4], %s4624_s15, %s4624_s15, %s4625_s16  }
 0x358   :  { %4617 = dma.done.wait [#allocation4], 32768  }
 0x359   :  { %4618 = vsyncadd [#allocation4], 4294934528 }
 0x35a   :  { %2873 = vsyncpa [#allocation3], 1 }
 0x35b   :  { %2874 = vsyncpa [#allocation6], 1 }
 0x35c   :  { %2875 = vsyncpa [#allocation4], 1 }

</bundles_post_ra>
